<compile_context>
chip_gen: v7x
topology: tpu7x:2x2x1
jax: 0.10.0
libtpu: 0.0.40
codegen_flags: <defaults>
</compile_context>

<pallas_src>
import functools

import jax
import jax.numpy as jnp
import numpy as np
from jax import lax
from jax.experimental import pallas as pl
from jax.experimental.pallas import tpu as pltpu


def _round_up(n, m):
    return ((n + m - 1) // m) * m


def _resblock_kernel(*refs, H, W, Cp, has_downsample):
    """Fused ResBlock on one NHWC image; channel dim lane-padded to Cp (multiple of 128)."""
    if has_downsample:
        (x_ref, w1_ref, b1_ref, w2_ref, b2_ref, wd_ref, bd_ref,
         o_ref, xpad, xcol) = refs
    else:
        (x_ref, w1_ref, b1_ref, w2_ref, b2_ref,
         o_ref, xpad, xcol) = refs
        wd_ref = bd_ref = None

    # ---- zero ONLY the 1-pixel halo border, once per image --------------------------------
    # xpad columns 0 / W+1 (left-right halo) and xcol rows 0 / H+1 (top-bottom halo).
    # Every im2col below rewrites only the interior, so the border stays valid for all
    # 2-3 convs of this image.  Cost is O(H*Cp + W*Cp), not O(H*W*Cp).
    zcol = jnp.zeros((H, 1, Cp), jnp.bfloat16)
    xpad[:, pl.ds(0, 1), :] = zcol
    xpad[:, pl.ds(W + 1, 1), :] = zcol
    zrow = jnp.zeros((1, W, 3 * Cp), jnp.bfloat16)
    xcol[pl.ds(0, 1), :, :] = zrow
    xcol[pl.ds(H + 1, 1), :, :] = zrow

    def im2col(src_bf16):
        """Pack the 3 kw-shifted copies of src (H, W, Cp) into xcol rows 1..H."""
        xpad[:, pl.ds(1, W), :] = src_bf16
        for kw in range(3):
            # Stores (the binding slot) are lane/sublane aligned full-tile writes; the
            # shifted (possibly misaligned) part is on the loads, which have slack.
            xcol[pl.ds(1, H), :, pl.ds(kw * Cp, Cp)] = xpad[:, pl.ds(kw, W), :]

    def conv(w_ref, b_ref, relu_patches):
        """3x3 conv of whatever im2col() last packed: 3 accumulating MXU matmuls, K=3*Cp."""
        acc = None
        for kh in range(3):
            lhs = xcol[pl.ds(kh, H), :, :].reshape(H * W, 3 * Cp)  # contiguous leading slice
            if relu_patches:
                lhs = jnp.maximum(lhs, 0)          # relu commutes with im2col (relu(0)=0)
            part = jnp.dot(lhs, w_ref[pl.ds(kh * 3 * Cp, 3 * Cp), :],
                           preferred_element_type=jnp.float32)
            acc = part if acc is None else acc + part
        return acc + b_ref[...]                     # (H*W, Cp) f32; bias (1, Cp) broadcasts

    x_f32 = x_ref[0]                                # (H, W, Cp) f32
    x_bf = x_f32.astype(jnp.bfloat16)

    if has_downsample:
        # One shared im2col of raw x feeds BOTH conv1 (relu applied on load) and downsample.
        im2col(x_bf)
        r = conv(w1_ref, b1_ref, relu_patches=True)       # conv1(relu(x))
        skip = conv(wd_ref, bd_ref, relu_patches=False)   # downsample(x); xcol still raw x
    else:
        im2col(jnp.maximum(x_bf, 0))
        r = conv(w1_ref, b1_ref, relu_patches=False)
        skip = None                                       # identity skip, read late in f32

    # conv2(relu(r)) — r flows as a value, no intermediate VMEM round trip (no r_buf).
    im2col(jnp.maximum(r, 0.0).astype(jnp.bfloat16).reshape(H, W, Cp))
    r2 = conv(w2_ref, b2_ref, relu_patches=False)

    if skip is None:
        skip = x_ref[0].reshape(H * W, Cp)                # f32-precision identity skip add

    # Single output store.
    o_ref[0] = (skip + r2).reshape(H, W, Cp)


def resblock_forward(x_nchw, params):
    """Pallas implementation of ResBlock.forward.  Input/output are NCHW (like PyTorch)."""
    B, Cin, H, W = x_nchw.shape
    Cout = params["w1"].shape[-1]                 # w1: (9, Cin, Cout)
    has_down = "wd" in params
    Cp = max(_round_up(Cin, 128), _round_up(Cout, 128))   # one lane-padded channel width

    # NCHW -> NHWC f32 with the channel (lane) dim padded to Cp.  This is lane padding only —
    # the 1-pixel spatial halo is handled inside the kernel in VMEM.
    x = jnp.transpose(x_nchw, (0, 2, 3, 1)).astype(jnp.float32)
    x = jnp.pad(x, ((0, 0), (0, 0), (0, 0), (0, Cp - Cin)))

    def prep(w, b, cin):
        # (9, cin, Cout) -> (9*Cp, Cp) bf16 so row index == (3*kh + kw)*Cp + input_channel.
        wp = jnp.pad(w, ((0, 0), (0, Cp - cin), (0, Cp - Cout)))
        wp = wp.astype(jnp.bfloat16).reshape(9 * Cp, Cp)
        bp = jnp.pad(b, ((0, 0), (0, Cp - Cout))).astype(jnp.float32)
        return wp, bp

    w1p, b1p = prep(params["w1"], params["b1"], Cin)
    w2p, b2p = prep(params["w2"], params["b2"], Cout)

    args = [x, w1p, b1p, w2p, b2p]
    in_specs = [
        pl.BlockSpec((1, H, W, Cp), lambda bb: (bb, 0, 0, 0)),
        pl.BlockSpec((9 * Cp, Cp), lambda bb: (0, 0)),    # grid-invariant -> fetched once
        pl.BlockSpec((1, Cp), lambda bb: (0, 0)),
        pl.BlockSpec((9 * Cp, Cp), lambda bb: (0, 0)),
        pl.BlockSpec((1, Cp), lambda bb: (0, 0)),
    ]
    if has_down:
        wdp, bdp = prep(params["wd"], params["bd"], Cin)
        args += [wdp, bdp]
        in_specs += [
            pl.BlockSpec((9 * Cp, Cp), lambda bb: (0, 0)),
            pl.BlockSpec((1, Cp), lambda bb: (0, 0)),
        ]

    kernel = functools.partial(_resblock_kernel, H=H, W=W, Cp=Cp, has_downsample=has_down)

    out = pl.pallas_call(
        kernel,
        out_shape=jax.ShapeDtypeStruct((B, H, W, Cp), jnp.float32),
        grid_spec=pltpu.PrefetchScalarGridSpec(
            num_scalar_prefetch=0,
            grid=(B,),
            in_specs=in_specs,
            out_specs=pl.BlockSpec((1, H, W, Cp), lambda bb: (bb, 0, 0, 0)),
            scratch_shapes=[
                pltpu.VMEM((H, W + 2, Cp), jnp.bfloat16),       # column-halo image
                pltpu.VMEM((H + 2, W, 3 * Cp), jnp.bfloat16),   # 3 kw slabs + row halo
            ],
        ),
        compiler_params=pltpu.CompilerParams(
            dimension_semantics=("parallel",),
            # ~2.5 MiB used at the test shapes.  Keep <= ~48 MiB on v7x (64 MiB physical
            # VMEM); v5e/v6e can raise this toward ~100 MiB when H, W or Cp grow.
            vmem_limit_bytes=32 * 1024 * 1024,
        ),
    )(*args)

    out = out[..., :Cout]                          # drop lane padding
    return jnp.transpose(out, (0, 3, 1, 2))        # NHWC -> NCHW


# ---------------------------------------------------------------------------
# Pure-JAX f32 reference (same math, no Pallas) for verification.
# ---------------------------------------------------------------------------
def _conv_ref(x_nhwc, w9, b):
    cin, cout = w9.shape[1], w9.shape[2]
    w_hwio = w9.reshape(3, 3, cin, cout)
    y = lax.conv_general_dilated(
        x_nhwc, w_hwio, window_strides=(1, 1), padding="SAME",
        dimension_numbers=("NHWC", "HWIO", "NHWC"))
    return y + b.reshape(1, 1, 1, cout)


def resblock_ref(x_nchw, params):
    x = jnp.transpose(x_nchw, (0, 2, 3, 1))
    r = _conv_ref(jnp.maximum(x, 0.0), params["w1"], params["b1"])
    r = _conv_ref(jnp.maximum(r, 0.0), params["w2"], params["b2"])
    if "wd" in params:
        x = _conv_ref(x, params["wd"], params["bd"])
    return jnp.transpose(x + r, (0, 3, 1, 2))


if __name__ == "__main__":
    key = jax.random.PRNGKey(0)

    def init_conv(kw_key, kb_key, cin, cout):
        fan_in = cin * 9
        bound = 1.0 / np.sqrt(fan_in)
        w = jax.random.uniform(kw_key, (9, cin, cout), jnp.float32, -bound, bound)
        b = jax.random.uniform(kb_key, (1, cout), jnp.float32, -bound, bound)
        return w, b

    # --- case 1: in_planes != out_planes  (downsample conv on the skip path) ---
    B, Cin, Cout, H, W = 2, 4, 8, 16, 16
    k = jax.random.split(key, 8)
    x1 = jax.random.normal(k[0], (B, Cin, H, W), jnp.float32)
    w1, b1 = init_conv(k[1], k[2], Cin, Cout)
    w2, b2 = init_conv(k[3], k[4], Cout, Cout)
    wd, bd = init_conv(k[5], k[6], Cin, Cout)
    params1 = {"w1": w1, "b1": b1, "w2": w2, "b2": b2, "wd": wd, "bd": bd}

    out1 = jax.block_until_ready(resblock_forward(x1, params1))
    ref1 = jax.block_until_ready(resblock_ref(x1, params1))
    assert out1.shape == (B, Cout, H, W), out1.shape
    # bf16 MXU operands (f32 accumulation) -> loosened tolerance vs the f32 reference.
    np.testing.assert_allclose(np.asarray(out1), np.asarray(ref1), rtol=2e-2, atol=2e-2)

    # --- case 2: in_planes == out_planes  (identity skip, added in f32) ---
    C = 8
    k2 = jax.random.split(k[7], 5)
    x2 = jax.random.normal(k2[0], (B, C, H, W), jnp.float32)
    w1b, b1b = init_conv(k2[1], k2[2], C, C)
    w2b, b2b = init_conv(k2[3], k2[4], C, C)
    params2 = {"w1": w1b, "b1": b1b, "w2": w2b, "b2": b2b}

    out2 = jax.block_until_ready(resblock_forward(x2, params2))
    ref2 = jax.block_until_ready(resblock_ref(x2, params2))
    assert out2.shape == (B, C, H, W), out2.shape
    np.testing.assert_allclose(np.asarray(out2), np.asarray(ref2), rtol=2e-2, atol=2e-2)

    print("KERNEL_OK")
</pallas_src>

<mosaic_0001>
module attributes {stable_mosaic.version = 11 : i64} {
  func.func @_resblock_kernel(%arg0: i32, %arg1: memref<1x16x16x128xf32, #tpu.memory_space<vmem>>, %arg2: memref<1152x128xbf16, #tpu.memory_space<vmem>>, %arg3: memref<1x128xf32, #tpu.memory_space<vmem>>, %arg4: memref<1152x128xbf16, #tpu.memory_space<vmem>>, %arg5: memref<1x128xf32, #tpu.memory_space<vmem>>, %arg6: memref<1152x128xbf16, #tpu.memory_space<vmem>>, %arg7: memref<1x128xf32, #tpu.memory_space<vmem>>, %arg8: memref<1x16x16x128xf32, #tpu.memory_space<vmem>>, %arg9: memref<16x18x128xbf16, #tpu.memory_space<vmem>>, %arg10: memref<18x16x384xbf16, #tpu.memory_space<vmem>>) attributes {dimension_semantics = [#tpu.dimension_semantics<parallel>], iteration_bounds = array<i64: 2>, scalar_prefetch = 0 : i64, scratch_operands = 2 : i64, tpu.core_type = #tpu.core_type<tc>, window_params = [{transform_indices = @transform_0, window_bounds = array<i64: 1, 16, 16, 128>}, {pipeline_mode = #tpu.pipeline_mode<synchronous>, transform_indices = @transform_1, window_bounds = array<i64: 1152, 128>}, {pipeline_mode = #tpu.pipeline_mode<synchronous>, transform_indices = @transform_2, window_bounds = array<i64: 1, 128>}, {pipeline_mode = #tpu.pipeline_mode<synchronous>, transform_indices = @transform_3, window_bounds = array<i64: 1152, 128>}, {pipeline_mode = #tpu.pipeline_mode<synchronous>, transform_indices = @transform_4, window_bounds = array<i64: 1, 128>}, {pipeline_mode = #tpu.pipeline_mode<synchronous>, transform_indices = @transform_5, window_bounds = array<i64: 1152, 128>}, {pipeline_mode = #tpu.pipeline_mode<synchronous>, transform_indices = @transform_6, window_bounds = array<i64: 1, 128>}, {transform_indices = @transform_7, window_bounds = array<i64: 1, 16, 16, 128>}]} {
    %cst = arith.constant 0.000000e+00 : bf16
    %0 = vector.broadcast %cst : bf16 to vector<16x1x128xbf16>
    %c0 = arith.constant 0 : index
    %c0_0 = arith.constant 0 : index
    %c0_1 = arith.constant 0 : index
    %1 = vector.load %arg9[%c0, %c0_0, %c0_1] : memref<16x18x128xbf16, #tpu.memory_space<vmem>>, vector<16x1x128xbf16>
    tpu.vector_store %arg9[%c0, %c0_0, %c0_1], %0 {strides = array<i32>} : memref<16x18x128xbf16, #tpu.memory_space<vmem>>, vector<16x1x128xbf16>,
    %c0_2 = arith.constant 0 : index
    %c17 = arith.constant 17 : index
    %c0_3 = arith.constant 0 : index
    %2 = vector.load %arg9[%c0_2, %c17, %c0_3] : memref<16x18x128xbf16, #tpu.memory_space<vmem>>, vector<16x1x128xbf16>
    tpu.vector_store %arg9[%c0_2, %c17, %c0_3], %0 {strides = array<i32>} : memref<16x18x128xbf16, #tpu.memory_space<vmem>>, vector<16x1x128xbf16>,
    %cst_4 = arith.constant 0.000000e+00 : bf16
    %3 = vector.broadcast %cst_4 : bf16 to vector<1x16x384xbf16>
    %c0_5 = arith.constant 0 : index
    %c0_6 = arith.constant 0 : index
    %c0_7 = arith.constant 0 : index
    %4 = vector.load %arg10[%c0_5, %c0_6, %c0_7] : memref<18x16x384xbf16, #tpu.memory_space<vmem>>, vector<1x16x384xbf16>
    tpu.vector_store %arg10[%c0_5, %c0_6, %c0_7], %3 {strides = array<i32>} : memref<18x16x384xbf16, #tpu.memory_space<vmem>>, vector<1x16x384xbf16>,
    %c17_8 = arith.constant 17 : index
    %c0_9 = arith.constant 0 : index
    %c0_10 = arith.constant 0 : index
    %5 = vector.load %arg10[%c17_8, %c0_9, %c0_10] : memref<18x16x384xbf16, #tpu.memory_space<vmem>>, vector<1x16x384xbf16>
    tpu.vector_store %arg10[%c17_8, %c0_9, %c0_10], %3 {strides = array<i32>} : memref<18x16x384xbf16, #tpu.memory_space<vmem>>, vector<1x16x384xbf16>,
    %c0_11 = arith.constant 0 : index
    %c0_12 = arith.constant 0 : index
    %c0_13 = arith.constant 0 : index
    %c0_14 = arith.constant 0 : index
    %6 = vector.load %arg1[%c0_11, %c0_12, %c0_13, %c0_14] : memref<1x16x16x128xf32, #tpu.memory_space<vmem>>, vector<1x16x16x128xf32>
    %7 = vector.shape_cast %6 : vector<1x16x16x128xf32> to vector<16x16x128xf32>
    %8 = arith.truncf %7 : vector<16x16x128xf32> to vector<16x16x128xbf16>
    %c0_15 = arith.constant 0 : index
    %c1 = arith.constant 1 : index
    %c0_16 = arith.constant 0 : index
    %9 = vector.load %arg9[%c0_15, %c1, %c0_16] : memref<16x18x128xbf16, #tpu.memory_space<vmem>>, vector<16x16x128xbf16>
    tpu.vector_store %arg9[%c0_15, %c1, %c0_16], %8 {strides = array<i32>} : memref<16x18x128xbf16, #tpu.memory_space<vmem>>, vector<16x16x128xbf16>,
    %c0_17 = arith.constant 0 : index
    %c0_18 = arith.constant 0 : index
    %c0_19 = arith.constant 0 : index
    %10 = vector.load %arg9[%c0_17, %c0_18, %c0_19] : memref<16x18x128xbf16, #tpu.memory_space<vmem>>, vector<16x16x128xbf16>
    %c1_20 = arith.constant 1 : index
    %c0_21 = arith.constant 0 : index
    %c0_22 = arith.constant 0 : index
    %11 = vector.load %arg10[%c1_20, %c0_21, %c0_22] : memref<18x16x384xbf16, #tpu.memory_space<vmem>>, vector<16x16x128xbf16>
    tpu.vector_store %arg10[%c1_20, %c0_21, %c0_22], %10 {strides = array<i32>} : memref<18x16x384xbf16, #tpu.memory_space<vmem>>, vector<16x16x128xbf16>,
    %c0_23 = arith.constant 0 : index
    %c1_24 = arith.constant 1 : index
    %c0_25 = arith.constant 0 : index
    %12 = vector.load %arg9[%c0_23, %c1_24, %c0_25] : memref<16x18x128xbf16, #tpu.memory_space<vmem>>, vector<16x16x128xbf16>
    %c1_26 = arith.constant 1 : index
    %c0_27 = arith.constant 0 : index
    %c128 = arith.constant 128 : index
    %13 = vector.load %arg10[%c1_26, %c0_27, %c128] : memref<18x16x384xbf16, #tpu.memory_space<vmem>>, vector<16x16x128xbf16>
    tpu.vector_store %arg10[%c1_26, %c0_27, %c128], %12 {strides = array<i32>} : memref<18x16x384xbf16, #tpu.memory_space<vmem>>, vector<16x16x128xbf16>,
    %c0_28 = arith.constant 0 : index
    %c2 = arith.constant 2 : index
    %c0_29 = arith.constant 0 : index
    %14 = vector.load %arg9[%c0_28, %c2, %c0_29] : memref<16x18x128xbf16, #tpu.memory_space<vmem>>, vector<16x16x128xbf16>
    %c1_30 = arith.constant 1 : index
    %c0_31 = arith.constant 0 : index
    %c256 = arith.constant 256 : index
    %15 = vector.load %arg10[%c1_30, %c0_31, %c256] : memref<18x16x384xbf16, #tpu.memory_space<vmem>>, vector<16x16x128xbf16>
    tpu.vector_store %arg10[%c1_30, %c0_31, %c256], %14 {strides = array<i32>} : memref<18x16x384xbf16, #tpu.memory_space<vmem>>, vector<16x16x128xbf16>,
    %c0_32 = arith.constant 0 : index
    %c0_33 = arith.constant 0 : index
    %c0_34 = arith.constant 0 : index
    %16 = vector.load %arg10[%c0_32, %c0_33, %c0_34] : memref<18x16x384xbf16, #tpu.memory_space<vmem>>, vector<16x16x384xbf16>
    %17 = vector.shape_cast %16 : vector<16x16x384xbf16> to vector<256x384xbf16>
    %cst_35 = arith.constant 0.000000e+00 : bf16
    %18 = vector.broadcast %cst_35 : bf16 to vector<256x384xbf16>
    %19 = arith.maximumf %17, %18 : vector<256x384xbf16>
    %c0_36 = arith.constant 0 : index
    %c0_37 = arith.constant 0 : index
    %20 = vector.load %arg2[%c0_36, %c0_37] : memref<1152x128xbf16, #tpu.memory_space<vmem>>, vector<384x128xbf16>
    %cst_38 = arith.constant dense<0.000000e+00> : vector<256x128xf32>
    %21 = tpu.matmul %19, %20, %cst_38 {dimension_numbers = #tpu.dot_dimension_numbers<[1], [0], [0], [1], [0, 0, 1, 1], [], []>} : vector<256x384xbf16>, vector<384x128xbf16>, vector<256x128xf32> -> vector<256x128xf32>
    %c1_39 = arith.constant 1 : index
    %c0_40 = arith.constant 0 : index
    %c0_41 = arith.constant 0 : index
    %22 = vector.load %arg10[%c1_39, %c0_40, %c0_41] : memref<18x16x384xbf16, #tpu.memory_space<vmem>>, vector<16x16x384xbf16>
    %23 = vector.shape_cast %22 : vector<16x16x384xbf16> to vector<256x384xbf16>
    %cst_42 = arith.constant 0.000000e+00 : bf16
    %24 = vector.broadcast %cst_42 : bf16 to vector<256x384xbf16>
    %25 = arith.maximumf %23, %24 : vector<256x384xbf16>
    %c384 = arith.constant 384 : index
    %c0_43 = arith.constant 0 : index
    %26 = vector.load %arg2[%c384, %c0_43] : memref<1152x128xbf16, #tpu.memory_space<vmem>>, vector<384x128xbf16>
    %cst_44 = arith.constant dense<0.000000e+00> : vector<256x128xf32>
    %27 = tpu.matmul %25, %26, %cst_44 {dimension_numbers = #tpu.dot_dimension_numbers<[1], [0], [0], [1], [0, 0, 1, 1], [], []>} : vector<256x384xbf16>, vector<384x128xbf16>, vector<256x128xf32> -> vector<256x128xf32>
    %28 = arith.addf %21, %27 : vector<256x128xf32>
    %c2_45 = arith.constant 2 : index
    %c0_46 = arith.constant 0 : index
    %c0_47 = arith.constant 0 : index
    %29 = vector.load %arg10[%c2_45, %c0_46, %c0_47] : memref<18x16x384xbf16, #tpu.memory_space<vmem>>, vector<16x16x384xbf16>
    %30 = vector.shape_cast %29 : vector<16x16x384xbf16> to vector<256x384xbf16>
    %cst_48 = arith.constant 0.000000e+00 : bf16
    %31 = vector.broadcast %cst_48 : bf16 to vector<256x384xbf16>
    %32 = arith.maximumf %30, %31 : vector<256x384xbf16>
    %c768 = arith.constant 768 : index
    %c0_49 = arith.constant 0 : index
    %33 = vector.load %arg2[%c768, %c0_49] : memref<1152x128xbf16, #tpu.memory_space<vmem>>, vector<384x128xbf16>
    %cst_50 = arith.constant dense<0.000000e+00> : vector<256x128xf32>
    %34 = tpu.matmul %32, %33, %cst_50 {dimension_numbers = #tpu.dot_dimension_numbers<[1], [0], [0], [1], [0, 0, 1, 1], [], []>} : vector<256x384xbf16>, vector<384x128xbf16>, vector<256x128xf32> -> vector<256x128xf32>
    %35 = arith.addf %28, %34 : vector<256x128xf32>
    %c0_51 = arith.constant 0 : index
    %c0_52 = arith.constant 0 : index
    %36 = vector.load %arg3[%c0_51, %c0_52] : memref<1x128xf32, #tpu.memory_space<vmem>>, vector<1x128xf32>
    %37 = vector.broadcast %36 : vector<1x128xf32> to vector<256x128xf32>
    %38 = arith.addf %35, %37 : vector<256x128xf32>
    %c0_53 = arith.constant 0 : index
    %c0_54 = arith.constant 0 : index
    %c0_55 = arith.constant 0 : index
    %39 = vector.load %arg10[%c0_53, %c0_54, %c0_55] : memref<18x16x384xbf16, #tpu.memory_space<vmem>>, vector<16x16x384xbf16>
    %40 = vector.shape_cast %39 : vector<16x16x384xbf16> to vector<256x384xbf16>
    %c0_56 = arith.constant 0 : index
    %c0_57 = arith.constant 0 : index
    %41 = vector.load %arg6[%c0_56, %c0_57] : memref<1152x128xbf16, #tpu.memory_space<vmem>>, vector<384x128xbf16>
    %cst_58 = arith.constant dense<0.000000e+00> : vector<256x128xf32>
    %42 = tpu.matmul %40, %41, %cst_58 {dimension_numbers = #tpu.dot_dimension_numbers<[1], [0], [0], [1], [0, 0, 1, 1], [], []>} : vector<256x384xbf16>, vector<384x128xbf16>, vector<256x128xf32> -> vector<256x128xf32>
    %c1_59 = arith.constant 1 : index
    %c0_60 = arith.constant 0 : index
    %c0_61 = arith.constant 0 : index
    %43 = vector.load %arg10[%c1_59, %c0_60, %c0_61] : memref<18x16x384xbf16, #tpu.memory_space<vmem>>, vector<16x16x384xbf16>
    %44 = vector.shape_cast %43 : vector<16x16x384xbf16> to vector<256x384xbf16>
    %c384_62 = arith.constant 384 : index
    %c0_63 = arith.constant 0 : index
    %45 = vector.load %arg6[%c384_62, %c0_63] : memref<1152x128xbf16, #tpu.memory_space<vmem>>, vector<384x128xbf16>
    %cst_64 = arith.constant dense<0.000000e+00> : vector<256x128xf32>
    %46 = tpu.matmul %44, %45, %cst_64 {dimension_numbers = #tpu.dot_dimension_numbers<[1], [0], [0], [1], [0, 0, 1, 1], [], []>} : vector<256x384xbf16>, vector<384x128xbf16>, vector<256x128xf32> -> vector<256x128xf32>
    %47 = arith.addf %42, %46 : vector<256x128xf32>
    %c2_65 = arith.constant 2 : index
    %c0_66 = arith.constant 0 : index
    %c0_67 = arith.constant 0 : index
    %48 = vector.load %arg10[%c2_65, %c0_66, %c0_67] : memref<18x16x384xbf16, #tpu.memory_space<vmem>>, vector<16x16x384xbf16>
    %49 = vector.shape_cast %48 : vector<16x16x384xbf16> to vector<256x384xbf16>
    %c768_68 = arith.constant 768 : index
    %c0_69 = arith.constant 0 : index
    %50 = vector.load %arg6[%c768_68, %c0_69] : memref<1152x128xbf16, #tpu.memory_space<vmem>>, vector<384x128xbf16>
    %cst_70 = arith.constant dense<0.000000e+00> : vector<256x128xf32>
    %51 = tpu.matmul %49, %50, %cst_70 {dimension_numbers = #tpu.dot_dimension_numbers<[1], [0], [0], [1], [0, 0, 1, 1], [], []>} : vector<256x384xbf16>, vector<384x128xbf16>, vector<256x128xf32> -> vector<256x128xf32>
    %52 = arith.addf %47, %51 : vector<256x128xf32>
    %c0_71 = arith.constant 0 : index
    %c0_72 = arith.constant 0 : index
    %53 = vector.load %arg7[%c0_71, %c0_72] : memref<1x128xf32, #tpu.memory_space<vmem>>, vector<1x128xf32>
    %54 = vector.broadcast %53 : vector<1x128xf32> to vector<256x128xf32>
    %55 = arith.addf %52, %54 : vector<256x128xf32>
    %cst_73 = arith.constant 0.000000e+00 : f32
    %56 = vector.broadcast %cst_73 : f32 to vector<256x128xf32>
    %57 = arith.maximumf %38, %56 : vector<256x128xf32>
    %58 = arith.truncf %57 : vector<256x128xf32> to vector<256x128xbf16>
    %59 = vector.shape_cast %58 : vector<256x128xbf16> to vector<16x16x128xbf16>
    %c0_74 = arith.constant 0 : index
    %c1_75 = arith.constant 1 : index
    %c0_76 = arith.constant 0 : index
    %60 = vector.load %arg9[%c0_74, %c1_75, %c0_76] : memref<16x18x128xbf16, #tpu.memory_space<vmem>>, vector<16x16x128xbf16>
    tpu.vector_store %arg9[%c0_74, %c1_75, %c0_76], %59 {strides = array<i32>} : memref<16x18x128xbf16, #tpu.memory_space<vmem>>, vector<16x16x128xbf16>,
    %c0_77 = arith.constant 0 : index
    %c0_78 = arith.constant 0 : index
    %c0_79 = arith.constant 0 : index
    %61 = vector.load %arg9[%c0_77, %c0_78, %c0_79] : memref<16x18x128xbf16, #tpu.memory_space<vmem>>, vector<16x16x128xbf16>
    %c1_80 = arith.constant 1 : index
    %c0_81 = arith.constant 0 : index
    %c0_82 = arith.constant 0 : index
    %62 = vector.load %arg10[%c1_80, %c0_81, %c0_82] : memref<18x16x384xbf16, #tpu.memory_space<vmem>>, vector<16x16x128xbf16>
    tpu.vector_store %arg10[%c1_80, %c0_81, %c0_82], %61 {strides = array<i32>} : memref<18x16x384xbf16, #tpu.memory_space<vmem>>, vector<16x16x128xbf16>,
    %c0_83 = arith.constant 0 : index
    %c1_84 = arith.constant 1 : index
    %c0_85 = arith.constant 0 : index
    %63 = vector.load %arg9[%c0_83, %c1_84, %c0_85] : memref<16x18x128xbf16, #tpu.memory_space<vmem>>, vector<16x16x128xbf16>
    %c1_86 = arith.constant 1 : index
    %c0_87 = arith.constant 0 : index
    %c128_88 = arith.constant 128 : index
    %64 = vector.load %arg10[%c1_86, %c0_87, %c128_88] : memref<18x16x384xbf16, #tpu.memory_space<vmem>>, vector<16x16x128xbf16>
    tpu.vector_store %arg10[%c1_86, %c0_87, %c128_88], %63 {strides = array<i32>} : memref<18x16x384xbf16, #tpu.memory_space<vmem>>, vector<16x16x128xbf16>,
    %c0_89 = arith.constant 0 : index
    %c2_90 = arith.constant 2 : index
    %c0_91 = arith.constant 0 : index
    %65 = vector.load %arg9[%c0_89, %c2_90, %c0_91] : memref<16x18x128xbf16, #tpu.memory_space<vmem>>, vector<16x16x128xbf16>
    %c1_92 = arith.constant 1 : index
    %c0_93 = arith.constant 0 : index
    %c256_94 = arith.constant 256 : index
    %66 = vector.load %arg10[%c1_92, %c0_93, %c256_94] : memref<18x16x384xbf16, #tpu.memory_space<vmem>>, vector<16x16x128xbf16>
    tpu.vector_store %arg10[%c1_92, %c0_93, %c256_94], %65 {strides = array<i32>} : memref<18x16x384xbf16, #tpu.memory_space<vmem>>, vector<16x16x128xbf16>,
    %c0_95 = arith.constant 0 : index
    %c0_96 = arith.constant 0 : index
    %c0_97 = arith.constant 0 : index
    %67 = vector.load %arg10[%c0_95, %c0_96, %c0_97] : memref<18x16x384xbf16, #tpu.memory_space<vmem>>, vector<16x16x384xbf16>
    %68 = vector.shape_cast %67 : vector<16x16x384xbf16> to vector<256x384xbf16>
    %c0_98 = arith.constant 0 : index
    %c0_99 = arith.constant 0 : index
    %69 = vector.load %arg4[%c0_98, %c0_99] : memref<1152x128xbf16, #tpu.memory_space<vmem>>, vector<384x128xbf16>
    %cst_100 = arith.constant dense<0.000000e+00> : vector<256x128xf32>
    %70 = tpu.matmul %68, %69, %cst_100 {dimension_numbers = #tpu.dot_dimension_numbers<[1], [0], [0], [1], [0, 0, 1, 1], [], []>} : vector<256x384xbf16>, vector<384x128xbf16>, vector<256x128xf32> -> vector<256x128xf32>
    %c1_101 = arith.constant 1 : index
    %c0_102 = arith.constant 0 : index
    %c0_103 = arith.constant 0 : index
    %71 = vector.load %arg10[%c1_101, %c0_102, %c0_103] : memref<18x16x384xbf16, #tpu.memory_space<vmem>>, vector<16x16x384xbf16>
    %72 = vector.shape_cast %71 : vector<16x16x384xbf16> to vector<256x384xbf16>
    %c384_104 = arith.constant 384 : index
    %c0_105 = arith.constant 0 : index
    %73 = vector.load %arg4[%c384_104, %c0_105] : memref<1152x128xbf16, #tpu.memory_space<vmem>>, vector<384x128xbf16>
    %cst_106 = arith.constant dense<0.000000e+00> : vector<256x128xf32>
    %74 = tpu.matmul %72, %73, %cst_106 {dimension_numbers = #tpu.dot_dimension_numbers<[1], [0], [0], [1], [0, 0, 1, 1], [], []>} : vector<256x384xbf16>, vector<384x128xbf16>, vector<256x128xf32> -> vector<256x128xf32>
    %75 = arith.addf %70, %74 : vector<256x128xf32>
    %c2_107 = arith.constant 2 : index
    %c0_108 = arith.constant 0 : index
    %c0_109 = arith.constant 0 : index
    %76 = vector.load %arg10[%c2_107, %c0_108, %c0_109] : memref<18x16x384xbf16, #tpu.memory_space<vmem>>, vector<16x16x384xbf16>
    %77 = vector.shape_cast %76 : vector<16x16x384xbf16> to vector<256x384xbf16>
    %c768_110 = arith.constant 768 : index
    %c0_111 = arith.constant 0 : index
    %78 = vector.load %arg4[%c768_110, %c0_111] : memref<1152x128xbf16, #tpu.memory_space<vmem>>, vector<384x128xbf16>
    %cst_112 = arith.constant dense<0.000000e+00> : vector<256x128xf32>
    %79 = tpu.matmul %77, %78, %cst_112 {dimension_numbers = #tpu.dot_dimension_numbers<[1], [0], [0], [1], [0, 0, 1, 1], [], []>} : vector<256x384xbf16>, vector<384x128xbf16>, vector<256x128xf32> -> vector<256x128xf32>
    %80 = arith.addf %75, %79 : vector<256x128xf32>
    %c0_113 = arith.constant 0 : index
    %c0_114 = arith.constant 0 : index
    %81 = vector.load %arg5[%c0_113, %c0_114] : memref<1x128xf32, #tpu.memory_space<vmem>>, vector<1x128xf32>
    %82 = vector.broadcast %81 : vector<1x128xf32> to vector<256x128xf32>
    %83 = arith.addf %80, %82 : vector<256x128xf32>
    %84 = arith.addf %55, %83 : vector<256x128xf32>
    %85 = vector.shape_cast %84 : vector<256x128xf32> to vector<16x16x128xf32>
    %c0_115 = arith.constant 0 : index
    %c0_116 = arith.constant 0 : index
    %c0_117 = arith.constant 0 : index
    %c0_118 = arith.constant 0 : index
    %86 = vector.load %arg8[%c0_115, %c0_116, %c0_117, %c0_118] : memref<1x16x16x128xf32, #tpu.memory_space<vmem>>, vector<1x16x16x128xf32>
    %87 = vector.shape_cast %86 : vector<1x16x16x128xf32> to vector<16x16x128xf32>
    %88 = vector.shape_cast %85 : vector<16x16x128xf32> to vector<1x16x16x128xf32>
    tpu.vector_store %arg8[%c0_115, %c0_116, %c0_117, %c0_118], %88 {strides = array<i32>} : memref<1x16x16x128xf32, #tpu.memory_space<vmem>>, vector<1x16x16x128xf32>,
    return
  }
  func.func @transform_0(%arg0: i32) -> (i32, i32, i32, i32) {
    %c0_i32 = arith.constant 0 : i32
    %c0_i32_0 = arith.constant 0 : i32
    %c0_i32_1 = arith.constant 0 : i32
    %c0_i32_2 = arith.constant 0 : i32
    return %arg0, %c0_i32, %c0_i32_0, %c0_i32_1 : i32, i32, i32, i32
  }
  func.func @transform_1(%arg0: i32) -> (i32, i32) {
    %c0_i32 = arith.constant 0 : i32
    %c0_i32_0 = arith.constant 0 : i32
    %c0_i32_1 = arith.constant 0 : i32
    return %c0_i32, %c0_i32_0 : i32, i32
  }
  func.func @transform_2(%arg0: i32) -> (i32, i32) {
    %c0_i32 = arith.constant 0 : i32
    %c0_i32_0 = arith.constant 0 : i32
    %c0_i32_1 = arith.constant 0 : i32
    return %c0_i32, %c0_i32_0 : i32, i32
  }
  func.func @transform_3(%arg0: i32) -> (i32, i32) {
    %c0_i32 = arith.constant 0 : i32
    %c0_i32_0 = arith.constant 0 : i32
    %c0_i32_1 = arith.constant 0 : i32
    return %c0_i32, %c0_i32_0 : i32, i32
  }
  func.func @transform_4(%arg0: i32) -> (i32, i32) {
    %c0_i32 = arith.constant 0 : i32
    %c0_i32_0 = arith.constant 0 : i32
    %c0_i32_1 = arith.constant 0 : i32
    return %c0_i32, %c0_i32_0 : i32, i32
  }
  func.func @transform_5(%arg0: i32) -> (i32, i32) {
    %c0_i32 = arith.constant 0 : i32
    %c0_i32_0 = arith.constant 0 : i32
    %c0_i32_1 = arith.constant 0 : i32
    return %c0_i32, %c0_i32_0 : i32, i32
  }
  func.func @transform_6(%arg0: i32) -> (i32, i32) {
    %c0_i32 = arith.constant 0 : i32
    %c0_i32_0 = arith.constant 0 : i32
    %c0_i32_1 = arith.constant 0 : i32
    return %c0_i32, %c0_i32_0 : i32, i32
  }
  func.func @transform_7(%arg0: i32) -> (i32, i32, i32, i32) {
    %c0_i32 = arith.constant 0 : i32
    %c0_i32_0 = arith.constant 0 : i32
    %c0_i32_1 = arith.constant 0 : i32
    %c0_i32_2 = arith.constant 0 : i32
    return %arg0, %c0_i32, %c0_i32_0, %c0_i32_1 : i32, i32, i32, i32
  }
}

</mosaic_0001>

<bundles_post_ra>
// kernel: tpu_custom_call.1
= control target key start
LH: loop header
LB: loop body
LE: loop exit
PB: predicated region body
PF: predicated region fallthrough
CT: control target
= control target key end

     0   :  { %12 = vsyncpa [#allocation5], 0  ;;  %s14785_s0 = inlined_call_operand.hbm [shape: f32[2,16,16,128], index: 0, kind: input, shape index: {}]   ;;  %s14786_s1 = inlined_call_operand.hbm [shape: bf16[1152,128], index: 1, kind: input, shape index: {}]   ;;  %s14787_s2 = inlined_call_operand.vmem [shape: f32[1,128], index: 2, kind: input, shape index: {}]   ;;  %s14788_s3 = inlined_call_operand.hbm [shape: bf16[1152,128], index: 3, kind: input, shape index: {}]   ;;  %s14789_s4 = inlined_call_operand.vmem [shape: f32[1,128], index: 4, kind: input, shape index: {}]   ;;  %s14790_s5 = inlined_call_operand.hbm [shape: bf16[1152,128], index: 5, kind: input, shape index: {}]   ;;  %s14791_s6 = inlined_call_operand.vmem [shape: f32[1,128], index: 6, kind: input, shape index: {}]   ;;  %s14792_s7 = inlined_call_operand.hbm [shape: f32[2,16,16,128], index: 7, kind: output, shape index: {}]  }
   0x1   :  { %14 = vsyncpa [#allocation5 + $0x1], 0 }
   0x2   :  { %15 = vsyncpa [#allocation8], 0 }
   0x3   :  { %16 = vsyncpa [#allocation11], 0 }
   0x4   :  { %17 = vsyncpa [#allocation6], 0 }
   0x5   :  { %19 = vsyncpa [#allocation6 + $0x1], 0  ;;  %s12156_s24 = smov 0   ;;  %s12158_s25 = smov 0  }
   0x6   :  { %s12160_s26 = smov 0   ;;  %s12162_s27 = smov 0  }
   0x7 LB: > { %s12177_s28 = sadd.s32 4294967295, %s12102_s27   ;;  %s8629_s29 = sadd.s32 4294967294, %s12102_s27   ;;  %s12102_s27 = sphi %s12162_s27, %s15246_s27   ;;  %s12098_s26 = sphi %s12160_s26, %s15245_s26   ;;  %s12094_s25 = sphi %s12158_s25, %s15244_s25   ;;  %s12090_s24 = sphi %s12156_s24, %s15243_s24  }
   0x8   : > { %p45_p0 = scmp.ne.s32.totalorder %s12094_s25, %s12090_s24  ;;  %p14793_p1 = scmp.eq.s32.totalorder %s12177_s28, 0 }
   0x9   : > { %p201_p3 = scmp.eq.s32.totalorder %s8629_s29, 1  ;;  %p8630_p5 = scmp.ge.s32.totalorder %s12102_s27, 1 }
   0xa   : > { %p12186_p4 = por %p14793_p1, %p45_p0  ;;  %p208_p7 = scmp.lt.s32.totalorder %s12102_s27, 3 }
   0xb   : > { %p12191_p6 = por %p201_p3, %p45_p0  ;;  %s12104_s10 = smov [#allocation7]  }
   0xc   : > { %s14919_s30 = scalar_select %p12186_p4, 1, 0 }
   0xd   : > { %s14920_s8 = scalar_select %p12191_p6, 1, 0 }
   0xe   : > { %p12196_p8 = pnand %p8630_p5, %p208_p7  ;;  %s220_s11 = sshll.u32 %s12104_s10, 4  ;;  %s12200_s11 = int_to_ptr.vmem [resolvable:$true] %s220_s11 }
   0xf   : > { %14921 = sst [smem:[#allocation17_spill]] %s14920_s8  ;;  %s12105_s13 = smov [#allocation9]  }
  0x10   : > { %s14922_s9 = scalar_select %p12196_p8, 1, 0 }
  0x11   : > { %p11422_p9 = pneg %p12196_p8  ;;  %s236_s14 = sshll.u32 %s12105_s13, 4  ;;  %s12211_s14 = int_to_ptr.vmem [resolvable:$true] %s236_s14 }
  0x12   : > { %s12106_s15 = smov [#allocation10]   ;;  %s11914_s19 = scalar_lea.hbm %s14786_s1, 9216 }
  0x13   : > { %p12207_p11 = pnand %p11422_p9, %p14793_p1  ;;  %s12213_s16 = sshll.u32 %s12106_s15, 4  ;;  %s253_s16 = int_to_ptr.vmem [resolvable:$true] %s12213_s16 }
  0x14   : > { %p11915_p12 = scmp.ne.s32.totalorder %s14786_s1, %s11914_s19  ;;  %p11921_p5 = scmp.lt.u32.totalorder %s11914_s19, %s14786_s1 }
  0x15   : > { %p12223_p13 = pneg %p12207_p11 }
  0x17   : > { %p11917_p0 = pnand %p12223_p13, %p11915_p12 }
  0x19   : > { %p11918_p3 = pneg %p11917_p0 }
  0x1b   : > { %p11923_p7 = pnand %p11921_p5, %p11918_p3 }
  0x1d   : > { %11926 = shalt.err (!%p11923_p7)
}
  0x1e   : > { %s11927_s10 = scalar_lea.vmem %s12200_s11, 9216  ;;  %p11935_p2 = scmp.lt.s32.totalorder %s12200_s11, %s12200_s11 }
  0x1f   : > { %p11928_p9 = scmp.ne.s32.totalorder %s12200_s11, %s11927_s10  ;;  %p11936_p6 = scmp.lt.s32.totalorder %s11927_s10, %s11927_s10 }
  0x21   : > { %p11930_p10 = pnand %p11928_p9, %p12223_p13  ;;  %p11937_p12 = por %p11936_p6, %p11935_p2 }
  0x23   : > { %p11931_p1 = pneg %p11930_p10 }
  0x25   : > { %p11938_p0 = pnand %p11937_p12, %p11931_p1 }
  0x27   : > { %11941 = shalt.err (!%p11938_p0)
}
  0x28   : > { %s12107_s13 = smov 64   ;;  %s12108_s15 = smov 4  }
  0x29   : > { %11425 = dma.hbm_to_vmem [thread:$0]  (!%p12207_p11), %s14786_s1, 9216, %s12200_s11, [#allocation8], %s12107_s13, %s12107_s13, %s12108_s15  }
  0x2a   : > { %s11942_s21 = scalar_lea.hbm %s14788_s3, 9216 }
  0x2b   : > { %p11943_p1 = scmp.ne.s32.totalorder %s14788_s3, %s11942_s21  ;;  %p11949_p10 = scmp.lt.u32.totalorder %s11942_s21, %s14788_s3 }
  0x2d   : > { %p11945_p2 = pnand %p11943_p1, %p12223_p13 }
  0x2f   : > { %p11946_p6 = pneg %p11945_p2 }
  0x31   : > { %p11951_p3 = pnand %p11949_p10, %p11946_p6 }
  0x33   : > { %11954 = shalt.err (!%p11951_p3)
}
  0x34   : > { %s11955_s11 = scalar_lea.vmem %s12211_s14, 9216  ;;  %p11963_p12 = scmp.lt.s32.totalorder %s12211_s14, %s12211_s14 }
  0x35   : > { %p11956_p5 = scmp.ne.s32.totalorder %s12211_s14, %s11955_s11  ;;  %p11964_p0 = scmp.lt.s32.totalorder %s11955_s11, %s11955_s11 }
  0x37   : > { %p11958_p7 = pnand %p11956_p5, %p12223_p13  ;;  %p11965_p1 = por %p11964_p0, %p11963_p12 }
  0x39   : > { %p11959_p9 = pneg %p11958_p7 }
  0x3b   : > { %p11966_p2 = pnand %p11965_p1, %p11959_p9 }
  0x3d   : > { %11969 = shalt.err (!%p11966_p2)
}
  0x3e   : > { %11428 = dma.hbm_to_vmem [thread:$0]  (!%p12207_p11), %s14788_s3, 9216, %s12211_s14, [#allocation8], %s12107_s13, %s12107_s13, %s12108_s15  }
  0x3f   : > { %s11970_s20 = scalar_lea.hbm %s14790_s5, 9216 }
  0x40   : > { %p11971_p6 = scmp.ne.s32.totalorder %s14790_s5, %s11970_s20  ;;  %p11977_p5 = scmp.lt.u32.totalorder %s11970_s20, %s14790_s5 }
  0x42   : > { %p11973_p10 = pnand %p11971_p6, %p12223_p13 }
  0x44   : > { %p11974_p3 = pneg %p11973_p10 }
  0x46   : > { %p11979_p7 = pnand %p11977_p5, %p11974_p3 }
  0x48   : > { %11982 = shalt.err (!%p11979_p7)
}
  0x49   : > { %s11983_s11 = scalar_lea.vmem %s253_s16, 9216  ;;  %p11991_p1 = scmp.lt.s32.totalorder %s253_s16, %s253_s16 }
  0x4a   : > { %p11984_p9 = scmp.ne.s32.totalorder %s253_s16, %s11983_s11  ;;  %p11992_p2 = scmp.lt.s32.totalorder %s11983_s11, %s11983_s11 }
  0x4c   : > { %p11986_p12 = pnand %p11984_p9, %p12223_p13  ;;  %p11993_p4 = por %p11992_p2, %p11991_p1 }
  0x4e   : > { %p11987_p0 = pneg %p11986_p12 }
  0x50   : > { %p11994_p8 = pnand %p11993_p4, %p11987_p0 }
  0x52   : > { %11997 = shalt.err (!%p11994_p8)
}
  0x53   : > { %11431 = dma.hbm_to_vmem [thread:$0]  (!%p12207_p11), %s14790_s5, 9216, %s253_s16, [#allocation11], %s12107_s13, %s12107_s13, %s12108_s15  }
  0x54   : > { %s12296_s22 = sadd.s32 1, %s12102_s27   ;;  %s32_s17 = sadd.s32 1, %s12098_s26 }
  0x55   : > { %s29_s12 = ssub.s32 %s12102_s27, %s12296_s22  ;;  %p39_p8 = scmp.ne.s32.totalorder %s12098_s26, %s12094_s25 }
  0x56   : > { %p30_p4 = scmp.eq.s32.totalorder %s29_s12, 0  ;;  %p40_p13 = scmp.eq.s32.totalorder %s12102_s27, 0 }
  0x57   : > { %p11443_p6 = scmp.lt.s32.totalorder %s12102_s27, 2  ;;  %p14925_p3 = scmp.eq.s32.totalorder %s12177_s28, 1 }
  0x58   : > { %s12306_s18 = scalar_select %p30_p4, %s12098_s26, %s32_s17  }
  0x59   : > { %p41_p10 = por %p40_p13, %p39_p8  ;;  %p12310_p5 = por %p14925_p3, %p39_p8 }
  0x5a   : > { %s269_s20 = sand.u32 1, %s12098_s26   ;;  %s9092_s21 = sshll.u32 %s12102_s27, 12 }
  0x5b   : > { %s8635_s16 = sshll.u32 %s269_s20, 8  ;;  %s12319_s23 = scalar_lea.hbm %s14785_s0, %s9092_s21 }
  0x5c   : > { %s273_s29 = scalar_lea.vmem [#allocation4], %s8635_s16  ;;  %p12321_p11 = pnand %p11443_p6, %p41_p10 }
  0x5d   : > { %s280_s10 = sshll.u32 %s273_s29, 4  ;;  %s12327_s14 = scalar_lea.sflag [#allocation5], %s269_s20  ;;  %s12325_s10 = int_to_ptr.vmem [resolvable:$true] %s280_s10 }
  0x5e   : > { %s11998_s8 = scalar_lea.hbm %s12319_s23, 4096  ;;  %p12000_p9 = pneg %p12321_p11 }
  0x5f   : > { %p11999_p7 = scmp.ne.s32.totalorder %s12319_s23, %s11998_s8  ;;  %s12003_s21 = scalar_lea.hbm %s14785_s0, 8192 }
  0x60   : > { %p12004_p1 = scmp.lt.u32.totalorder %s12319_s23, %s14785_s0  ;;  %p12005_p2 = scmp.lt.u32.totalorder %s12003_s21, %s11998_s8 }
  0x61   : > { %p12001_p12 = pnand %p12000_p9, %p11999_p7  ;;  %p12007_p8 = scmp.lt.u32.totalorder %s11998_s8, %s12319_s23 }
  0x62   : > { %p12006_p4 = por %p12005_p2, %p12004_p1 }
  0x63   : > { %p12002_p0 = pneg %p12001_p12 }
  0x64   : > { %p12008_p13 = por %p12007_p8, %p12006_p4 }
  0x66   : > { %p12009_p6 = pnand %p12008_p13, %p12002_p0 }
  0x68   : > { %12012 = shalt.err (!%p12009_p6)
}
  0x69   : > { %s12013_s20 = scalar_lea.vmem %s12325_s10, 4096  ;;  %s12109_s15 = smov [#allocation4]  }
  0x6a   : > { %p12014_p10 = scmp.ne.s32.totalorder %s12325_s10, %s12013_s20  ;;  %s12018_s29 = sshll.u32 %s12109_s15, 4  ;;  %s12019_s29 = int_to_ptr.vmem [resolvable:$false] %s12018_s29 }
  0x6b   : > { %s12020_s12 = scalar_lea.vmem %s12019_s29, 8192  ;;  %p12021_p12 = scmp.lt.s32.totalorder %s12325_s10, %s12019_s29 }
  0x6c   : > { %p12016_p3 = pnand %p12014_p10, %p12000_p9  ;;  %p12022_p1 = scmp.lt.s32.totalorder %s12020_s12, %s12013_s20 }
  0x6e   : > { %p12017_p7 = pneg %p12016_p3  ;;  %p12023_p2 = por %p12022_p1, %p12021_p12 }
  0x70   : > { %p12024_p4 = pnand %p12023_p2, %p12017_p7 }
  0x72   : > { %12027 = shalt.err (!%p12024_p4)
}
  0x73   : > { %s12110_s8 = smov 128   ;;  %s12111_s17 = smov 8  }
  0x74   : > { %11435 = dma.hbm_to_vmem [thread:$0]  (!%p12321_p11), %s12319_s23, 4096, %s12325_s10, %s12327_s14, %s12110_s8, %s12110_s8, %s12111_s17  }
  0x75   : > { %p14928_p9 = scmp.ne.s32.totalorder %s14922_s9, 0 }
  0x77   : > { %292 = sbr.rel (%p14928_p9) target bundleno = 1405 (0x57d), region = 48 }
  0x7e   : > { %s12358_s21 = sand.u32 1, %s12094_s25   ;;  %p14929_p0 = scmp.ne.s32.totalorder %s14919_s30, 0 }
  0x7f   : > { %s8639_s16 = sshll.u32 %s12358_s21, 8  ;;  %s295_s13 = scalar_lea.sflag [#allocation5], %s12358_s21 }
  0x80   : > { %s12364_s20 = scalar_lea.vmem [#allocation4], %s8639_s16 }
  0x81   : > { %12073 = dma.done.wait (%p14929_p0), %s295_s13, 4096  }
  0x82   : > { %12075 = vsyncadd (%p14929_p0), %s295_s13, 4294963200  ;;  %p14930_p11 = scmp.eq.s32.totalorder %s12177_s28, 0 }
  0x84   : > { %12077 = dma.done.wait (%p14930_p11), [#allocation8], 18432   ;;  %p14931_p8 = pmov %p14930_p11 }
  0x86   : > { %12079 = vsyncadd (%p14931_p8), [#allocation8], 4294948864  ;;  %p14932_p13 = pmov %p14931_p8 }
  0x87   : > { %p14933_p6 = pmov %p14931_p8 }
  0x88   : > { %12081 = dma.done.wait (%p14932_p13), [#allocation11], 9216  }
  0x89   : > { %12083 = vsyncadd (%p14933_p6), [#allocation11], 4294958080  ;;  %v11490_v0 = vld [vmem:[#allocation7 + $0x100] sm:$0xff]   ;;  %v11492_v2 = vld [vmem:[#allocation7 + $0x108] sm:$0xff]   ;;  %vm343_vm0 = vsmask.f32 256 }
  0x8a   : > { %v11491_v1 = vld [vmem:[#allocation7 + $0xc0] sm:$0xff]   ;;  %9158 = vmatprep.subr.bf16.mxu0 %v11490_v0  ;;  %10814 = vmatprep.subr.bf16.mxu1 %v11490_v0  ;;  %v11493_v3 = vld [vmem:[#allocation7 + $0xc8] sm:$0xff]   ;;  %v11494_v4 = vld [vmem:[#allocation7 + $0x110] sm:$0xff]   ;;  %vm342_vm1 = vcmask 1040384   ;;  %v14934_v7 = vmov 0  ;;  %vm900_vm6 = vcmask 1043456  }
  0x8b   : > { %9159 = vmatpush3.bf16.msra.mxu0 %v11491_v1  ;;  %10822 = vmatpush3.bf16.msra.mxu1 %v11491_v1  ;;  %v11495_v5 = vld [vmem:[#allocation7 + $0xd0] sm:$0xff]   ;;  %v11496_v6 = vld [vmem:[#allocation7 + $0x118] sm:$0xff]   ;;  %vm12379_vm2 = vmand %vm342_vm1, %vm343_vm0  ;;  %vm393_vm3 = vsmask.f32 7938  ;;  %vm578_vm5 = vsmask.f32 4368 }
  0x8c   : > { %9160 = vmatprep.subr.bf16.mxu0 %v11492_v2  ;;  %10815 = vmatprep.subr.bf16.mxu1 %v11492_v2  ;;  %v14935_v7 = vsel %vm12379_vm2, 4294967295, %v14934_v7  ;;  %v11497_v8 = vld [vmem:[#allocation7 + $0xd8] sm:$0xff]   ;;  %v11498_v9 = vld [vmem:[#allocation7 + $0x120] sm:$0xff]   ;;  %vm12384_vm4 = vmand %vm342_vm1, %vm393_vm3  ;;  %v14939_v38 = vmov 0  ;;  %v14942_v43 = vmov 0  ;;  %vm1736_vm10 = vcmask 1046528  }
  0x8d   : > { %14936 = vst [vmem:[#allocation18_spill] sm:$0xff] %v14935_v7  ;;  %v11499_v11 = vld [vmem:[#allocation7 + $0xe0] sm:$0xff]   ;;  %v11500_v12 = vld [vmem:[#allocation7 + $0x128] sm:$0xff]   ;;  %v381_v21 = vld [vmem:[#allocation2 + $0x90] sm:$0x1]  ;;  %s14581_s12 = scalar_lea.vmem [#allocation12], %s8639_s16 }
  0x8e   : > { %v345_v13 = vld [vmem:[#allocation2] sm:$0x1]  ;;  %v395_v14 = vld [vmem:[#allocation2 + $0x8] sm:$0x1]  ;;  %v382_v24 = vsel %vm12379_vm2, 0, %v381_v21  ;;  %v11502_v28 = vld [vmem:[#allocation7 + $0x130] sm:$0xff]  }
  0x8f   : > { %9161 = vmatpush3.bf16.msra.mxu0 %v11493_v3  ;;  %10823 = vmatpush3.bf16.msra.mxu1 %v11493_v3  ;;  %v450_v15 = vld [vmem:[%s12364_s20] sm:$0xff]  ;;  %v11501_v16 = vld [vmem:[#allocation7 + $0xe8] sm:$0xff]   ;;  %v346_v17 = vsel %vm12379_vm2, 0, %v345_v13  ;;  %v396_v18 = vsel %vm12384_vm4, 0, %v395_v14  ;;  %v431_v25 = vld [vmem:[#allocation2 + $0x98] sm:$0x1] }
  0x90   : > { %9162 = vmatprep.subr.bf16.mxu0 %v11494_v4  ;;  %10816 = vmatprep.subr.bf16.mxu1 %v11494_v4  ;;  %v451_v19 = vld [vmem:[%s12364_s20 + $0x8] sm:$0xff]  ;;  %v9093_v20 = vpack.c.bf16 %v450_v15, %v450_v15  ;;  %v474_v22 = vld [vmem:[%s12364_s20 + $0xc0] sm:$0xff]  ;;  %347 = vst [vmem:[#allocation2] sm:$0x1] %v346_v17  ;;  %397 = vst [vmem:[#allocation2 + $0x8] sm:$0x1] %v396_v18 }
  0x91   : > { %v9094_v23 = vpack.c.bf16 %v451_v19, %v451_v19  ;;  %v475_v26 = vld [vmem:[%s12364_s20 + $0xc8] sm:$0xff]  ;;  %v9117_v27 = vpack.c.bf16 %v474_v22, %v474_v22  ;;  %383 = vst [vmem:[#allocation2 + $0x90] sm:$0x1] %v382_v24  ;;  %v432_v31 = vsel %vm12384_vm4, 0, %v431_v25  ;;  %v11503_v37 = vld [vmem:[#allocation7 + $0xf0] sm:$0xff]   ;;  %vm12402_vm7 = vmor %vm343_vm0, %vm578_vm5  ;;  %s9157_s8 = sshll.u32 %s12177_s28, 12 }
  0x92   : > { %v581_v29 = vshrl.u32 %v9093_v20, 16  ;;  %v584_v30 = vshll.u32 %v9093_v20, 16  ;;  %v9118_v32 = vpack.c.bf16 %v475_v26, %v475_v26  ;;  %433 = vst [vmem:[#allocation2 + $0x98] sm:$0x1] %v432_v31  ;;  %v14940_v38 = vsel %vm12402_vm7, 4294967295, %v14939_v38  ;;  %vm12408_vm8 = vmand %vm900_vm6, %vm393_vm3  ;;  %v11504_v47 = vld [vmem:[#allocation7 + $0x138] sm:$0xff]  }
  0x93   : > { %9163 = vmatpush3.bf16.msra.mxu0 %v11495_v5  ;;  %10824 = vmatpush3.bf16.msra.mxu1 %v11495_v5  ;;  %v589_v33 = vshrl.u32 %v9094_v23, 16  ;;  %v592_v34 = vshll.u32 %v9094_v23, 16  ;;  %v785_v35 = vshrl.u32 %v9117_v27, 16  ;;  %v788_v36 = vshll.u32 %v9117_v27, 16  ;;  %14941 = vst [vmem:[#allocation19_spill] sm:$0xff] %v14940_v38  ;;  %v452_v52 = vld [vmem:[%s12364_s20 + $0x10] sm:$0xff] }
  0x94   : > { %9164 = vmatprep.subr.bf16.mxu0 %v11496_v6  ;;  %10817 = vmatprep.subr.bf16.mxu1 %v11496_v6  ;;  %v583_v39 = vrot.slane %v581_v29, 7  ;;  %v793_v40 = vshrl.u32 %v9118_v32, 16  ;;  %v796_v41 = vshll.u32 %v9118_v32, 16  ;;  %v14943_v43 = vsel %vm12408_vm8, 4294967295, %v14942_v43  ;;  %v348_v45 = vld [vmem:[#allocation2 + $0xc] sm:$0x1] }
  0x95   : > { %v591_v42 = vrot.slane %v589_v33, 7  ;;  %14944 = vst [vmem:[#allocation20_spill] sm:$0xff] %v14943_v43  ;;  %v787_v44 = vrot.slane %v785_v35, 7  ;;  %v398_v46 = vld [vmem:[#allocation2 + $0x14] sm:$0x1]  ;;  %v349_v51 = vsel %vm12379_vm2, 0, %v348_v45  ;;  %v9095_v3 = vpack.c.bf16 %v452_v52, %v452_v52 }
  0x96   : > { %v586_v48 = vor.u32 %v584_v30, %v583_v39  ;;  %v587_v49 = vrot.slane %v583_v39, 4  ;;  %v795_v50 = vrot.slane %v793_v40, 7  ;;  %v453_v53 = vld [vmem:[%s12364_s20 + $0x18] sm:$0xff]  ;;  %350 = vst [vmem:[#allocation2 + $0xc] sm:$0x1] %v349_v51  ;;  %v476_v60 = vld [vmem:[%s12364_s20 + $0xd0] sm:$0xff] }
  0x97   : > { %9165 = vmatpush3.bf16.msra.mxu0 %v11497_v8  ;;  %10825 = vmatpush3.bf16.msra.mxu1 %v11497_v8  ;;  %v594_v54 = vor.u32 %v592_v34, %v591_v42  ;;  %v596_v55 = vrot.slane %v591_v42, 4  ;;  %v790_v56 = vor.u32 %v788_v36, %v787_v44  ;;  %v791_v57 = vrot.slane %v787_v44, 4  ;;  %v384_v58 = vld [vmem:[#allocation2 + $0x9c] sm:$0x1]  ;;  %v434_v59 = vld [vmem:[#allocation2 + $0xa4] sm:$0x1] }
  0x98   : > { %9166 = vmatprep.subr.bf16.mxu0 %v11498_v9  ;;  %10818 = vmatprep.subr.bf16.mxu1 %v11498_v9  ;;  %v11505_v61 = vld [vmem:[#allocation7 + $0xf8] sm:$0xff]   ;;  %v902_v62 = vld [vmem:[#allocation2] sm:$0xf]  ;;  %v906_v63 = vld [vmem:[#allocation2 + $0x8] sm:$0x1]  ;;  %v798_v0 = vor.u32 %v796_v41, %v795_v50  ;;  %v800_v1 = vrot.slane %v795_v50, 4  ;;  %v9096_v9 = vpack.c.bf16 %v453_v53, %v453_v53  ;;  %v9119_v24 = vpack.c.bf16 %v476_v60, %v476_v60 }
  0x99   : > { %v399_v2 = vsel %vm12384_vm4, 0, %v398_v46  ;;  %v595_v4 = vsel %vm12402_vm7, %v587_v49, %v594_v54  ;;  %v903_v5 = vsel %vm12408_vm8, %v586_v48, %v902_v62  ;;  %v907_v6 = vsel %vm12379_vm2, %v596_v55, %v906_v63  ;;  %v986_v8 = vld [vmem:[#allocation2 + $0x90] sm:$0xf]  ;;  %v990_v14 = vld [vmem:[#allocation2 + $0x98] sm:$0x1]  ;;  %v12432_v18 = vld [vmem:[#allocation7 + $0x140] sm:$0xff]  }
  0x9a   : > { %400 = vst [vmem:[#allocation2 + $0x14] sm:$0x1] %v399_v2  ;;  %904 = vst [vmem:[#allocation2] sm:$0xf] %v903_v5  ;;  %v987_v13 = vsel %vm12408_vm8, %v790_v56, %v986_v8  ;;  %v598_v15 = vshrl.u32 %v9095_v3, 16  ;;  %v991_v17 = vsel %vm12379_vm2, %v800_v1, %v990_v14  ;;  %v606_v19 = vshrl.u32 %v9096_v9, 16 }
  0x9b   : > { %9167 = vmatpush3.bf16.msra.mxu0 %v11499_v11  ;;  %10826 = vmatpush3.bf16.msra.mxu1 %v11499_v11  ;;  %v477_v11 = vld [vmem:[%s12364_s20 + $0xd8] sm:$0xff]  ;;  %905 = vst [vmem:[#allocation2 + $0x4] sm:$0xf] %v595_v4  ;;  %908 = vst [vmem:[#allocation2 + $0x8] sm:$0x1] %v907_v6  ;;  %v609_v20 = vshll.u32 %v9096_v9, 16 }
  0x9c   : > { %9168 = vmatprep.subr.bf16.mxu0 %v11500_v12  ;;  %10819 = vmatprep.subr.bf16.mxu1 %v11500_v12  ;;  %v799_v12 = vsel %vm12402_vm7, %v791_v57, %v798_v0  ;;  %988 = vst [vmem:[#allocation2 + $0x90] sm:$0xf] %v987_v13  ;;  %v385_v21 = vsel %vm12379_vm2, 0, %v384_v58  ;;  %992 = vst [vmem:[#allocation2 + $0x98] sm:$0x1] %v991_v17  ;;  %v600_v22 = vrot.slane %v598_v15, 7 }
  0x9d   : > { %989 = vst [vmem:[#allocation2 + $0x94] sm:$0xf] %v799_v12  ;;  %386 = vst [vmem:[#allocation2 + $0x9c] sm:$0x1] %v385_v21  ;;  %v435_v23 = vsel %vm12384_vm4, 0, %v434_v59  ;;  %v12438_v25 = vpack.c.bf16 %v477_v11, %v477_v11  ;;  %v608_v26 = vrot.slane %v606_v19, 7 }
  0x9e   : > { %436 = vst [vmem:[#allocation2 + $0xa4] sm:$0x1] %v435_v23  ;;  %v351_v27 = vld [vmem:[#allocation2 + $0x18] sm:$0x1]  ;;  %v604_v30 = vrot.slane %v600_v22, 4  ;;  %v802_v32 = vshrl.u32 %v9119_v24, 16 }
  0x9f   : > { %9169 = vmatpush3.bf16.msra.mxu0 %v11501_v16  ;;  %10827 = vmatpush3.bf16.msra.mxu1 %v11501_v16  ;;  %v601_v16 = vshll.u32 %v9095_v3, 16  ;;  %v909_v31 = vld [vmem:[#allocation2 + $0xc] sm:$0xf]  ;;  %v805_v33 = vshll.u32 %v9119_v24, 16  ;;  %vm1335_vm9 = vsmask.f32 7424  ;;  %v611_v34 = vor.u32 %v609_v20, %v608_v26 }
  0xa0   : > { %9170 = vmatprep.subr.bf16.mxu0 %v11502_v28  ;;  %10820 = vmatprep.subr.bf16.mxu1 %v11502_v28  ;;  %v401_v28 = vld [vmem:[#allocation2 + $0x20] sm:$0x1]  ;;  %v613_v35 = vrot.slane %v608_v26, 4  ;;  %v810_v36 = vshrl.u32 %v12438_v25, 16  ;;  %v12445_v41 = vrot.slane %v802_v32, 7  ;;  %v352_v42 = vsel %vm12379_vm2, 0, %v351_v27 }
  0xa1   : > { %v603_v29 = vor.u32 %v601_v16, %v600_v22  ;;  %v913_v40 = vld [vmem:[#allocation2 + $0x14] sm:$0x1]  ;;  %v402_v44 = vsel %vm12384_vm4, 0, %v401_v28  ;;  %v454_v45 = vld [vmem:[%s12364_s20 + $0x20] sm:$0xff]  ;;  %v612_v46 = vsel %vm12402_vm7, %v604_v30, %v611_v34  ;;  %353 = vst [vmem:[#allocation2 + $0x18] sm:$0x1] %v352_v42 }
  0xa2   : > { %403 = vst [vmem:[#allocation2 + $0x20] sm:$0x1] %v402_v44  ;;  %v11506_v48 = vld [vmem:[#allocation2] sm:$0xff]   ;;  %v11507_v49 = vld [vmem:[#allocation2 + $0x8] ss:$0 sps:$4 sm:$0x11]   ;;  %v12458_v53 = vpack.c.bf16 %v454_v45, %v454_v45  ;;  %v807_v2 = vor.u32 %v805_v33, %v12445_v41 }
  0xa3   : > { %9171 = vmatpush3.bf16.msra.mxu0 %v11503_v37  ;;  %10828 = vmatpush3.bf16.msra.mxu1 %v11503_v37  ;;  %v813_v37 = vshll.u32 %v12438_v25, 16  ;;  %v910_v39 = vsel %vm12408_vm8, %v603_v29, %v909_v31  ;;  %912 = vst [vmem:[#allocation2 + $0x10] sm:$0xf] %v612_v46  ;;  %v455_v50 = vld [vmem:[%s12364_s20 + $0x28] sm:$0xff]  ;;  %v808_v52 = vrot.slane %v12445_v41, 4  ;;  %v478_v54 = vld [vmem:[%s12364_s20 + $0xe0] sm:$0xff] }
  0xa4   : > { %9172 = vmatprep.subr.bf16.mxu0 %v11504_v47  ;;  %10821 = vmatprep.subr.bf16.mxu1 %v11504_v47  ;;  %911 = vst [vmem:[#allocation2 + $0xc] sm:$0xf] %v910_v39  ;;  %v914_v47 = vsel %vm12379_vm2, %v613_v35, %v913_v40  ;;  %v11508_v51 = vld [vmem:[#allocation2 + $0x90] sm:$0xff]   ;;  %v1337_v55 = vshrl.u32 %v11506_v48, 16  ;;  %v1339_v56 = vshll.u32 %v11506_v48, 16  ;;  %v1344_v57 = vshll.u32 %v11507_v49, 16 }
  0xa5   : > { %915 = vst [vmem:[#allocation2 + $0x14] sm:$0x1] %v914_v47  ;;  %v11509_v58 = vld [vmem:[#allocation2 + $0x98] ss:$0 sps:$4 sm:$0x11]   ;;  %v479_v59 = vld [vmem:[%s12364_s20 + $0xe8] sm:$0xff]  ;;  %v12463_v6 = vpack.c.bf16 %v455_v50, %v455_v50  ;;  %v12467_v14 = vpack.c.bf16 %v478_v54, %v478_v54 }
  0xa6   : > { %v1481_v60 = vshrl.u32 %v11508_v51, 16  ;;  %v1341_v62 = vrot.slane %v1339_v56, 1  ;;  %v1346_v63 = vrot.slane %v1344_v57, 1  ;;  %v1488_v0 = vshll.u32 %v11509_v58, 16  ;;  %v11510_v1 = vld [vmem:[#allocation2] sm:$0xff]   ;;  %v11511_v4 = vld [vmem:[#allocation2 + $0x90] sm:$0xff]  }
  0xa7   : > { %9173 = vmatpush3.bf16.msra.mxu0 %v11505_v61  ;;  %10829 = vmatpush3.bf16.msra.mxu1 %v11505_v61  ;;  %v1483_v61 = vshll.u32 %v11508_v51, 16  ;;  %v812_v5 = vrot.slane %v810_v36, 7  ;;  %v615_v8 = vshrl.u32 %v12458_v53, 16  ;;  %v993_v12 = vld [vmem:[#allocation2 + $0x9c] sm:$0xf]  ;;  %v618_v13 = vshll.u32 %v12458_v53, 16 }
  0xa8   : > { %10382 = vmatprep.subr.bf16.mxu1 %v12432_v18  ;;  %v1342_v9 = vor.u32 %v1341_v62, %v1337_v55  ;;  %v1490_v11 = vrot.slane %v1488_v0, 1  ;;  %v387_v20 = vld [vmem:[#allocation2 + $0xa8] sm:$0x1]  ;;  %v12469_v21 = vpack.c.bf16 %v479_v59, %v479_v59  ;;  %v14801_v23 = vmov 0   ;;  %v997_v28 = vld [vmem:[#allocation2 + $0xa4] sm:$0x1] }
  0xa9   : > { %v1485_v3 = vrot.slane %v1483_v61, 1  ;;  %v815_v17 = vor.u32 %v813_v37, %v812_v5  ;;  %v817_v19 = vrot.slane %v812_v5, 4  ;;  %v12475_v24 = vmax.bf16 %v14801_v23, %v11510_v1  ;;  %v11513_v35 = vld [vmem:[#allocation7 + $0x148] sm:$0xff]   ;;  %v916_v40 = vld [vmem:[#allocation2 + $0x18] sm:$0xf]  ;;  %v456_v47 = vld [vmem:[%s12364_s20 + $0x30] sm:$0xff] }
  0xaa   : > { %v12472_v22 = vsel %vm1335_vm9, %v1342_v9, %v1346_v63  ;;  %v12478_v25 = vmax.bf16 %v14801_v23, %v11511_v4  ;;  %v994_v27 = vsel %vm12408_vm8, %v807_v2, %v993_v12  ;;  %v617_v44 = vrot.slane %v615_v8, 7  ;;  %v437_v46 = vld [vmem:[#allocation2 + $0xb0] sm:$0x1]  ;;  %v920_v50 = vld [vmem:[#allocation2 + $0x20] sm:$0x1]  ;;  %s8527_s17 = sshll.u32 %s14581_s12, 4  ;;  %s14738_s17 = int_to_ptr.vmem [resolvable:$true] %s8527_s17 }
  0xab   : > { %v1486_v15 = vor.u32 %v1485_v3, %v1481_v60  ;;  %v11514_v16 = vld [vmem:[#allocation2 + $0xc] sm:$0xff]   ;;  %v12484_v30 = vmax.bf16 %v14801_v23, %v12472_v22  ;;  %995 = vst [vmem:[#allocation2 + $0x9c] sm:$0xf] %v994_v27  ;;  %v816_v37 = vsel %vm12402_vm7, %v808_v52, %v815_v17  ;;  %v998_v39 = vsel %vm12379_vm2, %v817_v19, %v997_v28  ;;  %v354_v2 = vld [vmem:[#allocation2 + $0x24] sm:$0x1]  ;;  %s8514_s28 = scalar_lea.sflag [#allocation6], %s12358_s21 }
  0xac   : > { %v11515_v26 = vld [vmem:[#allocation2 + $0x14] ss:$0 sps:$4 sm:$0x11]   ;;  %v11518_v29 = vld [vmem:[#allocation2 + $0xc] sm:$0xff]   ;;  %v1349_v32 = vshrl.u32 %v11514_v16, 16  ;;  %v1351_v33 = vshll.u32 %v11514_v16, 16  ;;  %v620_v55 = vor.u32 %v618_v13, %v617_v44  ;;  %v9099_v8 = vpack.c.bf16 %v456_v47, %v456_v47 }
  0xad   : > { %v12487_v31 = vsel %vm1335_vm9, %v1486_v15, %v1490_v11  ;;  %v1356_v36 = vshll.u32 %v11515_v26, 16  ;;  %2281 = vmatprep.mubr.bf16.mxu0 %v12484_v30  ;;  %996 = vst [vmem:[#allocation2 + $0xa0] sm:$0xf] %v816_v37  ;;  %999 = vst [vmem:[#allocation2 + $0xa4] sm:$0x1] %v998_v39  ;;  %v12499_v42 = vmax.bf16 %v14801_v23, %v11518_v29  ;;  %v623_v45 = vshrl.u32 %v12463_v6, 16 }
  0xae   : > { %14945 = vst [vmem:[#allocation21_spill] sm:$0xff] %v12487_v31  ;;  %v12491_v34 = vmax.bf16 %v14801_v23, %v12487_v31  ;;  %v1353_v41 = vrot.slane %v1351_v33, 1  ;;  %2282 = vmatmul.mubr.bf16.vlgmr.msra.gmra.mrb[0].mxu0 %v12475_v24  ;;  %v626_v49 = vshll.u32 %v12463_v6, 16  ;;  %v388_v51 = vsel %vm12379_vm2, 0, %v387_v20  ;;  %v11520_v54 = vld [vmem:[#allocation7 + $0x150] sm:$0xff]   ;;  %v11528_v37 = vld [vmem:[#allocation7 + $0x160] sm:$0xff]  }
  0xaf   : > { %v1358_v48 = vrot.slane %v1356_v36, 1  ;;  %v438_v52 = vsel %vm12384_vm4, 0, %v437_v46  ;;  %v621_v56 = vrot.slane %v617_v44, 4  ;;  %v625_v57 = vrot.slane %v623_v45, 7  ;;  %389 = vst [vmem:[#allocation2 + $0xa8] sm:$0x1] %v388_v51 }
  0xb0   : > { %2377 = vmatprep.mubr.bf16.mxu1 %v12491_v34  ;;  %v1354_v53 = vor.u32 %v1353_v41, %v1349_v32  ;;  %439 = vst [vmem:[#allocation2 + $0xb0] sm:$0x1] %v438_v52  ;;  %v819_v58 = vshrl.u32 %v12467_v14, 16  ;;  %v822_v59 = vshll.u32 %v12467_v14, 16  ;;  %v827_v60 = vshrl.u32 %v12469_v21, 16  ;;  %s12028_s30 = scalar_lea.vmem %s14738_s17, 4096 }
  0xb1   : > { %2378 = vmatmul.mubr.bf16.vlgmr.msra.gmra.mrb[0].mxu1 %v12478_v25  ;;  %v830_v61 = vshll.u32 %v12469_v21, 16  ;;  %v628_v63 = vor.u32 %v626_v49, %v625_v57  ;;  %v630_v0 = vrot.slane %v625_v57, 4  ;;  %v917_v1 = vsel %vm12408_vm8, %v620_v55, %v916_v40  ;;  %v404_v3 = vld [vmem:[#allocation2 + $0x2c] sm:$0x1]  ;;  %v11521_v21 = vld [vmem:[#allocation7 + $0x158] sm:$0xff]   ;;  %v480_v55 = vld [vmem:[%s12364_s20 + $0xf0] sm:$0xff]  ;;  %p12029_p10 = scmp.ne.s32.totalorder %s14738_s17, %s12028_s30 }
  0xb2   : > { %10383 = vmatpush3.bf16.msra.mxu1 %v12432_v18  ;;  %v12517_v62 = vsel %vm1335_vm9, %v1354_v53, %v1358_v48  ;;  %v457_v18 = vld [vmem:[%s12364_s20 + $0x38] sm:$0xff]  ;;  %918 = vst [vmem:[#allocation2 + $0x18] sm:$0xf] %v917_v1  ;;  %v821_v5 = vrot.slane %v819_v58, 7  ;;  %v829_v6 = vrot.slane %v827_v60, 7  ;;  %v355_v12 = vsel %vm12379_vm2, 0, %v354_v2 }
  0xb3   : > { %10384 = vmatprep.subr.bf16.mxu1 %v11513_v35  ;;  %v12524_v4 = vmax.bf16 %v14801_v23, %v12517_v62  ;;  %v629_v9 = vsel %vm12402_vm7, %v621_v56, %v628_v63  ;;  %v921_v11 = vsel %vm12379_vm2, %v630_v0, %v920_v50  ;;  %v405_v13 = vsel %vm12384_vm4, 0, %v404_v3  ;;  %356 = vst [vmem:[#allocation2 + $0x24] sm:$0x1] %v355_v12  ;;  %v390_v40 = vld [vmem:[#allocation2 + $0xb4] sm:$0x1]  ;;  %v481_v1 = vld [vmem:[%s12364_s20 + $0xf8] sm:$0xff]  ;;  %p12030_p3 = pnand %p12029_p10, %p12310_p5 }
  0xb4   : > { %v11516_v14 = vld [vmem:[#allocation2 + $0x9c] sm:$0xff]   ;;  %919 = vst [vmem:[#allocation2 + $0x1c] sm:$0xf] %v629_v9  ;;  %922 = vst [vmem:[#allocation2 + $0x20] sm:$0x1] %v921_v11  ;;  %v824_v15 = vor.u32 %v822_v59, %v821_v5  ;;  %v825_v16 = vrot.slane %v821_v5, 4  ;;  %v832_v17 = vor.u32 %v830_v61, %v829_v6  ;;  %v9100_v19 = vpack.c.bf16 %v457_v18, %v457_v18 }
  0xb5   : > { %2289 = vmatprep.mubr.bf16.mxu0 %v12524_v4  ;;  %406 = vst [vmem:[#allocation2 + $0x2c] sm:$0x1] %v405_v13  ;;  %v11517_v20 = vld [vmem:[#allocation2 + $0xa4] ss:$0 sps:$4 sm:$0x11]   ;;  %v1493_v26 = vshrl.u32 %v11516_v14, 16  ;;  %p12031_p7 = pneg %p12030_p3 }
  0xb6   : > { %10385 = vmatpush3.bf16.msra.mxu1 %v11513_v35  ;;  %v1495_v27 = vshll.u32 %v11516_v14, 16  ;;  %2290 = vmatmul.mubr.bf16.gmra.mrb[4].mxu0 %v12499_v42  ;;  %v833_v28 = vsel %vm12402_vm7, %v825_v16, %v832_v17  ;;  %v834_v29 = vrot.slane %v829_v6, 4  ;;  %v1000_v32 = vld [vmem:[#allocation2 + $0xa8] sm:$0xf]  ;;  %v1500_v33 = vshll.u32 %v11517_v20, 16  ;;  %v11519_v44 = vld [vmem:[#allocation2 + $0x9c] sm:$0xff]  }
  0xb7   : > { %10386 = vmatprep.subr.bf16.mxu1 %v11520_v54  ;;  %v1001_v35 = vsel %vm12408_vm8, %v824_v15, %v1000_v32  ;;  %1003 = vst [vmem:[#allocation2 + $0xac] sm:$0xf] %v833_v28  ;;  %v1004_v36 = vld [vmem:[#allocation2 + $0xb0] sm:$0x1]  ;;  %v632_v39 = vshrl.u32 %v9099_v8, 16  ;;  %v635_v46 = vshll.u32 %v9099_v8, 16  ;;  %v12549_v59 = vmax.bf16 %v14801_v23, %v11519_v44 }
  0xb8   : > { %v1497_v41 = vrot.slane %v1495_v27, 1  ;;  %1002 = vst [vmem:[#allocation2 + $0xa8] sm:$0xf] %v1001_v35  ;;  %v1005_v45 = vsel %vm12379_vm2, %v834_v29, %v1004_v36  ;;  %v640_v47 = vshrl.u32 %v9100_v19, 16  ;;  %v1502_v48 = vrot.slane %v1500_v33, 1  ;;  %v11529_v61 = vld [vmem:[#allocation7 + $0x168] sm:$0xff]  }
  0xb9   : > { %1006 = vst [vmem:[#allocation2 + $0xb0] sm:$0x1] %v1005_v45  ;;  %v634_v49 = vrot.slane %v632_v39, 7  ;;  %v643_v52 = vshll.u32 %v9100_v19, 16  ;;  %v391_v53 = vsel %vm12379_vm2, 0, %v390_v40  ;;  %v9123_v8 = vpack.c.bf16 %v480_v55, %v480_v55  ;;  %v458_v9 = vld [vmem:[%s12364_s20 + $0x40] sm:$0xff] }
  0xba   : > { %10387 = vmatpush3.bf16.msra.mxu1 %v11520_v54  ;;  %v1498_v50 = vor.u32 %v1497_v41, %v1493_v26  ;;  %v642_v51 = vrot.slane %v640_v47, 7  ;;  %392 = vst [vmem:[#allocation2 + $0xb4] sm:$0x1] %v391_v53  ;;  %v440_v0 = vld [vmem:[#allocation2 + $0xbc] sm:$0x1]  ;;  %v9124_v17 = vpack.c.bf16 %v481_v1, %v481_v1  ;;  %v11536_v41 = vld [vmem:[#allocation7 + $0x170] sm:$0xff]  }
  0xbb   : > { %10388 = vmatprep.subr.bf16.mxu1 %v11521_v21  ;;  %v11522_v56 = vld [vmem:[#allocation2 + $0x18] sm:$0xff]   ;;  %v637_v54 = vor.u32 %v635_v46, %v634_v49  ;;  %v638_v57 = vrot.slane %v634_v49, 4  ;;  %v11523_v60 = vld [vmem:[#allocation2 + $0x20] ss:$0 sps:$4 sm:$0x11]   ;;  %v441_v32 = vsel %vm12384_vm4, 0, %v440_v0 }
  0xbc   : > { %v12546_v58 = vsel %vm1335_vm9, %v1498_v50, %v1502_v48  ;;  %v645_v63 = vor.u32 %v643_v52, %v642_v51  ;;  %v1361_v3 = vshrl.u32 %v11522_v56, 16  ;;  %v1363_v18 = vshll.u32 %v11522_v56, 16  ;;  %v11526_v5 = vld [vmem:[#allocation2 + $0x18] sm:$0xff]   ;;  %v923_v6 = vld [vmem:[#allocation2 + $0x24] sm:$0xf]  ;;  %v459_v44 = vld [vmem:[%s12364_s20 + $0x48] sm:$0xff] }
  0xbd   : > { %14946 = vst [vmem:[#allocation22_spill] sm:$0xff] %v12546_v58  ;;  %v12554_v2 = vmax.bf16 %v14801_v23, %v12546_v58  ;;  %v1368_v11 = vshll.u32 %v11523_v60, 16  ;;  %v647_v13 = vrot.slane %v642_v51, 4  ;;  %v924_v14 = vsel %vm12408_vm8, %v637_v54, %v923_v6  ;;  %v927_v29 = vld [vmem:[#allocation2 + $0x2c] sm:$0x1]  ;;  %v11537_v54 = vld [vmem:[#allocation7 + $0x178] sm:$0xff]  }
  0xbe   : > { %10389 = vmatpush3.bf16.msra.mxu1 %v11521_v21  ;;  %v646_v12 = vsel %vm12402_vm7, %v638_v57, %v645_v63  ;;  %v1365_v15 = vrot.slane %v1363_v18, 1  ;;  %925 = vst [vmem:[#allocation2 + $0x24] sm:$0xf] %v924_v14  ;;  %v12563_v21 = vpack.c.bf16 %v458_v9, %v458_v9  ;;  %442 = vst [vmem:[#allocation2 + $0xbc] sm:$0x1] %v441_v32  ;;  %v836_v39 = vshrl.u32 %v9123_v8, 16 }
  0xbf   : > { %10390 = vmatprep.subr.bf16.mxu1 %v11528_v37  ;;  %2385 = vmatprep.mubr.bf16.mxu1 %v12554_v2  ;;  %v11524_v16 = vld [vmem:[#allocation2 + $0xa8] sm:$0xff]   ;;  %926 = vst [vmem:[#allocation2 + $0x28] sm:$0xf] %v646_v12  ;;  %v1370_v19 = vrot.slane %v1368_v11, 1  ;;  %v928_v36 = vsel %vm12379_vm2, %v647_v13, %v927_v29  ;;  %v839_v40 = vshll.u32 %v9123_v8, 16  ;;  %v844_v47 = vshrl.u32 %v9124_v17, 16 }
  0xc0   : > { %2386 = vmatmul.mubr.bf16.gmra.mrb[4].mxu1 %v12549_v59  ;;  %v11525_v20 = vld [vmem:[#allocation2 + $0xb0] ss:$0 sps:$4 sm:$0x11]   ;;  %v1366_v26 = vor.u32 %v1365_v15, %v1361_v3  ;;  %v1505_v27 = vshrl.u32 %v11524_v16, 16  ;;  %v1507_v28 = vshll.u32 %v11524_v16, 16  ;;  %v11527_v35 = vld [vmem:[#allocation2 + $0xa8] sm:$0xff]   ;;  %v9102_v18 = vpack.c.bf16 %v459_v44, %v459_v44 }
  0xc1   : > { %v1512_v33 = vshll.u32 %v11525_v20, 16  ;;  %929 = vst [vmem:[#allocation2 + $0x2c] sm:$0x1] %v928_v36  ;;  %v1007_v48 = vld [vmem:[#allocation2 + $0xb4] sm:$0xf]  ;;  %v838_v51 = vrot.slane %v836_v39, 7 }
  0xc2   : > { %10391 = vmatpush3.bf16.msra.mxu1 %v11528_v37  ;;  %v12571_v45 = vsel %vm1335_vm9, %v1366_v26, %v1370_v19  ;;  %v1509_v46 = vrot.slane %v1507_v28, 1  ;;  %v12574_v37 = vmax.bf16 %v14801_v23, %v11526_v5  ;;  %v847_v52 = vshll.u32 %v9124_v17, 16  ;;  %v357_v53 = vld [vmem:[#allocation2 + $0x30] sm:$0x1]  ;;  %v407_v60 = vld [vmem:[#allocation2 + $0x38] sm:$0x1] }
  0xc3   : > { %10392 = vmatprep.subr.bf16.mxu1 %v11529_v61  ;;  %v12578_v49 = vmax.bf16 %v14801_v23, %v12571_v45  ;;  %v1514_v50 = vrot.slane %v1512_v33, 1  ;;  %v846_v56 = vrot.slane %v844_v47, 7  ;;  %v358_v57 = vsel %vm12379_vm2, 0, %v357_v53  ;;  %v11545_v14 = vld [vmem:[#allocation7 + $0x40] sm:$0xff]   ;;  %v460_v15 = vld [vmem:[%s12364_s20 + $0x50] sm:$0xff]  ;;  %v461_v53 = vld [vmem:[%s12364_s20 + $0x58] sm:$0xff] }
  0xc4   : > { %v1510_v55 = vor.u32 %v1509_v46, %v1505_v27  ;;  %v649_v63 = vshrl.u32 %v12563_v21, 16  ;;  %v841_v1 = vor.u32 %v839_v40, %v838_v51  ;;  %v842_v3 = vrot.slane %v838_v51, 4  ;;  %359 = vst [vmem:[#allocation2 + $0x30] sm:$0x1] %v358_v57  ;;  %v11540_v40 = vld [vmem:[#allocation2] sm:$0xfe]  }
  0xc5   : > { %2297 = vmatprep.mubr.bf16.mxu0 %v12578_v49  ;;  %v849_v6 = vor.u32 %v847_v52, %v846_v56  ;;  %v851_v8 = vrot.slane %v846_v56, 4  ;;  %v1011_v17 = vld [vmem:[#allocation2 + $0xbc] sm:$0x1]  ;;  %v408_v19 = vsel %vm12384_vm4, 0, %v407_v60  ;;  %v652_v29 = vshll.u32 %v12563_v21, 16  ;;  %s12113_s9 = smov [#allocation12]  }
  0xc6   : > { %10393 = vmatpush3.bf16.msra.mxu1 %v11529_v61  ;;  %v11530_v0 = vld [vmem:[#allocation2 + $0x24] sm:$0xff]   ;;  %v12585_v5 = vsel %vm1335_vm9, %v1510_v55, %v1514_v50  ;;  %2298 = vmatmul.mubr.bf16.gmra.mrb[8].mxu0 %v12574_v37  ;;  %v12589_v61 = vmax.bf16 %v14801_v23, %v11527_v35  ;;  %v1008_v13 = vsel %vm12408_vm8, %v841_v1, %v1007_v48  ;;  %v651_v20 = vrot.slane %v649_v63, 7  ;;  %v11543_v1 = vld [vmem:[#allocation2 + $0xc] sm:$0xfe]   ;;  %s12032_s23 = sshll.u32 %s12113_s9, 4  ;;  %s12033_s23 = int_to_ptr.vmem [resolvable:$false] %s12032_s23 }
  0xc7   : > { %10394 = vmatprep.subr.bf16.mxu1 %v11536_v41  ;;  %14947 = vst [vmem:[#allocation23_spill] sm:$0xff] %v12585_v5  ;;  %v12593_v9 = vmax.bf16 %v14801_v23, %v12585_v5  ;;  %v1373_v11 = vshrl.u32 %v11530_v0, 16  ;;  %v1375_v12 = vshll.u32 %v11530_v0, 16  ;;  %v850_v16 = vsel %vm12402_vm7, %v842_v3, %v849_v6  ;;  %1009 = vst [vmem:[#allocation2 + $0xb4] sm:$0xf] %v1008_v13  ;;  %v11534_v39 = vld [vmem:[#allocation2 + $0x24] sm:$0xff]   ;;  %p12035_p12 = scmp.lt.s32.totalorder %s14738_s17, %s12033_s23 }
  0xc8   : > { %v11531_v26 = vld [vmem:[#allocation2 + $0x2c] ss:$0 sps:$4 sm:$0x11]   ;;  %1010 = vst [vmem:[#allocation2 + $0xb8] sm:$0xf] %v850_v16  ;;  %v1012_v28 = vsel %vm12379_vm2, %v851_v8, %v1011_v17  ;;  %v657_v32 = vshrl.u32 %v9102_v18, 16  ;;  %v9103_v48 = vpack.c.bf16 %v460_v15, %v460_v15  ;;  %v12614_v56 = vmax.bf16 %v14801_v23, %v11534_v39 }
  0xc9   : > { %2393 = vmatprep.mubr.bf16.mxu1 %v12593_v9  ;;  %v1377_v27 = vrot.slane %v1375_v12, 1  ;;  %409 = vst [vmem:[#allocation2 + $0x38] sm:$0x1] %v408_v19  ;;  %1013 = vst [vmem:[#allocation2 + $0xbc] sm:$0x1] %v1012_v28  ;;  %v660_v33 = vshll.u32 %v9102_v18, 16  ;;  %v9104_v13 = vpack.c.bf16 %v461_v53, %v461_v53 }
  0xca   : > { %10395 = vmatpush3.bf16.msra.mxu1 %v11536_v41  ;;  %v1380_v36 = vshll.u32 %v11531_v26, 16  ;;  %v654_v41 = vor.u32 %v652_v29, %v651_v20  ;;  %v655_v44 = vrot.slane %v651_v20, 4  ;;  %v659_v46 = vrot.slane %v657_v32, 7  ;;  %v11541_v51 = vld [vmem:[#allocation2 + $0x8] ss:$0 sps:$4 sm:$0x11]  }
  0xcb   : > { %10396 = vmatprep.subr.bf16.mxu1 %v11537_v54  ;;  %2394 = vmatmul.mubr.bf16.gmra.mrb[8].mxu1 %v12589_v61  ;;  %v1378_v35 = vor.u32 %v1377_v27, %v1373_v11  ;;  %v930_v47 = vld [vmem:[#allocation2 + $0x30] sm:$0xf]  ;;  %v1737_v57 = vrot.slane %v11540_v40, 1  ;;  %v666_v3 = vshrl.u32 %v9103_v48, 16  ;;  %v1738_v6 = vrot.slane %v11541_v51, 1  ;;  %s12034_s10 = scalar_lea.vmem %s12033_s23, 8192 }
  0xcc   : > { %v1382_v50 = vrot.slane %v1380_v36, 1  ;;  %v662_v52 = vor.u32 %v660_v33, %v659_v46  ;;  %v931_v21 = vsel %vm12408_vm8, %v654_v41, %v930_v47  ;;  %v11544_v17 = vld [vmem:[#allocation2 + $0x14] ss:$0 sps:$4 sm:$0x11]   ;;  %v360_v20 = vld [vmem:[#allocation2 + $0x3c] sm:$0x1]  ;;  %p12036_p1 = scmp.lt.s32.totalorder %s12034_s10, %s12028_s30 }
  0xcd   : > { %932 = vst [vmem:[#allocation2 + $0x30] sm:$0xf] %v931_v21  ;;  %v410_v26 = vld [vmem:[#allocation2 + $0x44] sm:$0x1]  ;;  %v668_v27 = vrot.slane %v666_v3, 7  ;;  %v361_v29 = vsel %vm12379_vm2, 0, %v360_v20  ;;  %v12631_v36 = vsel %vm1736_vm10, %v1737_v57, %v1738_v6 }
  0xce   : > { %10397 = vmatpush3.bf16.msra.mxu1 %v11537_v54  ;;  %v12611_v55 = vsel %vm1335_vm9, %v1378_v35, %v1382_v50  ;;  %v664_v54 = vrot.slane %v659_v46, 4  ;;  %v663_v0 = vsel %vm12402_vm7, %v655_v44, %v662_v52  ;;  %v411_v32 = vsel %vm12384_vm4, 0, %v410_v26  ;;  %14949 = vst [vmem:[#allocation25_spill] sm:$0xff] %v12631_v36  ;;  %362 = vst [vmem:[#allocation2 + $0x3c] sm:$0x1] %v361_v29  ;;  %v463_v26 = vld [vmem:[%s12364_s20 + $0x68] sm:$0xff]  ;;  %p12037_p2 = por %p12036_p1, %p12035_p12 }
  0xcf   : > { %9294 = vmatprep.subr.bf16.mxu1 %v11545_v14  ;;  %14948 = vst [vmem:[#allocation24_spill] sm:$0xff] %v12611_v55  ;;  %v12618_v60 = vmax.bf16 %v14801_v23, %v12611_v55  ;;  %v11532_v63 = vld [vmem:[#allocation2 + $0xb4] sm:$0xff]   ;;  %933 = vst [vmem:[#allocation2 + $0x34] sm:$0xf] %v663_v0  ;;  %v669_v33 = vshll.u32 %v9103_v48, 16  ;;  %v1740_v39 = vrot.slane %v11543_v1, 1  ;;  %v12645_v52 = vmax.bf16 %v14801_v23, %v12631_v36 }
  0xd0   : > { %v11533_v18 = vld [vmem:[#allocation2 + $0xbc] ss:$0 sps:$4 sm:$0x11]   ;;  %v1517_v8 = vshrl.u32 %v11532_v63, 16  ;;  %v1519_v11 = vshll.u32 %v11532_v63, 16  ;;  %v11535_v15 = vld [vmem:[#allocation2 + $0xb4] sm:$0xff]   ;;  %p12038_p4 = pnand %p12037_p2, %p12031_p7 }
  0xd1   : > { %2305 = vmatprep.mubr.bf16.mxu0 %v12618_v60  ;;  %v934_v12 = vld [vmem:[#allocation2 + $0x38] sm:$0x1]  ;;  %v1524_v14 = vshll.u32 %v11533_v18, 16  ;;  %412 = vst [vmem:[#allocation2 + $0x44] sm:$0x1] %v411_v32  ;;  %v674_v40 = vshrl.u32 %v9104_v13, 16  ;;  %v12637_v47 = vmax.bf16 %v14801_v23, %v11535_v15  ;;  %v671_v53 = vor.u32 %v669_v33, %v668_v27 }
  0xd2   : > { %2306 = vmatmul.mubr.bf16.gmra.mrb[12].mxu0 %v12614_v56  ;;  %v935_v16 = vsel %vm12379_vm2, %v664_v54, %v934_v12  ;;  %v1521_v19 = vrot.slane %v1519_v11, 1  ;;  %v672_v41 = vrot.slane %v668_v27, 4  ;;  %v677_v44 = vshll.u32 %v9104_v13, 16  ;;  %v11549_v54 = vld [vmem:[#allocation2 + $0x18] sm:$0xfe]   ;;  %v462_v18 = vld [vmem:[%s12364_s20 + $0x60] sm:$0xff] }
  0xd3   : > { %936 = vst [vmem:[#allocation2 + $0x38] sm:$0x1] %v935_v16  ;;  %v1526_v28 = vrot.slane %v1524_v14, 1  ;;  %v676_v51 = vrot.slane %v674_v40, 7  ;;  %v1741_v21 = vrot.slane %v11544_v17, 1  ;;  %v1743_v11 = vrot.slane %v11549_v54, 1 }
  0xd4   : > { %v1522_v35 = vor.u32 %v1521_v19, %v1517_v8  ;;  %v11550_v57 = vld [vmem:[#allocation2 + $0x20] ss:$0 sps:$4 sm:$0x11]   ;;  %v12649_v12 = vpack.c.bf16 %v462_v18, %v462_v18  ;;  %v11552_v32 = vld [vmem:[#allocation2 + $0x24] sm:$0xfe]  }
  0xd5   : > { %v679_v1 = vor.u32 %v677_v44, %v676_v51  ;;  %v681_v3 = vrot.slane %v676_v51, 4  ;;  %v1744_v15 = vrot.slane %v11550_v57, 1  ;;  %v12656_v17 = vsel %vm1736_vm10, %v1740_v39, %v1741_v21  ;;  %v937_v19 = vld [vmem:[#allocation2 + $0x3c] sm:$0xf]  ;;  %v11546_v40 = vld [vmem:[#allocation7] sm:$0xff]   ;;  %v11554_v57 = vld [vmem:[#allocation7 + $0x48] sm:$0xff]  }
  0xd6   : > { %v12634_v46 = vsel %vm1335_vm9, %v1522_v35, %v1526_v28  ;;  %v11538_v50 = vld [vmem:[#allocation2 + $0x30] sm:$0xff]   ;;  %14951 = vst [vmem:[#allocation27_spill] sm:$0xff] %v12656_v17  ;;  %v938_v28 = vsel %vm12408_vm8, %v671_v53, %v937_v19  ;;  %v11553_v33 = vld [vmem:[#allocation2 + $0x2c] ss:$0 sps:$4 sm:$0x11]   ;;  %v683_v44 = vshrl.u32 %v12649_v12, 16 }
  0xd7   : > { %14950 = vst [vmem:[#allocation26_spill] sm:$0xff] %v12634_v46  ;;  %v12641_v48 = vmax.bf16 %v14801_v23, %v12634_v46  ;;  %v1385_v63 = vshrl.u32 %v11538_v50, 16  ;;  %v1387_v0 = vshll.u32 %v11538_v50, 16  ;;  %v11542_v8 = vld [vmem:[#allocation2 + $0x30] sm:$0xff]   ;;  %v680_v14 = vsel %vm12402_vm7, %v672_v41, %v679_v1  ;;  %939 = vst [vmem:[#allocation2 + $0x3c] sm:$0xf] %v938_v28 }
  0xd8   : > { %940 = vst [vmem:[#allocation2 + $0x40] sm:$0xf] %v680_v14  ;;  %v941_v20 = vld [vmem:[#allocation2 + $0x44] sm:$0x1]  ;;  %v12664_v39 = vsel %vm1736_vm10, %v1743_v11, %v1744_v15  ;;  %v9106_v41 = vpack.c.bf16 %v463_v26, %v463_v26  ;;  %v12669_v50 = vmax.bf16 %v14801_v23, %v12656_v17  ;;  %v1746_v51 = vrot.slane %v11552_v32, 1 }
  0xd9   : > { %2401 = vmatprep.mubr.bf16.mxu1 %v12641_v48  ;;  %v1389_v13 = vrot.slane %v1387_v0, 1  ;;  %v942_v29 = vsel %vm12379_vm2, %v681_v3, %v941_v20  ;;  %14952 = vst [vmem:[#allocation28_spill] sm:$0xff] %v12664_v39  ;;  %v1747_v21 = vrot.slane %v11553_v33, 1  ;;  %v12675_v54 = vmax.bf16 %v14801_v23, %v11542_v8  ;;  %v413_v0 = vld [vmem:[#allocation2 + $0x50] sm:$0x1]  ;;  %v11555_v8 = vld [vmem:[#allocation7 + $0x8] sm:$0xff]  }
  0xda   : > { %v11539_v6 = vld [vmem:[#allocation2 + $0x38] ss:$0 sps:$4 sm:$0x11]   ;;  %2402 = vmatmul.mubr.bf16.gmra.mrb[12].mxu1 %v12637_v47  ;;  %943 = vst [vmem:[#allocation2 + $0x44] sm:$0x1] %v942_v29  ;;  %v685_v1 = vrot.slane %v683_v44, 7  ;;  %v12683_v18 = vmax.bf16 %v14801_v23, %v12664_v39 }
  0xdb   : > { %v1392_v16 = vshll.u32 %v11539_v6, 16  ;;  %10398 = vmatprep.mubr.bf16.mxu1 %v12645_v52  ;;  %v1390_v27 = vor.u32 %v1389_v13, %v1385_v63  ;;  %v363_v63 = vld [vmem:[#allocation2 + $0x48] sm:$0x1]  ;;  %v414_v11 = vsel %vm12384_vm4, 0, %v413_v0  ;;  %v686_v13 = vshll.u32 %v12649_v12, 16  ;;  %v11563_v20 = vld [vmem:[#allocation7 + $0x50] sm:$0xff]  }
  0xdc   : > { %v364_v6 = vsel %vm12379_vm2, 0, %v363_v63  ;;  %415 = vst [vmem:[#allocation2 + $0x50] sm:$0x1] %v414_v11  ;;  %v691_v14 = vshrl.u32 %v9106_v41, 16  ;;  %v11558_v15 = vld [vmem:[#allocation2 + $0x30] sm:$0xfe]  }
  0xdd   : > { %v1394_v35 = vrot.slane %v1392_v16, 1  ;;  %365 = vst [vmem:[#allocation2 + $0x48] sm:$0x1] %v364_v6  ;;  %v12693_v16 = vsel %vm1736_vm10, %v1746_v51, %v1747_v21  ;;  %v694_v19 = vshll.u32 %v9106_v41, 16  ;;  %v689_v26 = vrot.slane %v685_v1, 4  ;;  %v464_v29 = vld [vmem:[%s12364_s20 + $0x70] sm:$0xff] }
  0xde   : > { %14954 = vst [vmem:[#allocation30_spill] sm:$0xff] %v12693_v16  ;;  %v11559_v28 = vld [vmem:[#allocation2 + $0x38] ss:$0 sps:$4 sm:$0x11]   ;;  %v1749_v12 = vrot.slane %v11558_v15, 1  ;;  %v9107_v33 = vpack.c.bf16 %v464_v29, %v464_v29  ;;  %v12700_v41 = vmax.bf16 %v14801_v23, %v12693_v16  ;;  %v688_v51 = vor.u32 %v686_v13, %v685_v1 }
  0xdf   : > { %v12672_v53 = vsel %vm1335_vm9, %v1390_v27, %v1394_v35  ;;  %v693_v27 = vrot.slane %v691_v14, 7  ;;  %v11547_v32 = vld [vmem:[#allocation2 + $0x3c] sm:$0xff]   ;;  %v1750_v11 = vrot.slane %v11559_v28, 1  ;;  %v11602_v7 = vld [vmem:[#allocation2 + $0x90] sm:$0xfe]  }
  0xe0   : > { %14953 = vst [vmem:[#allocation29_spill] sm:$0xff] %v12672_v53  ;;  %v12679_v3 = vmax.bf16 %v14801_v23, %v12672_v53  ;;  %v11551_v44 = vld [vmem:[#allocation2 + $0x3c] sm:$0xff]   ;;  %14955 = vst [vmem:[#allocation31_spill] sm:$0xff] %v12700_v41  ;;  %v1397_v63 = vshrl.u32 %v11547_v32, 16  ;;  %v1399_v0 = vshll.u32 %v11547_v32, 16  ;;  %v700_v13 = vshrl.u32 %v9107_v33, 16 }
  0xe1   : > { %v11548_v35 = vld [vmem:[#allocation2 + $0x44] ss:$0 sps:$4 sm:$0x11]   ;;  %v696_v21 = vor.u32 %v694_v19, %v693_v27  ;;  %v698_v6 = vrot.slane %v693_v27, 4  ;;  %v465_v15 = vld [vmem:[%s12364_s20 + $0x78] sm:$0xff]  ;;  %v12706_v23 = vsel %vm1736_vm10, %v1749_v12, %v1750_v11  ;;  %v703_v11 = vshll.u32 %v9107_v33, 16 }
  0xe2   : > { %2313 = vmatprep.mubr.bf16.mxu0 %v12679_v3  ;;  %10399 = vmatmul.mubr.bf16.vlgmr.msra.gmra.mrb[16].mxu1 %v12669_v50  ;;  %v1404_v14 = vshll.u32 %v11548_v35, 16  ;;  %v1401_v29 = vrot.slane %v1399_v0, 1  ;;  %14956 = vst [vmem:[#allocation32_spill] sm:$0xff] %v12706_v23  ;;  %v9108_v1 = vpack.c.bf16 %v465_v15, %v465_v15  ;;  %v11561_v32 = vld [vmem:[#allocation2 + $0x3c] sm:$0xfe]   ;;  %v1773_v38 = vrot.slane %v11602_v7, 1 }
  0xe3   : > { %2314 = vmatmul.mubr.bf16.gmra.mrb[16].mxu0 %v12675_v54  ;;  %9295 = vmatpush3.bf16.msra.mxu1 %v11546_v40  ;;  %v11564_v40 = vld [vmem:[#allocation7 + $0x10] sm:$0xff]   ;;  %v11562_v35 = vld [vmem:[#allocation2 + $0x44] ss:$0 sps:$4 sm:$0x11]   ;;  %v11605_v7 = vld [vmem:[#allocation2 + $0x9c] sm:$0xfe]  }
  0xe4   : > { %10402 = vmatprep.mubr.bf16.mxu1 %v12683_v18  ;;  %9296 = vmatprep.subr.bf16.mxu1 %v11554_v57  ;;  %v697_v57 = vsel %vm12402_vm7, %v689_v26, %v696_v21  ;;  %v944_v39 = vld [vmem:[#allocation2 + $0x48] sm:$0xf]  ;;  %v948_v17 = vld [vmem:[#allocation2 + $0x50] sm:$0x1]  ;;  %v1406_v19 = vrot.slane %v1404_v14, 1  ;;  %v14957_v26 = vmov 0   ;;  %v1402_v21 = vor.u32 %v1401_v29, %v1397_v63 }
  0xe5   : > { %947 = vst [vmem:[#allocation2 + $0x4c] sm:$0xf] %v697_v57  ;;  %v945_v27 = vsel %vm12408_vm8, %v688_v51, %v944_v39  ;;  %v12714_v28 = vmax.bf16 %v14957_v26, %v12706_v23  ;;  %v1752_v39 = vrot.slane %v11561_v32, 1  ;;  %v1753_v12 = vrot.slane %v11562_v35, 1  ;;  %v416_v63 = vld [vmem:[#allocation2 + $0x5c] sm:$0x1] }
  0xe6   : > { %946 = vst [vmem:[#allocation2 + $0x48] sm:$0xf] %v945_v27  ;;  %v12722_v51 = vsel %vm1335_vm9, %v1402_v21, %v1406_v19  ;;  %v11572_v14 = vld [vmem:[#allocation7 + $0x58] sm:$0xff]   ;;  %v708_v15 = vshrl.u32 %v9108_v1, 16  ;;  %v711_v33 = vshll.u32 %v9108_v1, 16  ;;  %v11573_v27 = vld [vmem:[#allocation7 + $0x1c0] sm:$0xff]  }
  0xe7   : > { %9297 = vmatpush3.bf16.msra.mxu1 %v11555_v8  ;;  %v949_v8 = vsel %vm12379_vm2, %v698_v6, %v948_v17  ;;  %14958 = vst [vmem:[#allocation33_spill] sm:$0xff] %v12714_v28  ;;  %v366_v17 = vld [vmem:[#allocation2 + $0x54] sm:$0x1]  ;;  %14959 = vst [vmem:[#allocation34_spill] sm:$0xff] %v12722_v51  ;;  %v702_v6 = vrot.slane %v700_v13, 7  ;;  %v12731_v57 = vsel %vm1736_vm10, %v1752_v39, %v1753_v12  ;;  %9430 = vmatprep.subr.bf16.mxu0 %v11573_v27 }
  0xe8   : > { %9298 = vmatprep.subr.bf16.mxu1 %v11563_v20  ;;  %950 = vst [vmem:[#allocation2 + $0x50] sm:$0x1] %v949_v8  ;;  %v12718_v20 = vmax.bf16 %v14957_v26, %v11551_v44  ;;  %v367_v0 = vsel %vm12379_vm2, 0, %v366_v17  ;;  %v12728_v44 = vmax.bf16 %v14957_v26, %v12722_v51  ;;  %14960 = vst [vmem:[#allocation35_spill] sm:$0xff] %v12731_v57  ;;  %v710_v19 = vrot.slane %v708_v15, 7  ;;  %v11574_v15 = vld [vmem:[#allocation7 + $0x18] sm:$0xff]  }
  0xe9   : > { %368 = vst [vmem:[#allocation2 + $0x54] sm:$0x1] %v367_v0  ;;  %v12737_v29 = vmax.bf16 %v14957_v26, %v12731_v57  ;;  %v706_v13 = vrot.slane %v702_v6, 4  ;;  %v705_v32 = vor.u32 %v703_v11, %v702_v6 }
  0xea   : > { %10403 = vmatmul.mubr.bf16.gmra.mrb[20].mxu1 %v12700_v41  ;;  %2321 = vmatprep.mubr.bf16.mxu0 %v12728_v44  ;;  %v713_v35 = vor.u32 %v711_v33, %v710_v19  ;;  %v715_v21 = vrot.slane %v710_v19, 4 }
  0xeb   : > { %10406 = vmatprep.mubr.bf16.mxu1 %v12714_v28  ;;  %9299 = vmatpush3.bf16.msra.mxu1 %v11564_v40  ;;  %v417_v40 = vsel %vm12384_vm4, 0, %v416_v63  ;;  %14961 = vst [vmem:[#allocation36_spill] sm:$0xff] %v12737_v29 }
  0xec   : > { %418 = vst [vmem:[#allocation2 + $0x5c] sm:$0x1] %v417_v40  ;;  %9300 = vmatprep.subr.bf16.mxu1 %v11572_v14  ;;  %2322 = vmatmul.mubr.bf16.gmra.mrb[20].mxu0 %v12718_v20  ;;  %v714_v1 = vsel %vm12402_vm7, %v706_v13, %v713_v35 }
  0xed   : > { %v11556_v8 = vld [vmem:[#allocation2 + $0x48] sm:$0xff]   ;;  %954 = vst [vmem:[#allocation2 + $0x58] sm:$0xf] %v714_v1  ;;  %v369_v1 = vld [vmem:[#allocation2 + $0x60] sm:$0x1] }
  0xee   : > { %v11560_v12 = vld [vmem:[#allocation2 + $0x48] sm:$0xff]   ;;  %v1409_v17 = vshrl.u32 %v11556_v8, 16  ;;  %v1411_v0 = vshll.u32 %v11556_v8, 16 }
  0xef   : > { %v11557_v39 = vld [vmem:[#allocation2 + $0x50] ss:$0 sps:$4 sm:$0x11]   ;;  %v11567_v40 = vld [vmem:[#allocation2 + $0x48] sm:$0xfe]   ;;  %9301 = vmatpush3.bf16.msra.mxu1 %v11574_v15 }
  0xf0   : > { %v1416_v63 = vshll.u32 %v11557_v39, 16  ;;  %v951_v14 = vld [vmem:[#allocation2 + $0x54] sm:$0xf]  ;;  %v1413_v57 = vrot.slane %v1411_v0, 1  ;;  %v1755_v8 = vrot.slane %v11567_v40, 1  ;;  %v11575_v39 = vld [vmem:[#allocation7 + $0x180] sm:$0xff]  }
  0xf1   : > { %v952_v6 = vsel %vm12408_vm8, %v705_v32, %v951_v14  ;;  %v11568_v33 = vld [vmem:[#allocation2 + $0x50] ss:$0 sps:$4 sm:$0x11]   ;;  %v419_v0 = vld [vmem:[#allocation2 + $0x68] sm:$0x1]  ;;  %v12749_v32 = vmax.bf16 %v14957_v26, %v11560_v12  ;;  %v370_v14 = vsel %vm12379_vm2, 0, %v369_v1  ;;  %9431 = vmatpush3.bf16.msra.mxu0 %v11575_v39 }
  0xf2   : > { %10407 = vmatmul.mubr.bf16.gmra.mrb[24].mxu1 %v12737_v29  ;;  %v1418_v19 = vrot.slane %v1416_v63, 1  ;;  %953 = vst [vmem:[#allocation2 + $0x54] sm:$0xf] %v952_v6  ;;  %v1414_v13 = vor.u32 %v1413_v57, %v1409_v17  ;;  %v1756_v35 = vrot.slane %v11568_v33, 1  ;;  %v420_v63 = vsel %vm12384_vm4, 0, %v419_v0  ;;  %v466_v6 = vld [vmem:[%s12364_s20 + $0x80] sm:$0xff] }
  0xf3   : > { %v955_v11 = vld [vmem:[#allocation2 + $0x5c] sm:$0x1]  ;;  %v372_v40 = vld [vmem:[#allocation2 + $0x6c] sm:$0x1]  ;;  %371 = vst [vmem:[#allocation2 + $0x60] sm:$0x1] %v370_v14  ;;  %v9109_v12 = vpack.c.bf16 %v466_v6, %v466_v6 }
  0xf4   : > { %v956_v27 = vsel %vm12379_vm2, %v715_v21, %v955_v11  ;;  %v467_v21 = vld [vmem:[%s12364_s20 + $0x88] sm:$0xff]  ;;  %v12758_v57 = vsel %vm1335_vm9, %v1414_v13, %v1418_v19  ;;  %v12761_v17 = vsel %vm1736_vm10, %v1755_v8, %v1756_v35  ;;  %421 = vst [vmem:[#allocation2 + $0x68] sm:$0x1] %v420_v63  ;;  %v422_v11 = vld [vmem:[#allocation2 + $0x74] sm:$0x1]  ;;  %v373_v19 = vsel %vm12379_vm2, 0, %v372_v40 }
  0xf5   : > { %957 = vst [vmem:[#allocation2 + $0x5c] sm:$0x1] %v956_v27  ;;  %14962 = vst [vmem:[#allocation37_spill] sm:$0xff] %v12758_v57  ;;  %v9110_v15 = vpack.c.bf16 %v467_v21, %v467_v21  ;;  %v468_v33 = vld [vmem:[%s12364_s20 + $0x90] sm:$0xff]  ;;  %v12766_v27 = vmax.bf16 %v14957_v26, %v12758_v57  ;;  %v12770_v1 = vmax.bf16 %v14957_v26, %v12761_v17  ;;  %v423_v8 = vsel %vm12384_vm4, 0, %v422_v11  ;;  %v469_v13 = vld [vmem:[%s12364_s20 + $0x98] sm:$0xff] }
  0xf6   : > { %14963 = vst [vmem:[#allocation38_spill] sm:$0xff] %v12761_v17  ;;  %374 = vst [vmem:[#allocation2 + $0x6c] sm:$0x1] %v373_v19  ;;  %v9111_v35 = vpack.c.bf16 %v468_v33, %v468_v33  ;;  %v717_v39 = vshrl.u32 %v9109_v12, 16  ;;  %v720_v0 = vshll.u32 %v9109_v12, 16  ;;  %v11583_v6 = vld [vmem:[#allocation7 + $0x60] sm:$0xff]   ;;  %v9112_v46 = vpack.c.bf16 %v469_v13, %v469_v13 }
  0xf7   : > { %14964 = vst [vmem:[#allocation39_spill] sm:$0xff] %v12770_v1  ;;  %424 = vst [vmem:[#allocation2 + $0x74] sm:$0x1] %v423_v8  ;;  %2329 = vmatprep.mubr.bf16.mxu0 %v12766_v27  ;;  %10410 = vmatprep.mubr.bf16.mxu1 %v12770_v1  ;;  %v725_v14 = vshrl.u32 %v9110_v15, 16  ;;  %v728_v63 = vshll.u32 %v9110_v15, 16  ;;  %v11584_v21 = vld [vmem:[#allocation7 + $0x20] sm:$0xff]  }
  0xf8   : > { %2330 = vmatmul.mubr.bf16.gmra.mrb[24].mxu0 %v12749_v32  ;;  %v734_v17 = vshrl.u32 %v9111_v35, 16  ;;  %9302 = vmatprep.subr.bf16.mxu1 %v11583_v6  ;;  %v719_v12 = vrot.slane %v717_v39, 7  ;;  %v737_v53 = vshll.u32 %v9111_v35, 16 }
  0xf9   : > { %v11565_v40 = vld [vmem:[#allocation2 + $0x54] sm:$0xff]   ;;  %9303 = vmatpush3.bf16.msra.mxu1 %v11584_v21  ;;  %v727_v58 = vrot.slane %v725_v14, 7  ;;  %v471_v14 = vld [vmem:[%s12364_s20 + $0xa8] sm:$0xff] }
  0xfa   : > { %v11569_v11 = vld [vmem:[#allocation2 + $0x54] sm:$0xff]   ;;  %v1421_v19 = vshrl.u32 %v11565_v40, 16  ;;  %v1423_v8 = vshll.u32 %v11565_v40, 16  ;;  %v12780_v15 = vrot.slane %v734_v17, 7  ;;  %v958_v1 = vld [vmem:[#allocation2 + $0x60] sm:$0xf]  ;;  %v722_v28 = vor.u32 %v720_v0, %v719_v12 }
  0xfb   : > { %v11570_v16 = vld [vmem:[#allocation2 + $0x54] sm:$0xfe]   ;;  %v723_v6 = vrot.slane %v719_v12, 4  ;;  %v730_v55 = vor.u32 %v728_v63, %v727_v58  ;;  %v962_v40 = vld [vmem:[#allocation2 + $0x68] sm:$0x1]  ;;  %v12783_v41 = vmax.bf16 %v14957_v26, %v11569_v11  ;;  %v732_v17 = vrot.slane %v727_v58, 4 }
  0xfc   : > { %v11566_v23 = vld [vmem:[#allocation2 + $0x5c] ss:$0 sps:$4 sm:$0x11]   ;;  %v1425_v5 = vrot.slane %v1423_v8, 1  ;;  %v1758_v57 = vrot.slane %v11570_v16, 1  ;;  %v739_v16 = vor.u32 %v737_v53, %v12780_v15  ;;  %v959_v39 = vsel %vm12408_vm8, %v722_v28, %v958_v1  ;;  %v472_v12 = vld [vmem:[%s12364_s20 + $0xb0] sm:$0xff] }
  0xfd   : > { %v1428_v33 = vshll.u32 %v11566_v23, 16  ;;  %v11571_v36 = vld [vmem:[#allocation2 + $0x5c] ss:$0 sps:$4 sm:$0x11]   ;;  %v965_v21 = vld [vmem:[#allocation2 + $0x6c] sm:$0xf]  ;;  %v731_v35 = vsel %vm12402_vm7, %v723_v6, %v730_v55  ;;  %v9114_v8 = vpack.c.bf16 %v471_v14, %v471_v14 }
  0xfe   : > { %v1759_v51 = vrot.slane %v11571_v36, 1  ;;  %v1426_v29 = vor.u32 %v1425_v5, %v1421_v19  ;;  %v11585_v23 = vld [vmem:[#allocation7 + $0x1c8] sm:$0xff]   ;;  %960 = vst [vmem:[#allocation2 + $0x60] sm:$0xf] %v959_v39  ;;  %961 = vst [vmem:[#allocation2 + $0x64] sm:$0xf] %v731_v35  ;;  %v966_v28 = vsel %vm12408_vm8, %v739_v16, %v965_v21 }
  0xff   : > { %v1430_v31 = vrot.slane %v1428_v33, 1  ;;  %9432 = vmatprep.subr.bf16.mxu0 %v11585_v23  ;;  %v742_v53 = vshrl.u32 %v9112_v46, 16  ;;  %v740_v55 = vrot.slane %v12780_v15, 4  ;;  %v375_v1 = vld [vmem:[#allocation2 + $0x78] sm:$0x1]  ;;  %v9115_v23 = vpack.c.bf16 %v472_v12, %v472_v12 }
 0x100   : > { %v12786_v13 = vsel %vm1736_vm10, %v1758_v57, %v1759_v51  ;;  %v745_v51 = vshll.u32 %v9112_v46, 16  ;;  %v470_v57 = vld [vmem:[%s12364_s20 + $0xa0] sm:$0xff]  ;;  %967 = vst [vmem:[#allocation2 + $0x6c] sm:$0xf] %v966_v28  ;;  %v376_v46 = vsel %vm12379_vm2, 0, %v375_v1  ;;  %v759_v35 = vshrl.u32 %v9114_v8, 16 }
 0x101   : > { %14965 = vst [vmem:[#allocation40_spill] sm:$0xff] %v12786_v13  ;;  %v12790_v36 = vsel %vm1335_vm9, %v1426_v29, %v1430_v31  ;;  %v12794_v5 = vmax.bf16 %v14957_v26, %v12786_v13  ;;  %v963_v31 = vsel %vm12379_vm2, %v732_v17, %v962_v40  ;;  %v11586_v29 = vld [vmem:[#allocation7 + $0x188] sm:$0xff]   ;;  %v425_v0 = vld [vmem:[#allocation2 + $0x80] sm:$0x1]  ;;  %v9113_v63 = vpack.c.bf16 %v470_v57, %v470_v57  ;;  %v378_v33 = vld [vmem:[#allocation2 + $0x84] sm:$0x1] }
 0x102   : > { %14966 = vst [vmem:[#allocation41_spill] sm:$0xff] %v12790_v36  ;;  %v12802_v58 = vmax.bf16 %v14957_v26, %v12790_v36  ;;  %964 = vst [vmem:[#allocation2 + $0x68] sm:$0x1] %v963_v31  ;;  %v744_v11 = vrot.slane %v742_v53, 7  ;;  %9433 = vmatpush3.bf16.msra.mxu0 %v11586_v29  ;;  %v426_v19 = vsel %vm12384_vm4, 0, %v425_v0  ;;  %v379_v40 = vsel %vm12379_vm2, 0, %v378_v33 }
 0x103   : > { %10411 = vmatmul.mubr.bf16.gmra.mrb[28].mxu1 %v12794_v5  ;;  %v969_v15 = vld [vmem:[#allocation2 + $0x74] sm:$0x1]  ;;  %377 = vst [vmem:[#allocation2 + $0x78] sm:$0x1] %v376_v46  ;;  %427 = vst [vmem:[#allocation2 + $0x80] sm:$0x1] %v426_v19 }
 0x104   : > { %2337 = vmatprep.mubr.bf16.mxu0 %v12802_v58  ;;  %v751_v6 = vshrl.u32 %v9113_v63, 16  ;;  %v428_v21 = vld [vmem:[#allocation2 + $0x8c] sm:$0x1]  ;;  %v747_v17 = vor.u32 %v745_v51, %v744_v11  ;;  %v749_v16 = vrot.slane %v744_v11, 4  ;;  %v762_v39 = vshll.u32 %v9114_v8, 16  ;;  %v11595_v28 = vld [vmem:[#allocation7 + $0x1d0] sm:$0xff]  }
 0x105   : > { %2338 = vmatmul.mubr.bf16.gmra.mrb[28].mxu0 %v12783_v41  ;;  %380 = vst [vmem:[#allocation2 + $0x84] sm:$0x1] %v379_v40  ;;  %v11594_v31 = vld [vmem:[#allocation7 + $0x68] sm:$0xff]   ;;  %v754_v29 = vshll.u32 %v9113_v63, 16  ;;  %v429_v57 = vsel %vm12384_vm4, 0, %v428_v21  ;;  %v761_v14 = vrot.slane %v759_v35, 7  ;;  %9434 = vmatprep.subr.bf16.mxu0 %v11595_v28 }
 0x106   : > { %v753_v53 = vrot.slane %v751_v6, 7  ;;  %v748_v1 = vsel %vm12402_vm7, %v740_v55, %v747_v17  ;;  %v970_v0 = vsel %vm12379_vm2, %v749_v16, %v969_v15  ;;  %430 = vst [vmem:[#allocation2 + $0x8c] sm:$0x1] %v429_v57  ;;  %v768_v51 = vshrl.u32 %v9115_v23, 16  ;;  %9304 = vmatprep.subr.bf16.mxu1 %v11594_v31  ;;  %v11576_v11 = vld [vmem:[#allocation2 + $0x60] sm:$0xff]   ;;  %v473_v17 = vld [vmem:[%s12364_s20 + $0xb8] sm:$0xff]  ;;  %s14736_s20 = scalar_lea.hbm %s14792_s7, %s9157_s8 }
 0x107   : > { %968 = vst [vmem:[#allocation2 + $0x70] sm:$0xf] %v748_v1  ;;  %971 = vst [vmem:[#allocation2 + $0x74] sm:$0x1] %v970_v0  ;;  %v764_v10 = vor.u32 %v762_v39, %v761_v14  ;;  %v771_v19 = vshll.u32 %v9115_v23, 16  ;;  %v1433_v8 = vshrl.u32 %v11576_v11, 16 }
 0x108   : > { %v757_v46 = vrot.slane %v753_v53, 4  ;;  %v1435_v33 = vshll.u32 %v11576_v11, 16  ;;  %v11580_v12 = vld [vmem:[#allocation2 + $0x60] sm:$0xff]   ;;  %v756_v40 = vor.u32 %v754_v29, %v753_v53  ;;  %v766_v21 = vrot.slane %v761_v14, 4 }
 0x109   : > { %v11577_v63 = vld [vmem:[#allocation2 + $0x68] ss:$0 sps:$4 sm:$0x11]   ;;  %v11578_v6 = vld [vmem:[#allocation2 + $0x60] sm:$0xfe]   ;;  %v770_v23 = vrot.slane %v768_v51, 7  ;;  %v12839_v14 = vmax.bf16 %v14957_v26, %v11580_v12 }
 0x10a   : > { %v1440_v55 = vshll.u32 %v11577_v63, 16  ;;  %v765_v15 = vsel %vm12402_vm7, %v757_v46, %v764_v10  ;;  %v1437_v16 = vrot.slane %v1435_v33, 1  ;;  %v11579_v35 = vld [vmem:[#allocation2 + $0x68] ss:$0 sps:$4 sm:$0x11]   ;;  %v1761_v57 = vrot.slane %v11578_v6, 1 }
 0x10b   : > { %975 = vst [vmem:[#allocation2 + $0x7c] sm:$0xf] %v765_v15  ;;  %v1762_v1 = vrot.slane %v11579_v35, 1  ;;  %v972_v39 = vld [vmem:[#allocation2 + $0x78] sm:$0xf]  ;;  %v9116_v10 = vpack.c.bf16 %v473_v17, %v473_v17  ;;  %v773_v6 = vor.u32 %v771_v19, %v770_v23 }
 0x10c   : > { %v1442_v31 = vrot.slane %v1440_v55, 1  ;;  %v1438_v28 = vor.u32 %v1437_v16, %v1433_v8  ;;  %v973_v11 = vsel %vm12408_vm8, %v756_v40, %v972_v39  ;;  %v976_v12 = vld [vmem:[#allocation2 + $0x80] sm:$0x1]  ;;  %v979_v39 = vld [vmem:[#allocation2 + $0x84] sm:$0xf] }
 0x10d   : > { %v12836_v29 = vsel %vm1736_vm10, %v1761_v57, %v1762_v1  ;;  %974 = vst [vmem:[#allocation2 + $0x78] sm:$0xf] %v973_v11  ;;  %v774_v57 = vrot.slane %v770_v23, 4  ;;  %v776_v1 = vshrl.u32 %v9116_v10, 16 }
 0x10e   : > { %v11581_v0 = vld [vmem:[#allocation2 + $0x6c] sm:$0xfe]   ;;  %v12833_v53 = vsel %vm1335_vm9, %v1438_v28, %v1442_v31  ;;  %14968 = vst [vmem:[#allocation43_spill] sm:$0xff] %v12836_v29  ;;  %v11582_v46 = vld [vmem:[#allocation2 + $0x74] ss:$0 sps:$4 sm:$0x11]   ;;  %v12847_v8 = vmax.bf16 %v14957_v26, %v12836_v29  ;;  %v977_v31 = vsel %vm12379_vm2, %v766_v21, %v976_v12 }
 0x10f   : > { %14967 = vst [vmem:[#allocation42_spill] sm:$0xff] %v12833_v53  ;;  %v11587_v63 = vld [vmem:[#allocation2 + $0x6c] sm:$0xff]   ;;  %v12843_v51 = vmax.bf16 %v14957_v26, %v12833_v53  ;;  %v1764_v33 = vrot.slane %v11581_v0, 1  ;;  %v11588_v55 = vld [vmem:[#allocation2 + $0x74] ss:$0 sps:$4 sm:$0x11]  }
 0x110   : > { %v1765_v40 = vrot.slane %v11582_v46, 1  ;;  %v1445_v15 = vshrl.u32 %v11587_v63, 16  ;;  %v1447_v16 = vshll.u32 %v11587_v63, 16  ;;  %v11591_v35 = vld [vmem:[#allocation2 + $0x6c] sm:$0xff]   ;;  %10414 = vmatprep.mubr.bf16.mxu1 %v12847_v8  ;;  %v1452_v17 = vshll.u32 %v11588_v55, 16  ;;  %v11622_v53 = vld [vmem:[#allocation7 + $0x38] sm:$0xff]  }
 0x111   : > { %2345 = vmatprep.mubr.bf16.mxu0 %v12843_v51  ;;  %978 = vst [vmem:[#allocation2 + $0x80] sm:$0x1] %v977_v31  ;;  %v779_v46 = vshll.u32 %v9116_v10, 16  ;;  %v980_v63 = vsel %vm12408_vm8, %v773_v6, %v979_v39  ;;  %v983_v21 = vld [vmem:[#allocation2 + $0x8c] sm:$0x1]  ;;  %v778_v55 = vrot.slane %v776_v1, 7 }
 0x112   : > { %2346 = vmatmul.mubr.bf16.gmra.mrb[32].mxu0 %v12839_v14  ;;  %v12855_v28 = vsel %vm1736_vm10, %v1764_v33, %v1765_v40  ;;  %v1449_v19 = vrot.slane %v1447_v16, 1  ;;  %v1454_v11 = vrot.slane %v1452_v17, 1  ;;  %981 = vst [vmem:[#allocation2 + $0x84] sm:$0xf] %v980_v63  ;;  %v11596_v12 = vld [vmem:[#allocation7 + $0x28] sm:$0xff]   ;;  %v12868_v16 = vmax.bf16 %v14957_v26, %v11591_v35  ;;  %v11597_v10 = vld [vmem:[#allocation7 + $0x190] sm:$0xff]  }
 0x113   : > { %14969 = vst [vmem:[#allocation44_spill] sm:$0xff] %v12855_v28  ;;  %v12859_v0 = vmax.bf16 %v14957_v26, %v12855_v28  ;;  %v781_v31 = vor.u32 %v779_v46, %v778_v55  ;;  %v783_v17 = vrot.slane %v778_v55, 4  ;;  %9305 = vmatpush3.bf16.msra.mxu1 %v11596_v12  ;;  %9435 = vmatpush3.bf16.msra.mxu0 %v11597_v10 }
 0x114   : > { %v1450_v23 = vor.u32 %v1449_v19, %v1445_v15  ;;  %v11589_v33 = vld [vmem:[#allocation2 + $0x78] sm:$0xfe]  }
 0x115   : > { %10415 = vmatmul.mubr.bf16.gmra.mrb[32].mxu1 %v12859_v0  ;;  %v11598_v15 = vld [vmem:[#allocation7 + $0x1d8] sm:$0xff]   ;;  %v1767_v19 = vrot.slane %v11589_v33, 1  ;;  %v782_v1 = vsel %vm12402_vm7, %v774_v57, %v781_v31  ;;  %v984_v39 = vsel %vm12379_vm2, %v783_v17, %v983_v21  ;;  %v11607_v57 = vld [vmem:[#allocation7 + $0x70] sm:$0xff]   ;;  %v11608_v21 = vld [vmem:[#allocation7 + $0x1e0] sm:$0xff]  }
 0x116   : > { %v12865_v40 = vsel %vm1335_vm9, %v1450_v23, %v1454_v11  ;;  %v11599_v11 = vld [vmem:[#allocation7 + $0x198] sm:$0xff]   ;;  %982 = vst [vmem:[#allocation2 + $0x88] sm:$0xf] %v782_v1  ;;  %985 = vst [vmem:[#allocation2 + $0x8c] sm:$0x1] %v984_v39  ;;  %9436 = vmatprep.subr.bf16.mxu0 %v11598_v15  ;;  %9306 = vmatprep.subr.bf16.mxu1 %v11607_v57  ;;  %v11609_v1 = vld [vmem:[#allocation7 + $0x30] sm:$0xff]  }
 0x117   : > { %14970 = vst [vmem:[#allocation45_spill] sm:$0xff] %v12865_v40  ;;  %v12872_v6 = vmax.bf16 %v14957_v26, %v12865_v40  ;;  %v11600_v46 = vld [vmem:[#allocation2 + $0x78] sm:$0xff]   ;;  %9437 = vmatpush3.bf16.msra.mxu0 %v11599_v11  ;;  %9307 = vmatpush3.bf16.msra.mxu1 %v11609_v1  ;;  %v11610_v11 = vld [vmem:[#allocation7 + $0x1a0] sm:$0xff]  }
 0x118   : > { %v11590_v35 = vld [vmem:[#allocation2 + $0x80] ss:$0 sps:$4 sm:$0x11]   ;;  %v1457_v55 = vshrl.u32 %v11600_v46, 16  ;;  %v1459_v12 = vshll.u32 %v11600_v46, 16  ;;  %v11604_v33 = vld [vmem:[#allocation2 + $0x78] sm:$0xff]   ;;  %9438 = vmatprep.subr.bf16.mxu0 %v11608_v21 }
 0x119   : > { %2353 = vmatprep.mubr.bf16.mxu0 %v12872_v6  ;;  %v11601_v63 = vld [vmem:[#allocation2 + $0x80] ss:$0 sps:$4 sm:$0x11]   ;;  %v1768_v23 = vrot.slane %v11590_v35, 1  ;;  %v12892_v57 = vmax.bf16 %v14957_v26, %v11604_v33 }
 0x11a   : > { %2354 = vmatmul.mubr.bf16.gmra.mrb[36].mxu0 %v12868_v16  ;;  %v1464_v31 = vshll.u32 %v11601_v63, 16  ;;  %v1461_v10 = vrot.slane %v1459_v12, 1  ;;  %v11603_v35 = vld [vmem:[#allocation2 + $0x98] ss:$0 sps:$4 sm:$0x11]  }
 0x11b   : > { %v12881_v17 = vsel %vm1736_vm10, %v1767_v19, %v1768_v23  ;;  %v1774_v12 = vrot.slane %v11603_v35, 1  ;;  %9439 = vmatpush3.bf16.msra.mxu0 %v11610_v11  ;;  %v11606_v1 = vld [vmem:[#allocation2 + $0xa4] ss:$0 sps:$4 sm:$0x11]   ;;  %v11612_v35 = vld [vmem:[#allocation7 + $0x1a8] sm:$0xff]  }
 0x11c   : > { %14971 = vst [vmem:[#allocation46_spill] sm:$0xff] %v12881_v17  ;;  %v12885_v15 = vmax.bf16 %v14957_v26, %v12881_v17  ;;  %v1466_v39 = vrot.slane %v1464_v31, 1  ;;  %v1462_v46 = vor.u32 %v1461_v10, %v1457_v55  ;;  %v11611_v55 = vld [vmem:[#allocation7 + $0x1e8] sm:$0xff]   ;;  %v1777_v11 = vrot.slane %v11606_v1, 1  ;;  %v11620_v1 = vld [vmem:[#allocation7 + $0x78] sm:$0xff]  }
 0x11d   : > { %v11592_v63 = vld [vmem:[#allocation2 + $0x84] sm:$0xfe]   ;;  %v11593_v19 = vld [vmem:[#allocation2 + $0x8c] ss:$0 sps:$4 sm:$0x11]   ;;  %v12899_v10 = vsel %vm1736_vm10, %v1773_v38, %v1774_v12  ;;  %9440 = vmatprep.subr.bf16.mxu0 %v11611_v55  ;;  %9308 = vmatprep.subr.bf16.mxu1 %v11620_v1 }
 0x11e   : > { %10418 = vmatprep.mubr.bf16.mxu1 %v12885_v15  ;;  %v12889_v23 = vsel %vm1335_vm9, %v1462_v46, %v1466_v39  ;;  %v1770_v43 = vrot.slane %v11592_v63, 1  ;;  %v1771_v21 = vrot.slane %v11593_v19, 1  ;;  %14973 = vst [vmem:[#allocation48_spill] sm:$0xff] %v12899_v10  ;;  %v1776_v39 = vrot.slane %v11605_v7, 1  ;;  %v11613_v63 = vld [vmem:[#allocation2 + $0x84] sm:$0xff]   ;;  %9309 = vmatpush3.bf16.msra.mxu1 %v11622_v53 }
 0x11f   : > { %14972 = vst [vmem:[#allocation47_spill] sm:$0xff] %v12889_v23  ;;  %v12896_v31 = vmax.bf16 %v14957_v26, %v12889_v23  ;;  %v12907_v46 = vmax.bf16 %v14957_v26, %v12899_v10  ;;  %9441 = vmatpush3.bf16.msra.mxu0 %v11612_v35  ;;  %v11614_v19 = vld [vmem:[#allocation2 + $0x8c] ss:$0 sps:$4 sm:$0x11]   ;;  %v1469_v12 = vshrl.u32 %v11613_v63, 16  ;;  %v1471_v7 = vshll.u32 %v11613_v63, 16 }
 0x120   : > { %v12903_v33 = vsel %vm1736_vm10, %v1770_v43, %v1771_v21  ;;  %v12917_v43 = vsel %vm1736_vm10, %v1776_v39, %v1777_v11  ;;  %v11617_v55 = vld [vmem:[#allocation2 + $0x84] sm:$0xff]   ;;  %v1476_v21 = vshll.u32 %v11614_v19, 16  ;;  %v11616_v35 = vld [vmem:[#allocation2 + $0xb0] ss:$0 sps:$4 sm:$0x11]  }
 0x121   : > { %2361 = vmatprep.mubr.bf16.mxu0 %v12896_v31  ;;  %14974 = vst [vmem:[#allocation49_spill] sm:$0xff] %v12903_v33  ;;  %v12912_v38 = vmax.bf16 %v14957_v26, %v12903_v33  ;;  %14975 = vst [vmem:[#allocation50_spill] sm:$0xff] %v12917_v43  ;;  %v11615_v10 = vld [vmem:[#allocation2 + $0xa8] sm:$0xfe]   ;;  %v12921_v17 = vmax.bf16 %v14957_v26, %v12917_v43  ;;  %v1473_v33 = vrot.slane %v1471_v7, 1  ;;  %v1780_v23 = vrot.slane %v11616_v35, 1 }
 0x122   : > { %2362 = vmatmul.mubr.bf16.gmra.mrb[40].mxu0 %v12892_v57  ;;  %v1478_v28 = vrot.slane %v1476_v21, 1  ;;  %v1779_v29 = vrot.slane %v11615_v10, 1  ;;  %v11621_v39 = vld [vmem:[#allocation7 + $0x1f0] sm:$0xff]   ;;  %v11619_v40 = vld [vmem:[#allocation2 + $0xbc] ss:$0 sps:$4 sm:$0x11]   ;;  %v12931_v7 = vmax.bf16 %v14957_v26, %v11617_v55 }
 0x123   : > { %10419 = vmatmul.mubr.bf16.gmra.mrb[36].mxu1 %v12912_v38  ;;  %v1474_v13 = vor.u32 %v1473_v33, %v1469_v12  ;;  %v11618_v11 = vld [vmem:[#allocation2 + $0xb4] sm:$0xfe]   ;;  %9442 = vmatprep.subr.bf16.mxu0 %v11621_v39  ;;  %v1783_v21 = vrot.slane %v11619_v40, 1  ;;  %v12952_v40 = vmax.bf16 %v14957_v26, 0  ;;  %v11626_v53 = vld [vmem:[#allocation7 + $0x80] sm:$0xff]   ;;  %v11627_v39 = vld [vmem:[#allocation7 + $0x88] sm:$0xff]  }
 0x124   : > { %10422 = vmatprep.mubr.bf16.mxu1 %v12907_v46  ;;  %v12928_v19 = vsel %vm1736_vm10, %v1779_v29, %v1780_v23  ;;  %v1782_v12 = vrot.slane %v11618_v11, 1  ;;  %v11623_v29 = vld [vmem:[#allocation7 + $0x1b0] sm:$0xff]   ;;  %v11624_v23 = vld [vmem:[#allocation7 + $0x1f8] sm:$0xff]   ;;  %10430 = vmatprep.subr.bf16.mxu1 %v11626_v53  ;;  %v11630_v1 = vld [vmem:[#allocation10 + $0x100] sm:$0xff]  }
 0x125   : > { %v12925_v63 = vsel %vm1335_vm9, %v1474_v13, %v1478_v28  ;;  %14977 = vst [vmem:[#allocation52_spill] sm:$0xff] %v12928_v19  ;;  %v12939_v33 = vmax.bf16 %v14957_v26, %v12928_v19  ;;  %9443 = vmatpush3.bf16.msra.mxu0 %v11623_v29  ;;  %v11625_v55 = vld [vmem:[#allocation7 + $0x1b8] sm:$0xff]   ;;  %v11631_v35 = vld [vmem:[#allocation10 + $0xc0] sm:$0xff]   ;;  %v11633_v11 = vld [vmem:[#allocation10 + $0x108] sm:$0xff]  }
 0x126   : > { %14976 = vst [vmem:[#allocation51_spill] sm:$0xff] %v12925_v63  ;;  %v12935_v10 = vmax.bf16 %v14957_v26, %v12925_v63  ;;  %v12944_v13 = vsel %vm1736_vm10, %v1782_v12, %v1783_v21  ;;  %9444 = vmatprep.subr.bf16.mxu0 %v11624_v23  ;;  %v11634_v12 = vld [vmem:[#allocation10 + $0xc8] sm:$0xff]   ;;  %v11636_v21 = vld [vmem:[#allocation10 + $0x110] sm:$0xff]  }
 0x127   : > { %14978 = vst [vmem:[#allocation53_spill] sm:$0xff] %v12944_v13  ;;  %v12949_v28 = vmax.bf16 %v14957_v26, %v12944_v13  ;;  %v11628_v29 = vld [vmem:[#allocation7 + $0x90] sm:$0xff]   ;;  %v13155_v19 = vld [vmem:[#allocation2 + $0x84] sm:$0xff]  }
 0x128   : > { %2369 = vmatprep.mubr.bf16.mxu0 %v12935_v10  ;;  %v11637_v23 = vld [vmem:[#allocation10 + $0xd0] sm:$0xff]  }
 0x129   : > { %9445 = vmatpush3.bf16.msra.mxu0 %v11625_v55  ;;  %v11639_v55 = vld [vmem:[#allocation10 + $0x118] sm:$0xff]  }
 0x12a   : > { %2370 = vmatmul.mubr.bf16.gmra.mrb[44].mxu0 %v12931_v7  ;;  %9566 = vmatprep.subr.bf16.mxu0 %v11630_v1  ;;  %v11629_v1 = vld [vmem:[#allocation7 + $0x98] sm:$0xff]  }
 0x12b   : > { %10423 = vmatmul.mubr.bf16.gmra.mrb[40].mxu1 %v12921_v17  ;;  %3358 = vmatprep.mubr.bf16.mxu0 %v12524_v4 }
 0x12c   : > { %10426 = vmatprep.mubr.bf16.mxu1 %v12939_v33 }
 0x132   : > { %3359 = vmatmul.mubr.bf16.vlgmr.msra.gmra.mrb[48].mxu0 %v12499_v42 }
 0x133   : > { %10427 = vmatmul.mubr.bf16.gmra.mrb[44].mxu1 %v12949_v28  ;;  %3366 = vmatprep.mubr.bf16.mxu0 %v12578_v49 }
 0x134   : > { %2747 = vmatprep.mubr.bf16.mxu1 %v12952_v40  ;;  %9567 = vmatpush3.bf16.msra.mxu0 %v11631_v35  ;;  %v11640_v35 = vld [vmem:[#allocation10 + $0xd8] sm:$0xff]  }
 0x135   : > { %9568 = vmatprep.subr.bf16.mxu0 %v11633_v11  ;;  %v11642_v11 = vld [vmem:[#allocation10 + $0x120] sm:$0xff]  }
 0x138   : > { %9569 = vmatpush3.bf16.msra.mxu0 %v11634_v12  ;;  %v11644_v12 = vld [vmem:[#allocation10 + $0x128] sm:$0xff]  }
 0x139   : > { %9570 = vmatprep.subr.bf16.mxu0 %v11636_v21  ;;  %v11645_v21 = vld [vmem:[#allocation10 + $0xe8] sm:$0xff]  }
 0x13a   : > { %3367 = vmatmul.mubr.bf16.gmra.mrb[52].mxu0 %v12574_v37 }
 0x13b   : > { %2748 = vmatmul.mubr.bf16.vlgmr.msra.gmra.mrb[48].mxu1 %v12952_v40  ;;  %3374 = vmatprep.mubr.bf16.mxu0 %v12618_v60 }
 0x13c   : > { %10431 = vmatpush3.bf16.msra.mxu1 %v11626_v53  ;;  %2755 = vmatprep.mubr.bf16.mxu1 %v12484_v30  ;;  %v11632_v30 = vld [vmem:[#allocation7 + $0xa0] sm:$0xff]  }
 0x13d   : > { %10432 = vmatprep.subr.bf16.mxu1 %v11627_v39  ;;  %9571 = vmatpush3.bf16.msra.mxu0 %v11637_v23  ;;  %v11643_v53 = vld [vmem:[#allocation10 + $0xe0] sm:$0xff]   ;;  %v11648_v23 = vld [vmem:[#allocation10 + $0x138] sm:$0xff]  }
 0x13e   : > { %9572 = vmatprep.subr.bf16.mxu0 %v11639_v55  ;;  %v11641_v55 = vld [vmem:[#allocation7 + $0xb8] sm:$0xff]  }
 0x140   : > { %10433 = vmatpush3.bf16.msra.mxu1 %v11627_v39  ;;  %v11635_v39 = vld [vmem:[#allocation7 + $0xa8] sm:$0xff]  }
 0x141   : > { %10434 = vmatprep.subr.bf16.mxu1 %v11628_v29  ;;  %9573 = vmatpush3.bf16.msra.mxu0 %v11640_v35 }
 0x142   : > { %9574 = vmatprep.subr.bf16.mxu0 %v11642_v11  ;;  %3375 = vmatmul.mubr.bf16.gmra.mrb[56].mxu0 %v12614_v56 }
 0x143   : > { %2756 = vmatmul.mubr.bf16.gmra.mrb[52].mxu1 %v12475_v24  ;;  %3382 = vmatprep.mubr.bf16.mxu0 %v12679_v3  ;;  %v11646_v24 = vld [vmem:[#allocation10 + $0x130] sm:$0xff]  }
 0x144   : > { %2763 = vmatprep.mubr.bf16.mxu1 %v12524_v4  ;;  %10435 = vmatpush3.bf16.msra.mxu1 %v11628_v29  ;;  %v11638_v4 = vld [vmem:[#allocation7 + $0xb0] sm:$0xff]  }
 0x145   : > { %10436 = vmatprep.subr.bf16.mxu1 %v11629_v1  ;;  %9575 = vmatpush3.bf16.msra.mxu0 %v11643_v53  ;;  %v11647_v29 = vld [vmem:[#allocation10 + $0xf0] sm:$0xff]  }
 0x146   : > { %9576 = vmatprep.subr.bf16.mxu0 %v11644_v12 }
 0x148   : > { %10437 = vmatpush3.bf16.msra.mxu1 %v11629_v1  ;;  %v11649_v1 = vld [vmem:[#allocation10 + $0xf8] sm:$0xff]  }
 0x149   : > { %10438 = vmatprep.subr.bf16.mxu1 %v11632_v30  ;;  %9577 = vmatpush3.bf16.msra.mxu0 %v11645_v21 }
 0x14a   : > { %9578 = vmatprep.subr.bf16.mxu0 %v11646_v24  ;;  %3383 = vmatmul.mubr.bf16.gmra.mrb[60].mxu0 %v12675_v54 }
 0x14b   : > { %2764 = vmatmul.mubr.bf16.gmra.mrb[56].mxu1 %v12499_v42  ;;  %3390 = vmatprep.mubr.bf16.mxu0 %v12728_v44  ;;  %v12972_v42 = vld [vmem:[#allocation7 + $0x200] sm:$0xff]  }
 0x14c   : > { %2771 = vmatprep.mubr.bf16.mxu1 %v12578_v49  ;;  %10439 = vmatpush3.bf16.msra.mxu1 %v11632_v30 }
 0x14d   : > { %10440 = vmatprep.subr.bf16.mxu1 %v11635_v39  ;;  %9579 = vmatpush3.bf16.msra.mxu0 %v11647_v29 }
 0x14e   : > { %9580 = vmatprep.subr.bf16.mxu0 %v11648_v23 }
 0x150   : > { %10441 = vmatpush3.bf16.msra.mxu1 %v11635_v39 }
 0x151   : > { %10442 = vmatprep.subr.bf16.mxu1 %v11638_v4  ;;  %9581 = vmatpush3.bf16.msra.mxu0 %v11649_v1 }
 0x152   : > { %3391 = vmatmul.mubr.bf16.gmra.mrb[64].mxu0 %v12718_v20 }
 0x153   : > { %2772 = vmatmul.mubr.bf16.gmra.mrb[60].mxu1 %v12574_v37  ;;  %3398 = vmatprep.mubr.bf16.mxu0 %v12766_v27 }
 0x154   : > { %2779 = vmatprep.mubr.bf16.mxu1 %v12618_v60  ;;  %10443 = vmatpush3.bf16.msra.mxu1 %v11638_v4  ;;  %v11658_v60 = vld [vmem:[#allocation10 + $0x40] sm:$0xff]  }
 0x155   : > { %10444 = vmatprep.subr.bf16.mxu1 %v11641_v55  ;;  %9702 = vmatprep.subr.bf16.mxu0 %v11658_v60 }
 0x158   : > { %10445 = vmatpush3.bf16.msra.mxu1 %v11641_v55 }
 0x159   : > { %10478 = vmatprep.subr.bf16.mxu1 %v12972_v42 }
 0x15a   : > { %3399 = vmatmul.mubr.bf16.gmra.mrb[68].mxu0 %v12749_v32 }
 0x15b   : > { %2780 = vmatmul.mubr.bf16.gmra.mrb[64].mxu1 %v12614_v56  ;;  %3406 = vmatprep.mubr.bf16.mxu0 %v12802_v58 }
 0x15c   : > { %2787 = vmatprep.mubr.bf16.mxu1 %v12679_v3 }
 0x162   : > { %3407 = vmatmul.mubr.bf16.gmra.mrb[72].mxu0 %v12783_v41 }
 0x163   : > { %2788 = vmatmul.mubr.bf16.gmra.mrb[68].mxu1 %v12675_v54  ;;  %3414 = vmatprep.mubr.bf16.mxu0 %v12843_v51 }
 0x164   : > { %2795 = vmatprep.mubr.bf16.mxu1 %v12728_v44 }
 0x16a   : > { %3415 = vmatmul.mubr.bf16.gmra.mrb[76].mxu0 %v12839_v14 }
 0x16b   : > { %2796 = vmatmul.mubr.bf16.gmra.mrb[72].mxu1 %v12718_v20  ;;  %3422 = vmatprep.mubr.bf16.mxu0 %v12872_v6 }
 0x16c   : > { %2803 = vmatprep.mubr.bf16.mxu1 %v12766_v27 }
 0x172   : > { %3423 = vmatmul.mubr.bf16.gmra.mrb[80].mxu0 %v12868_v16 }
 0x173   : > { %2804 = vmatmul.mubr.bf16.gmra.mrb[76].mxu1 %v12749_v32  ;;  %3430 = vmatprep.mubr.bf16.mxu0 %v12896_v31 }
 0x174   : > { %2811 = vmatprep.mubr.bf16.mxu1 %v12802_v58 }
 0x17a   : > { %3431 = vmatmul.mubr.bf16.gmra.mrb[84].mxu0 %v12892_v57 }
 0x17b   : > { %2812 = vmatmul.mubr.bf16.gmra.mrb[80].mxu1 %v12783_v41  ;;  %3438 = vmatprep.mubr.bf16.mxu0 %v12935_v10 }
 0x17c   : > { %2819 = vmatprep.mubr.bf16.mxu1 %v12843_v51 }
 0x181   : > { %v9174_v37 = vpop.f32.mrb[0].mxu0 }
 0x182   : > { %v9175_v56 = vpop.f32.mrb[1].mxu0  ;;  %3439 = vmatmul.mubr.bf16.gmra.mrb[88].mxu0 %v12931_v7 }
 0x183   : > { %v12992_v3 = vadd.f32 %v9175_v56, %v9174_v37  ;;  %v9177_v44 = vpop.f32.mrb[2].mxu0  ;;  %2820 = vmatmul.mubr.bf16.gmra.mrb[84].mxu1 %v12839_v14  ;;  %3446 = vmatprep.mubr.bf16.mxu0 %v12491_v34 }
 0x184   : > { %v9246_v49 = vpop.f32.mrb[0].mxu1  ;;  %v9178_v27 = vpop.f32.mrb[3].mxu0  ;;  %2827 = vmatprep.mubr.bf16.mxu1 %v12872_v6 }
 0x185   : > { %v9247_v54 = vpop.f32.mrb[1].mxu1  ;;  %v12996_v30 = vadd.f32 %v9178_v27, %v9177_v44 }
 0x186   : > { %v12994_v35 = vadd.f32 %v9247_v54, %v9246_v49  ;;  %v9249_v20 = vpop.f32.mrb[2].mxu1 }
 0x187   : > { %v9250_v11 = vpop.f32.mrb[3].mxu1 }
 0x188   : > { %14979 = vst [vmem:[#allocation54_spill] sm:$0xff] %v12994_v35  ;;  %v12999_v32 = vadd.f32 %v9250_v11, %v9249_v20 }
 0x189   : > { %v9180_v53 = vpop.f32.mrb[4].mxu0 }
 0x18a   : > { %14980 = vst [vmem:[#allocation55_spill] sm:$0xff] %v12999_v32  ;;  %v9181_v58 = vpop.f32.mrb[5].mxu0  ;;  %3447 = vmatmul.mubr.bf16.gmra.mrb[92].mxu0 %v12478_v25 }
 0x18b   : > { %v13004_v12 = vadd.f32 %v9181_v58, %v9180_v53  ;;  %v9183_v39 = vpop.f32.mrb[6].mxu0  ;;  %2828 = vmatmul.mubr.bf16.gmra.mrb[88].mxu1 %v12868_v16  ;;  %3454 = vmatprep.mubr.bf16.mxu0 %v12554_v2 }
 0x18c   : > { %v9184_v21 = vpop.f32.mrb[7].mxu0  ;;  %2835 = vmatprep.mubr.bf16.mxu1 %v12896_v31 }
 0x18d   : > { %v13006_v24 = vadd.f32 %v9184_v21, %v9183_v39 }
 0x192   : > { %3455 = vmatmul.mubr.bf16.gmra.mrb[96].mxu0 %v12549_v59 }
 0x193   : > { %v9252_v4 = vpop.f32.mrb[4].mxu1  ;;  %2836 = vmatmul.mubr.bf16.gmra.mrb[92].mxu1 %v12892_v57  ;;  %3462 = vmatprep.mubr.bf16.mxu0 %v12593_v9 }
 0x194   : > { %v9253_v29 = vpop.f32.mrb[5].mxu1  ;;  %2843 = vmatprep.mubr.bf16.mxu1 %v12935_v10 }
 0x195   : > { %v13012_v41 = vadd.f32 %v9253_v29, %v9252_v4  ;;  %v9255_v23 = vpop.f32.mrb[6].mxu1 }
 0x196   : > { %v9256_v51 = vpop.f32.mrb[7].mxu1 }
 0x197   : > { %14981 = vst [vmem:[#allocation56_spill] sm:$0xff] %v13012_v41  ;;  %v13016_v55 = vadd.f32 %v9256_v51, %v9255_v23 }
 0x199   : > { %14982 = vst [vmem:[#allocation57_spill] sm:$0xff] %v13016_v55  ;;  %v9186_v1 = vpop.f32.mrb[8].mxu0 }
 0x19a   : > { %v9187_v14 = vpop.f32.mrb[9].mxu0  ;;  %3463 = vmatmul.mubr.bf16.gmra.mrb[100].mxu0 %v12589_v61 }
 0x19b   : > { %v13020_v37 = vadd.f32 %v9187_v14, %v9186_v1  ;;  %v9189_v6 = vpop.f32.mrb[10].mxu0  ;;  %2844 = vmatmul.mubr.bf16.gmra.mrb[96].mxu1 %v12931_v7  ;;  %3470 = vmatprep.mubr.bf16.mxu0 %v12641_v48 }
 0x19c   : > { %v9190_v49 = vpop.f32.mrb[11].mxu0  ;;  %2851 = vmatprep.mubr.bf16.mxu1 %v12491_v34 }
 0x19d   : > { %v13023_v60 = vadd.f32 %v9190_v49, %v9189_v6  ;;  %v11651_v49 = vld [vmem:[#allocation7 + $0x208] sm:$0xff]  }
 0x19e   : > { %v9258_v56 = vpop.f32.mrb[8].mxu1 }
 0x19f   : > { %v9259_v54 = vpop.f32.mrb[9].mxu1 }
 0x1a0   : > { %v13026_v44 = vadd.f32 %v9259_v54, %v9258_v56  ;;  %v9261_v20 = vpop.f32.mrb[10].mxu1 }
 0x1a1   : > { %v9262_v16 = vpop.f32.mrb[11].mxu1 }
 0x1a2   : > { %14983 = vst [vmem:[#allocation58_spill] sm:$0xff] %v13026_v44  ;;  %v13029_v31 = vadd.f32 %v9262_v16, %v9261_v20  ;;  %3471 = vmatmul.mubr.bf16.gmra.mrb[104].mxu0 %v12637_v47  ;;  %v11660_v47 = vld [vmem:[#allocation10 + $0x48] sm:$0xff]  }
 0x1a3   : > { %2852 = vmatmul.mubr.bf16.gmra.mrb[100].mxu1 %v12478_v25  ;;  %3478 = vmatprep.mubr.bf16.mxu0 %v12952_v40  ;;  %v11661_v20 = vld [vmem:[#allocation10 + $0x8] sm:$0xff]  }
 0x1a4   : > { %14984 = vst [vmem:[#allocation59_spill] sm:$0xff] %v13029_v31  ;;  %2859 = vmatprep.mubr.bf16.mxu1 %v12554_v2  ;;  %v11659_v2 = vld [vmem:[#allocation10] sm:$0xff]   ;;  %v13113_v31 = vld [vmem:[#allocation2 + $0x48] sm:$0xff]  }
 0x1a5   : > { %v9192_v27 = vpop.f32.mrb[12].mxu0 }
 0x1a6   : > { %v9193_v11 = vpop.f32.mrb[13].mxu0 }
 0x1a7   : > { %v13034_v53 = vadd.f32 %v9193_v11, %v9192_v27  ;;  %v9195_v58 = vpop.f32.mrb[14].mxu0  ;;  %v11652_v11 = vld [vmem:[#allocation7 + $0x210] sm:$0xff]  }
 0x1a8   : > { %v9196_v39 = vpop.f32.mrb[15].mxu0 }
 0x1a9   : > { %v13038_v21 = vadd.f32 %v9196_v39, %v9195_v58  ;;  %v11663_v58 = vld [vmem:[#allocation10 + $0x10] sm:$0xff]   ;;  %v11667_v39 = vld [vmem:[#allocation10 + $0x58] sm:$0xff]  }
 0x1aa   : > { %3479 = vmatmul.mubr.bf16.gmra.mrb[108].mxu0 %v12952_v40 }
 0x1ab   : > { %2860 = vmatmul.mubr.bf16.gmra.mrb[104].mxu1 %v12549_v59  ;;  %3991 = vmatprep.mubr.bf16.mxu0 %v12472_v22  ;;  %v13060_v59 = vld [vmem:[#allocation2] sm:$0xff]  }
 0x1ac   : > { %2867 = vmatprep.mubr.bf16.mxu1 %v12593_v9 }
 0x1ad   : > { %v9264_v57 = vpop.f32.mrb[12].mxu1 }
 0x1ae   : > { %v9265_v10 = vpop.f32.mrb[13].mxu1 }
 0x1af   : > { %v13043_v4 = vadd.f32 %v9265_v10, %v9264_v57  ;;  %v9267_v29 = vpop.f32.mrb[14].mxu1  ;;  %v13071_v57 = vld [vmem:[#allocation2 + $0xc] sm:$0xff]   ;;  %v11668_v10 = vld [vmem:[#allocation10 + $0x18] sm:$0xff]  }
 0x1b0   : > { %v9268_v23 = vpop.f32.mrb[15].mxu1 }
 0x1b1   : > { %14985 = vst [vmem:[#allocation60_spill] sm:$0xff] %v13043_v4  ;;  %v13046_v7 = vadd.f32 %v9268_v23, %v9267_v29  ;;  %v14987_v29 = vld [vmem:[#allocation31_spill] sm:$0xff]  ;;  %v13097_v4 = vld [vmem:[#allocation2 + $0x30] sm:$0xff]  }
 0x1b2   : > { %3992 = vmatmul.mubr.bf16.vlgmr.msra.gmra.mrb[112].mxu0 %v13060_v59  ;;  %14995 = vst [vmem:[#allocation31_spill] sm:$0xff] %v13113_v31 }
 0x1b3   : > { %14986 = vst [vmem:[#allocation61_spill] sm:$0xff] %v13046_v7  ;;  %2868 = vmatmul.mubr.bf16.gmra.mrb[108].mxu1 %v12589_v61  ;;  %3999 = vmatprep.mubr.bf16.mxu0 %v12517_v62  ;;  %v11662_v61 = vld [vmem:[#allocation10 + $0x50] sm:$0xff]  }
 0x1b4   : > { %10446 = vmatprep.mubr.bf16.mxu1 %v12952_v40  ;;  %9703 = vmatpush3.bf16.msra.mxu0 %v11659_v2 }
 0x1b5   : > { %9704 = vmatprep.subr.bf16.mxu0 %v11660_v47  ;;  %v11674_v47 = vld [vmem:[#allocation10 + $0x68] sm:$0xff]  }
 0x1b6   : > { %v9198_v34 = vpop.f32.mrb[16].mxu0 }
 0x1b7   : > { %v9199_v48 = vpop.f32.mrb[17].mxu0 }
 0x1b8   : > { %v13052_v51 = vadd.f32 %v9199_v48, %v9198_v34  ;;  %v9201_v25 = vpop.f32.mrb[18].mxu0  ;;  %9705 = vmatpush3.bf16.msra.mxu0 %v11661_v20  ;;  %v11654_v34 = vld [vmem:[#allocation7 + $0x220] sm:$0xff]   ;;  %v11655_v20 = vld [vmem:[#allocation7 + $0x228] sm:$0xff]  }
 0x1b9   : > { %v9202_v1 = vpop.f32.mrb[19].mxu0  ;;  %9706 = vmatprep.subr.bf16.mxu0 %v11662_v61  ;;  %v11677_v61 = vld [vmem:[#allocation10 + $0x70] sm:$0xff]  }
 0x1ba   : > { %v13054_v14 = vadd.f32 %v9202_v1, %v9201_v25  ;;  %4000 = vmatmul.mubr.bf16.gmra.mrb[116].mxu0 %v13071_v57  ;;  %v11672_v25 = vld [vmem:[#allocation10 + $0x20] sm:$0xff]  }
 0x1bb   : > { %10447 = vmatmul.mubr.bf16.vlgmr.msra.gmra.mrb[16].mxu1 %v12645_v52  ;;  %4007 = vmatprep.mubr.bf16.mxu0 %v12571_v45  ;;  %v11653_v52 = vld [vmem:[#allocation7 + $0x218] sm:$0xff]  }
 0x1bc   : > { %10479 = vmatpush3.bf16.msra.mxu1 %v12972_v42  ;;  %10450 = vmatprep.mubr.bf16.mxu1 %v12669_v50  ;;  %v11671_v42 = vld [vmem:[#allocation10 + $0x60] sm:$0xff]  }
 0x1bd   : > { %10480 = vmatprep.subr.bf16.mxu1 %v11651_v49  ;;  %9707 = vmatpush3.bf16.msra.mxu0 %v11663_v58  ;;  %v14990_v58 = vld [vmem:[#allocation36_spill] sm:$0xff] }
 0x1be   : > { %9708 = vmatprep.subr.bf16.mxu0 %v11667_v39  ;;  %v11656_v39 = vld [vmem:[#allocation7 + $0x230] sm:$0xff]  }
 0x1bf   : > { %v9204_v9 = vpop.f32.mrb[20].mxu0 }
 0x1c0   : > { %v9205_v6 = vpop.f32.mrb[21].mxu0  ;;  %10481 = vmatpush3.bf16.msra.mxu1 %v11651_v49  ;;  %v14988_v49 = vld [vmem:[#allocation24_spill] sm:$0xff] }
 0x1c1   : > { %v13064_v56 = vadd.f32 %v9205_v6, %v9204_v9  ;;  %v9207_v54 = vpop.f32.mrb[22].mxu0  ;;  %10482 = vmatprep.subr.bf16.mxu1 %v11652_v11  ;;  %9709 = vmatpush3.bf16.msra.mxu0 %v11668_v10  ;;  %v13079_v9 = vld [vmem:[#allocation2 + $0x18] sm:$0xff]   ;;  %v11678_v10 = vld [vmem:[#allocation10 + $0x30] sm:$0xff]  }
 0x1c2   : > { %v9208_v16 = vpop.f32.mrb[23].mxu0  ;;  %9710 = vmatprep.subr.bf16.mxu0 %v11671_v42  ;;  %4008 = vmatmul.mubr.bf16.gmra.mrb[120].mxu0 %v13079_v9  ;;  %v11680_v42 = vld [vmem:[#allocation10 + $0x78] sm:$0xff]  }
 0x1c3   : > { %v13067_v27 = vadd.f32 %v9208_v16, %v9207_v54  ;;  %10451 = vmatmul.mubr.bf16.gmra.mrb[20].mxu1 %v12683_v18  ;;  %4015 = vmatprep.mubr.bf16.mxu0 %v14988_v49  ;;  %v11675_v16 = vld [vmem:[#allocation10 + $0x28] sm:$0xff]  }
 0x1c4   : > { %10454 = vmatprep.mubr.bf16.mxu1 %v14987_v29  ;;  %10483 = vmatpush3.bf16.msra.mxu1 %v11652_v11  ;;  %v14989_v11 = vld [vmem:[#allocation33_spill] sm:$0xff] }
 0x1c5   : > { %10484 = vmatprep.subr.bf16.mxu1 %v11653_v52  ;;  %9711 = vmatpush3.bf16.msra.mxu0 %v11672_v25  ;;  %v11657_v25 = vld [vmem:[#allocation7 + $0x238] sm:$0xff]  }
 0x1c6   : > { %9712 = vmatprep.subr.bf16.mxu0 %v11674_v47  ;;  %v11681_v47 = vld [vmem:[#allocation10 + $0x38] sm:$0xff]  }
 0x1c8   : > { %10485 = vmatpush3.bf16.msra.mxu1 %v11653_v52  ;;  %v13087_v52 = vld [vmem:[#allocation2 + $0x24] sm:$0xff]  }
 0x1c9   : > { %10486 = vmatprep.subr.bf16.mxu1 %v11654_v34  ;;  %9713 = vmatpush3.bf16.msra.mxu0 %v11675_v16  ;;  %v14992_v16 = vld [vmem:[#allocation39_spill] sm:$0xff] }
 0x1ca   : > { %9714 = vmatprep.subr.bf16.mxu0 %v11677_v61  ;;  %4016 = vmatmul.mubr.bf16.gmra.mrb[124].mxu0 %v13087_v52 }
 0x1cb   : > { %v9210_v23 = vpop.f32.mrb[24].mxu0  ;;  %10455 = vmatmul.mubr.bf16.gmra.mrb[24].mxu1 %v14989_v11 }
 0x1cc   : > { %v9211_v48 = vpop.f32.mrb[25].mxu0  ;;  %10458 = vmatprep.mubr.bf16.mxu1 %v14990_v58  ;;  %10487 = vmatpush3.bf16.msra.mxu1 %v11654_v34 }
 0x1cd   : > { %v13077_v1 = vadd.f32 %v9211_v48, %v9210_v23  ;;  %v9213_v2 = vpop.f32.mrb[26].mxu0  ;;  %10488 = vmatprep.subr.bf16.mxu1 %v11655_v20  ;;  %v14991_v23 = vld [vmem:[#allocation29_spill] sm:$0xff]  ;;  %9715 = vmatpush3.bf16.msra.mxu0 %v11678_v10  ;;  %v14993_v10 = vld [vmem:[#allocation34_spill] sm:$0xff] }
 0x1ce   : > { %v9214_v6 = vpop.f32.mrb[27].mxu0  ;;  %4023 = vmatprep.mubr.bf16.mxu0 %v14991_v23  ;;  %9716 = vmatprep.subr.bf16.mxu0 %v11680_v42  ;;  %v13103_v42 = vld [vmem:[#allocation2 + $0x3c] sm:$0xff]  }
 0x1cf   : > { %v13083_v54 = vadd.f32 %v9214_v6, %v9213_v2 }
 0x1d0   : > { %10489 = vmatpush3.bf16.msra.mxu1 %v11655_v20  ;;  %v11664_v20 = vld [vmem:[#allocation10 + $0x140] sm:$0xff]  }
 0x1d1   : > { %10490 = vmatprep.subr.bf16.mxu1 %v11656_v39  ;;  %9717 = vmatpush3.bf16.msra.mxu0 %v11681_v47 }
 0x1d2   : > { %4024 = vmatmul.mubr.bf16.gmra.mrb[128].mxu0 %v13097_v4 }
 0x1d3   : > { %10459 = vmatmul.mubr.bf16.gmra.mrb[28].mxu1 %v14992_v16  ;;  %4031 = vmatprep.mubr.bf16.mxu0 %v14993_v10 }
 0x1d4   : > { %10462 = vmatprep.mubr.bf16.mxu1 %v12794_v5  ;;  %10491 = vmatpush3.bf16.msra.mxu1 %v11656_v39  ;;  %v14994_v39 = vld [vmem:[#allocation37_spill] sm:$0xff] }
 0x1d5   : > { %10492 = vmatprep.subr.bf16.mxu1 %v11657_v25 }
 0x1d8   : > { %v9216_v48 = vpop.f32.mrb[28].mxu0  ;;  %10493 = vmatpush3.bf16.msra.mxu1 %v11657_v25 }
 0x1d9   : > { %v9217_v2 = vpop.f32.mrb[29].mxu0  ;;  %10526 = vmatprep.subr.bf16.mxu1 %v11664_v20 }
 0x1da   : > { %v13091_v34 = vadd.f32 %v9217_v2, %v9216_v48  ;;  %v9219_v6 = vpop.f32.mrb[30].mxu0  ;;  %4032 = vmatmul.mubr.bf16.gmra.mrb[132].mxu0 %v13103_v42 }
 0x1db   : > { %v9220_v61 = vpop.f32.mrb[31].mxu0  ;;  %10463 = vmatmul.mubr.bf16.gmra.mrb[32].mxu1 %v12847_v8  ;;  %4039 = vmatprep.mubr.bf16.mxu0 %v14994_v39 }
 0x1dc   : > { %v13095_v7 = vadd.f32 %v9220_v61, %v9219_v6  ;;  %10466 = vmatprep.mubr.bf16.mxu1 %v12859_v0 }
 0x1e2   : > { %4040 = vmatmul.mubr.bf16.gmra.mrb[136].mxu0 %v13113_v31 }
 0x1e3   : > { %10467 = vmatmul.mubr.bf16.gmra.mrb[36].mxu1 %v12885_v15  ;;  %4047 = vmatprep.mubr.bf16.mxu0 %v12790_v36 }
 0x1e4   : > { %10470 = vmatprep.mubr.bf16.mxu1 %v12912_v38 }
 0x1e5   : > { %v9222_v48 = vpop.f32.mrb[32].mxu0 }
 0x1e6   : > { %v9223_v2 = vpop.f32.mrb[33].mxu0 }
 0x1e7   : > { %v13107_v47 = vadd.f32 %v9223_v2, %v9222_v48  ;;  %v9225_v6 = vpop.f32.mrb[34].mxu0 }
 0x1e8   : > { %v9226_v61 = vpop.f32.mrb[35].mxu0 }
 0x1e9   : > { %v13111_v25 = vadd.f32 %v9226_v61, %v9225_v6  ;;  %v13123_v6 = vld [vmem:[#allocation2 + $0x54] sm:$0xff]   ;;  %v14997_v61 = vld [vmem:[#allocation42_spill] sm:$0xff] }
 0x1ea   : > { %14996 = vst [vmem:[#allocation24_spill] sm:$0xff] %v13123_v6  ;;  %4048 = vmatmul.mubr.bf16.gmra.mrb[140].mxu0 %v13123_v6  ;;  %v14999_v6 = vld [vmem:[#allocation45_spill] sm:$0xff] }
 0x1eb   : > { %10471 = vmatmul.mubr.bf16.gmra.mrb[40].mxu1 %v12907_v46  ;;  %4055 = vmatprep.mubr.bf16.mxu0 %v14997_v61  ;;  %v11665_v61 = vld [vmem:[#allocation10 + $0x148] sm:$0xff]  }
 0x1ec   : > { %10474 = vmatprep.mubr.bf16.mxu1 %v12921_v17 }
 0x1ed   : > { %v9228_v44 = vpop.f32.mrb[36].mxu0 }
 0x1ee   : > { %v9229_v55 = vpop.f32.mrb[37].mxu0 }
 0x1ef   : > { %v13117_v41 = vadd.f32 %v9229_v55, %v9228_v44  ;;  %v9231_v48 = vpop.f32.mrb[38].mxu0  ;;  %v11689_v44 = vld [vmem:[#allocation9 + $0x100] sm:$0xff]  }
 0x1f0   : > { %v9232_v2 = vpop.f32.mrb[39].mxu0  ;;  %9974 = vmatprep.subr.bf16.mxu0 %v11689_v44 }
 0x1f1   : > { %v13121_v32 = vadd.f32 %v9232_v2, %v9231_v48  ;;  %v13131_v48 = vld [vmem:[#allocation2 + $0x60] sm:$0xff]  }
 0x1f2   : > { %14998 = vst [vmem:[#allocation33_spill] sm:$0xff] %v13131_v48  ;;  %4056 = vmatmul.mubr.bf16.gmra.mrb[144].mxu0 %v13131_v48 }
 0x1f3   : > { %10475 = vmatmul.mubr.bf16.gmra.mrb[44].mxu1 %v12939_v33  ;;  %4063 = vmatprep.mubr.bf16.mxu0 %v14999_v6  ;;  %v11670_v6 = vld [vmem:[#allocation10 + $0x160] sm:$0xff]  }
 0x1f4   : > { %10494 = vmatprep.mubr.bf16.mxu1 %v12669_v50  ;;  %v11666_v50 = vld [vmem:[#allocation10 + $0x150] sm:$0xff]  }
 0x1f5   : > { %v9234_v13 = vpop.f32.mrb[40].mxu0 }
 0x1f6   : > { %v9235_v55 = vpop.f32.mrb[41].mxu0 }
 0x1f7   : > { %v13129_v35 = vadd.f32 %v9235_v55, %v9234_v13  ;;  %v9237_v36 = vpop.f32.mrb[42].mxu0  ;;  %v13139_v13 = vld [vmem:[#allocation2 + $0x6c] sm:$0xff]  }
 0x1f8   : > { %v9238_v31 = vpop.f32.mrb[43].mxu0  ;;  %15000 = vst [vmem:[#allocation36_spill] sm:$0xff] %v13139_v13  ;;  %v15001_v55 = vld [vmem:[#allocation47_spill] sm:$0xff] }
 0x1f9   : > { %v13134_v2 = vadd.f32 %v9238_v31, %v9237_v36  ;;  %v11669_v36 = vld [vmem:[#allocation10 + $0x158] sm:$0xff]  }
 0x1fa   : > { %4064 = vmatmul.mubr.bf16.gmra.mrb[148].mxu0 %v13139_v13  ;;  %v13149_v13 = vld [vmem:[#allocation2 + $0x78] sm:$0xff]  }
 0x1fb   : > { %10495 = vmatmul.mubr.bf16.vlgmr.msra.gmra.mrb[16].mxu1 %v12683_v18  ;;  %4071 = vmatprep.mubr.bf16.mxu0 %v15001_v55  ;;  %15004 = vst [vmem:[#allocation34_spill] sm:$0xff] %v13149_v13 }
 0x1fc   : > { %10498 = vmatprep.mubr.bf16.mxu1 %v14987_v29  ;;  %10527 = vmatpush3.bf16.msra.mxu1 %v11664_v20 }
 0x1fd   : > { %10528 = vmatprep.subr.bf16.mxu1 %v11665_v61  ;;  %v9240_v31 = vpop.f32.mrb[44].mxu0 }
 0x1fe   : > { %v9241_v44 = vpop.f32.mrb[45].mxu0 }
 0x1ff   : > { %v13145_v18 = vadd.f32 %v9241_v44, %v9240_v31  ;;  %v9243_v29 = vpop.f32.mrb[46].mxu0 }
 0x200   : > { %10529 = vmatpush3.bf16.msra.mxu1 %v11665_v61  ;;  %v9244_v20 = vpop.f32.mrb[47].mxu0 }
 0x201   : > { %10530 = vmatprep.subr.bf16.mxu1 %v11666_v50  ;;  %15002 = vst [vmem:[#allocation29_spill] sm:$0xff] %v13145_v18  ;;  %v13147_v48 = vadd.f32 %v9244_v20, %v9243_v29  ;;  %v11676_v29 = vld [vmem:[#allocation10 + $0x170] sm:$0xff]  }
 0x202   : > { %4072 = vmatmul.mubr.bf16.gmra.mrb[152].mxu0 %v13149_v13 }
 0x203   : > { %10499 = vmatmul.mubr.bf16.gmra.mrb[20].mxu1 %v14989_v11  ;;  %15003 = vst [vmem:[#allocation39_spill] sm:$0xff] %v13147_v48  ;;  %4079 = vmatprep.mubr.bf16.mxu0 %v12925_v63  ;;  %v11673_v11 = vld [vmem:[#allocation10 + $0x168] sm:$0xff]   ;;  %v15005_v48 = vld [vmem:[#allocation21_spill] sm:$0xff] }
 0x204   : > { %10502 = vmatprep.mubr.bf16.mxu1 %v14990_v58  ;;  %10531 = vmatpush3.bf16.msra.mxu1 %v11666_v50 }
 0x205   : > { %10532 = vmatprep.subr.bf16.mxu1 %v11669_v36  ;;  %v9446_v61 = vpop.f32.mrb[48].mxu0 }
 0x206   : > { %v9447_v58 = vpop.f32.mrb[49].mxu0 }
 0x207   : > { %v9448_v31 = vadd.f32 %v9447_v58, %v9446_v61  ;;  %v9449_v50 = vpop.f32.mrb[50].mxu0  ;;  %v11679_v61 = vld [vmem:[#allocation10 + $0x178] sm:$0xff]  }
 0x208   : > { %10533 = vmatpush3.bf16.msra.mxu1 %v11669_v36  ;;  %v9450_v44 = vpop.f32.mrb[51].mxu0 }
 0x209   : > { %10534 = vmatprep.subr.bf16.mxu1 %v11670_v6  ;;  %v9451_v55 = vadd.f32 %v9450_v44, %v9449_v50 }
 0x20a   : > { %4080 = vmatmul.mubr.bf16.gmra.mrb[156].mxu0 %v13155_v19 }
 0x20b   : > { %10503 = vmatmul.mubr.bf16.gmra.mrb[24].mxu1 %v14992_v16  ;;  %4087 = vmatprep.mubr.bf16.mxu0 %v15005_v48 }
 0x20c   : > { %10506 = vmatprep.mubr.bf16.mxu1 %v12794_v5  ;;  %10535 = vmatpush3.bf16.msra.mxu1 %v11670_v6 }
 0x20d   : > { %10536 = vmatprep.subr.bf16.mxu1 %v11673_v11  ;;  %v9452_v58 = vpop.f32.mrb[52].mxu0 }
 0x20e   : > { %v9310_v20 = vpop.f32.mrb[48].mxu1  ;;  %v9453_v50 = vpop.f32.mrb[53].mxu0 }
 0x20f   : > { %v9311_v13 = vpop.f32.mrb[49].mxu1  ;;  %v9454_v43 = vadd.f32 %v9453_v50, %v9452_v58  ;;  %v9455_v18 = vpop.f32.mrb[54].mxu0 }
 0x210   : > { %v9312_v36 = vadd.f32 %v9311_v13, %v9310_v20  ;;  %v9313_v63 = vpop.f32.mrb[50].mxu1  ;;  %10537 = vmatpush3.bf16.msra.mxu1 %v11673_v11  ;;  %v9456_v11 = vpop.f32.mrb[55].mxu0  ;;  %v13165_v20 = vld [vmem:[#allocation10 + $0x80] sm:$0xff]  }
 0x211   : > { %v9314_v16 = vpop.f32.mrb[51].mxu1  ;;  %10538 = vmatprep.subr.bf16.mxu1 %v11676_v29 }
 0x212   : > { %v10833_v5 = vadd.f32 %v9312_v36, %v12992_v3  ;;  %v9315_v6 = vadd.f32 %v9314_v16, %v9313_v63  ;;  %v9457_v3 = vadd.f32 %v9456_v11, %v9455_v18 }
 0x213   : > { %10507 = vmatmul.mubr.bf16.gmra.mrb[28].mxu1 %v12847_v8  ;;  %v13169_v8 = vld [vmem:[#allocation2 + $0x90] sm:$0xff]  }
 0x214   : > { %v10839_v44 = vadd.f32 %v9315_v6, %v12996_v30  ;;  %10510 = vmatprep.mubr.bf16.mxu1 %v12859_v0  ;;  %10539 = vmatpush3.bf16.msra.mxu1 %v11676_v29  ;;  %v13163_v13 = vadd.f32 %v10833_v5, %v9448_v31  ;;  %v15007_v6 = vld [vmem:[#allocation22_spill] sm:$0xff] }
 0x215   : > { %10540 = vmatprep.subr.bf16.mxu1 %v11679_v61  ;;  %4088 = vmatmul.mubr.bf16.gmra.mrb[160].mxu0 %v13169_v8  ;;  %v9458_v5 = vpop.f32.mrb[56].mxu0 }
 0x216   : > { %v9316_v48 = vpop.f32.mrb[52].mxu1  ;;  %v13167_v63 = vadd.f32 %v10839_v44, %v9451_v55  ;;  %4095 = vmatprep.mubr.bf16.mxu0 %v15007_v6  ;;  %v9459_v55 = vpop.f32.mrb[57].mxu0 }
 0x217   : > { %v9317_v36 = vpop.f32.mrb[53].mxu1  ;;  %v9460_v58 = vadd.f32 %v9459_v55, %v9458_v5  ;;  %v9461_v50 = vpop.f32.mrb[58].mxu0 }
 0x218   : > { %15006 = vst [vmem:[#allocation37_spill] sm:$0xff] %v13167_v63  ;;  %v9318_v30 = vadd.f32 %v9317_v36, %v9316_v48  ;;  %v9319_v16 = vpop.f32.mrb[54].mxu1  ;;  %10541 = vmatpush3.bf16.msra.mxu1 %v11679_v61  ;;  %v9462_v44 = vpop.f32.mrb[59].mxu0 }
 0x219   : > { %v9320_v0 = vpop.f32.mrb[55].mxu1  ;;  %10574 = vmatprep.subr.bf16.mxu1 %v13165_v20  ;;  %v9463_v11 = vadd.f32 %v9462_v44, %v9461_v50 }
 0x21a   : > { %v10830_v31 = vadd.f32 %v9318_v30, %v13004_v12  ;;  %v9321_v29 = vadd.f32 %v9320_v0, %v9319_v16  ;;  %v13182_v12 = vld [vmem:[#allocation2 + $0x9c] sm:$0xff]   ;;  %v15008_v16 = vld [vmem:[#allocation23_spill] sm:$0xff] }
 0x21b   : > { %10511 = vmatmul.mubr.bf16.gmra.mrb[32].mxu1 %v12885_v15 }
 0x21c   : > { %v10836_v18 = vadd.f32 %v9321_v29, %v13006_v24  ;;  %10514 = vmatprep.mubr.bf16.mxu1 %v12912_v38  ;;  %v13178_v48 = vadd.f32 %v10830_v31, %v9454_v43 }
 0x21d   : > { %4096 = vmatmul.mubr.bf16.gmra.mrb[164].mxu0 %v13182_v12  ;;  %v9464_v43 = vpop.f32.mrb[60].mxu0 }
 0x21e   : > { %v9322_v61 = vpop.f32.mrb[56].mxu1  ;;  %v13180_v36 = vadd.f32 %v10836_v18, %v9457_v3  ;;  %4103 = vmatprep.mubr.bf16.mxu0 %v15008_v16  ;;  %v9465_v31 = vpop.f32.mrb[61].mxu0 }
 0x21f   : > { %v9323_v63 = vpop.f32.mrb[57].mxu1  ;;  %v9466_v29 = vadd.f32 %v9465_v31, %v9464_v43  ;;  %v9467_v5 = vpop.f32.mrb[62].mxu0 }
 0x220   : > { %v9324_v15 = vadd.f32 %v9323_v63, %v9322_v61  ;;  %v9325_v30 = vpop.f32.mrb[58].mxu1  ;;  %v9468_v63 = vpop.f32.mrb[63].mxu0 }
 0x221   : > { %v9326_v24 = vpop.f32.mrb[59].mxu1  ;;  %v9469_v50 = vadd.f32 %v9468_v63, %v9467_v5 }
 0x222   : > { %v10845_v0 = vadd.f32 %v9324_v15, %v13020_v37  ;;  %v9327_v38 = vadd.f32 %v9326_v24, %v9325_v30  ;;  %v13194_v37 = vld [vmem:[#allocation2 + $0xa8] sm:$0xff]   ;;  %v15009_v30 = vld [vmem:[#allocation26_spill] sm:$0xff] }
 0x223   : > { %10515 = vmatmul.mubr.bf16.gmra.mrb[36].mxu1 %v12907_v46 }
 0x224   : > { %v10851_v3 = vadd.f32 %v9327_v38, %v13023_v60  ;;  %10518 = vmatprep.mubr.bf16.mxu1 %v12921_v17  ;;  %v13190_v55 = vadd.f32 %v10845_v0, %v9460_v58 }
 0x225   : > { %4104 = vmatmul.mubr.bf16.gmra.mrb[168].mxu0 %v13194_v37  ;;  %v9470_v58 = vpop.f32.mrb[64].mxu0 }
 0x226   : > { %v9328_v18 = vpop.f32.mrb[60].mxu1  ;;  %v13192_v44 = vadd.f32 %v10851_v3, %v9463_v11  ;;  %4111 = vmatprep.mubr.bf16.mxu0 %v15009_v30  ;;  %v9471_v0 = vpop.f32.mrb[65].mxu0  ;;  %v11686_v30 = vld [vmem:[#allocation10 + $0xa0] sm:$0xff]  }
 0x227   : > { %v9329_v61 = vpop.f32.mrb[61].mxu1  ;;  %v9472_v38 = vadd.f32 %v9471_v0, %v9470_v58  ;;  %v9473_v43 = vpop.f32.mrb[66].mxu0  ;;  %v15010_v58 = vld [vmem:[#allocation25_spill] sm:$0xff]  ;;  %v11690_v0 = vld [vmem:[#allocation9 + $0xc0] sm:$0xff]  }
 0x228   : > { %v9330_v46 = vadd.f32 %v9329_v61, %v9328_v18  ;;  %v9331_v15 = vpop.f32.mrb[62].mxu1  ;;  %v9474_v3 = vpop.f32.mrb[67].mxu0 }
 0x229   : > { %v9332_v60 = vpop.f32.mrb[63].mxu1  ;;  %v9475_v63 = vadd.f32 %v9474_v3, %v9473_v43  ;;  %v11692_v3 = vld [vmem:[#allocation9 + $0x108] sm:$0xff]  }
 0x22a   : > { %v10842_v24 = vadd.f32 %v9330_v46, %v13034_v53  ;;  %v9333_v17 = vadd.f32 %v9332_v60, %v9331_v15  ;;  %v11881_v53 = vld [vmem:[#allocation2 + $0xb4] sm:$0xff]  }
 0x22b   : > { %10519 = vmatmul.mubr.bf16.gmra.mrb[40].mxu1 %v12939_v33 }
 0x22c   : > { %v10848_v11 = vadd.f32 %v9333_v17, %v13038_v21  ;;  %10522 = vmatprep.mubr.bf16.mxu1 %v12949_v28  ;;  %v13202_v31 = vadd.f32 %v10842_v24, %v9466_v29 }
 0x22d   : > { %4112 = vmatmul.mubr.bf16.gmra.mrb[172].mxu0 %v11881_v53  ;;  %v9476_v17 = vpop.f32.mrb[68].mxu0 }
 0x22e   : > { %v9334_v5 = vpop.f32.mrb[64].mxu1  ;;  %v13204_v18 = vadd.f32 %v10848_v11, %v9469_v50  ;;  %4457 = vmatprep.mubr.bf16.mxu0 %v14957_v26  ;;  %v9477_v28 = vpop.f32.mrb[69].mxu0 }
 0x22f   : > { %v9335_v61 = vpop.f32.mrb[65].mxu1  ;;  %v9478_v24 = vadd.f32 %v9477_v28, %v9476_v17  ;;  %v9479_v50 = vpop.f32.mrb[70].mxu0  ;;  %v11694_v17 = vld [vmem:[#allocation9 + $0x110] sm:$0xff]   ;;  %v15012_v28 = vld [vmem:[#allocation27_spill] sm:$0xff] }
 0x230   : > { %v9336_v46 = vadd.f32 %v9335_v61, %v9334_v5  ;;  %v9337_v15 = vpop.f32.mrb[66].mxu1  ;;  %v9480_v43 = vpop.f32.mrb[71].mxu0 }
 0x231   : > { %v9338_v33 = vpop.f32.mrb[67].mxu1  ;;  %v9481_v61 = vadd.f32 %v9480_v43, %v9479_v50 }
 0x232   : > { %v10857_v21 = vadd.f32 %v9336_v46, %v13052_v51  ;;  %v9339_v60 = vadd.f32 %v9338_v33, %v9337_v15  ;;  %v11683_v15 = vld [vmem:[#allocation10 + $0x88] sm:$0xff]  }
 0x233   : > { %10523 = vmatmul.mubr.bf16.gmra.mrb[44].mxu1 %v12952_v40  ;;  %v11693_v33 = vld [vmem:[#allocation9 + $0xc8] sm:$0xff]  }
 0x234   : > { %v10863_v29 = vadd.f32 %v9339_v60, %v13054_v14  ;;  %10542 = vmatprep.mubr.bf16.mxu1 %v15010_v58  ;;  %v13211_v11 = vadd.f32 %v10857_v21, %v9472_v38 }
 0x235   : > { %4458 = vmatmul.mubr.bf16.vlgmr.msra.gmra.mrb[176].mxu0 %v14957_v26  ;;  %v9482_v60 = vpop.f32.mrb[72].mxu0 }
 0x236   : > { %v9340_v5 = vpop.f32.mrb[68].mxu1  ;;  %v13213_v53 = vadd.f32 %v10863_v29, %v9475_v63  ;;  %4465 = vmatprep.mubr.bf16.mxu0 %v12472_v22  ;;  %9975 = vmatpush3.bf16.msra.mxu0 %v11690_v0  ;;  %v9483_v63 = vpop.f32.mrb[73].mxu0 }
 0x237   : > { %v9341_v51 = vpop.f32.mrb[69].mxu1  ;;  %9976 = vmatprep.subr.bf16.mxu0 %v11692_v3  ;;  %v9484_v50 = vadd.f32 %v9483_v63, %v9482_v60  ;;  %v9485_v43 = vpop.f32.mrb[74].mxu0  ;;  %v11684_v3 = vld [vmem:[#allocation10 + $0x90] sm:$0xff]  }
 0x238   : > { %15011 = vst [vmem:[#allocation22_spill] sm:$0xff] %v13213_v53  ;;  %v9342_v40 = vadd.f32 %v9341_v51, %v9340_v5  ;;  %v9343_v46 = vpop.f32.mrb[70].mxu1  ;;  %v15013_v5 = vld [vmem:[#allocation28_spill] sm:$0xff]  ;;  %v9486_v0 = vpop.f32.mrb[75].mxu0 }
 0x239   : > { %v9344_v14 = vpop.f32.mrb[71].mxu1 }
 0x23a   : > { %v10854_v38 = vadd.f32 %v9342_v40, %v13064_v56  ;;  %v9345_v21 = vadd.f32 %v9344_v14, %v9343_v46  ;;  %9977 = vmatpush3.bf16.msra.mxu0 %v11693_v33  ;;  %v11695_v56 = vld [vmem:[#allocation9 + $0xd0] sm:$0xff]   ;;  %v9487_v40 = vadd.f32 %v9486_v0, %v9485_v43  ;;  %v11701_v46 = vld [vmem:[#allocation9 + $0x118] sm:$0xff]  }
 0x23b   : > { %10543 = vmatmul.mubr.bf16.vlgmr.msra.gmra.mrb[112].mxu1 %v15012_v28  ;;  %9978 = vmatprep.subr.bf16.mxu0 %v11694_v17  ;;  %v11703_v33 = vld [vmem:[#allocation9 + $0xd8] sm:$0xff]  }
 0x23c   : > { %v10860_v29 = vadd.f32 %v9345_v21, %v13067_v27  ;;  %10546 = vmatprep.mubr.bf16.mxu1 %v15013_v5  ;;  %10575 = vmatpush3.bf16.msra.mxu1 %v13165_v20  ;;  %v13222_v22 = vadd.f32 %v10854_v38, %v9478_v24  ;;  %v11685_v24 = vld [vmem:[#allocation10 + $0x98] sm:$0xff]  }
 0x23d   : > { %10576 = vmatprep.subr.bf16.mxu1 %v11683_v15  ;;  %4466 = vmatmul.mubr.bf16.gmra.mrb[180].mxu0 %v13060_v59  ;;  %v9488_v17 = vpop.f32.mrb[76].mxu0 }
 0x23e   : > { %v9346_v51 = vpop.f32.mrb[72].mxu1  ;;  %v13224_v14 = vadd.f32 %v10860_v29, %v9481_v61  ;;  %4473 = vmatprep.mubr.bf16.mxu0 %v12517_v62  ;;  %9979 = vmatpush3.bf16.msra.mxu0 %v11695_v56  ;;  %v11711_v61 = vld [vmem:[#allocation9 + $0x120] sm:$0xff]   ;;  %v9489_v43 = vpop.f32.mrb[77].mxu0 }
 0x23f   : > { %v9347_v27 = vpop.f32.mrb[73].mxu1  ;;  %9980 = vmatprep.subr.bf16.mxu0 %v11701_v46  ;;  %v15014_v29 = vld [vmem:[#allocation30_spill] sm:$0xff]  ;;  %v9490_v0 = vadd.f32 %v9489_v43, %v9488_v17 }
 0x240   : > { %v9348_v21 = vadd.f32 %v9347_v27, %v9346_v51  ;;  %v9349_v60 = vpop.f32.mrb[74].mxu1  ;;  %10577 = vmatpush3.bf16.msra.mxu1 %v11683_v15  ;;  %v9491_v51 = vpop.f32.mrb[78].mxu0  ;;  %v15015_v27 = vld [vmem:[#allocation32_spill] sm:$0xff] }
 0x241   : > { %v9350_v20 = vpop.f32.mrb[75].mxu1  ;;  %10578 = vmatprep.subr.bf16.mxu1 %v11684_v3  ;;  %v9492_v56 = vpop.f32.mrb[79].mxu0 }
 0x242   : > { %v10869_v38 = vadd.f32 %v9348_v21, %v13077_v1  ;;  %v9351_v63 = vadd.f32 %v9350_v20, %v9349_v60  ;;  %9981 = vmatpush3.bf16.msra.mxu0 %v11703_v33  ;;  %v11713_v1 = vld [vmem:[#allocation9 + $0xe0] sm:$0xff]   ;;  %v9493_v46 = vadd.f32 %v9492_v56, %v9491_v51  ;;  %v11716_v60 = vld [vmem:[#allocation9 + $0x128] sm:$0xff]  }
 0x243   : > { %10547 = vmatmul.mubr.bf16.gmra.mrb[116].mxu1 %v15014_v29  ;;  %9982 = vmatprep.subr.bf16.mxu0 %v11711_v61  ;;  %v11717_v33 = vld [vmem:[#allocation9 + $0xe8] sm:$0xff]   ;;  %v15017_v51 = vld [vmem:[#allocation38_spill] sm:$0xff] }
 0x244   : > { %v10875_v59 = vadd.f32 %v9351_v63, %v13083_v54  ;;  %10550 = vmatprep.mubr.bf16.mxu1 %v15015_v27  ;;  %10579 = vmatpush3.bf16.msra.mxu1 %v11684_v3  ;;  %v13232_v15 = vadd.f32 %v10869_v38, %v9484_v50  ;;  %v11687_v3 = vld [vmem:[#allocation10 + $0xa8] sm:$0xff]  }
 0x245   : > { %10580 = vmatprep.subr.bf16.mxu1 %v11685_v24  ;;  %4474 = vmatmul.mubr.bf16.gmra.mrb[184].mxu0 %v13071_v57  ;;  %v9494_v61 = vpop.f32.mrb[80].mxu0 }
 0x246   : > { %v9352_v21 = vpop.f32.mrb[76].mxu1  ;;  %v13234_v20 = vadd.f32 %v10875_v59, %v9487_v40  ;;  %4481 = vmatprep.mubr.bf16.mxu0 %v12571_v45  ;;  %9983 = vmatpush3.bf16.msra.mxu0 %v11713_v1  ;;  %v15016_v40 = vld [vmem:[#allocation35_spill] sm:$0xff]  ;;  %v9495_v43 = vpop.f32.mrb[81].mxu0  ;;  %v11688_v1 = vld [vmem:[#allocation10 + $0xb0] sm:$0xff]  }
 0x247   : > { %v9353_v53 = vpop.f32.mrb[77].mxu1  ;;  %9984 = vmatprep.subr.bf16.mxu0 %v11716_v60  ;;  %v9497_v59 = vpop.f32.mrb[82].mxu0 }
 0x248   : > { %v9354_v54 = vadd.f32 %v9353_v53, %v9352_v21  ;;  %v9355_v63 = vpop.f32.mrb[78].mxu1  ;;  %10581 = vmatpush3.bf16.msra.mxu1 %v11685_v24  ;;  %v9496_v53 = vadd.f32 %v9495_v43, %v9494_v61  ;;  %v9498_v56 = vpop.f32.mrb[83].mxu0 }
 0x249   : > { %v9356_v50 = vpop.f32.mrb[79].mxu1  ;;  %10582 = vmatprep.subr.bf16.mxu1 %v11686_v30  ;;  %v9499_v21 = vadd.f32 %v9498_v56, %v9497_v59  ;;  %v11696_v56 = vld [vmem:[#allocation10 + $0x1c0] sm:$0xff]  }
 0x24a   : > { %v10866_v38 = vadd.f32 %v9354_v54, %v13091_v34  ;;  %v9357_v17 = vadd.f32 %v9356_v50, %v9355_v63  ;;  %9985 = vmatpush3.bf16.msra.mxu0 %v11717_v33  ;;  %v15018_v33 = vld [vmem:[#allocation40_spill] sm:$0xff] }
 0x24b   : > { %10551 = vmatmul.mubr.bf16.gmra.mrb[120].mxu1 %v15016_v40 }
 0x24c   : > { %v10872_v57 = vadd.f32 %v9357_v17, %v13095_v7  ;;  %10554 = vmatprep.mubr.bf16.mxu1 %v15017_v51  ;;  %10583 = vmatpush3.bf16.msra.mxu1 %v11686_v30  ;;  %v13242_v24 = vadd.f32 %v10866_v38, %v9490_v0  ;;  %v11691_v30 = vld [vmem:[#allocation10 + $0xb8] sm:$0xff]  }
 0x24d   : > { %10584 = vmatprep.subr.bf16.mxu1 %v11687_v3  ;;  %4482 = vmatmul.mubr.bf16.gmra.mrb[188].mxu0 %v13079_v9  ;;  %v9500_v17 = vpop.f32.mrb[84].mxu0  ;;  %v15019_v9 = vld [vmem:[#allocation43_spill] sm:$0xff] }
 0x24e   : > { %v9358_v34 = vpop.f32.mrb[80].mxu1  ;;  %v13244_v54 = vadd.f32 %v10872_v57, %v9493_v46  ;;  %4489 = vmatprep.mubr.bf16.mxu0 %v14988_v49  ;;  %v9501_v61 = vpop.f32.mrb[85].mxu0 }
 0x24f   : > { %v9359_v60 = vpop.f32.mrb[81].mxu1  ;;  %v9502_v43 = vadd.f32 %v9501_v61, %v9500_v17  ;;  %v9503_v57 = vpop.f32.mrb[86].mxu0 }
 0x250   : > { %v9360_v63 = vadd.f32 %v9359_v60, %v9358_v34  ;;  %v9361_v7 = vpop.f32.mrb[82].mxu1  ;;  %10585 = vmatpush3.bf16.msra.mxu1 %v11687_v3  ;;  %v9504_v3 = vpop.f32.mrb[87].mxu0 }
 0x251   : > { %v9362_v50 = vpop.f32.mrb[83].mxu1  ;;  %10586 = vmatprep.subr.bf16.mxu1 %v11688_v1  ;;  %v9505_v60 = vadd.f32 %v9504_v3, %v9503_v57  ;;  %v15023_v57 = vld [vmem:[#allocation46_spill] sm:$0xff] }
 0x252   : > { %v10881_v0 = vadd.f32 %v9360_v63, %v13107_v47  ;;  %v9363_v38 = vadd.f32 %v9362_v50, %v9361_v7 }
 0x253   : > { %10555 = vmatmul.mubr.bf16.gmra.mrb[124].mxu1 %v15018_v33 }
 0x254   : > { %v10887_v46 = vadd.f32 %v9363_v38, %v13111_v25  ;;  %10558 = vmatprep.mubr.bf16.mxu1 %v15019_v9  ;;  %10587 = vmatpush3.bf16.msra.mxu1 %v11688_v1  ;;  %v13252_v59 = vadd.f32 %v10881_v0, %v9496_v53  ;;  %v15022_v38 = vld [vmem:[#allocation44_spill] sm:$0xff] }
 0x255   : > { %10588 = vmatprep.subr.bf16.mxu1 %v11691_v30  ;;  %4490 = vmatmul.mubr.bf16.gmra.mrb[192].mxu0 %v13087_v52  ;;  %v9506_v0 = vpop.f32.mrb[88].mxu0 }
 0x256   : > { %15020 = vst [vmem:[#allocation23_spill] sm:$0xff] %v13252_v59  ;;  %v9364_v34 = vpop.f32.mrb[84].mxu1  ;;  %v13254_v47 = vadd.f32 %v10887_v46, %v9499_v21  ;;  %4497 = vmatprep.mubr.bf16.mxu0 %v14991_v23  ;;  %v9507_v17 = vpop.f32.mrb[89].mxu0 }
 0x257   : > { %v9365_v63 = vpop.f32.mrb[85].mxu1  ;;  %v9508_v61 = vadd.f32 %v9507_v17, %v9506_v0  ;;  %v9509_v46 = vpop.f32.mrb[90].mxu0 }
 0x258   : > { %15021 = vst [vmem:[#allocation25_spill] sm:$0xff] %v13254_v47  ;;  %v9366_v7 = vadd.f32 %v9365_v63, %v9364_v34  ;;  %v9367_v50 = vpop.f32.mrb[86].mxu1  ;;  %10589 = vmatpush3.bf16.msra.mxu1 %v11691_v30  ;;  %v9510_v3 = vpop.f32.mrb[91].mxu0 }
 0x259   : > { %v9368_v25 = vpop.f32.mrb[87].mxu1  ;;  %9838 = vmatprep.subr.bf16.mxu1 %v11696_v56  ;;  %v9511_v30 = vadd.f32 %v9510_v3, %v9509_v46 }
 0x25a   : > { %v10878_v53 = vadd.f32 %v9366_v7, %v13117_v41  ;;  %v9369_v1 = vadd.f32 %v9368_v25, %v9367_v50  ;;  %v11719_v25 = vld [vmem:[#allocation9 + $0xf0] sm:$0xff]  }
 0x25b   : > { %10559 = vmatmul.mubr.bf16.gmra.mrb[128].mxu1 %v15022_v38 }
 0x25c   : > { %v10884_v21 = vadd.f32 %v9369_v1, %v13121_v32  ;;  %10562 = vmatprep.mubr.bf16.mxu1 %v15023_v57  ;;  %v13262_v52 = vadd.f32 %v10878_v53, %v9502_v43  ;;  %v11718_v32 = vld [vmem:[#allocation9 + $0x130] sm:$0xff]   ;;  %v15026_v53 = vld [vmem:[#allocation49_spill] sm:$0xff] }
 0x25d   : > { %4498 = vmatmul.mubr.bf16.gmra.mrb[196].mxu0 %v13097_v4  ;;  %v9512_v43 = vpop.f32.mrb[92].mxu0  ;;  %9986 = vmatprep.subr.bf16.mxu0 %v11718_v32  ;;  %v15027_v4 = vld [vmem:[#allocation48_spill] sm:$0xff] }
 0x25e   : > { %15024 = vst [vmem:[#allocation62_spill] sm:$0xff] %v13262_v52  ;;  %v9370_v34 = vpop.f32.mrb[88].mxu1  ;;  %v13264_v63 = vadd.f32 %v10884_v21, %v9505_v60  ;;  %4505 = vmatprep.mubr.bf16.mxu0 %v14993_v10  ;;  %v9513_v17 = vpop.f32.mrb[93].mxu0  ;;  %9987 = vmatpush3.bf16.msra.mxu0 %v11719_v25  ;;  %v15031_v25 = vld [vmem:[#allocation50_spill] sm:$0xff]  ;;  %v15039_v52 = vld [vmem:[#allocation53_spill] sm:$0xff] }
 0x25f   : > { %v9371_v56 = vpop.f32.mrb[89].mxu1  ;;  %v9514_v21 = vadd.f32 %v9513_v17, %v9512_v43  ;;  %v9515_v46 = vpop.f32.mrb[94].mxu0 }
 0x260   : > { %15025 = vst [vmem:[#allocation63_spill] sm:$0xff] %v13264_v63  ;;  %v9372_v41 = vadd.f32 %v9371_v56, %v9370_v34  ;;  %v9373_v7 = vpop.f32.mrb[90].mxu1  ;;  %v9516_v34 = vpop.f32.mrb[95].mxu0 }
 0x261   : > { %v9374_v50 = vpop.f32.mrb[91].mxu1  ;;  %v9517_v47 = vadd.f32 %v9516_v34, %v9515_v46 }
 0x262   : > { %v10893_v1 = vadd.f32 %v9372_v41, %v13129_v35  ;;  %v9375_v0 = vadd.f32 %v9374_v50, %v9373_v7  ;;  %v15030_v50 = vld [vmem:[#allocation29_spill] sm:$0xff] }
 0x263   : > { %10563 = vmatmul.mubr.bf16.gmra.mrb[132].mxu1 %v15026_v53 }
 0x264   : > { %v10899_v60 = vadd.f32 %v9375_v0, %v13134_v2  ;;  %10566 = vmatprep.mubr.bf16.mxu1 %v15027_v4  ;;  %v13272_v3 = vadd.f32 %v10893_v1, %v9508_v61  ;;  %v15032_v1 = vld [vmem:[#allocation39_spill] sm:$0xff] }
 0x265   : > { %4506 = vmatmul.mubr.bf16.gmra.mrb[200].mxu0 %v13103_v42  ;;  %v9518_v43 = vpop.f32.mrb[96].mxu0 }
 0x266   : > { %15028 = vst [vmem:[#allocation64_spill] sm:$0xff] %v13272_v3  ;;  %v9376_v56 = vpop.f32.mrb[92].mxu1  ;;  %v13274_v63 = vadd.f32 %v10899_v60, %v9511_v30  ;;  %4513 = vmatprep.mubr.bf16.mxu0 %v14994_v39  ;;  %v9519_v61 = vpop.f32.mrb[97].mxu0  ;;  %v15033_v60 = vld [vmem:[#allocation52_spill] sm:$0xff] }
 0x267   : > { %v9377_v35 = vpop.f32.mrb[93].mxu1  ;;  %v9520_v46 = vadd.f32 %v9519_v61, %v9518_v43  ;;  %v9521_v30 = vpop.f32.mrb[98].mxu0 }
 0x268   : > { %15029 = vst [vmem:[#allocation65_spill] sm:$0xff] %v13274_v63  ;;  %v9378_v41 = vadd.f32 %v9377_v35, %v9376_v56  ;;  %v9379_v7 = vpop.f32.mrb[94].mxu1  ;;  %v9522_v42 = vpop.f32.mrb[99].mxu0 }
 0x269   : > { %v9380_v2 = vpop.f32.mrb[95].mxu1  ;;  %v9523_v35 = vadd.f32 %v9522_v42, %v9521_v30 }
 0x26a   : > { %v10890_v32 = vadd.f32 %v9378_v41, %v15030_v50  ;;  %v9381_v0 = vadd.f32 %v9380_v2, %v9379_v7  ;;  %v15036_v41 = vld [vmem:[#allocation31_spill] sm:$0xff]  ;;  %v15037_v50 = vld [vmem:[#allocation41_spill] sm:$0xff] }
 0x26b   : > { %10567 = vmatmul.mubr.bf16.gmra.mrb[136].mxu1 %v15031_v25 }
 0x26c   : > { %v10896_v17 = vadd.f32 %v9381_v0, %v15032_v1  ;;  %10570 = vmatprep.mubr.bf16.mxu1 %v15033_v60  ;;  %v13282_v34 = vadd.f32 %v10890_v32, %v9514_v21  ;;  %v15038_v0 = vld [vmem:[#allocation54_spill] sm:$0xff]  ;;  %v15040_v32 = vld [vmem:[#allocation55_spill] sm:$0xff] }
 0x26d   : > { %4514 = vmatmul.mubr.bf16.gmra.mrb[204].mxu0 %v15036_v41  ;;  %v9524_v1 = vpop.f32.mrb[100].mxu0 }
 0x26e   : > { %15034 = vst [vmem:[#allocation29_spill] sm:$0xff] %v13282_v34  ;;  %v9382_v56 = vpop.f32.mrb[96].mxu1  ;;  %v13284_v63 = vadd.f32 %v10896_v17, %v9517_v47  ;;  %4521 = vmatprep.mubr.bf16.mxu0 %v15037_v50  ;;  %v9525_v21 = vpop.f32.mrb[101].mxu0  ;;  %v11720_v17 = vld [vmem:[#allocation9 + $0x138] sm:$0xff]  }
 0x26f   : > { %v9383_v3 = vpop.f32.mrb[97].mxu1  ;;  %v9526_v30 = vadd.f32 %v9525_v21, %v9524_v1  ;;  %v9527_v47 = vpop.f32.mrb[102].mxu0  ;;  %9988 = vmatprep.subr.bf16.mxu0 %v11720_v17  ;;  %v11697_v1 = vld [vmem:[#allocation10 + $0x180] sm:$0xff]  }
 0x270   : > { %15035 = vst [vmem:[#allocation39_spill] sm:$0xff] %v13284_v63  ;;  %v9384_v7 = vadd.f32 %v9383_v3, %v9382_v56  ;;  %v9385_v2 = vpop.f32.mrb[98].mxu1  ;;  %v9528_v3 = vpop.f32.mrb[103].mxu0  ;;  %v11721_v56 = vld [vmem:[#allocation9 + $0xf8] sm:$0xff]  }
 0x271   : > { %v9386_v59 = vpop.f32.mrb[99].mxu1  ;;  %v9529_v63 = vadd.f32 %v9528_v3, %v9527_v47  ;;  %9989 = vmatpush3.bf16.msra.mxu0 %v11721_v56 }
 0x272   : > { %v10905_v43 = vadd.f32 %v9384_v7, %v15038_v0  ;;  %v9387_v61 = vadd.f32 %v9386_v59, %v9385_v2  ;;  %v15043_v2 = vld [vmem:[#allocation24_spill] sm:$0xff] }
 0x273   : > { %10571 = vmatmul.mubr.bf16.gmra.mrb[140].mxu1 %v15039_v52 }
 0x274   : > { %v10911_v34 = vadd.f32 %v9387_v61, %v15040_v32  ;;  %10590 = vmatprep.mubr.bf16.mxu1 %v14957_v26  ;;  %v13292_v42 = vadd.f32 %v10905_v43, %v9520_v46  ;;  %v15044_v61 = vld [vmem:[#allocation42_spill] sm:$0xff]  ;;  %v11698_v32 = vld [vmem:[#allocation10 + $0x1c8] sm:$0xff]   ;;  %v15045_v46 = vld [vmem:[#allocation56_spill] sm:$0xff] }
 0x275   : > { %4522 = vmatmul.mubr.bf16.gmra.mrb[208].mxu0 %v15043_v2  ;;  %v11700_v2 = vld [vmem:[#allocation10 + $0x1d0] sm:$0xff]  }
 0x276   : > { %15041 = vst [vmem:[#allocation31_spill] sm:$0xff] %v13292_v42  ;;  %v9388_v41 = vpop.f32.mrb[100].mxu1  ;;  %v13294_v7 = vadd.f32 %v10911_v34, %v9523_v35  ;;  %4529 = vmatprep.mubr.bf16.mxu0 %v15044_v61  ;;  %v9530_v42 = vpop.f32.mrb[104].mxu0  ;;  %v15046_v34 = vld [vmem:[#allocation57_spill] sm:$0xff] }
 0x277   : > { %v9389_v59 = vpop.f32.mrb[101].mxu1  ;;  %v9531_v47 = vpop.f32.mrb[105].mxu0 }
 0x278   : > { %15042 = vst [vmem:[#allocation41_spill] sm:$0xff] %v13294_v7  ;;  %v9390_v0 = vadd.f32 %v9389_v59, %v9388_v41  ;;  %v9391_v52 = vpop.f32.mrb[102].mxu1  ;;  %v9532_v17 = vadd.f32 %v9531_v47, %v9530_v42  ;;  %v9533_v3 = vpop.f32.mrb[106].mxu0  ;;  %v11699_v41 = vld [vmem:[#allocation10 + $0x188] sm:$0xff]   ;;  %v15049_v42 = vld [vmem:[#allocation45_spill] sm:$0xff]  ;;  %v11702_v47 = vld [vmem:[#allocation10 + $0x190] sm:$0xff]  }
 0x279   : > { %v9392_v21 = vpop.f32.mrb[103].mxu1  ;;  %v9534_v56 = vpop.f32.mrb[107].mxu0 }
 0x27a   : > { %v10902_v43 = vadd.f32 %v9390_v0, %v15045_v46  ;;  %v9393_v26 = vadd.f32 %v9392_v21, %v9391_v52  ;;  %v9535_v0 = vadd.f32 %v9534_v56, %v9533_v3 }
 0x27b   : > { %10591 = vmatmul.mubr.bf16.vlgmr.msra.gmra.mrb[112].mxu1 %v15010_v58  ;;  %v15048_v58 = vld [vmem:[#allocation33_spill] sm:$0xff] }
 0x27c   : > { %v10908_v35 = vadd.f32 %v9393_v26, %v15046_v34  ;;  %10594 = vmatprep.mubr.bf16.mxu1 %v15012_v28  ;;  %9839 = vmatpush3.bf16.msra.mxu1 %v11697_v1  ;;  %v13302_v59 = vadd.f32 %v10902_v43, %v9526_v30  ;;  %v11704_v30 = vld [vmem:[#allocation10 + $0x1d8] sm:$0xff]   ;;  %v15050_v43 = vld [vmem:[#allocation58_spill] sm:$0xff] }
 0x27d   : > { %9840 = vmatprep.subr.bf16.mxu1 %v11698_v32  ;;  %4530 = vmatmul.mubr.bf16.gmra.mrb[212].mxu0 %v15048_v58  ;;  %v9536_v28 = vpop.f32.mrb[108].mxu0 }
 0x27e   : > { %v9394_v7 = vpop.f32.mrb[104].mxu1  ;;  %v13304_v52 = vadd.f32 %v10908_v35, %v9529_v63  ;;  %4537 = vmatprep.mubr.bf16.mxu0 %v15049_v42  ;;  %v9537_v63 = vpop.f32.mrb[109].mxu0  ;;  %v15051_v35 = vld [vmem:[#allocation59_spill] sm:$0xff] }
 0x27f   : > { %v9395_v21 = vpop.f32.mrb[105].mxu1  ;;  %v9538_v56 = vadd.f32 %v9537_v63, %v9536_v28  ;;  %v9539_v58 = vpop.f32.mrb[110].mxu0  ;;  %v15055_v28 = vld [vmem:[#allocation47_spill] sm:$0xff]  ;;  %v11707_v63 = vld [vmem:[#allocation10 + $0x1a0] sm:$0xff]  }
 0x280   : > { %15047 = vst [vmem:[#allocation54_spill] sm:$0xff] %v13304_v52  ;;  %v9396_v46 = vadd.f32 %v9395_v21, %v9394_v7  ;;  %v9397_v26 = vpop.f32.mrb[106].mxu1  ;;  %9841 = vmatpush3.bf16.msra.mxu1 %v11699_v41  ;;  %v11705_v7 = vld [vmem:[#allocation10 + $0x198] sm:$0xff]   ;;  %v9540_v21 = vpop.f32.mrb[111].mxu0 }
 0x281   : > { %v9398_v1 = vpop.f32.mrb[107].mxu1  ;;  %9842 = vmatprep.subr.bf16.mxu1 %v11700_v2  ;;  %v11706_v2 = vld [vmem:[#allocation10 + $0x1e0] sm:$0xff]  }
 0x282   : > { %v10917_v34 = vadd.f32 %v9396_v46, %v15050_v43  ;;  %v9399_v32 = vadd.f32 %v9398_v1, %v9397_v26  ;;  %v9541_v46 = vadd.f32 %v9540_v21, %v9539_v58  ;;  %v15054_v43 = vld [vmem:[#allocation36_spill] sm:$0xff] }
 0x283   : > { %10595 = vmatmul.mubr.bf16.gmra.mrb[116].mxu1 %v15013_v5 }
 0x284   : > { %v10923_v3 = vadd.f32 %v9399_v32, %v15051_v35  ;;  %10598 = vmatprep.mubr.bf16.mxu1 %v15014_v29  ;;  %9843 = vmatpush3.bf16.msra.mxu1 %v11702_v47  ;;  %v13312_v41 = vadd.f32 %v10917_v34, %v9532_v17  ;;  %v11708_v17 = vld [vmem:[#allocation10 + $0x1e8] sm:$0xff]   ;;  %v15056_v34 = vld [vmem:[#allocation60_spill] sm:$0xff] }
 0x285   : > { %9844 = vmatprep.subr.bf16.mxu1 %v11704_v30  ;;  %4538 = vmatmul.mubr.bf16.gmra.mrb[216].mxu0 %v15054_v43  ;;  %v9582_v29 = vpop.f32.mrb[112].mxu0 }
 0x286   : > { %15052 = vst [vmem:[#allocation55_spill] sm:$0xff] %v13312_v41  ;;  %v9400_v52 = vpop.f32.mrb[108].mxu1  ;;  %v13314_v26 = vadd.f32 %v10923_v3, %v9535_v0  ;;  %4545 = vmatprep.mubr.bf16.mxu0 %v15055_v28  ;;  %v9583_v0 = vpop.f32.mrb[113].mxu0  ;;  %v15057_v3 = vld [vmem:[#allocation61_spill] sm:$0xff] }
 0x287   : > { %v9401_v1 = vpop.f32.mrb[109].mxu1  ;;  %v13322_v21 = vadd.f32 %v9583_v0, %v9582_v29  ;;  %v11714_v29 = vld [vmem:[#allocation10 + $0x1f8] sm:$0xff]  }
 0x288   : > { %15053 = vst [vmem:[#allocation24_spill] sm:$0xff] %v13314_v26  ;;  %v9402_v5 = vadd.f32 %v9401_v1, %v9400_v52  ;;  %v9403_v32 = vpop.f32.mrb[110].mxu1  ;;  %9845 = vmatpush3.bf16.msra.mxu1 %v11705_v7  ;;  %v11709_v52 = vld [vmem:[#allocation10 + $0x1a8] sm:$0xff]   ;;  %v9585_v7 = vpop.f32.mrb[114].mxu0 }
 0x289   : > { %v9404_v47 = vpop.f32.mrb[111].mxu1  ;;  %9846 = vmatprep.subr.bf16.mxu1 %v11706_v2  ;;  %15058 = vst [vmem:[#allocation42_spill] sm:$0xff] %v13322_v21  ;;  %v11710_v2 = vld [vmem:[#allocation10 + $0x1f0] sm:$0xff]   ;;  %v9586_v43 = vpop.f32.mrb[115].mxu0 }
 0x28a   : > { %v10914_v35 = vadd.f32 %v9402_v5, %v15056_v34  ;;  %v9405_v30 = vadd.f32 %v9404_v47, %v9403_v32  ;;  %v13326_v5 = vadd.f32 %v9586_v43, %v9585_v7  ;;  %v11725_v32 = vld [vmem:[#allocation9 + $0x40] sm:$0xff]   ;;  %v15065_v7 = vld [vmem:[#allocation21_spill] sm:$0xff] }
 0x28b   : > { %10599 = vmatmul.mubr.bf16.gmra.mrb[120].mxu1 %v15015_v27  ;;  %v15061_v34 = vld [vmem:[#allocation34_spill] sm:$0xff]  ;;  %10110 = vmatprep.subr.bf16.mxu0 %v11725_v32 }
 0x28c   : > { %v10920_v58 = vadd.f32 %v9405_v30, %v15057_v3  ;;  %10602 = vmatprep.mubr.bf16.mxu1 %v15016_v40  ;;  %9847 = vmatpush3.bf16.msra.mxu1 %v11707_v63  ;;  %v13324_v1 = vadd.f32 %v10914_v35, %v9538_v56  ;;  %15059 = vst [vmem:[#allocation56_spill] sm:$0xff] %v13326_v5  ;;  %v15062_v30 = vld [vmem:[#allocation51_spill] sm:$0xff]  ;;  %v11712_v63 = vld [vmem:[#allocation10 + $0x1b0] sm:$0xff]   ;;  %v5780_v40 = vld [vmem:[#allocation2] sm:$0xf] }
 0x28d   : > { %9848 = vmatprep.subr.bf16.mxu1 %v11708_v17  ;;  %4546 = vmatmul.mubr.bf16.gmra.mrb[220].mxu0 %v15061_v34  ;;  %v9588_v0 = vpop.f32.mrb[116].mxu0  ;;  %v11715_v17 = vld [vmem:[#allocation10 + $0x1b8] sm:$0xff]   ;;  %v5843_v5 = vld [vmem:[#allocation2 + $0x6c] sm:$0xf] }
 0x28e   : > { %v13328_v47 = vadd.f32 %v10920_v58, %v9541_v46  ;;  %4553 = vmatprep.mubr.bf16.mxu0 %v15062_v30  ;;  %v9589_v56 = vpop.f32.mrb[117].mxu0 }
 0x28f   : > { %v13334_v35 = vadd.f32 %v9589_v56, %v9588_v0  ;;  %v9591_v46 = vpop.f32.mrb[118].mxu0 }
 0x290   : > { %15060 = vst [vmem:[#allocation57_spill] sm:$0xff] %v13328_v47  ;;  %9849 = vmatpush3.bf16.msra.mxu1 %v11709_v52  ;;  %v9592_v3 = vpop.f32.mrb[119].mxu0  ;;  %v11729_v52 = vld [vmem:[#allocation10 + $0x200] sm:$0xff]  }
 0x291   : > { %9850 = vmatprep.subr.bf16.mxu1 %v11710_v2  ;;  %15063 = vst [vmem:[#allocation33_spill] sm:$0xff] %v13334_v35  ;;  %v13336_v58 = vadd.f32 %v9592_v3, %v9591_v46 }
 0x293   : > { %10603 = vmatmul.mubr.bf16.gmra.mrb[124].mxu1 %v15017_v51  ;;  %15064 = vst [vmem:[#allocation45_spill] sm:$0xff] %v13336_v58 }
 0x294   : > { %10606 = vmatprep.mubr.bf16.mxu1 %v15018_v33  ;;  %9851 = vmatpush3.bf16.msra.mxu1 %v11712_v63  ;;  %v15080_v33 = vld [vmem:[#allocation37_spill] sm:$0xff] }
 0x295   : > { %9852 = vmatprep.subr.bf16.mxu1 %v11714_v29  ;;  %4554 = vmatmul.mubr.bf16.gmra.mrb[224].mxu0 %v13155_v19  ;;  %v9594_v2 = vpop.f32.mrb[120].mxu0 }
 0x296   : > { %4561 = vmatprep.mubr.bf16.mxu0 %v15065_v7  ;;  %v9595_v43 = vpop.f32.mrb[121].mxu0 }
 0x297   : > { %v13342_v32 = vadd.f32 %v9595_v43, %v9594_v2  ;;  %v9597_v34 = vpop.f32.mrb[122].mxu0 }
 0x298   : > { %9853 = vmatpush3.bf16.msra.mxu1 %v11715_v17  ;;  %v9598_v63 = vpop.f32.mrb[123].mxu0 }
 0x299   : > { %10622 = vmatprep.subr.bf16.mxu1 %v11729_v52  ;;  %15066 = vst [vmem:[#allocation58_spill] sm:$0xff] %v13342_v32  ;;  %v13344_v29 = vadd.f32 %v9598_v63, %v9597_v34 }
 0x29b   : > { %10607 = vmatmul.mubr.bf16.gmra.mrb[128].mxu1 %v15019_v9  ;;  %15067 = vst [vmem:[#allocation59_spill] sm:$0xff] %v13344_v29  ;;  %v5812_v29 = vld [vmem:[#allocation2 + $0x38] sm:$0x1] }
 0x29c   : > { %10610 = vmatprep.mubr.bf16.mxu1 %v15022_v38 }
 0x29d   : > { %4562 = vmatmul.mubr.bf16.gmra.mrb[228].mxu0 %v13169_v8  ;;  %v9600_v19 = vpop.f32.mrb[124].mxu0 }
 0x29e   : > { %4569 = vmatprep.mubr.bf16.mxu0 %v15007_v6  ;;  %v9601_v0 = vpop.f32.mrb[125].mxu0 }
 0x29f   : > { %v13350_v56 = vadd.f32 %v9601_v0, %v9600_v19  ;;  %v9603_v17 = vpop.f32.mrb[126].mxu0 }
 0x2a0   : > { %v9604_v46 = vpop.f32.mrb[127].mxu0 }
 0x2a1   : > { %15068 = vst [vmem:[#allocation36_spill] sm:$0xff] %v13350_v56  ;;  %v13352_v3 = vadd.f32 %v9604_v46, %v9603_v17 }
 0x2a3   : > { %10611 = vmatmul.mubr.bf16.gmra.mrb[132].mxu1 %v15023_v57  ;;  %15069 = vst [vmem:[#allocation47_spill] sm:$0xff] %v13352_v3 }
 0x2a4   : > { %10614 = vmatprep.mubr.bf16.mxu1 %v15026_v53 }
 0x2a5   : > { %4570 = vmatmul.mubr.bf16.gmra.mrb[232].mxu0 %v13182_v12  ;;  %v9606_v2 = vpop.f32.mrb[128].mxu0 }
 0x2a6   : > { %4577 = vmatprep.mubr.bf16.mxu0 %v15008_v16  ;;  %v9607_v8 = vpop.f32.mrb[129].mxu0 }
 0x2a7   : > { %v13358_v43 = vadd.f32 %v9607_v8, %v9606_v2  ;;  %v9609_v34 = vpop.f32.mrb[130].mxu0  ;;  %v11738_v2 = vld [vmem:[#allocation10 + $0x208] sm:$0xff]  }
 0x2a8   : > { %v9610_v63 = vpop.f32.mrb[131].mxu0 }
 0x2a9   : > { %15070 = vst [vmem:[#allocation60_spill] sm:$0xff] %v13358_v43  ;;  %v13360_v19 = vadd.f32 %v9610_v63, %v9609_v34 }
 0x2ab   : > { %10615 = vmatmul.mubr.bf16.gmra.mrb[136].mxu1 %v15027_v4  ;;  %15071 = vst [vmem:[#allocation61_spill] sm:$0xff] %v13360_v19 }
 0x2ac   : > { %10618 = vmatprep.mubr.bf16.mxu1 %v15031_v25  ;;  %v11882_v25 = vld [vmem:[#allocation2 + $0xc] sm:$0xff]  }
 0x2ad   : > { %4578 = vmatmul.mubr.bf16.gmra.mrb[236].mxu0 %v13194_v37  ;;  %v9612_v0 = vpop.f32.mrb[132].mxu0 }
 0x2ae   : > { %v9613_v12 = vpop.f32.mrb[133].mxu0 }
 0x2af   : > { %v13365_v17 = vadd.f32 %v9613_v12, %v9612_v0  ;;  %v9615_v46 = vpop.f32.mrb[134].mxu0  ;;  %v11883_v12 = vld [vmem:[#allocation2 + $0x18] sm:$0xff]  }
 0x2b0   : > { %v9616_v4 = vpop.f32.mrb[135].mxu0 }
 0x2b1   : > { %15072 = vst [vmem:[#allocation34_spill] sm:$0xff] %v13365_v17  ;;  %v13367_v53 = vadd.f32 %v9616_v4, %v9615_v46 }
 0x2b3   : > { %10619 = vmatmul.mubr.bf16.gmra.mrb[140].mxu1 %v15033_v60  ;;  %15073 = vst [vmem:[#allocation51_spill] sm:$0xff] %v13367_v53 }
 0x2b4   : > { %4971 = vmatprep.mubr.bf16.mxu1 %v12517_v62  ;;  %v11747_v62 = vld [vmem:[#allocation10 + $0x210] sm:$0xff]  }
 0x2b5   : > { %v9618_v8 = vpop.f32.mrb[136].mxu0 }
 0x2b6   : > { %v9619_v34 = vpop.f32.mrb[137].mxu0 }
 0x2b7   : > { %v13370_v37 = vadd.f32 %v9619_v34, %v9618_v8  ;;  %v9621_v63 = vpop.f32.mrb[138].mxu0  ;;  %v11756_v8 = vld [vmem:[#allocation10 + $0x218] sm:$0xff]  }
 0x2b8   : > { %v9622_v60 = vpop.f32.mrb[139].mxu0 }
 0x2b9   : > { %15074 = vst [vmem:[#allocation21_spill] sm:$0xff] %v13370_v37  ;;  %v13372_v0 = vadd.f32 %v9622_v60, %v9621_v63  ;;  %v5791_v37 = vld [vmem:[#allocation2 + $0x14] sm:$0x1] }
 0x2bb   : > { %4972 = vmatmul.mubr.bf16.vlgmr.msra.gmra.mrb[144].mxu1 %v11882_v25  ;;  %15075 = vst [vmem:[#allocation66_spill] sm:$0xff] %v13372_v0 }
 0x2bc   : > { %4979 = vmatprep.mubr.bf16.mxu1 %v12571_v45  ;;  %10623 = vmatpush3.bf16.msra.mxu1 %v11729_v52  ;;  %v11757_v52 = vld [vmem:[#allocation10 + $0x220] sm:$0xff]  }
 0x2bd   : > { %10624 = vmatprep.subr.bf16.mxu1 %v11738_v2  ;;  %v9624_v4 = vpop.f32.mrb[140].mxu0 }
 0x2be   : > { %v9625_v46 = vpop.f32.mrb[141].mxu0 }
 0x2bf   : > { %v13375_v25 = vadd.f32 %v9625_v46, %v9624_v4  ;;  %v9627_v45 = vpop.f32.mrb[142].mxu0  ;;  %v11761_v4 = vld [vmem:[#allocation10 + $0x228] sm:$0xff]   ;;  %v11762_v46 = vld [vmem:[#allocation10 + $0x230] sm:$0xff]  }
 0x2c0   : > { %10625 = vmatpush3.bf16.msra.mxu1 %v11738_v2  ;;  %v9628_v34 = vpop.f32.mrb[143].mxu0  ;;  %v11884_v2 = vld [vmem:[#allocation2 + $0x24] sm:$0xff]  }
 0x2c1   : > { %10626 = vmatprep.subr.bf16.mxu1 %v11747_v62  ;;  %15076 = vst [vmem:[#allocation67_spill] sm:$0xff] %v13375_v25  ;;  %v13377_v57 = vadd.f32 %v9628_v34, %v9627_v45  ;;  %v13385_v45 = vld [vmem:[%s14787_s2] ss:$0 sm:$0xff] }
 0x2c3   : > { %4980 = vmatmul.mubr.bf16.gmra.mrb[148].mxu1 %v11883_v12  ;;  %15077 = vst [vmem:[#allocation68_spill] sm:$0xff] %v13377_v57 }
 0x2c4   : > { %4987 = vmatprep.mubr.bf16.mxu1 %v14988_v49  ;;  %10627 = vmatpush3.bf16.msra.mxu1 %v11747_v62 }
 0x2c5   : > { %10628 = vmatprep.subr.bf16.mxu1 %v11756_v8  ;;  %v9630_v60 = vpop.f32.mrb[144].mxu0 }
 0x2c6   : > { %v9631_v63 = vpop.f32.mrb[145].mxu0 }
 0x2c7   : > { %v13380_v12 = vadd.f32 %v9631_v63, %v9630_v60  ;;  %v9633_v49 = vpop.f32.mrb[146].mxu0 }
 0x2c8   : > { %10629 = vmatpush3.bf16.msra.mxu1 %v11756_v8  ;;  %v9634_v62 = vpop.f32.mrb[147].mxu0 }
 0x2c9   : > { %10630 = vmatprep.subr.bf16.mxu1 %v11757_v52  ;;  %15078 = vst [vmem:[#allocation69_spill] sm:$0xff] %v13380_v12  ;;  %v13387_v8 = vadd.f32 %v9634_v62, %v9633_v49 }
 0x2cb   : > { %4988 = vmatmul.mubr.bf16.gmra.mrb[152].mxu1 %v11884_v2  ;;  %15079 = vst [vmem:[#allocation70_spill] sm:$0xff] %v13387_v8 }
 0x2cc   : > { %4995 = vmatprep.mubr.bf16.mxu1 %v14991_v23  ;;  %10631 = vmatpush3.bf16.msra.mxu1 %v11757_v52 }
 0x2cd   : > { %10632 = vmatprep.subr.bf16.mxu1 %v11761_v4  ;;  %v9636_v49 = vpop.f32.mrb[148].mxu0 }
 0x2ce   : > { %v10496_v38 = vpop.f32.mrb[16].mxu1 }
 0x2cf   : > { %v10832_v34 = vadd.f32 %v13178_v48, %v10496_v38  ;;  %v3521_v2 = vpop.f32.mrb[17].mxu1  ;;  %v11885_v48 = vld [vmem:[#allocation2 + $0x30] sm:$0xff]   ;;  %v9637_v38 = vpop.f32.mrb[149].mxu0 }
 0x2d0   : > { %v10835_v23 = vadd.f32 %v13163_v13, %v3521_v2  ;;  %v10497_v60 = vpop.f32.mrb[18].mxu1  ;;  %10633 = vmatpush3.bf16.msra.mxu1 %v11761_v4  ;;  %v11768_v2 = vld [vmem:[#allocation10 + $0x238] sm:$0xff]  }
 0x2d1   : > { %v3689_v52 = vadd.f32 %v10832_v34, %v13385_v45  ;;  %v10838_v63 = vadd.f32 %v13180_v36, %v10497_v60  ;;  %v3524_v9 = vpop.f32.mrb[19].mxu1  ;;  %10634 = vmatprep.subr.bf16.mxu1 %v11762_v46  ;;  %v13398_v34 = vadd.f32 %v9637_v38, %v9636_v49  ;;  %v9639_v36 = vpop.f32.mrb[150].mxu0 }
 0x2d2   : > { %v3687_v12 = vadd.f32 %v10835_v23, %v13385_v45  ;;  %v10841_v51 = vadd.f32 %v15080_v33, %v3524_v9  ;;  %v9640_v33 = vpop.f32.mrb[151].mxu0 }
 0x2d3   : > { %v5334_v62 = vmax.f32 %v3689_v52, 0.0  ;;  %v3690_v8 = vadd.f32 %v10838_v63, %v13385_v45  ;;  %4996 = vmatmul.mubr.bf16.gmra.mrb[156].mxu1 %v11885_v48  ;;  %15081 = vst [vmem:[#allocation37_spill] sm:$0xff] %v13398_v34  ;;  %v13400_v63 = vadd.f32 %v9640_v33, %v9639_v36 }
 0x2d4   : > { %v5332_v13 = vmax.f32 %v3687_v12, 0.0  ;;  %v3688_v4 = vadd.f32 %v10841_v51, %v13385_v45  ;;  %5003 = vmatprep.mubr.bf16.mxu1 %v14993_v10  ;;  %10635 = vmatpush3.bf16.msra.mxu1 %v11762_v46 }
 0x2d5   : > { %v9127_v23 = vpack.c.bf16 %v5334_v62, %v5334_v62  ;;  %v5335_v60 = vmax.f32 %v3690_v8, 0.0  ;;  %15082 = vst [vmem:[#allocation71_spill] sm:$0xff] %v13400_v63  ;;  %10636 = vmatprep.subr.bf16.mxu1 %v11768_v2  ;;  %v5787_v63 = vld [vmem:[#allocation2 + $0xc] sm:$0xf] }
 0x2d6   : > { %v9125_v9 = vpack.c.bf16 %v5332_v13, %v5332_v13  ;;  %v5333_v52 = vmax.f32 %v3688_v4, 0.0  ;;  %v10500_v57 = vpop.f32.mrb[20].mxu1 }
 0x2d7   : > { %v5478_v48 = vshrl.u32 %v9127_v23, 16  ;;  %v5481_v12 = vshll.u32 %v9127_v23, 16  ;;  %v9128_v25 = vpack.c.bf16 %v5335_v60, %v5335_v60  ;;  %v10844_v51 = vadd.f32 %v13202_v31, %v10500_v57  ;;  %v3537_v10 = vpop.f32.mrb[21].mxu1  ;;  %v13406_v57 = vpop.f32.mrb[152].mxu0 }
 0x2d8   : > { %v5461_v49 = vshrl.u32 %v9125_v9, 16  ;;  %v5464_v38 = vshll.u32 %v9125_v9, 16  ;;  %v9126_v34 = vpack.c.bf16 %v5333_v52, %v5333_v52  ;;  %v10847_v46 = vadd.f32 %v13190_v55, %v3537_v10  ;;  %v10501_v62 = vpop.f32.mrb[22].mxu1  ;;  %10637 = vmatpush3.bf16.msra.mxu1 %v11768_v2  ;;  %v11886_v2 = vld [vmem:[#allocation2 + $0x3c] sm:$0xff]  }
 0x2d9   : > { %v5480_v8 = vrot.slane %v5478_v48, 7  ;;  %v5486_v13 = vshrl.u32 %v9128_v25, 16  ;;  %v5489_v4 = vshll.u32 %v9128_v25, 16  ;;  %v3693_v36 = vadd.f32 %v10844_v51, %v13385_v45  ;;  %v3540_v33 = vpop.f32.mrb[23].mxu1  ;;  %v13408_v48 = vpop.f32.mrb[153].mxu0 }
 0x2da   : > { %v5463_v0 = vrot.slane %v5461_v49, 7  ;;  %v5469_v23 = vshrl.u32 %v9126_v34, 16  ;;  %v5472_v60 = vshll.u32 %v9126_v34, 16  ;;  %v3691_v31 = vadd.f32 %v10847_v46, %v13385_v45  ;;  %v13411_v34 = vpop.f32.mrb[154].mxu0 }
 0x2db   : > { %v5483_v9 = vor.u32 %v5481_v12, %v5480_v8  ;;  %v5484_v52 = vrot.slane %v5480_v8, 4  ;;  %v5488_v55 = vrot.slane %v5486_v13, 7  ;;  %v5338_v10 = vmax.f32 %v3693_v36, 0.0  ;;  %5004 = vmatmul.mubr.bf16.gmra.mrb[160].mxu1 %v11886_v2  ;;  %v5784_v13 = vld [vmem:[#allocation2 + $0x8] sm:$0x1]  ;;  %v13415_v17 = vpop.f32.mrb[155].mxu0 }
 0x2dc   : > { %v5466_v25 = vor.u32 %v5464_v38, %v5463_v0  ;;  %v5467_v51 = vrot.slane %v5463_v0, 4  ;;  %v5471_v27 = vrot.slane %v5469_v23, 7  ;;  %v5336_v49 = vmax.f32 %v3691_v31, 0.0  ;;  %5011 = vmatprep.mubr.bf16.mxu1 %v14994_v39 }
 0x2dd   : > { %v5788_v12 = vsel %vm12408_vm8, %v5483_v9, %v5787_v63  ;;  %v5491_v8 = vor.u32 %v5489_v4, %v5488_v55  ;;  %v5493_v53 = vrot.slane %v5488_v55, 4  ;;  %v9131_v36 = vpack.c.bf16 %v5338_v10, %v5338_v10 }
 0x2de   : > { %5789 = vst [vmem:[#allocation2 + $0xc] sm:$0xf] %v5788_v12  ;;  %v5781_v0 = vsel %vm12408_vm8, %v5466_v25, %v5780_v40  ;;  %v5474_v38 = vor.u32 %v5472_v60, %v5471_v27  ;;  %v5476_v23 = vrot.slane %v5471_v27, 4  ;;  %v9129_v31 = vpack.c.bf16 %v5336_v49, %v5336_v49  ;;  %v10504_v2 = vpop.f32.mrb[24].mxu1  ;;  %v5801_v12 = vld [vmem:[#allocation2 + $0x24] sm:$0xf] }
 0x2df   : > { %5782 = vst [vmem:[#allocation2] sm:$0xf] %v5781_v0  ;;  %v5492_v19 = vsel %vm12402_vm7, %v5484_v52, %v5491_v8  ;;  %v5792_v63 = vsel %vm12379_vm2, %v5493_v53, %v5791_v37  ;;  %v5512_v4 = vshrl.u32 %v9131_v36, 16  ;;  %v5515_v9 = vshll.u32 %v9131_v36, 16  ;;  %v3553_v55 = vpop.f32.mrb[25].mxu1  ;;  %v15086_v36 = vld [vmem:[#allocation22_spill] sm:$0xff] }
 0x2e0   : > { %5790 = vst [vmem:[#allocation2 + $0x10] sm:$0xf] %v5492_v19  ;;  %5793 = vst [vmem:[#allocation2 + $0x14] sm:$0x1] %v5792_v63  ;;  %v5475_v10 = vsel %vm12402_vm7, %v5467_v51, %v5474_v38  ;;  %v5785_v27 = vsel %vm12379_vm2, %v5476_v23, %v5784_v13  ;;  %v5495_v40 = vshrl.u32 %v9129_v31, 16  ;;  %v5498_v60 = vshll.u32 %v9129_v31, 16 }
 0x2e1   : > { %v10505_v25 = vpop.f32.mrb[26].mxu1  ;;  %5783 = vst [vmem:[#allocation2 + $0x4] sm:$0xf] %v5475_v10  ;;  %5786 = vst [vmem:[#allocation2 + $0x8] sm:$0x1] %v5785_v27  ;;  %v13427_v52 = vrot.slane %v5512_v4, 7  ;;  %v10850_v53 = vadd.f32 %v13204_v18, %v10501_v62  ;;  %v10853_v37 = vadd.f32 %v13192_v44, %v3540_v33  ;;  %v10856_v19 = vadd.f32 %v13222_v22, %v10504_v2 }
 0x2e2   : > { %v3556_v49 = vpop.f32.mrb[27].mxu1  ;;  %v13432_v8 = vrot.slane %v5495_v40, 7  ;;  %v10859_v51 = vadd.f32 %v13211_v11, %v3553_v55  ;;  %v10862_v13 = vadd.f32 %v13224_v14, %v10505_v25  ;;  %v13437_v38 = vpop.f32.mrb[156].mxu0  ;;  %v5794_v62 = vld [vmem:[#allocation2 + $0x18] sm:$0xf]  ;;  %v11887_v33 = vld [vmem:[#allocation2 + $0x48] sm:$0xff]  }
 0x2e3   : > { %v10865_v0 = vadd.f32 %v15086_v36, %v3556_v49  ;;  %v5517_v23 = vor.u32 %v5515_v9, %v13427_v52  ;;  %v3694_v44 = vadd.f32 %v10850_v53, %v13385_v45  ;;  %v3692_v22 = vadd.f32 %v10853_v37, %v13385_v45  ;;  %5012 = vmatmul.mubr.bf16.gmra.mrb[164].mxu1 %v11887_v33  ;;  %v13443_v31 = vpop.f32.mrb[157].mxu0 }
 0x2e4   : > { %v5500_v11 = vor.u32 %v5498_v60, %v13432_v8  ;;  %v3697_v2 = vadd.f32 %v10856_v19, %v13385_v45  ;;  %v3695_v63 = vadd.f32 %v10859_v51, %v13385_v45  ;;  %5019 = vmatprep.mubr.bf16.mxu1 %v15037_v50  ;;  %v13450_v4 = vpop.f32.mrb[158].mxu0  ;;  %v3698_v27 = vadd.f32 %v10862_v13, %v13385_v45 }
 0x2e5   : > { %v5802_v9 = vsel %vm12408_vm8, %v5517_v23, %v5801_v12  ;;  %v5339_v55 = vmax.f32 %v3694_v44, 0.0  ;;  %v5337_v10 = vmax.f32 %v3692_v22, 0.0  ;;  %v3696_v53 = vadd.f32 %v10865_v0, %v13385_v45  ;;  %v13458_v19 = vpop.f32.mrb[159].mxu0 }
 0x2e6   : > { %5803 = vst [vmem:[#allocation2 + $0x24] sm:$0xf] %v5802_v9  ;;  %v5795_v40 = vsel %vm12408_vm8, %v5500_v11, %v5794_v62  ;;  %v5342_v60 = vmax.f32 %v3697_v2, 0.0  ;;  %v5340_v25 = vmax.f32 %v3695_v63, 0.0  ;;  %v10508_v37 = vpop.f32.mrb[28].mxu1  ;;  %v5343_v51 = vmax.f32 %v3698_v27, 0.0 }
 0x2e7   : > { %5796 = vst [vmem:[#allocation2 + $0x18] sm:$0xf] %v5795_v40  ;;  %v9132_v50 = vpack.c.bf16 %v5339_v55, %v5339_v55  ;;  %v9130_v49 = vpack.c.bf16 %v5337_v10, %v5337_v10  ;;  %v10868_v12 = vadd.f32 %v13242_v24, %v10508_v37  ;;  %v3569_v36 = vpop.f32.mrb[29].mxu1  ;;  %v5341_v44 = vmax.f32 %v3696_v53, 0.0  ;;  %v5805_v27 = vld [vmem:[#allocation2 + $0x2c] sm:$0x1] }
 0x2e8   : > { %v9135_v23 = vpack.c.bf16 %v5342_v60, %v5342_v60  ;;  %v9133_v13 = vpack.c.bf16 %v5340_v25, %v5340_v25  ;;  %v10871_v22 = vadd.f32 %v13232_v15, %v3569_v36  ;;  %v10509_v62 = vpop.f32.mrb[30].mxu1  ;;  %v5798_v24 = vld [vmem:[#allocation2 + $0x20] sm:$0x1]  ;;  %v9136_v37 = vpack.c.bf16 %v5343_v51, %v5343_v51  ;;  %v11888_v25 = vld [vmem:[#allocation2 + $0x54] sm:$0xff]   ;;  %v5815_v53 = vld [vmem:[#allocation2 + $0x3c] sm:$0xf] }
 0x2e9   : > { %v5520_v33 = vshrl.u32 %v9132_v50, 16  ;;  %v5523_v11 = vshll.u32 %v9132_v50, 16  ;;  %v5503_v2 = vshrl.u32 %v9130_v49, 16  ;;  %v5506_v0 = vshll.u32 %v9130_v49, 16  ;;  %v3572_v63 = vpop.f32.mrb[31].mxu1  ;;  %v13564_v35 = vld [vmem:[#allocation2 + $0xc] sm:$0xff]  }
 0x2ea   : > { %v5546_v9 = vshrl.u32 %v9135_v23, 16  ;;  %v5549_v14 = vshll.u32 %v9135_v23, 16  ;;  %v5529_v40 = vshrl.u32 %v9133_v13, 16  ;;  %v5532_v55 = vshll.u32 %v9133_v13, 16  ;;  %v5808_v51 = vld [vmem:[#allocation2 + $0x30] sm:$0xf] }
 0x2eb   : > { %v5522_v10 = vrot.slane %v5520_v33, 7  ;;  %v5505_v18 = vrot.slane %v5503_v2, 7  ;;  %v13462_v60 = vpack.c.bf16 %v5341_v44, %v5341_v44  ;;  %5020 = vmatmul.mubr.bf16.gmra.mrb[168].mxu1 %v11888_v25  ;;  %v3701_v49 = vadd.f32 %v10868_v12, %v13385_v45  ;;  %v13471_v44 = vpop.f32.mrb[160].mxu0  ;;  %v11723_v58 = vld [vmem:[#allocation2 + $0x8] ss:$0 sps:$4 sm:$0x11]  }
 0x2ec   : > { %v13464_v15 = vrot.slane %v5546_v9, 7  ;;  %v13466_v50 = vrot.slane %v5529_v40, 7  ;;  %v3699_v36 = vadd.f32 %v10871_v22, %v13385_v45  ;;  %5027 = vmatprep.mubr.bf16.mxu1 %v15044_v61  ;;  %v13477_v56 = vpop.f32.mrb[161].mxu0  ;;  %v15087_v61 = vrot.slane %v13427_v52, 4 }
 0x2ed   : > { %v5525_v23 = vor.u32 %v5523_v11, %v5522_v10  ;;  %v5527_v13 = vrot.slane %v5522_v10, 4  ;;  %v5508_v33 = vor.u32 %v5506_v0, %v5505_v18  ;;  %v5510_v2 = vrot.slane %v5505_v18, 4  ;;  %v13491_v10 = vpop.f32.mrb[162].mxu0 }
 0x2ee   : > { %v5551_v25 = vor.u32 %v5549_v14, %v13464_v15  ;;  %v5552_v9 = vrot.slane %v13464_v15, 4  ;;  %v5534_v40 = vor.u32 %v5532_v55, %v13466_v50  ;;  %v5535_v3 = vrot.slane %v13466_v50, 4  ;;  %v10512_v12 = vpop.f32.mrb[32].mxu1 }
 0x2ef   : > { %v5526_v22 = vsel %vm12402_vm7, %v15087_v61, %v5525_v23  ;;  %v5806_v18 = vsel %vm12379_vm2, %v5527_v13, %v5805_v27  ;;  %v15088_v11 = vrot.slane %v13432_v8, 4  ;;  %v5799_v0 = vsel %vm12379_vm2, %v5510_v2, %v5798_v24  ;;  %v3585_v55 = vpop.f32.mrb[33].mxu1  ;;  %v13497_v23 = vpop.f32.mrb[163].mxu0 }
 0x2f0   : > { %5804 = vst [vmem:[#allocation2 + $0x28] sm:$0xf] %v5526_v22  ;;  %5807 = vst [vmem:[#allocation2 + $0x2c] sm:$0x1] %v5806_v18  ;;  %v5816_v52 = vsel %vm12408_vm8, %v5551_v25, %v5815_v53  ;;  %v5809_v27 = vsel %vm12408_vm8, %v5534_v40, %v5808_v51  ;;  %v5554_v8 = vshrl.u32 %v9136_v37, 16  ;;  %v5557_v15 = vshll.u32 %v9136_v37, 16 }
 0x2f1   : > { %v5509_v14 = vsel %vm12402_vm7, %v15088_v11, %v5508_v33  ;;  %5800 = vst [vmem:[#allocation2 + $0x20] sm:$0x1] %v5799_v0  ;;  %v10513_v50 = vpop.f32.mrb[34].mxu1  ;;  %5817 = vst [vmem:[#allocation2 + $0x3c] sm:$0xf] %v5816_v52  ;;  %v5537_v24 = vshrl.u32 %v13462_v60, 16  ;;  %v10874_v53 = vadd.f32 %v13244_v54, %v10509_v62  ;;  %v10877_v51 = vadd.f32 %v13234_v20, %v3572_v63 }
 0x2f2   : > { %5797 = vst [vmem:[#allocation2 + $0x1c] sm:$0xf] %v5509_v14  ;;  %5810 = vst [vmem:[#allocation2 + $0x30] sm:$0xf] %v5809_v27  ;;  %v5540_v13 = vshll.u32 %v13462_v60, 16  ;;  %v5346_v33 = vmax.f32 %v3701_v49, 0.0 }
 0x2f3   : > { %v5344_v2 = vmax.f32 %v3699_v36, 0.0  ;;  %v13501_v61 = vpop.f32.mrb[35].mxu1  ;;  %v5556_v22 = vrot.slane %v5554_v8, 7  ;;  %v15089_v25 = vld [vmem:[#allocation62_spill] sm:$0xff]  ;;  %v13506_v40 = vpop.f32.mrb[164].mxu0  ;;  %v5539_v11 = vrot.slane %v5537_v24, 7  ;;  %v3702_v54 = vadd.f32 %v10874_v53, %v13385_v45 }
 0x2f4   : > { %v10880_v37 = vadd.f32 %v15089_v25, %v10512_v12  ;;  %v5819_v18 = vld [vmem:[#allocation2 + $0x44] sm:$0x1]  ;;  %v9139_v14 = vpack.c.bf16 %v5346_v33, %v5346_v33  ;;  %v15090_v52 = vld [vmem:[#allocation23_spill] sm:$0xff]  ;;  %v13509_v49 = vpop.f32.mrb[165].mxu0  ;;  %v3700_v20 = vadd.f32 %v10877_v51, %v13385_v45 }
 0x2f5   : > { %v9137_v0 = vpack.c.bf16 %v5344_v2, %v5344_v2  ;;  %v10883_v27 = vadd.f32 %v15090_v52, %v3585_v55  ;;  %v11889_v60 = vld [vmem:[#allocation2 + $0x60] sm:$0xff]   ;;  %v5559_v36 = vor.u32 %v5557_v15, %v5556_v22  ;;  %v5561_v8 = vrot.slane %v5556_v22, 4  ;;  %v13514_v62 = vpop.f32.mrb[166].mxu0  ;;  %v5829_v22 = vld [vmem:[#allocation2 + $0x54] sm:$0xf] }
 0x2f6   : > { %5028 = vmatmul.mubr.bf16.gmra.mrb[172].mxu1 %v11889_v60  ;;  %v5542_v63 = vor.u32 %v5540_v13, %v5539_v11  ;;  %v5544_v12 = vrot.slane %v5539_v11, 4  ;;  %v5580_v24 = vshrl.u32 %v9139_v14, 16  ;;  %v5583_v33 = vshll.u32 %v9139_v14, 16  ;;  %v13516_v55 = vpop.f32.mrb[167].mxu0  ;;  %v13522_v51 = vpop.f32.mrb[36].mxu1 }
 0x2f7   : > { %5035 = vmatprep.mubr.bf16.mxu1 %v15049_v42  ;;  %v5560_v2 = vsel %vm12402_vm7, %v5552_v9, %v5559_v36  ;;  %v5820_v15 = vsel %vm12379_vm2, %v5561_v8, %v5819_v18  ;;  %v5563_v53 = vshrl.u32 %v9137_v0, 16  ;;  %v5566_v25 = vshll.u32 %v9137_v0, 16  ;;  %v13530_v9 = vpop.f32.mrb[37].mxu1  ;;  %v5822_v8 = vld [vmem:[#allocation2 + $0x48] sm:$0xf] }
 0x2f8   : > { %5818 = vst [vmem:[#allocation2 + $0x40] sm:$0xf] %v5560_v2  ;;  %5821 = vst [vmem:[#allocation2 + $0x44] sm:$0x1] %v5820_v15  ;;  %v5543_v42 = vsel %vm12402_vm7, %v5535_v3, %v5542_v63  ;;  %v5813_v13 = vsel %vm12379_vm2, %v5544_v12, %v5812_v29  ;;  %v13528_v11 = vrot.slane %v5580_v24, 7  ;;  %v5347_v14 = vmax.f32 %v3702_v54, 0.0 }
 0x2f9   : > { %5811 = vst [vmem:[#allocation2 + $0x34] sm:$0xf] %v5543_v42  ;;  %5814 = vst [vmem:[#allocation2 + $0x38] sm:$0x1] %v5813_v13  ;;  %v13532_v18 = vrot.slane %v5563_v53, 7  ;;  %v5345_v0 = vmax.f32 %v3700_v20, 0.0  ;;  %v3705_v52 = vadd.f32 %v10880_v37, %v13385_v45  ;;  %v3703_v60 = vadd.f32 %v10883_v27, %v13385_v45 }
 0x2fa   : > { %v13536_v36 = vpop.f32.mrb[38].mxu1  ;;  %v5585_v3 = vor.u32 %v5583_v33, %v13528_v11  ;;  %v5586_v29 = vrot.slane %v13528_v11, 4  ;;  %v9140_v63 = vpack.c.bf16 %v5347_v14, %v5347_v14  ;;  %v15091_v54 = vld [vmem:[#allocation63_spill] sm:$0xff]  ;;  %v13541_v24 = vld [vmem:[#allocation2] sm:$0xff]   ;;  %v13549_v14 = vpop.f32.mrb[168].mxu0 }
 0x2fb   : > { %v10886_v12 = vadd.f32 %v15091_v54, %v10513_v50  ;;  %v13543_v2 = vpop.f32.mrb[39].mxu1  ;;  %v5568_v20 = vor.u32 %v5566_v25, %v13532_v18  ;;  %v5569_v37 = vrot.slane %v13532_v18, 4  ;;  %v9138_v15 = vpack.c.bf16 %v5345_v0, %v5345_v0  ;;  %v11890_v11 = vld [vmem:[#allocation2 + $0x6c] sm:$0xff]   ;;  %15092 = vst [vmem:[#allocation20_spill] sm:$0xff] %v13549_v14  ;;  %v5833_v54 = vld [vmem:[#allocation2 + $0x5c] sm:$0x1] }
 0x2fc   : > { %v5350_v27 = vmax.f32 %v3705_v52, 0.0  ;;  %v5830_v53 = vsel %vm12408_vm8, %v5585_v3, %v5829_v22  ;;  %v5588_v33 = vshrl.u32 %v9140_v63, 16  ;;  %v5591_v42 = vshll.u32 %v9140_v63, 16  ;;  %v13554_v0 = vpop.f32.mrb[169].mxu0  ;;  %v5826_v52 = vld [vmem:[#allocation2 + $0x50] sm:$0x1] }
 0x2fd   : > { %v5348_v13 = vmax.f32 %v3703_v60, 0.0  ;;  %5831 = vst [vmem:[#allocation2 + $0x54] sm:$0xf] %v5830_v53  ;;  %v5823_v50 = vsel %vm12408_vm8, %v5568_v20, %v5822_v8  ;;  %v5571_v25 = vshrl.u32 %v9138_v15, 16  ;;  %v5574_v32 = vshll.u32 %v9138_v15, 16  ;;  %15093 = vst [vmem:[#allocation19_spill] sm:$0xff] %v13554_v0 }
 0x2fe   : > { %5036 = vmatmul.mubr.bf16.gmra.mrb[176].mxu1 %v11890_v11  ;;  %v9143_v18 = vpack.c.bf16 %v5350_v27, %v5350_v27  ;;  %5824 = vst [vmem:[#allocation2 + $0x48] sm:$0xf] %v5823_v50  ;;  %v5590_v22 = vrot.slane %v5588_v33, 7  ;;  %v3706_v3 = vadd.f32 %v10886_v12, %v13385_v45  ;;  %v15094_v63 = vld [vmem:[#allocation25_spill] sm:$0xff]  ;;  %v13559_v11 = vpop.f32.mrb[170].mxu0  ;;  %v13561_v8 = vld [vmem:[#allocation9 + $0x140] sm:$0xff]  }
 0x2ff   : > { %5043 = vmatprep.mubr.bf16.mxu1 %v15055_v28  ;;  %v9141_v60 = vpack.c.bf16 %v5348_v13, %v5348_v13  ;;  %v10889_v53 = vadd.f32 %v15094_v63, %v13501_v61  ;;  %15095 = vst [vmem:[#allocation18_spill] sm:$0xff] %v13559_v11  ;;  %15096 = vst [vmem:[#allocation22_spill] sm:$0xff] %v13561_v8  ;;  %v5573_v20 = vrot.slane %v5571_v25, 7  ;;  %v13566_v33 = vpop.f32.mrb[40].mxu1  ;;  %v13568_v13 = vpop.f32.mrb[171].mxu0  ;;  %10670 = vmatprep.subr.bf16.mxu1 %v13561_v8 }
 0x300   : > { %v5614_v15 = vshrl.u32 %v9143_v18, 16  ;;  %v5617_v27 = vshll.u32 %v9143_v18, 16  ;;  %15097 = vst [vmem:[#allocation62_spill] sm:$0xff] %v13568_v13  ;;  %v5593_v12 = vor.u32 %v5591_v42, %v5590_v22  ;;  %v5595_v50 = vrot.slane %v5590_v22, 4  ;;  %v13570_v21 = vpop.f32.mrb[41].mxu1 }
 0x301   : > { %v5597_v61 = vshrl.u32 %v9141_v60, 16  ;;  %v5600_v63 = vshll.u32 %v9141_v60, 16  ;;  %v5576_v25 = vor.u32 %v5574_v32, %v5573_v20  ;;  %v5578_v18 = vrot.slane %v5573_v20, 4  ;;  %v13575_v26 = vpop.f32.mrb[42].mxu1  ;;  %v5836_v60 = vld [vmem:[#allocation2 + $0x60] sm:$0xf] }
 0x302   : > { %v13573_v11 = vrot.slane %v5614_v15, 7  ;;  %v5351_v28 = vmax.f32 %v3706_v3, 0.0  ;;  %v5594_v47 = vsel %vm12402_vm7, %v5586_v29, %v5593_v12  ;;  %v5834_v42 = vsel %vm12379_vm2, %v5595_v50, %v5833_v54  ;;  %v13584_v0 = vpop.f32.mrb[43].mxu1  ;;  %v11727_v54 = vld [vmem:[#allocation2 + $0x14] ss:$0 sps:$4 sm:$0x11]  }
 0x303   : > { %v13581_v22 = vrot.slane %v5597_v61, 7  ;;  %v3704_v13 = vadd.f32 %v10889_v53, %v13385_v45  ;;  %5832 = vst [vmem:[#allocation2 + $0x58] sm:$0xf] %v5594_v47  ;;  %5835 = vst [vmem:[#allocation2 + $0x5c] sm:$0x1] %v5834_v42  ;;  %v5577_v32 = vsel %vm12402_vm7, %v5569_v37, %v5576_v25  ;;  %v5827_v3 = vsel %vm12379_vm2, %v5578_v18, %v5826_v52  ;;  %v13592_v15 = vpop.f32.mrb[172].mxu0 }
 0x304   : > { %v5619_v29 = vor.u32 %v5617_v27, %v13573_v11  ;;  %v5620_v20 = vrot.slane %v13573_v11, 4  ;;  %15098 = vst [vmem:[#allocation23_spill] sm:$0xff] %v13592_v15  ;;  %5825 = vst [vmem:[#allocation2 + $0x4c] sm:$0xf] %v5577_v32  ;;  %v9144_v12 = vpack.c.bf16 %v5351_v28, %v5351_v28  ;;  %v11891_v61 = vld [vmem:[#allocation2 + $0x78] sm:$0xff]   ;;  %v13596_v37 = vpop.f32.mrb[173].mxu0 }
 0x305   : > { %5828 = vst [vmem:[#allocation2 + $0x50] sm:$0x1] %v5827_v3  ;;  %v5602_v53 = vor.u32 %v5600_v63, %v13581_v22  ;;  %v5349_v50 = vmax.f32 %v3704_v13, 0.0  ;;  %15099 = vst [vmem:[#allocation63_spill] sm:$0xff] %v13596_v37  ;;  %v6215_v11 = vshll.u32 %v13541_v24, 16  ;;  %v6220_v27 = vshll.u32 %v11723_v58, 16 }
 0x306   : > { %5044 = vmatmul.mubr.bf16.gmra.mrb[180].mxu1 %v11891_v61  ;;  %v5844_v52 = vsel %vm12408_vm8, %v5619_v29, %v5843_v5  ;;  %v6225_v25 = vshrl.u32 %v13564_v35, 16  ;;  %v13603_v18 = vpop.f32.mrb[174].mxu0  ;;  %v5622_v13 = vshrl.u32 %v9144_v12, 16  ;;  %v5625_v63 = vshll.u32 %v9144_v12, 16  ;;  %v5847_v5 = vld [vmem:[#allocation2 + $0x74] sm:$0x1] }
 0x307   : > { %5051 = vmatprep.mubr.bf16.mxu1 %v15062_v30  ;;  %15100 = vst [vmem:[#allocation25_spill] sm:$0xff] %v13603_v18  ;;  %5845 = vst [vmem:[#allocation2 + $0x6c] sm:$0xf] %v5844_v52  ;;  %v5837_v28 = vsel %vm12408_vm8, %v5602_v53, %v5836_v60  ;;  %v9142_v42 = vpack.c.bf16 %v5349_v50, %v5349_v50  ;;  %v13607_v32 = vpop.f32.mrb[175].mxu0  ;;  %v6217_v3 = vrot.slane %v6215_v11, 1  ;;  %v6222_v29 = vrot.slane %v6220_v27, 1 }
 0x308   : > { %15101 = vst [vmem:[#allocation72_spill] sm:$0xff] %v13607_v32  ;;  %5838 = vst [vmem:[#allocation2 + $0x60] sm:$0xf] %v5837_v28  ;;  %v6227_v58 = vshll.u32 %v13564_v35, 16  ;;  %v6232_v61 = vshll.u32 %v11727_v54, 16  ;;  %v13610_v47 = vpop.f32.mrb[44].mxu1 }
 0x309   : > { %v5624_v30 = vrot.slane %v5622_v13, 7  ;;  %v5605_v8 = vshrl.u32 %v9142_v42, 16  ;;  %v5608_v52 = vshll.u32 %v9142_v42, 16  ;;  %v11728_v18 = vld [vmem:[#allocation9] sm:$0xff]   ;;  %v15102_v60 = vld [vmem:[#allocation29_spill] sm:$0xff]  ;;  %v13614_v12 = vpop.f32.mrb[45].mxu1 }
 0x30a   : > { %v10892_v53 = vadd.f32 %v15102_v60, %v13522_v51  ;;  %15103 = vst [vmem:[#allocation29_spill] sm:$0xff] %v13614_v12  ;;  %v5840_v50 = vld [vmem:[#allocation2 + $0x68] sm:$0x1]  ;;  %v15104_v28 = vshrl.u32 %v13541_v24, 16  ;;  %v6229_v11 = vrot.slane %v6227_v58, 1  ;;  %v6234_v27 = vrot.slane %v6232_v61, 1 }
 0x30b   : > { %v15105_v35 = vld [vmem:[#allocation64_spill] sm:$0xff]  ;;  %v13620_v37 = vld [vmem:[#allocation2 + $0x18] sm:$0xff]   ;;  %v11734_v13 = vld [vmem:[#allocation9 + $0x48] sm:$0xff]   ;;  %v13622_v15 = vpop.f32.mrb[46].mxu1  ;;  %v5627_v42 = vor.u32 %v5625_v63, %v5624_v30  ;;  %v5629_v14 = vrot.slane %v5624_v30, 4  ;;  %v5607_v41 = vrot.slane %v5605_v8, 7  ;;  %v13633_v61 = vadd.f32 %v13408_v48, %v13406_v57 }
 0x30c   : > { %v6218_v32 = vor.u32 %v6217_v3, %v15104_v28  ;;  %v10895_v54 = vadd.f32 %v15105_v35, %v13530_v9  ;;  %v3709_v51 = vadd.f32 %v10892_v53, %v13385_v45  ;;  %v11732_v60 = vld [vmem:[#allocation2 + $0x20] ss:$0 sps:$4 sm:$0x11]   ;;  %v13625_v12 = vpop.f32.mrb[47].mxu1  ;;  %v6230_v58 = vor.u32 %v6229_v11, %v6225_v25  ;;  %v13635_v28 = vpop.f32.mrb[176].mxu0 }
 0x30d   : > { %v11724_v3 = vld [vmem:[#allocation2] sm:$0xff]   ;;  %v5628_v8 = vsel %vm12402_vm7, %v5620_v20, %v5627_v42  ;;  %v5848_v63 = vsel %vm12379_vm2, %v5629_v14, %v5847_v5  ;;  %v5610_v30 = vor.u32 %v5608_v52, %v5607_v41  ;;  %v5612_v53 = vrot.slane %v5607_v41, 4  ;;  %v13642_v25 = vpop.f32.mrb[177].mxu0  ;;  %v15107_v20 = vld [vmem:[#allocation39_spill] sm:$0xff] }
 0x30e   : > { %v13628_v24 = vsel %vm1335_vm9, %v6218_v32, %v6222_v29  ;;  %v3707_v9 = vadd.f32 %v10895_v54, %v13385_v45  ;;  %v11892_v32 = vld [vmem:[#allocation2 + $0x84] sm:$0xff]   ;;  %5846 = vst [vmem:[#allocation2 + $0x70] sm:$0xf] %v5628_v8  ;;  %5849 = vst [vmem:[#allocation2 + $0x74] sm:$0x1] %v5848_v63  ;;  %v13645_v57 = vsel %vm1335_vm9, %v6230_v58, %v6234_v27  ;;  %v5354_v48 = vmax.f32 %v3709_v51, 0.0 }
 0x30f   : > { %7060 = vmatprep.mubr.bf16.mxu0 %v13628_v24  ;;  %5052 = vmatmul.mubr.bf16.gmra.mrb[184].mxu1 %v11892_v32  ;;  %15106 = vst [vmem:[#allocation64_spill] sm:$0xff] %v13645_v57  ;;  %v10898_v11 = vadd.f32 %v15107_v20, %v13536_v36  ;;  %v13649_v14 = vpop.f32.mrb[178].mxu0  ;;  %v15108_v41 = vrot.slane %v13581_v22, 4  ;;  %v5841_v52 = vsel %vm12379_vm2, %v5612_v53, %v5840_v50  ;;  %v15109_v27 = vld [vmem:[#allocation65_spill] sm:$0xff]  ;;  %v6237_v36 = vshrl.u32 %v13620_v37, 16  ;;  %v11737_v54 = vld [vmem:[#allocation9 + $0x8] sm:$0xff]  }
 0x310   : > { %7061 = vmatmul.mubr.bf16.vlgmr.msra.gmra.mrb[240].mxu0 %v11724_v3  ;;  %v5352_v29 = vmax.f32 %v3707_v9, 0.0  ;;  %5059 = vmatprep.mubr.bf16.mxu1 %v15065_v7  ;;  %v10901_v35 = vadd.f32 %v15109_v27, %v13543_v2  ;;  %v13662_v42 = vpop.f32.mrb[179].mxu0  ;;  %v11743_v7 = vld [vmem:[#allocation9 + $0x50] sm:$0xff]   ;;  %5842 = vst [vmem:[#allocation2 + $0x68] sm:$0x1] %v5841_v52  ;;  %v9147_v22 = vpack.c.bf16 %v5354_v48, %v5354_v48  ;;  %v6239_v58 = vshll.u32 %v13620_v37, 16 }
 0x311   : > { %v5611_v5 = vsel %vm12402_vm7, %v15108_v41, %v5610_v30  ;;  %7068 = vmatprep.mubr.bf16.mxu0 %v13645_v57  ;;  %10111 = vmatpush3.bf16.msra.mxu0 %v11728_v18  ;;  %v3710_v3 = vadd.f32 %v10898_v11, %v13385_v45  ;;  %v13667_v50 = vadd.f32 %v13415_v17, %v13411_v34  ;;  %v6244_v9 = vshll.u32 %v11732_v60, 16  ;;  %v11746_v8 = vld [vmem:[#allocation9 + $0x10] sm:$0xff]   ;;  %v5857_v48 = vld [vmem:[#allocation2 + $0x84] sm:$0xf]  ;;  %v13685_v60 = vpop.f32.mrb[180].mxu0 }
 0x312   : > { %5839 = vst [vmem:[#allocation2 + $0x64] sm:$0xf] %v5611_v5  ;;  %v9145_v51 = vpack.c.bf16 %v5352_v29, %v5352_v29  ;;  %10112 = vmatprep.subr.bf16.mxu0 %v11734_v13  ;;  %v3708_v18 = vadd.f32 %v10901_v35, %v13385_v45  ;;  %v13672_v2 = vadd.f32 %v13443_v31, %v13437_v38  ;;  %v5648_v63 = vshrl.u32 %v9147_v22, 16  ;;  %v5850_v29 = vld [vmem:[#allocation2 + $0x78] sm:$0xf]  ;;  %v11730_v38 = vld [vmem:[#allocation2 + $0xc] sm:$0xff]  }
 0x313   : > { %v5651_v30 = vshll.u32 %v9147_v22, 16  ;;  %v5355_v20 = vmax.f32 %v3710_v3, 0.0  ;;  %v6241_v34 = vrot.slane %v6239_v58, 1  ;;  %v6246_v13 = vrot.slane %v6244_v9, 1  ;;  %v11752_v5 = vld [vmem:[#allocation9 + $0x58] sm:$0xff]   ;;  %v13689_v3 = vpop.f32.mrb[181].mxu0 }
 0x314   : > { %v5631_v53 = vshrl.u32 %v9145_v51, 16  ;;  %v5634_v32 = vshll.u32 %v9145_v51, 16  ;;  %v5353_v17 = vmax.f32 %v3708_v18, 0.0  ;;  %v13675_v11 = vrot.slane %v5648_v63, 7  ;;  %v11893_v51 = vld [vmem:[#allocation2 + $0x90] sm:$0xff]  }
 0x315   : > { %10113 = vmatpush3.bf16.msra.mxu0 %v11737_v54  ;;  %v13681_v31 = vadd.f32 %v13458_v19, %v13450_v4  ;;  %v10904_v37 = vadd.f32 %v13302_v59, %v13566_v33  ;;  %v9148_v52 = vpack.c.bf16 %v5355_v20, %v5355_v20  ;;  %v6242_v35 = vor.u32 %v6241_v34, %v6237_v36  ;;  %v15110_v54 = vld [vmem:[#allocation31_spill] sm:$0xff]  ;;  %v11755_v36 = vld [vmem:[#allocation9 + $0x18] sm:$0xff]  }
 0x316   : > { %v13677_v41 = vrot.slane %v5631_v53, 7  ;;  %10114 = vmatprep.subr.bf16.mxu0 %v11743_v7  ;;  %v9146_v27 = vpack.c.bf16 %v5353_v17, %v5353_v17  ;;  %v10907_v22 = vadd.f32 %v15110_v54, %v13570_v21  ;;  %v5653_v4 = vor.u32 %v5651_v30, %v13675_v11  ;;  %v13695_v7 = vpop.f32.mrb[182].mxu0  ;;  %v11764_v30 = vld [vmem:[#allocation9 + $0x60] sm:$0xff]   ;;  %v5861_v34 = vld [vmem:[#allocation2 + $0x8c] sm:$0x1] }
 0x317   : > { %5060 = vmatmul.mubr.bf16.gmra.mrb[188].mxu1 %v11893_v51  ;;  %v5654_v19 = vrot.slane %v13675_v11, 4  ;;  %v5656_v18 = vshrl.u32 %v9148_v52, 16  ;;  %v5659_v21 = vshll.u32 %v9148_v52, 16  ;;  %v13698_v63 = vpop.f32.mrb[183].mxu0  ;;  %v13705_v20 = vsel %vm1335_vm9, %v6242_v35, %v6246_v13  ;;  %v5854_v11 = vld [vmem:[#allocation2 + $0x80] sm:$0x1] }
 0x318   : > { %v5636_v59 = vor.u32 %v5634_v32, %v13677_v41  ;;  %v5637_v33 = vrot.slane %v13677_v41, 4  ;;  %7069 = vmatmul.mubr.bf16.gmra.mrb[244].mxu0 %v11730_v38  ;;  %5067 = vmatprep.mubr.bf16.mxu1 %v15007_v6  ;;  %v5639_v58 = vshrl.u32 %v9146_v27, 16  ;;  %v5642_v9 = vshll.u32 %v9146_v27, 16  ;;  %15111 = vst [vmem:[#allocation39_spill] sm:$0xff] %v13705_v20  ;;  %v15112_v13 = vld [vmem:[#allocation54_spill] sm:$0xff] }
 0x319   : > { %10115 = vmatpush3.bf16.msra.mxu0 %v11746_v8  ;;  %v5858_v53 = vsel %vm12408_vm8, %v5653_v4, %v5857_v48  ;;  %v3713_v6 = vadd.f32 %v10904_v37, %v13385_v45  ;;  %v5658_v17 = vrot.slane %v5656_v18, 7  ;;  %7076 = vmatprep.mubr.bf16.mxu0 %v13705_v20  ;;  %v3711_v41 = vadd.f32 %v10907_v22, %v13385_v45  ;;  %v15113_v37 = vld [vmem:[#allocation41_spill] sm:$0xff]  ;;  %v11767_v27 = vld [vmem:[#allocation9 + $0x20] sm:$0xff]  }
 0x31a   : > { %v5851_v32 = vsel %vm12408_vm8, %v5636_v59, %v5850_v29  ;;  %10116 = vmatprep.subr.bf16.mxu0 %v11752_v5  ;;  %5859 = vst [vmem:[#allocation2 + $0x84] sm:$0xf] %v5858_v53  ;;  %v5641_v8 = vrot.slane %v5639_v58, 7  ;;  %v13712_v48 = vadd.f32 %v13477_v56, %v13471_v44  ;;  %v10910_v38 = vadd.f32 %v15112_v13, %v13575_v26  ;;  %v11733_v22 = vld [vmem:[#allocation2 + $0x18] sm:$0xff]   ;;  %v11735_v4 = vld [vmem:[#allocation2 + $0x24] sm:$0xff]  }
 0x31b   : > { %5852 = vst [vmem:[#allocation2 + $0x78] sm:$0xf] %v5851_v32  ;;  %v5358_v29 = vmax.f32 %v3713_v6, 0.0  ;;  %v10913_v5 = vadd.f32 %v15113_v37, %v13584_v0  ;;  %v13720_v52 = vadd.f32 %v13497_v23, %v13491_v10  ;;  %v5661_v35 = vor.u32 %v5659_v21, %v5658_v17  ;;  %v11773_v56 = vld [vmem:[#allocation9 + $0x68] sm:$0xff]   ;;  %v13725_v26 = vld [vmem:[%s14787_s2] ss:$0 sm:$0xff] }
 0x31c   : > { %v5663_v54 = vrot.slane %v5658_v17, 4  ;;  %v5644_v51 = vor.u32 %v5642_v9, %v5641_v8  ;;  %v5646_v45 = vrot.slane %v5641_v8, 4  ;;  %v5356_v59 = vmax.f32 %v3711_v41, 0.0  ;;  %v13729_v23 = vpop.f32.mrb[184].mxu0  ;;  %v11895_v53 = vld [vmem:[#allocation2 + $0x9c] sm:$0xff]  }
 0x31d   : > { %10117 = vmatpush3.bf16.msra.mxu0 %v11755_v36  ;;  %v9151_v44 = vpack.c.bf16 %v5358_v29, %v5358_v29  ;;  %v3714_v0 = vadd.f32 %v13725_v26, %v10910_v38  ;;  %v3712_v10 = vadd.f32 %v13725_v26, %v10913_v5  ;;  %v5662_v18 = vsel %vm12402_vm7, %v5654_v19, %v5661_v35  ;;  %v11736_v9 = vld [vmem:[#allocation2 + $0x2c] ss:$0 sps:$4 sm:$0x11]   ;;  %v13739_v32 = vpop.f32.mrb[185].mxu0 }
 0x31e   : > { %10118 = vmatprep.subr.bf16.mxu0 %v11764_v30  ;;  %v5862_v36 = vsel %vm12379_vm2, %v5663_v54, %v5861_v34  ;;  %v5645_v21 = vsel %vm12402_vm7, %v5637_v33, %v5644_v51  ;;  %v5855_v58 = vsel %vm12379_vm2, %v5646_v45, %v5854_v11  ;;  %5860 = vst [vmem:[#allocation2 + $0x88] sm:$0xf] %v5662_v18  ;;  %v13741_v34 = vpop.f32.mrb[186].mxu0  ;;  %v5871_v33 = vld [vmem:[#allocation2 + $0x9c] sm:$0xf]  ;;  %v6249_v41 = vshrl.u32 %v11735_v4, 16 }
 0x31f   : > { %5068 = vmatmul.mubr.bf16.gmra.mrb[192].mxu1 %v11895_v53  ;;  %5863 = vst [vmem:[#allocation2 + $0x8c] sm:$0x1] %v5862_v36  ;;  %5853 = vst [vmem:[#allocation2 + $0x7c] sm:$0xf] %v5645_v21  ;;  %v5682_v30 = vshrl.u32 %v9151_v44, 16  ;;  %v5685_v19 = vshll.u32 %v9151_v44, 16  ;;  %v9149_v6 = vpack.c.bf16 %v5356_v59, %v5356_v59  ;;  %v13746_v11 = vadd.f32 %v13509_v49, %v13506_v40 }
 0x320   : > { %5856 = vst [vmem:[#allocation2 + $0x80] sm:$0x1] %v5855_v58  ;;  %v5359_v17 = vmax.f32 %v3714_v0, 0.0  ;;  %7077 = vmatmul.mubr.bf16.gmra.mrb[248].mxu0 %v11733_v22  ;;  %5075 = vmatprep.mubr.bf16.mxu1 %v15008_v16  ;;  %v5357_v8 = vmax.f32 %v3712_v10, 0.0  ;;  %v6251_v29 = vshll.u32 %v11735_v4, 16  ;;  %v13748_v13 = vpop.f32.mrb[187].mxu0  ;;  %v13752_v40 = vadd.f32 %v13516_v55, %v13514_v62 }
 0x321   : > { %10119 = vmatpush3.bf16.msra.mxu0 %v11767_v27  ;;  %v11776_v38 = vld [vmem:[#allocation9 + $0x28] sm:$0xff]   ;;  %v5684_v37 = vrot.slane %v5682_v30, 7  ;;  %v5665_v5 = vshrl.u32 %v9149_v6, 16  ;;  %v5668_v35 = vshll.u32 %v9149_v6, 16  ;;  %v11781_v51 = vld [vmem:[#allocation9 + $0x70] sm:$0xff]   ;;  %v6256_v44 = vshll.u32 %v11736_v9, 16 }
 0x322   : > { %v9152_v54 = vpack.c.bf16 %v5359_v17, %v5359_v17  ;;  %10120 = vmatprep.subr.bf16.mxu0 %v11773_v56  ;;  %v5864_v45 = vld [vmem:[#allocation2 + $0x90] sm:$0xf]  ;;  %v9150_v16 = vpack.c.bf16 %v5357_v8, %v5357_v8  ;;  %v6253_v22 = vrot.slane %v6251_v29, 1  ;;  %v5875_v10 = vld [vmem:[#allocation2 + $0xa4] sm:$0x1]  ;;  %v13756_v62 = vpop.f32.mrb[188].mxu0  ;;  %v10916_v17 = vadd.f32 %v13324_v1, %v13610_v47 }
 0x323   : > { %v5687_v49 = vor.u32 %v5685_v19, %v5684_v37  ;;  %v5688_v4 = vrot.slane %v5684_v37, 4  ;;  %v5667_v59 = vrot.slane %v5665_v5, 7  ;;  %v11784_v56 = vld [vmem:[#allocation9 + $0x30] sm:$0xff]   ;;  %v5868_v6 = vld [vmem:[#allocation2 + $0x98] sm:$0x1]  ;;  %v6258_v19 = vrot.slane %v6256_v44, 1 }
 0x324   : > { %v5690_v0 = vshrl.u32 %v9152_v54, 16  ;;  %v5693_v27 = vshll.u32 %v9152_v54, 16  ;;  %v5673_v18 = vshrl.u32 %v9150_v16, 16  ;;  %v5676_v36 = vshll.u32 %v9150_v16, 16  ;;  %v15114_v8 = vld [vmem:[#allocation29_spill] sm:$0xff]  ;;  %v13762_v37 = vld [vmem:[#allocation2 + $0x30] sm:$0xff]  }
 0x325   : > { %v6254_v21 = vor.u32 %v6253_v22, %v6249_v41  ;;  %10121 = vmatpush3.bf16.msra.mxu0 %v11776_v38  ;;  %v5872_v58 = vsel %vm12408_vm8, %v5687_v49, %v5871_v33  ;;  %v5670_v53 = vor.u32 %v5668_v35, %v5667_v59  ;;  %v5671_v9 = vrot.slane %v5667_v59, 4  ;;  %v15115_v41 = vld [vmem:[#allocation55_spill] sm:$0xff]  ;;  %v13764_v5 = vpop.f32.mrb[189].mxu0  ;;  %v11792_v35 = vld [vmem:[#allocation9 + $0x78] sm:$0xff]   ;;  %v15116_v22 = vld [vmem:[#allocation20_spill] sm:$0xff] }
 0x326   : > { %v5692_v30 = vrot.slane %v5690_v0, 7  ;;  %10122 = vmatprep.subr.bf16.mxu0 %v11781_v51  ;;  %5873 = vst [vmem:[#allocation2 + $0x9c] sm:$0xf] %v5872_v58  ;;  %v5675_v55 = vrot.slane %v5673_v18, 7  ;;  %v10919_v29 = vadd.f32 %v15115_v41, %v15114_v8  ;;  %v11739_v38 = vld [vmem:[#allocation2 + $0x24] sm:$0xff]   ;;  %v13772_v1 = vpop.f32.mrb[190].mxu0  ;;  %v3717_v58 = vadd.f32 %v13725_v26, %v10916_v17 }
 0x327   : > { %v11896_v33 = vld [vmem:[#allocation2 + $0xa8] sm:$0xff]   ;;  %v5865_v54 = vsel %vm12408_vm8, %v5670_v53, %v5864_v45  ;;  %v15118_v47 = vld [vmem:[#allocation26_spill] sm:$0xff]  ;;  %v13776_v18 = vsel %vm1335_vm9, %v6254_v21, %v6258_v19  ;;  %v11741_v8 = vld [vmem:[#allocation2 + $0x38] ss:$0 sps:$4 sm:$0x11]   ;;  %v13779_v45 = vpop.f32.mrb[191].mxu0  ;;  %v9732_v39 = vadd.f32 %v13739_v32, %v13729_v23  ;;  %v9735_v43 = vadd.f32 %v13748_v13, %v13741_v34 }
 0x328   : > { %5076 = vmatmul.mubr.bf16.gmra.mrb[196].mxu1 %v11896_v33  ;;  %v5695_v51 = vor.u32 %v5693_v27, %v5692_v30  ;;  %v5697_v16 = vrot.slane %v5692_v30, 4  ;;  %v15117_v44 = vld [vmem:[#allocation19_spill] sm:$0xff]  ;;  %5866 = vst [vmem:[#allocation2 + $0x90] sm:$0xf] %v5865_v54  ;;  %v5678_v59 = vor.u32 %v5676_v36, %v5675_v55  ;;  %v5680_v0 = vrot.slane %v5675_v55, 4  ;;  %15119 = vst [vmem:[#allocation65_spill] sm:$0xff] %v13776_v18 }
 0x329   : > { %v13770_v49 = vadd.f32 %v15117_v44, %v15116_v22  ;;  %5083 = vmatprep.mubr.bf16.mxu1 %v15118_v47  ;;  %10123 = vmatpush3.bf16.msra.mxu0 %v11784_v56  ;;  %v11795_v27 = vld [vmem:[#allocation9 + $0x38] sm:$0xff]   ;;  %v3715_v36 = vadd.f32 %v13725_v26, %v10919_v29  ;;  %v11801_v19 = vld [vmem:[#allocation9 + $0x1c0] sm:$0xff]   ;;  %v15121_v41 = vld [vmem:[#allocation24_spill] sm:$0xff]  ;;  %v6268_v47 = vshll.u32 %v11741_v8, 16  ;;  %v9738_v34 = vadd.f32 %v13764_v5, %v13756_v62 }
 0x32a   : > { %v5696_v53 = vsel %vm12402_vm7, %v5688_v4, %v5695_v51  ;;  %v5876_v30 = vsel %vm12379_vm2, %v5697_v16, %v5875_v10  ;;  %7084 = vmatprep.mubr.bf16.mxu0 %v13776_v18  ;;  %v15120_v21 = vld [vmem:[#allocation57_spill] sm:$0xff]  ;;  %v5679_v56 = vsel %vm12402_vm7, %v5671_v9, %v5678_v59  ;;  %v5869_v17 = vsel %vm12379_vm2, %v5680_v0, %v5868_v6  ;;  %v15122_v33 = vld [vmem:[#allocation18_spill] sm:$0xff]  ;;  %v15124_v16 = vld [vmem:[#allocation23_spill] sm:$0xff] }
 0x32b   : > { %v10922_v55 = vadd.f32 %v15120_v21, %v13622_v15  ;;  %5874 = vst [vmem:[#allocation2 + $0xa0] sm:$0xf] %v5696_v53  ;;  %5877 = vst [vmem:[#allocation2 + $0xa4] sm:$0x1] %v5876_v30  ;;  %v5362_v4 = vmax.f32 %v3717_v58, 0.0  ;;  %v10925_v10 = vadd.f32 %v15121_v41, %v13625_v12  ;;  %7085 = vmatmul.mubr.bf16.gmra.mrb[252].mxu0 %v11739_v38  ;;  %10124 = vmatprep.subr.bf16.mxu0 %v11792_v35  ;;  %v15123_v54 = vld [vmem:[#allocation62_spill] sm:$0xff] }
 0x32c   : > { %5867 = vst [vmem:[#allocation2 + $0x94] sm:$0xf] %v5679_v56  ;;  %5870 = vst [vmem:[#allocation2 + $0x98] sm:$0x1] %v5869_v17  ;;  %v5360_v29 = vmax.f32 %v3715_v36, 0.0  ;;  %v13798_v51 = vadd.f32 %v15123_v54, %v15122_v33  ;;  %v15125_v9 = vld [vmem:[#allocation63_spill] sm:$0xff] }
 0x32d   : > { %v3718_v15 = vadd.f32 %v13725_v26, %v10922_v55  ;;  %v13802_v22 = vadd.f32 %v15125_v9, %v15124_v16  ;;  %v9155_v6 = vpack.c.bf16 %v5362_v4, %v5362_v4  ;;  %v3716_v44 = vadd.f32 %v13725_v26, %v10925_v10  ;;  %10125 = vmatpush3.bf16.msra.mxu0 %v11795_v27  ;;  %v15126_v59 = vld [vmem:[#allocation25_spill] sm:$0xff]  ;;  %v15127_v0 = vld [vmem:[#allocation72_spill] sm:$0xff]  ;;  %v13810_v53 = vpop.f32.mrb[192].mxu0  ;;  %v11745_v16 = vld [vmem:[#allocation2 + $0x44] ss:$0 sps:$4 sm:$0x11]  }
 0x32e   : > { %v6263_v12 = vshll.u32 %v13762_v37, 16  ;;  %v9153_v38 = vpack.c.bf16 %v5360_v29, %v5360_v29  ;;  %v13808_v58 = vadd.f32 %v15127_v0, %v15126_v59  ;;  %10246 = vmatprep.subr.bf16.mxu0 %v11801_v19  ;;  %v6261_v21 = vshrl.u32 %v13762_v37, 16  ;;  %v11897_v56 = vld [vmem:[#allocation2 + $0xb4] sm:$0xff]   ;;  %v13813_v26 = vpop.f32.mrb[193].mxu0  ;;  %v5878_v19 = vld [vmem:[#allocation2 + $0xa8] sm:$0xf] }
 0x32f   : > { %v5363_v35 = vmax.f32 %v3718_v15, 0.0  ;;  %v5716_v30 = vshrl.u32 %v9155_v6, 16  ;;  %v5361_v36 = vmax.f32 %v3716_v44, 0.0  ;;  %v5719_v27 = vshll.u32 %v9155_v6, 16  ;;  %v5885_v17 = vld [vmem:[#allocation2 + $0xb4] sm:$0xf] }
 0x330   : > { %v6265_v55 = vrot.slane %v6263_v12, 1  ;;  %5084 = vmatmul.mubr.bf16.gmra.mrb[200].mxu1 %v11897_v56  ;;  %v5699_v4 = vshrl.u32 %v9153_v38, 16  ;;  %v5702_v8 = vshll.u32 %v9153_v38, 16  ;;  %v13815_v10 = vpop.f32.mrb[194].mxu0  ;;  %v15128_v29 = vmov 0  }
 0x331   : > { %v9156_v41 = vpack.c.bf16 %v5363_v35, %v5363_v35  ;;  %5091 = vmatprep.mubr.bf16.mxu1 %v15128_v29  ;;  %v5718_v15 = vrot.slane %v5716_v30, 7  ;;  %v9154_v33 = vpack.c.bf16 %v5361_v36, %v5361_v36  ;;  %v9720_v37 = vadd.f32 %v13642_v25, %v13635_v28  ;;  %v13820_v9 = vpop.f32.mrb[195].mxu0  ;;  %v11742_v35 = vld [vmem:[#allocation2 + $0x30] sm:$0xff]   ;;  %v5889_v30 = vld [vmem:[#allocation2 + $0xbc] sm:$0x1] }
 0x332   : > { %v6266_v54 = vor.u32 %v6265_v55, %v6261_v21  ;;  %v5701_v44 = vrot.slane %v5699_v4, 7  ;;  %v6270_v12 = vrot.slane %v6268_v47, 1  ;;  %v9723_v38 = vadd.f32 %v13662_v42, %v13649_v14  ;;  %v11744_v36 = vld [vmem:[#allocation2 + $0x3c] sm:$0xff]   ;;  %v5882_v4 = vld [vmem:[#allocation2 + $0xb0] sm:$0x1] }
 0x333   : > { %v5724_v6 = vshrl.u32 %v9156_v41, 16  ;;  %v5721_v59 = vor.u32 %v5719_v27, %v5718_v15  ;;  %v5722_v0 = vrot.slane %v5718_v15, 4  ;;  %v5727_v56 = vshll.u32 %v9156_v41, 16  ;;  %v15129_v14 = vld [vmem:[#allocation42_spill] sm:$0xff]  ;;  %v15130_v27 = vld [vmem:[#allocation56_spill] sm:$0xff] }
 0x334   : > { %v5707_v18 = vshrl.u32 %v9154_v33, 16  ;;  %v5704_v21 = vor.u32 %v5702_v8, %v5701_v44  ;;  %v5710_v20 = vshll.u32 %v9154_v33, 16  ;;  %v13825_v28 = vsel %vm1335_vm9, %v6266_v54, %v6270_v12  ;;  %v11750_v15 = vld [vmem:[#allocation2 + $0x50] ss:$0 sps:$4 sm:$0x11]  }
 0x335   : > { %v5726_v55 = vrot.slane %v5724_v6, 7  ;;  %v5886_v25 = vsel %vm12408_vm8, %v5721_v59, %v5885_v17  ;;  %7092 = vmatprep.mubr.bf16.mxu0 %v13825_v28  ;;  %v13831_v42 = vadd.f32 %v9720_v37, %v15129_v14  ;;  %v13834_v41 = vadd.f32 %v9723_v38, %v15130_v27  ;;  %v11749_v17 = vld [vmem:[#allocation2 + $0x48] sm:$0xff]  }
 0x336   : > { %v5709_v47 = vrot.slane %v5707_v18, 7  ;;  %5887 = vst [vmem:[#allocation2 + $0xb4] sm:$0xf] %v5886_v25  ;;  %v5705_v8 = vrot.slane %v5701_v44, 4  ;;  %v5879_v33 = vsel %vm12408_vm8, %v5704_v21, %v5878_v19  ;;  %7093 = vmatmul.mubr.bf16.gmra.mrb[0].mxu0 %v11742_v35  ;;  %v13838_v18 = vpop.f32.mrb[196].mxu0  ;;  %v6275_v37 = vshll.u32 %v11744_v36, 16 }
 0x337   : > { %v5729_v54 = vor.u32 %v5727_v56, %v5726_v55  ;;  %v5731_v6 = vrot.slane %v5726_v55, 4  ;;  %5880 = vst [vmem:[#allocation2 + $0xa8] sm:$0xf] %v5879_v33  ;;  %v6280_v14 = vshll.u32 %v11745_v16, 16  ;;  %v13841_v38 = vpop.f32.mrb[197].mxu0  ;;  %v9726_v19 = vadd.f32 %v13689_v3, %v13685_v60  ;;  %v15131_v21 = vld [vmem:[#allocation27_spill] sm:$0xff] }
 0x338   : > { %v5712_v12 = vor.u32 %v5710_v20, %v5709_v47  ;;  %v5714_v59 = vrot.slane %v5709_v47, 4  ;;  %5092 = vmatmul.mubr.bf16.gmra.mrb[204].mxu1 %v15128_v29  ;;  %v9729_v35 = vadd.f32 %v13698_v63, %v13695_v7  ;;  %v11753_v20 = vld [vmem:[#allocation2 + $0x54] sm:$0xff]   ;;  %v9751_v56 = vpop.f32.mrb[198].mxu0  ;;  %v6273_v55 = vshrl.u32 %v11744_v36, 16 }
 0x339   : > { %v5730_v44 = vsel %vm12402_vm7, %v5722_v0, %v5729_v54  ;;  %v5890_v46 = vsel %vm12379_vm2, %v5731_v6, %v5889_v30  ;;  %10638 = vmatprep.mubr.bf16.mxu1 %v15131_v21  ;;  %v6277_v30 = vrot.slane %v6275_v37, 1  ;;  %v9752_v25 = vpop.f32.mrb[199].mxu0  ;;  %v6282_v60 = vrot.slane %v6280_v14, 1  ;;  %v15132_v3 = vld [vmem:[#allocation33_spill] sm:$0xff]  ;;  %v15134_v37 = vld [vmem:[#allocation58_spill] sm:$0xff]  ;;  %v15136_v21 = vld [vmem:[#allocation28_spill] sm:$0xff] }
 0x33a   : > { %5888 = vst [vmem:[#allocation2 + $0xb8] sm:$0xf] %v5730_v44  ;;  %5891 = vst [vmem:[#allocation2 + $0xbc] sm:$0x1] %v5890_v46  ;;  %v5713_v16 = vsel %vm12402_vm7, %v5705_v8, %v5712_v12  ;;  %v5883_v0 = vsel %vm12379_vm2, %v5714_v59, %v5882_v4  ;;  %v13857_v7 = vadd.f32 %v9726_v19, %v15132_v3  ;;  %v15133_v63 = vld [vmem:[#allocation45_spill] sm:$0xff]  ;;  %v6287_v27 = vshll.u32 %v11749_v17, 16 }
 0x33b   : > { %5881 = vst [vmem:[#allocation2 + $0xac] sm:$0xf] %v5713_v16  ;;  %5884 = vst [vmem:[#allocation2 + $0xb0] sm:$0x1] %v5883_v0  ;;  %v13860_v47 = vadd.f32 %v9729_v35, %v15133_v63  ;;  %v6278_v33 = vor.u32 %v6277_v30, %v6273_v55  ;;  %v6292_v54 = vshll.u32 %v11750_v15, 16  ;;  %v6285_v4 = vshrl.u32 %v11749_v17, 16 }
 0x33c   : > { %v11754_v36 = vld [vmem:[#allocation2 + $0x5c] ss:$0 sps:$4 sm:$0x11]   ;;  %v6289_v8 = vrot.slane %v6287_v27, 1  ;;  %v6299_v6 = vshll.u32 %v11753_v20, 16  ;;  %v13870_v14 = vadd.f32 %v9732_v39, %v15134_v37  ;;  %v15135_v44 = vld [vmem:[#allocation59_spill] sm:$0xff]  ;;  %v9741_v19 = vadd.f32 %v13779_v45, %v13772_v1 }
 0x33d   : > { %v13867_v12 = vsel %vm1335_vm9, %v6278_v33, %v6282_v60  ;;  %v11748_v59 = vld [vmem:[#allocation2 + $0x3c] sm:$0xff]   ;;  %v13873_v46 = vadd.f32 %v9735_v43, %v15135_v44  ;;  %v6294_v32 = vrot.slane %v6292_v54, 1  ;;  %v9754_v13 = vpop.f32.mrb[200].mxu0  ;;  %v11789_v15 = vld [vmem:[#allocation9 + $0x148] sm:$0xff]   ;;  %v15137_v55 = vld [vmem:[#allocation36_spill] sm:$0xff]  ;;  %v9744_v62 = vadd.f32 %v13813_v26, %v13810_v53 }
 0x33e   : > { %7100 = vmatprep.mubr.bf16.mxu0 %v13867_v12  ;;  %v6290_v23 = vor.u32 %v6289_v8, %v6285_v4  ;;  %v6301_v17 = vrot.slane %v6299_v6, 1  ;;  %v11759_v35 = vld [vmem:[#allocation2 + $0x60] sm:$0xff]   ;;  %v9755_v16 = vpop.f32.mrb[201].mxu0  ;;  %v13885_v30 = vadd.f32 %v9738_v34, %v15137_v55  ;;  %v6297_v3 = vshrl.u32 %v11753_v20, 16  ;;  %v15139_v45 = vld [vmem:[#allocation47_spill] sm:$0xff]  ;;  %v15141_v39 = vld [vmem:[#allocation60_spill] sm:$0xff] }
 0x33f   : > { %7101 = vmatmul.mubr.bf16.gmra.mrb[4].mxu0 %v11748_v59  ;;  %v9757_v5 = vpop.f32.mrb[202].mxu0  ;;  %v15138_v60 = vld [vmem:[#allocation30_spill] sm:$0xff]  ;;  %v6304_v1 = vshll.u32 %v11754_v36, 16  ;;  %v13892_v63 = vadd.f32 %v9741_v19, %v15139_v45  ;;  %v9747_v27 = vadd.f32 %v13820_v9, %v13815_v10  ;;  %v13898_v43 = vadd.f32 %v9744_v62, %v15141_v39  ;;  %v11791_v53 = vld [vmem:[#allocation9 + $0x150] sm:$0xff]   ;;  %v15142_v8 = vld [vmem:[#allocation61_spill] sm:$0xff] }
 0x340   : > { %10639 = vmatmul.mubr.bf16.vlgmr.msra.gmra.mrb[112].mxu1 %v15136_v21  ;;  %v13882_v0 = vsel %vm1335_vm9, %v6290_v23, %v6294_v32  ;;  %v9758_v33 = vpop.f32.mrb[203].mxu0  ;;  %v15140_v54 = vld [vmem:[#allocation22_spill] sm:$0xff]  ;;  %v6302_v26 = vor.u32 %v6301_v17, %v6297_v3  ;;  %v6311_v4 = vshll.u32 %v11759_v35, 16  ;;  %v9750_v20 = vadd.f32 %v13841_v38, %v13838_v18  ;;  %v11760_v36 = vld [vmem:[#allocation2 + $0x68] ss:$0 sps:$4 sm:$0x11]  }
 0x341   : > { %10642 = vmatprep.mubr.bf16.mxu1 %v15138_v60  ;;  %7108 = vmatprep.mubr.bf16.mxu0 %v13882_v0  ;;  %v13901_v6 = vadd.f32 %v9747_v27, %v15142_v8  ;;  %v9753_v59 = vadd.f32 %v9752_v25, %v9751_v56  ;;  %v13905_v37 = vld [vmem:[#allocation2 + $0x48] sm:$0xff]   ;;  %v6306_v10 = vrot.slane %v6304_v1, 1  ;;  %v15143_v9 = vld [vmem:[#allocation34_spill] sm:$0xff]  ;;  %v9756_v34 = vadd.f32 %v9755_v16, %v9754_v13  ;;  %v9760_v17 = vpop.f32.mrb[204].mxu0  ;;  %v11796_v19 = vld [vmem:[#allocation9 + $0x158] sm:$0xff]  }
 0x342   : > { %10671 = vmatpush3.bf16.msra.mxu1 %v15140_v54  ;;  %v13908_v44 = vadd.f32 %v9750_v20, %v15143_v9  ;;  %v15144_v23 = vld [vmem:[#allocation51_spill] sm:$0xff]  ;;  %v6313_v38 = vrot.slane %v6311_v4, 1  ;;  %v9759_v25 = vadd.f32 %v9758_v33, %v9757_v5  ;;  %v15146_v21 = vld [vmem:[#allocation32_spill] sm:$0xff]  ;;  %v9761_v55 = vpop.f32.mrb[205].mxu0  ;;  %v6309_v60 = vshrl.u32 %v11759_v35, 16  ;;  %v15149_v1 = vld [vmem:[#allocation66_spill] sm:$0xff] }
 0x343   : > { %10672 = vmatprep.subr.bf16.mxu1 %v11789_v15  ;;  %v13911_v32 = vadd.f32 %v9753_v59, %v15144_v23  ;;  %v13915_v18 = vsel %vm1335_vm9, %v6302_v26, %v6306_v10  ;;  %v11765_v56 = vld [vmem:[#allocation2 + $0x6c] sm:$0xff]   ;;  %v9763_v13 = vpop.f32.mrb[206].mxu0  ;;  %v6316_v3 = vshll.u32 %v11760_v36, 16  ;;  %v9762_v27 = vadd.f32 %v9761_v55, %v9760_v17  ;;  %v11798_v33 = vld [vmem:[#allocation9 + $0x160] sm:$0xff]   ;;  %v13929_v20 = vld [vmem:[#allocation2 + $0x54] sm:$0xff]  }
 0x344   : > { %15145 = vst [vmem:[#allocation31_spill] sm:$0xff] %v13915_v18  ;;  %v15148_v16 = vld [vmem:[#allocation35_spill] sm:$0xff]  ;;  %v13924_v45 = vadd.f32 %v9759_v25, %v15149_v1  ;;  %v9764_v54 = vpop.f32.mrb[207].mxu0  ;;  %v6314_v39 = vor.u32 %v6313_v38, %v6309_v60  ;;  %v6323_v26 = vshll.u32 %v11765_v56, 16  ;;  %v15151_v59 = vld [vmem:[#allocation68_spill] sm:$0xff]  ;;  %v11770_v17 = vld [vmem:[#allocation2 + $0x78] sm:$0xff]  }
 0x345   : > { %v9765_v5 = vadd.f32 %v9764_v54, %v9763_v13  ;;  %v15150_v4 = vld [vmem:[#allocation67_spill] sm:$0xff]  ;;  %v6318_v35 = vrot.slane %v6316_v3, 1  ;;  %v11766_v36 = vld [vmem:[#allocation2 + $0x74] ss:$0 sps:$4 sm:$0x11]   ;;  %v15153_v38 = vld [vmem:[#allocation38_spill] sm:$0xff] }
 0x346   : > { %10673 = vmatpush3.bf16.msra.mxu1 %v11789_v15  ;;  %v15147_v15 = vld [vmem:[#allocation21_spill] sm:$0xff]  ;;  %v13927_v8 = vadd.f32 %v9762_v27, %v15150_v4  ;;  %v11799_v23 = vld [vmem:[#allocation9 + $0x168] sm:$0xff]   ;;  %v6328_v13 = vshll.u32 %v11766_v36, 16  ;;  %v11800_v27 = vld [vmem:[#allocation9 + $0x170] sm:$0xff]  }
 0x347   : > { %10674 = vmatprep.subr.bf16.mxu1 %v11791_v53  ;;  %7109 = vmatmul.mubr.bf16.gmra.mrb[8].mxu0 %v13905_v37  ;;  %v13920_v62 = vadd.f32 %v9756_v34, %v15147_v15  ;;  %v13932_v10 = vadd.f32 %v9765_v5, %v15151_v59  ;;  %v6325_v34 = vrot.slane %v6323_v26, 1  ;;  %v15154_v15 = vld [vmem:[#allocation40_spill] sm:$0xff]  ;;  %v15155_v60 = vld [vmem:[#allocation69_spill] sm:$0xff]  ;;  %v6335_v5 = vshll.u32 %v11770_v17, 16  ;;  %v15156_v26 = vld [vmem:[#allocation70_spill] sm:$0xff] }
 0x348   : > { %10643 = vmatmul.mubr.bf16.gmra.mrb[116].mxu1 %v15146_v21  ;;  %7116 = vmatprep.mubr.bf16.mxu0 %v13915_v18  ;;  %v9766_v9 = vpop.f32.mrb[208].mxu0  ;;  %v13947_v59 = vld [vmem:[#allocation2 + $0x60] sm:$0xff]  }
 0x349   : > { %10646 = vmatprep.mubr.bf16.mxu1 %v15148_v16  ;;  %v9767_v25 = vpop.f32.mrb[209].mxu0 }
 0x34a   : > { %10675 = vmatpush3.bf16.msra.mxu1 %v11791_v53  ;;  %v13936_v53 = vsel %vm1335_vm9, %v6314_v39, %v6318_v35  ;;  %v9768_v21 = vadd.f32 %v9767_v25, %v9766_v9  ;;  %v9769_v55 = vpop.f32.mrb[210].mxu0  ;;  %v11771_v39 = vld [vmem:[#allocation2 + $0x80] ss:$0 sps:$4 sm:$0x11]   ;;  %v6330_v35 = vrot.slane %v6328_v13, 1 }
 0x34b   : > { %10676 = vmatprep.subr.bf16.mxu1 %v11796_v19  ;;  %15152 = vst [vmem:[#allocation54_spill] sm:$0xff] %v13936_v53  ;;  %v9770_v16 = vpop.f32.mrb[211].mxu0 }
 0x34c   : > { %v13942_v3 = vadd.f32 %v9768_v21, %v15155_v60  ;;  %v9771_v1 = vadd.f32 %v9770_v16, %v9769_v55  ;;  %v6333_v21 = vshrl.u32 %v11770_v17, 16  ;;  %v15160_v60 = vld [vmem:[#allocation37_spill] sm:$0xff]  ;;  %v13964_v17 = vld [vmem:[#allocation2 + $0x6c] sm:$0xff]  }
 0x34d   : > { %15163 = vst [vmem:[#allocation55_spill] sm:$0xff] %v13964_v17 }
 0x34e   : > { %10677 = vmatpush3.bf16.msra.mxu1 %v11796_v19  ;;  %v6321_v19 = vshrl.u32 %v11765_v56, 16  ;;  %v13945_v4 = vadd.f32 %v9771_v1, %v15156_v26  ;;  %v11774_v56 = vld [vmem:[#allocation2 + $0x84] sm:$0xff]  }
 0x34f   : > { %10678 = vmatprep.subr.bf16.mxu1 %v11798_v33  ;;  %7117 = vmatmul.mubr.bf16.gmra.mrb[12].mxu0 %v13929_v20  ;;  %v6347_v16 = vshll.u32 %v11774_v56, 16 }
 0x350   : > { %10647 = vmatmul.mubr.bf16.gmra.mrb[120].mxu1 %v15153_v38  ;;  %7124 = vmatprep.mubr.bf16.mxu0 %v13936_v53  ;;  %v6326_v54 = vor.u32 %v6325_v34, %v6321_v19  ;;  %v9772_v36 = vpop.f32.mrb[212].mxu0  ;;  %v6337_v38 = vrot.slane %v6335_v5, 1  ;;  %v15158_v34 = vld [vmem:[#allocation43_spill] sm:$0xff]  ;;  %v15159_v19 = vld [vmem:[#allocation44_spill] sm:$0xff]  ;;  %v13959_v5 = vld [vmem:[#allocation9 + $0x80] sm:$0xff]  }
 0x351   : > { %10650 = vmatprep.mubr.bf16.mxu1 %v15154_v15  ;;  %v9773_v25 = vpop.f32.mrb[213].mxu0 }
 0x352   : > { %10679 = vmatpush3.bf16.msra.mxu1 %v11798_v33  ;;  %v11805_v33 = vld [vmem:[#allocation9 + $0x178] sm:$0xff]   ;;  %v13951_v9 = vsel %vm1335_vm9, %v6326_v54, %v6330_v35  ;;  %v9774_v55 = vadd.f32 %v9773_v25, %v9772_v36  ;;  %v9775_v15 = vpop.f32.mrb[214].mxu0  ;;  %v6338_v26 = vor.u32 %v6337_v38, %v6333_v21  ;;  %v11775_v35 = vld [vmem:[#allocation2 + $0x8c] ss:$0 sps:$4 sm:$0x11]   ;;  %v6349_v25 = vrot.slane %v6347_v16, 1 }
 0x353   : > { %10680 = vmatprep.subr.bf16.mxu1 %v11799_v23  ;;  %15157 = vst [vmem:[#allocation41_spill] sm:$0xff] %v13951_v9  ;;  %v9776_v13 = vpop.f32.mrb[215].mxu0  ;;  %v6352_v21 = vshll.u32 %v11775_v35, 16  ;;  %v13977_v16 = vld [vmem:[#allocation2 + $0x78] sm:$0xff]  }
 0x354   : > { %v13957_v1 = vadd.f32 %v9774_v55, %v15160_v60  ;;  %v9777_v54 = vadd.f32 %v9776_v13, %v9775_v15  ;;  %v11778_v55 = vld [vmem:[#allocation2 + $0x90] sm:$0xff]   ;;  %v15165_v15 = vld [vmem:[#allocation46_spill] sm:$0xff]  ;;  %15168 = vst [vmem:[#allocation26_spill] sm:$0xff] %v13977_v16 }
 0x356   : > { %10681 = vmatpush3.bf16.msra.mxu1 %v11799_v23  ;;  %v6340_v23 = vshll.u32 %v11771_v39, 16 }
 0x357   : > { %10682 = vmatprep.subr.bf16.mxu1 %v11800_v27  ;;  %7125 = vmatmul.mubr.bf16.gmra.mrb[16].mxu0 %v13947_v59 }
 0x358   : > { %10651 = vmatmul.mubr.bf16.gmra.mrb[124].mxu1 %v15158_v34  ;;  %7132 = vmatprep.mubr.bf16.mxu0 %v13951_v9  ;;  %v15161_v34 = vld [vmem:[#allocation71_spill] sm:$0xff]  ;;  %v6342_v36 = vrot.slane %v6340_v23, 1  ;;  %v9778_v39 = vpop.f32.mrb[216].mxu0  ;;  %v15166_v23 = vld [vmem:[#allocation49_spill] sm:$0xff] }
 0x359   : > { %10654 = vmatprep.mubr.bf16.mxu1 %v15159_v19  ;;  %v13962_v9 = vadd.f32 %v9777_v54, %v15161_v34  ;;  %v9779_v38 = vpop.f32.mrb[217].mxu0 }
 0x35a   : > { %10683 = vmatpush3.bf16.msra.mxu1 %v11800_v27  ;;  %v13969_v27 = vsel %vm1335_vm9, %v6338_v26, %v6342_v36  ;;  %v9780_v19 = vadd.f32 %v9779_v38, %v9778_v39  ;;  %v9781_v13 = vpop.f32.mrb[218].mxu0  ;;  %v6359_v36 = vshll.u32 %v11778_v55, 16  ;;  %v11782_v38 = vld [vmem:[#allocation2 + $0x9c] sm:$0xff]  }
 0x35b   : > { %10684 = vmatprep.subr.bf16.mxu1 %v11805_v33  ;;  %15162 = vst [vmem:[#allocation29_spill] sm:$0xff] %v13962_v9  ;;  %15164 = vst [vmem:[#allocation20_spill] sm:$0xff] %v13969_v27  ;;  %v9782_v60 = vpop.f32.mrb[219].mxu0 }
 0x35c   : > { %v13975_v54 = vadd.f32 %v9780_v19, %v13633_v61  ;;  %v9783_v34 = vadd.f32 %v9782_v60, %v9781_v13  ;;  %v15171_v61 = vld [vmem:[#allocation48_spill] sm:$0xff] }
 0x35e   : > { %10685 = vmatpush3.bf16.msra.mxu1 %v11805_v33  ;;  %v6345_v33 = vshrl.u32 %v11774_v56, 16  ;;  %15167 = vst [vmem:[#allocation19_spill] sm:$0xff] %v13975_v54  ;;  %v13980_v9 = vadd.f32 %v9783_v34, %v13667_v50  ;;  %v6361_v56 = vrot.slane %v6359_v36, 1  ;;  %v14028_v54 = vld [vmem:[#allocation2 + $0x9c] sm:$0xff]  }
 0x35f   : > { %10718 = vmatprep.subr.bf16.mxu1 %v13959_v5  ;;  %7133 = vmatmul.mubr.bf16.gmra.mrb[20].mxu0 %v13964_v17  ;;  %v6354_v17 = vrot.slane %v6352_v21, 1  ;;  %v15172_v21 = vld [vmem:[#allocation50_spill] sm:$0xff]  ;;  %15184 = vst [vmem:[#allocation33_spill] sm:$0xff] %v14028_v54 }
 0x360   : > { %10655 = vmatmul.mubr.bf16.gmra.mrb[128].mxu1 %v15165_v15  ;;  %7140 = vmatprep.mubr.bf16.mxu0 %v13969_v27  ;;  %v6350_v26 = vor.u32 %v6349_v25, %v6345_v33  ;;  %v11779_v15 = vld [vmem:[#allocation2 + $0x98] ss:$0 sps:$4 sm:$0x11]   ;;  %15169 = vst [vmem:[#allocation57_spill] sm:$0xff] %v13980_v9  ;;  %v9784_v35 = vpop.f32.mrb[220].mxu0 }
 0x361   : > { %10658 = vmatprep.mubr.bf16.mxu1 %v15166_v23  ;;  %v9785_v19 = vpop.f32.mrb[221].mxu0  ;;  %v6357_v23 = vshrl.u32 %v11778_v55, 16  ;;  %v6364_v50 = vshll.u32 %v11779_v15, 16  ;;  %v11806_v9 = vld [vmem:[#allocation2 + $0xc] sm:$0xfe]  }
 0x362   : > { %v13984_v39 = vsel %vm1335_vm9, %v6350_v26, %v6354_v17  ;;  %v9786_v25 = vadd.f32 %v9785_v19, %v9784_v35  ;;  %v9787_v13 = vpop.f32.mrb[222].mxu0  ;;  %v6371_v26 = vshll.u32 %v11782_v38, 16  ;;  %v11802_v19 = vld [vmem:[#allocation2] sm:$0xfe]  }
 0x363   : > { %15170 = vst [vmem:[#allocation24_spill] sm:$0xff] %v13984_v39  ;;  %v9788_v33 = vpop.f32.mrb[223].mxu0  ;;  %v6362_v17 = vor.u32 %v6361_v56, %v6357_v23  ;;  %v15178_v23 = vld [vmem:[#allocation53_spill] sm:$0xff] }
 0x364   : > { %v13990_v60 = vadd.f32 %v9786_v25, %v13672_v2  ;;  %v9789_v34 = vadd.f32 %v9788_v33, %v9787_v13  ;;  %v6373_v15 = vrot.slane %v6371_v26, 1  ;;  %v11787_v2 = vld [vmem:[#allocation2 + $0xa8] sm:$0xff]   ;;  %v15177_v25 = vld [vmem:[#allocation52_spill] sm:$0xff]  ;;  %v11794_v27 = vld [vmem:[#allocation2 + $0xbc] ss:$0 sps:$4 sm:$0x11]  }
 0x365   : > { %v11803_v13 = vld [vmem:[#allocation2 + $0x8] ss:$0 sps:$4 sm:$0x11]   ;;  %v6383_v26 = vshll.u32 %v11787_v2, 16 }
 0x366   : > { %15173 = vst [vmem:[#allocation18_spill] sm:$0xff] %v13990_v60  ;;  %v13993_v36 = vadd.f32 %v9789_v34, %v13681_v31  ;;  %v6613_v60 = vrot.slane %v11803_v13, 1  ;;  %v11809_v13 = vld [vmem:[#allocation2 + $0x20] ss:$0 sps:$4 sm:$0x11]  }
 0x367   : > { %7141 = vmatmul.mubr.bf16.gmra.mrb[24].mxu0 %v13977_v16  ;;  %v6366_v16 = vrot.slane %v6364_v50, 1  ;;  %v6369_v50 = vshrl.u32 %v11782_v38, 16  ;;  %v11807_v38 = vld [vmem:[#allocation2 + $0x14] ss:$0 sps:$4 sm:$0x11]  }
 0x368   : > { %10659 = vmatmul.mubr.bf16.gmra.mrb[132].mxu1 %v15171_v61  ;;  %7148 = vmatprep.mubr.bf16.mxu0 %v13984_v39  ;;  %15174 = vst [vmem:[#allocation62_spill] sm:$0xff] %v13993_v36  ;;  %v13995_v61 = vld [vmem:[#allocation2 + $0x84] sm:$0xff]   ;;  %v9790_v35 = vpop.f32.mrb[224].mxu0  ;;  %v6612_v36 = vrot.slane %v11802_v19, 1 }
 0x369   : > { %10662 = vmatprep.mubr.bf16.mxu1 %v15172_v21  ;;  %15175 = vst [vmem:[#allocation23_spill] sm:$0xff] %v13995_v61  ;;  %v11783_v39 = vld [vmem:[#allocation2 + $0xa4] ss:$0 sps:$4 sm:$0x11]   ;;  %v13999_v55 = vsel %vm1335_vm9, %v6362_v17, %v6366_v16  ;;  %v9791_v56 = vpop.f32.mrb[225].mxu0  ;;  %v6374_v17 = vor.u32 %v6373_v15, %v6369_v50  ;;  %v6385_v15 = vrot.slane %v6383_v26, 1 }
 0x36a   : > { %15176 = vst [vmem:[#allocation63_spill] sm:$0xff] %v13999_v55  ;;  %v9792_v31 = vadd.f32 %v9791_v56, %v9790_v35  ;;  %v9793_v21 = vpop.f32.mrb[226].mxu0  ;;  %v6376_v33 = vshll.u32 %v11783_v39, 16  ;;  %v11788_v56 = vld [vmem:[#allocation2 + $0xb0] ss:$0 sps:$4 sm:$0x11]  }
 0x36b   : > { %v9794_v34 = vpop.f32.mrb[227].mxu0  ;;  %v11808_v39 = vld [vmem:[#allocation2 + $0x18] sm:$0xfe]  }
 0x36c   : > { %v9795_v16 = vadd.f32 %v9794_v34, %v9793_v21  ;;  %v6378_v35 = vrot.slane %v6376_v33, 1  ;;  %v6381_v33 = vshrl.u32 %v11787_v2, 16  ;;  %v6388_v34 = vshll.u32 %v11788_v56, 16  ;;  %v11811_v2 = vld [vmem:[#allocation2 + $0x2c] ss:$0 sps:$4 sm:$0x11]  }
 0x36f   : > { %7149 = vmatmul.mubr.bf16.gmra.mrb[28].mxu0 %v13995_v61  ;;  %v14005_v61 = vadd.f32 %v9792_v31, %v13712_v48  ;;  %v14014_v48 = vsel %vm1335_vm9, %v6374_v17, %v6378_v35  ;;  %v11793_v31 = vld [vmem:[#allocation2 + $0xb4] sm:$0xff]   ;;  %v6615_v35 = vrot.slane %v11806_v9, 1  ;;  %v11831_v9 = vld [vmem:[#allocation9 + $0x88] sm:$0xff]  }
 0x370   : > { %10663 = vmatmul.mubr.bf16.gmra.mrb[136].mxu1 %v15177_v25  ;;  %7156 = vmatprep.mubr.bf16.mxu0 %v13999_v55  ;;  %v14008_v25 = vadd.f32 %v9795_v16, %v13720_v52  ;;  %v14010_v55 = vld [vmem:[#allocation2 + $0x90] sm:$0xff]   ;;  %15182 = vst [vmem:[#allocation56_spill] sm:$0xff] %v14014_v48  ;;  %v14018_v52 = vsel %vm1736_vm10, %v6612_v36, %v6613_v60  ;;  %v6395_v60 = vshll.u32 %v11793_v31, 16  ;;  %v6618_v36 = vrot.slane %v11808_v39, 1 }
 0x371   : > { %10666 = vmatprep.mubr.bf16.mxu1 %v15178_v23  ;;  %15179 = vst [vmem:[#allocation25_spill] sm:$0xff] %v14005_v61  ;;  %15181 = vst [vmem:[#allocation42_spill] sm:$0xff] %v14010_v55  ;;  %v9796_v23 = vpop.f32.mrb[228].mxu0  ;;  %v6619_v61 = vrot.slane %v11809_v13, 1 }
 0x372   : > { %15180 = vst [vmem:[#allocation72_spill] sm:$0xff] %v14008_v25  ;;  %v9797_v19 = vpop.f32.mrb[229].mxu0  ;;  %v6386_v25 = vor.u32 %v6385_v15, %v6381_v33  ;;  %v6397_v39 = vrot.slane %v6395_v60, 1  ;;  %v11814_v13 = vld [vmem:[#allocation2 + $0x38] ss:$0 sps:$4 sm:$0x11]  }
 0x373   : > { %v9798_v21 = vadd.f32 %v9797_v19, %v9796_v23  ;;  %v9799_v50 = vpop.f32.mrb[230].mxu0  ;;  %v6390_v23 = vrot.slane %v6388_v34, 1  ;;  %v11810_v19 = vld [vmem:[#allocation2 + $0x24] sm:$0xfe]   ;;  %v6393_v33 = vshrl.u32 %v11793_v31, 16  ;;  %v6400_v34 = vshll.u32 %v11794_v27, 16 }
 0x374   : > { %v9800_v16 = vpop.f32.mrb[231].mxu0  ;;  %v11834_v60 = vld [vmem:[#allocation9 + $0x90] sm:$0xff]   ;;  %v11816_v31 = vld [vmem:[#allocation2 + $0x3c] sm:$0xfe]  }
 0x375   : > { %v14023_v17 = vadd.f32 %v9798_v21, %v13746_v11  ;;  %v9801_v26 = vadd.f32 %v9800_v16, %v9799_v50  ;;  %v11813_v21 = vld [vmem:[#allocation2 + $0x30] sm:$0xfe]   ;;  %v6402_v27 = vrot.slane %v6400_v34, 1 }
 0x377   : > { %7157 = vmatmul.mubr.bf16.gmra.mrb[32].mxu0 %v14010_v55  ;;  %v6616_v55 = vrot.slane %v11807_v38, 1  ;;  %v14035_v38 = vsel %vm1335_vm9, %v6386_v25, %v6390_v23  ;;  %v6624_v23 = vrot.slane %v11813_v21, 1 }
 0x378   : > { %10667 = vmatmul.mubr.bf16.gmra.mrb[140].mxu1 %v15128_v29  ;;  %7164 = vmatprep.mubr.bf16.mxu0 %v14014_v48  ;;  %v14026_v48 = vadd.f32 %v9801_v26, %v13752_v40  ;;  %v9802_v11 = vpop.f32.mrb[232].mxu0  ;;  %15185 = vst [vmem:[#allocation45_spill] sm:$0xff] %v14035_v38  ;;  %v14039_v40 = vsel %vm1736_vm10, %v6618_v36, %v6619_v61  ;;  %v6622_v61 = vrot.slane %v11811_v2, 1  ;;  %v11839_v2 = vld [vmem:[#allocation9 + $0x98] sm:$0xff]  }
 0x379   : > { %10686 = vmatprep.mubr.bf16.mxu1 %v14018_v52  ;;  %v14031_v56 = vsel %vm1736_vm10, %v6615_v35, %v6616_v55  ;;  %v9803_v15 = vpop.f32.mrb[233].mxu0  ;;  %v6621_v35 = vrot.slane %v11810_v19, 1  ;;  %v6398_v36 = vor.u32 %v6397_v39, %v6393_v33  ;;  %v11818_v39 = vld [vmem:[#allocation2 + $0x48] sm:$0xfe]  }
 0x37a   : > { %15183 = vst [vmem:[#allocation27_spill] sm:$0xff] %v14026_v48  ;;  %v9804_v55 = vadd.f32 %v9803_v15, %v9802_v11  ;;  %v9805_v50 = vpop.f32.mrb[234].mxu0  ;;  %v14050_v11 = vld [vmem:[#allocation2 + $0xa8] sm:$0xff]   ;;  %v11817_v15 = vld [vmem:[#allocation2 + $0x44] ss:$0 sps:$4 sm:$0x11]  }
 0x37b   : > { %v9806_v16 = vpop.f32.mrb[235].mxu0  ;;  %15188 = vst [vmem:[#allocation28_spill] sm:$0xff] %v14050_v11  ;;  %v14057_v19 = vsel %vm1335_vm9, %v6398_v36, %v6402_v27  ;;  %v11846_v48 = vld [vmem:[#allocation2 + $0xb4] sm:$0xfe]  }
 0x37c   : > { %v14045_v25 = vadd.f32 %v9804_v55, %v13770_v49  ;;  %v9807_v26 = vadd.f32 %v9806_v16, %v9805_v50  ;;  %15189 = vst [vmem:[#allocation36_spill] sm:$0xff] %v14057_v19  ;;  %v6627_v16 = vrot.slane %v11816_v31, 1 }
 0x37e   : > { %15186 = vst [vmem:[#allocation58_spill] sm:$0xff] %v14045_v25 }
 0x37f   : > { %7165 = vmatmul.mubr.bf16.gmra.mrb[36].mxu0 %v14028_v54  ;;  %v14048_v54 = vadd.f32 %v9807_v26, %v13798_v51  ;;  %v6628_v26 = vrot.slane %v11817_v15, 1  ;;  %v11824_v15 = vld [vmem:[#allocation2 + $0x68] ss:$0 sps:$4 sm:$0x11]  }
 0x380   : > { %10687 = vmatmul.mubr.bf16.vlgmr.msra.gmra.mrb[112].mxu1 %v14031_v56  ;;  %7172 = vmatprep.mubr.bf16.mxu0 %v14035_v38  ;;  %v6625_v38 = vrot.slane %v11814_v13, 1  ;;  %v9808_v49 = vpop.f32.mrb[236].mxu0 }
 0x381   : > { %10690 = vmatprep.mubr.bf16.mxu1 %v14039_v40  ;;  %10719 = vmatpush3.bf16.msra.mxu1 %v13959_v5  ;;  %15187 = vst [vmem:[#allocation59_spill] sm:$0xff] %v14048_v54  ;;  %v14053_v5 = vsel %vm1736_vm10, %v6621_v35, %v6622_v61  ;;  %v9809_v21 = vpop.f32.mrb[237].mxu0  ;;  %v6630_v35 = vrot.slane %v11818_v39, 1  ;;  %v14072_v27 = vsel %vm1736_vm10, %v6627_v16, %v6628_v26  ;;  %v6637_v26 = vrot.slane %v11824_v15, 1  ;;  %v11829_v15 = vld [vmem:[#allocation2 + $0x78] sm:$0xfe]  }
 0x382   : > { %10720 = vmatprep.subr.bf16.mxu1 %v11831_v9  ;;  %v14061_v51 = vsel %vm1736_vm10, %v6624_v23, %v6625_v38  ;;  %v9810_v13 = vadd.f32 %v9809_v21, %v9808_v49  ;;  %v9811_v55 = vpop.f32.mrb[238].mxu0  ;;  %v11842_v38 = vld [vmem:[#allocation9 + $0xa0] sm:$0xff]   ;;  %v11797_v23 = vld [vmem:[#allocation2 + $0xb4] sm:$0xff]   ;;  %v14120_v54 = vld [vmem:[#allocation2 + $0xc] sm:$0xff]  }
 0x383   : > { %v9812_v50 = vpop.f32.mrb[239].mxu0  ;;  %v11820_v49 = vld [vmem:[#allocation2 + $0x54] sm:$0xfe]   ;;  %15192 = vst [vmem:[#allocation22_spill] sm:$0xff] %v14120_v54 }
 0x384   : > { %v14066_v33 = vadd.f32 %v9810_v13, %v13802_v22  ;;  %v9813_v34 = vadd.f32 %v9812_v50, %v9811_v55  ;;  %v11845_v22 = vld [vmem:[#allocation9 + $0xa8] sm:$0xff]   ;;  %v6633_v21 = vrot.slane %v11820_v49, 1  ;;  %v11804_v55 = vld [vmem:[#allocation9 + $0x180] sm:$0xff]  }
 0x385   : > { %10721 = vmatpush3.bf16.msra.mxu1 %v11831_v9  ;;  %v11819_v9 = vld [vmem:[#allocation2 + $0x50] ss:$0 sps:$4 sm:$0x11]  }
 0x386   : > { %10722 = vmatprep.subr.bf16.mxu1 %v11834_v60  ;;  %15190 = vst [vmem:[#allocation30_spill] sm:$0xff] %v14066_v33  ;;  %v6631_v61 = vrot.slane %v11819_v9, 1  ;;  %v14069_v36 = vadd.f32 %v9813_v34, %v13808_v58  ;;  %v11823_v58 = vld [vmem:[#allocation2 + $0x60] sm:$0xfe]   ;;  %v11848_v9 = vld [vmem:[#allocation9 + $0xb0] sm:$0xff]  }
 0x387   : > { %7173 = vmatmul.mubr.bf16.gmra.mrb[40].mxu0 %v14050_v11  ;;  %v6636_v16 = vrot.slane %v11823_v58, 1  ;;  %v11826_v49 = vld [vmem:[#allocation2 + $0x6c] sm:$0xfe]  }
 0x388   : > { %10691 = vmatmul.mubr.bf16.gmra.mrb[116].mxu1 %v14053_v5  ;;  %7180 = vmatprep.mubr.bf16.mxu0 %v14057_v19  ;;  %15191 = vst [vmem:[#allocation47_spill] sm:$0xff] %v14069_v36  ;;  %v14076_v31 = vsel %vm1736_vm10, %v6630_v35, %v6631_v61  ;;  %v11812_v35 = vld [vmem:[#allocation9 + $0x1c8] sm:$0xff]  }
 0x389   : > { %10694 = vmatprep.mubr.bf16.mxu1 %v14061_v51  ;;  %10723 = vmatpush3.bf16.msra.mxu1 %v11834_v60  ;;  %v11821_v60 = vld [vmem:[#allocation2 + $0x5c] ss:$0 sps:$4 sm:$0x11]   ;;  %v11815_v58 = vld [vmem:[#allocation9 + $0x188] sm:$0xff]  }
 0x38a   : > { %10724 = vmatprep.subr.bf16.mxu1 %v11839_v2  ;;  %v6634_v39 = vrot.slane %v11821_v60, 1  ;;  %v11827_v60 = vld [vmem:[#allocation2 + $0x74] ss:$0 sps:$4 sm:$0x11]  }
 0x38d   : > { %10725 = vmatpush3.bf16.msra.mxu1 %v11839_v2 }
 0x38e   : > { %10726 = vmatprep.subr.bf16.mxu1 %v11842_v38  ;;  %v9854_v2 = vpop.f32.mrb[144].mxu1 }
 0x38f   : > { %7181 = vmatmul.mubr.bf16.gmra.mrb[44].mxu0 %v11797_v23  ;;  %v9855_v13 = vpop.f32.mrb[145].mxu1 }
 0x390   : > { %10695 = vmatmul.mubr.bf16.gmra.mrb[120].mxu1 %v14072_v27  ;;  %7526 = vmatprep.mubr.bf16.mxu0 %v15128_v29  ;;  %v9856_v50 = vadd.f32 %v9855_v13, %v9854_v2  ;;  %v9857_v34 = vpop.f32.mrb[146].mxu1  ;;  %v11851_v2 = vld [vmem:[#allocation9 + $0xb8] sm:$0xff]  }
 0x391   : > { %10698 = vmatprep.mubr.bf16.mxu1 %v14076_v31  ;;  %10727 = vmatpush3.bf16.msra.mxu1 %v11842_v38  ;;  %v9858_v61 = vpop.f32.mrb[147].mxu1  ;;  %v14084_v38 = vsel %vm1736_vm10, %v6633_v21, %v6634_v39  ;;  %v11830_v21 = vld [vmem:[#allocation2 + $0x80] ss:$0 sps:$4 sm:$0x11]   ;;  %v11822_v39 = vld [vmem:[#allocation9 + $0x1d0] sm:$0xff]  }
 0x392   : > { %10728 = vmatprep.subr.bf16.mxu1 %v11845_v22  ;;  %v14081_v23 = vadd.f32 %v13831_v42, %v9856_v50  ;;  %v9859_v19 = vadd.f32 %v9858_v61, %v9857_v34  ;;  %v14093_v42 = vsel %vm1736_vm10, %v6636_v16, %v6637_v26  ;;  %v6639_v50 = vrot.slane %v11826_v49, 1  ;;  %v11835_v26 = vld [vmem:[#allocation9 + $0x1d8] sm:$0xff]   ;;  %v11832_v49 = vld [vmem:[#allocation2 + $0x84] sm:$0xfe]  }
 0x393   : > { %v6640_v34 = vrot.slane %v11827_v60, 1  ;;  %v6643_v36 = vrot.slane %v11830_v21, 1  ;;  %v14102_v60 = vld [vmem:[#allocation9 + $0x200] sm:$0xff]   ;;  %v11837_v21 = vld [vmem:[#allocation2 + $0x98] ss:$0 sps:$4 sm:$0x11]  }
 0x395   : > { %10729 = vmatpush3.bf16.msra.mxu1 %v11845_v22  ;;  %v14090_v22 = vadd.f32 %v13834_v41, %v9859_v19  ;;  %v6642_v19 = vrot.slane %v11829_v15, 1  ;;  %v14100_v33 = vsel %vm1736_vm10, %v6639_v50, %v6640_v34  ;;  %v11836_v15 = vld [vmem:[#allocation2 + $0x90] sm:$0xfe]   ;;  %v6645_v34 = vrot.slane %v11832_v49, 1  ;;  %v11840_v49 = vld [vmem:[#allocation2 + $0x9c] sm:$0xfe]  }
 0x396   : > { %10730 = vmatprep.subr.bf16.mxu1 %v11848_v9  ;;  %v9860_v13 = vpop.f32.mrb[148].mxu1 }
 0x397   : > { %7527 = vmatmul.mubr.bf16.vlgmr.msra.gmra.mrb[48].mxu0 %v15128_v29  ;;  %v9861_v61 = vpop.f32.mrb[149].mxu1 }
 0x398   : > { %10699 = vmatmul.mubr.bf16.gmra.mrb[124].mxu1 %v14084_v38  ;;  %7534 = vmatprep.mubr.bf16.mxu0 %v13628_v24  ;;  %v11825_v24 = vld [vmem:[#allocation9 + $0x190] sm:$0xff]   ;;  %v9863_v41 = vpop.f32.mrb[150].mxu1 }
 0x399   : > { %10247 = vmatpush3.bf16.msra.mxu0 %v11804_v55  ;;  %10702 = vmatprep.mubr.bf16.mxu1 %v14093_v42  ;;  %v9862_v55 = vadd.f32 %v9861_v61, %v9860_v13  ;;  %v9864_v16 = vpop.f32.mrb[151].mxu1  ;;  %v11838_v13 = vld [vmem:[#allocation9 + $0x198] sm:$0xff]  }
 0x39a   : > { %10248 = vmatprep.subr.bf16.mxu0 %v11812_v35  ;;  %10731 = vmatpush3.bf16.msra.mxu1 %v11848_v9  ;;  %v9865_v11 = vadd.f32 %v9864_v16, %v9863_v41  ;;  %v11833_v9 = vld [vmem:[#allocation2 + $0x8c] ss:$0 sps:$4 sm:$0x11]   ;;  %v6648_v41 = vrot.slane %v11836_v15, 1  ;;  %v6649_v16 = vrot.slane %v11837_v21, 1 }
 0x39b   : > { %10732 = vmatprep.subr.bf16.mxu1 %v11851_v2  ;;  %v14097_v35 = vadd.f32 %v13857_v7, %v9862_v55  ;;  %v6646_v61 = vrot.slane %v11833_v9, 1  ;;  %v11841_v9 = vld [vmem:[#allocation2 + $0xa4] ss:$0 sps:$4 sm:$0x11]   ;;  %v11843_v21 = vld [vmem:[#allocation2 + $0xa8] sm:$0xfe]  }
 0x39c   : > { %v14107_v7 = vadd.f32 %v13860_v47, %v9865_v11  ;;  %v11850_v11 = vld [vmem:[#allocation9 + $0x1a0] sm:$0xff]   ;;  %v14125_v15 = vsel %vm1736_vm10, %v6648_v41, %v6649_v16 }
 0x39d   : > { %10249 = vmatpush3.bf16.msra.mxu0 %v11815_v58  ;;  %v11898_v58 = vld [vmem:[#allocation2] sm:$0xff]  }
 0x39e   : > { %10250 = vmatprep.subr.bf16.mxu0 %v11822_v39  ;;  %10733 = vmatpush3.bf16.msra.mxu1 %v11851_v2  ;;  %v14110_v39 = vsel %vm1736_vm10, %v6642_v19, %v6643_v36  ;;  %v11849_v2 = vld [vmem:[#allocation9 + $0x1e0] sm:$0xff]   ;;  %v9866_v50 = vpop.f32.mrb[152].mxu1 }
 0x39f   : > { %7535 = vmatmul.mubr.bf16.gmra.mrb[52].mxu0 %v11898_v58  ;;  %10766 = vmatprep.subr.bf16.mxu1 %v14102_v60  ;;  %v9867_v55 = vpop.f32.mrb[153].mxu1 }
 0x3a0   : > { %10703 = vmatmul.mubr.bf16.gmra.mrb[128].mxu1 %v14100_v33  ;;  %7542 = vmatprep.mubr.bf16.mxu0 %v13645_v57  ;;  %v9869_v58 = vpop.f32.mrb[154].mxu1  ;;  %v11852_v57 = vld [vmem:[#allocation9 + $0x1e8] sm:$0xff]  }
 0x3a1   : > { %10251 = vmatpush3.bf16.msra.mxu0 %v11825_v24  ;;  %10706 = vmatprep.mubr.bf16.mxu1 %v14110_v39  ;;  %v9868_v24 = vadd.f32 %v9867_v55, %v9866_v50  ;;  %v9870_v47 = vpop.f32.mrb[155].mxu1  ;;  %v11853_v50 = vld [vmem:[#allocation9 + $0x1a8] sm:$0xff]   ;;  %v6652_v55 = vrot.slane %v11841_v9, 1  ;;  %v14138_v9 = vld [vmem:[#allocation2 + $0x18] sm:$0xff]  }
 0x3a2   : > { %10252 = vmatprep.subr.bf16.mxu0 %v11835_v26  ;;  %v9871_v19 = vadd.f32 %v9870_v47, %v9869_v58  ;;  %v14118_v26 = vsel %vm1736_vm10, %v6645_v34, %v6646_v61  ;;  %v6651_v61 = vrot.slane %v11840_v49, 1  ;;  %v6654_v47 = vrot.slane %v11843_v21, 1  ;;  %v11847_v49 = vld [vmem:[#allocation2 + $0xbc] ss:$0 sps:$4 sm:$0x11]  }
 0x3a3   : > { %v14115_v36 = vadd.f32 %v13870_v14, %v9868_v24  ;;  %v15193_v14 = vld [vmem:[#allocation39_spill] sm:$0xff]  ;;  %v11854_v24 = vld [vmem:[#allocation9 + $0x1f0] sm:$0xff]  }
 0x3a5   : > { %10253 = vmatpush3.bf16.msra.mxu0 %v11838_v13  ;;  %v11844_v13 = vld [vmem:[#allocation2 + $0xb0] ss:$0 sps:$4 sm:$0x11]  }
 0x3a6   : > { %10254 = vmatprep.subr.bf16.mxu0 %v11849_v2  ;;  %v14129_v2 = vadd.f32 %v13873_v46, %v9871_v19  ;;  %v9872_v34 = vpop.f32.mrb[156].mxu1  ;;  %v6655_v41 = vrot.slane %v11844_v13, 1  ;;  %v15194_v13 = vld [vmem:[#allocation65_spill] sm:$0xff] }
 0x3a7   : > { %7543 = vmatmul.mubr.bf16.gmra.mrb[56].mxu0 %v14120_v54  ;;  %v9873_v58 = vpop.f32.mrb[157].mxu1 }
 0x3a8   : > { %10707 = vmatmul.mubr.bf16.gmra.mrb[132].mxu1 %v14118_v26  ;;  %7550 = vmatprep.mubr.bf16.mxu0 %v15193_v14  ;;  %v9874_v16 = vadd.f32 %v9873_v58, %v9872_v34  ;;  %v9875_v54 = vpop.f32.mrb[158].mxu1  ;;  %v11855_v14 = vld [vmem:[#allocation9 + $0x1b0] sm:$0xff]   ;;  %v14143_v21 = vsel %vm1736_vm10, %v6654_v47, %v6655_v41  ;;  %v6658_v34 = vrot.slane %v11847_v49, 1 }
 0x3a9   : > { %10710 = vmatprep.mubr.bf16.mxu1 %v14125_v15  ;;  %10255 = vmatpush3.bf16.msra.mxu0 %v11850_v11  ;;  %v9876_v25 = vpop.f32.mrb[159].mxu1  ;;  %v14136_v11 = vsel %vm1736_vm10, %v6651_v61, %v6652_v55 }
 0x3aa   : > { %10256 = vmatprep.subr.bf16.mxu0 %v11852_v57  ;;  %v14133_v46 = vadd.f32 %v13885_v30, %v9874_v16  ;;  %v9877_v19 = vadd.f32 %v9876_v25, %v9875_v54  ;;  %v11858_v57 = vld [vmem:[#allocation9 + $0x1f8] sm:$0xff]   ;;  %v14156_v16 = vld [vmem:[#allocation2 + $0x24] sm:$0xff]  }
 0x3ab   : > { %v11860_v54 = vld [vmem:[#allocation9 + $0x1b8] sm:$0xff]  }
 0x3ac   : > { %v14147_v30 = vadd.f32 %v13892_v63, %v9877_v19 }
 0x3ad   : > { %10257 = vmatpush3.bf16.msra.mxu0 %v11853_v50  ;;  %v6657_v50 = vrot.slane %v11846_v48, 1 }
 0x3ae   : > { %10258 = vmatprep.subr.bf16.mxu0 %v11854_v24  ;;  %v9878_v25 = vpop.f32.mrb[160].mxu1 }
 0x3af   : > { %7551 = vmatmul.mubr.bf16.gmra.mrb[60].mxu0 %v14138_v9  ;;  %v9879_v61 = vpop.f32.mrb[161].mxu1  ;;  %v14154_v63 = vsel %vm1736_vm10, %v6657_v50, %v6658_v34  ;;  %v11857_v50 = vld [vmem:[#allocation9 + $0x208] sm:$0xff]   ;;  %v14168_v34 = vld [vmem:[#allocation2 + $0x30] sm:$0xff]  }
 0x3b0   : > { %10711 = vmatmul.mubr.bf16.gmra.mrb[136].mxu1 %v14136_v11  ;;  %7558 = vmatprep.mubr.bf16.mxu0 %v15194_v13  ;;  %v9880_v55 = vadd.f32 %v9879_v61, %v9878_v25  ;;  %v9881_v24 = vpop.f32.mrb[162].mxu1 }
 0x3b1   : > { %10714 = vmatprep.mubr.bf16.mxu1 %v14143_v21  ;;  %10259 = vmatpush3.bf16.msra.mxu0 %v11855_v14  ;;  %v9882_v58 = vpop.f32.mrb[163].mxu1 }
 0x3b2   : > { %10260 = vmatprep.subr.bf16.mxu0 %v11858_v57  ;;  %v14151_v47 = vadd.f32 %v13898_v43, %v9880_v55  ;;  %v9883_v41 = vadd.f32 %v9882_v58, %v9881_v24 }
 0x3b4   : > { %v14162_v48 = vadd.f32 %v13901_v6, %v9883_v41 }
 0x3b5   : > { %10261 = vmatpush3.bf16.msra.mxu0 %v11860_v54 }
 0x3b6   : > { %v9884_v14 = vpop.f32.mrb[164].mxu1 }
 0x3b7   : > { %7559 = vmatmul.mubr.bf16.gmra.mrb[64].mxu0 %v14156_v16  ;;  %v9885_v43 = vpop.f32.mrb[165].mxu1 }
 0x3b8   : > { %10715 = vmatmul.mubr.bf16.gmra.mrb[140].mxu1 %v14154_v63  ;;  %7566 = vmatprep.mubr.bf16.mxu0 %v13825_v28  ;;  %v9886_v19 = vadd.f32 %v9885_v43, %v9884_v14  ;;  %v9887_v49 = vpop.f32.mrb[166].mxu1  ;;  %v11861_v43 = vld [vmem:[#allocation9 + $0x218] sm:$0xff]  }
 0x3b9   : > { %10734 = vmatprep.mubr.bf16.mxu1 %v15128_v29  ;;  %v9888_v57 = vpop.f32.mrb[167].mxu1 }
 0x3ba   : > { %v14166_v54 = vadd.f32 %v13908_v44, %v9886_v19  ;;  %v9889_v25 = vadd.f32 %v9888_v57, %v9887_v49  ;;  %v11859_v44 = vld [vmem:[#allocation9 + $0x210] sm:$0xff]  }
 0x3bc   : > { %v14174_v6 = vadd.f32 %v13911_v32, %v9889_v25  ;;  %v14181_v32 = vld [vmem:[#allocation2 + $0x3c] sm:$0xff]  }
 0x3be   : > { %v9890_v61 = vpop.f32.mrb[168].mxu1 }
 0x3bf   : > { %7567 = vmatmul.mubr.bf16.gmra.mrb[68].mxu0 %v14168_v34  ;;  %v9891_v55 = vpop.f32.mrb[169].mxu1 }
 0x3c0   : > { %10735 = vmatmul.mubr.bf16.vlgmr.msra.gmra.mrb[112].mxu1 %v14018_v52  ;;  %7574 = vmatprep.mubr.bf16.mxu0 %v13867_v12  ;;  %v9892_v24 = vadd.f32 %v9891_v55, %v9890_v61  ;;  %v9893_v58 = vpop.f32.mrb[170].mxu1 }
 0x3c1   : > { %10738 = vmatprep.mubr.bf16.mxu1 %v14031_v56  ;;  %10767 = vmatpush3.bf16.msra.mxu1 %v14102_v60  ;;  %v9894_v41 = vpop.f32.mrb[171].mxu1 }
 0x3c2   : > { %10768 = vmatprep.subr.bf16.mxu1 %v11857_v50  ;;  %v14179_v14 = vadd.f32 %v13920_v62, %v9892_v24  ;;  %v9895_v52 = vadd.f32 %v9894_v41, %v9893_v58  ;;  %v11862_v62 = vld [vmem:[#allocation9 + $0x220] sm:$0xff]   ;;  %v11863_v24 = vld [vmem:[#allocation9 + $0x228] sm:$0xff]   ;;  %v11864_v58 = vld [vmem:[#allocation9 + $0x230] sm:$0xff]  }
 0x3c4   : > { %v14187_v60 = vadd.f32 %v13924_v45, %v9895_v52 }
 0x3c5   : > { %10769 = vmatpush3.bf16.msra.mxu1 %v11857_v50 }
 0x3c6   : > { %10770 = vmatprep.subr.bf16.mxu1 %v11859_v44 }
 0x3c7   : > { %7575 = vmatmul.mubr.bf16.gmra.mrb[72].mxu0 %v14181_v32 }
 0x3c8   : > { %10739 = vmatmul.mubr.bf16.gmra.mrb[116].mxu1 %v14039_v40  ;;  %7582 = vmatprep.mubr.bf16.mxu0 %v13882_v0 }
 0x3c9   : > { %10742 = vmatprep.mubr.bf16.mxu1 %v14053_v5  ;;  %10771 = vmatpush3.bf16.msra.mxu1 %v11859_v44  ;;  %v9896_v19 = vpop.f32.mrb[172].mxu1 }
 0x3ca   : > { %10772 = vmatprep.subr.bf16.mxu1 %v11861_v43  ;;  %v9897_v49 = vpop.f32.mrb[173].mxu1 }
 0x3cb   : > { %v9898_v57 = vadd.f32 %v9897_v49, %v9896_v19  ;;  %v9899_v25 = vpop.f32.mrb[174].mxu1  ;;  %v11865_v49 = vld [vmem:[#allocation9 + $0x238] sm:$0xff]  }
 0x3cc   : > { %v9900_v50 = vpop.f32.mrb[175].mxu1 }
 0x3cd   : > { %10773 = vmatpush3.bf16.msra.mxu1 %v11861_v43  ;;  %v14191_v61 = vadd.f32 %v13927_v8, %v9898_v57  ;;  %v9901_v55 = vadd.f32 %v9900_v50, %v9899_v25 }
 0x3ce   : > { %10774 = vmatprep.subr.bf16.mxu1 %v11862_v62 }
 0x3cf   : > { %7583 = vmatmul.mubr.bf16.gmra.mrb[76].mxu0 %v13905_v37  ;;  %v14197_v45 = vadd.f32 %v13932_v10, %v9901_v55 }
 0x3d0   : > { %10743 = vmatmul.mubr.bf16.gmra.mrb[120].mxu1 %v14061_v51  ;;  %7590 = vmatprep.mubr.bf16.mxu0 %v13915_v18  ;;  %v15204_v18 = vld [vmem:[#allocation26_spill] sm:$0xff] }
 0x3d1   : > { %10746 = vmatprep.mubr.bf16.mxu1 %v14072_v27  ;;  %10775 = vmatpush3.bf16.msra.mxu1 %v11862_v62  ;;  %v9902_v44 = vpop.f32.mrb[176].mxu1 }
 0x3d2   : > { %10776 = vmatprep.subr.bf16.mxu1 %v11863_v24  ;;  %v9903_v8 = vpop.f32.mrb[177].mxu1 }
 0x3d3   : > { %v9904_v41 = vadd.f32 %v9903_v8, %v9902_v44  ;;  %v9905_v52 = vpop.f32.mrb[178].mxu1 }
 0x3d4   : > { %v9906_v43 = vpop.f32.mrb[179].mxu1 }
 0x3d5   : > { %10777 = vmatpush3.bf16.msra.mxu1 %v11863_v24  ;;  %v14201_v37 = vadd.f32 %v13942_v3, %v9904_v41  ;;  %v9907_v19 = vadd.f32 %v9906_v43, %v9905_v52  ;;  %v15196_v24 = vld [vmem:[#allocation29_spill] sm:$0xff] }
 0x3d6   : > { %10778 = vmatprep.subr.bf16.mxu1 %v11864_v58 }
 0x3d7   : > { %7591 = vmatmul.mubr.bf16.gmra.mrb[80].mxu0 %v13929_v20  ;;  %v14207_v10 = vadd.f32 %v13945_v4, %v9907_v19  ;;  %v15195_v4 = vld [vmem:[#allocation41_spill] sm:$0xff] }
 0x3d8   : > { %10747 = vmatmul.mubr.bf16.gmra.mrb[124].mxu1 %v14076_v31  ;;  %7598 = vmatprep.mubr.bf16.mxu0 %v13936_v53 }
 0x3d9   : > { %10750 = vmatprep.mubr.bf16.mxu1 %v14084_v38  ;;  %10779 = vmatpush3.bf16.msra.mxu1 %v11864_v58  ;;  %v9908_v62 = vpop.f32.mrb[180].mxu1  ;;  %v14223_v58 = vld [vmem:[%s14791_s6] ss:$0 sm:$0xff] }
 0x3da   : > { %10780 = vmatprep.subr.bf16.mxu1 %v11865_v49  ;;  %v9909_v57 = vpop.f32.mrb[181].mxu1 }
 0x3db   : > { %v9910_v3 = vadd.f32 %v9909_v57, %v9908_v62  ;;  %v9911_v25 = vpop.f32.mrb[182].mxu1 }
 0x3dc   : > { %v9912_v50 = vpop.f32.mrb[183].mxu1 }
 0x3dd   : > { %10781 = vmatpush3.bf16.msra.mxu1 %v11865_v49  ;;  %v14211_v55 = vadd.f32 %v13957_v1, %v9910_v3  ;;  %v9913_v20 = vadd.f32 %v9912_v50, %v9911_v25  ;;  %v10936_v49 = vadd.f32 %v14081_v23, %v14223_v58  ;;  %v15197_v25 = vld [vmem:[#allocation19_spill] sm:$0xff]  ;;  %v15201_v23 = vld [vmem:[#allocation57_spill] sm:$0xff] }
 0x3df   : > { %7599 = vmatmul.mubr.bf16.gmra.mrb[84].mxu0 %v13947_v59  ;;  %v14217_v44 = vadd.f32 %v15196_v24, %v9913_v20  ;;  %v15198_v24 = vld [vmem:[#allocation55_spill] sm:$0xff] }
 0x3e0   : > { %10751 = vmatmul.mubr.bf16.gmra.mrb[128].mxu1 %v14093_v42  ;;  %7606 = vmatprep.mubr.bf16.mxu0 %v15195_v4 }
 0x3e1   : > { %10754 = vmatprep.mubr.bf16.mxu1 %v14100_v33 }
 0x3e2   : > { %v9914_v8 = vpop.f32.mrb[184].mxu1 }
 0x3e3   : > { %v9990_v1 = vpop.f32.mrb[240].mxu0  ;;  %v9915_v41 = vpop.f32.mrb[185].mxu1 }
 0x3e4   : > { %v9991_v52 = vpop.f32.mrb[241].mxu0  ;;  %v9916_v43 = vadd.f32 %v9915_v41, %v9914_v8  ;;  %v9917_v59 = vpop.f32.mrb[186].mxu1  ;;  %v10952_v8 = vadd.f32 %v14090_v22, %v14223_v58  ;;  %v10928_v22 = vadd.f32 %v14097_v35, %v14223_v58  ;;  %v15207_v35 = vld [vmem:[#allocation62_spill] sm:$0xff] }
 0x3e5   : > { %v9992_v19 = vadd.f32 %v9991_v52, %v9990_v1  ;;  %v9993_v62 = vpop.f32.mrb[242].mxu0  ;;  %v9918_v57 = vpop.f32.mrb[187].mxu1  ;;  %v15200_v1 = vld [vmem:[#allocation20_spill] sm:$0xff] }
 0x3e6   : > { %v9994_v3 = vpop.f32.mrb[243].mxu0  ;;  %v14228_v50 = vadd.f32 %v15197_v25, %v9916_v43  ;;  %v9919_v20 = vadd.f32 %v9918_v57, %v9917_v59 }
 0x3e7   : > { %7607 = vmatmul.mubr.bf16.gmra.mrb[88].mxu0 %v15198_v24  ;;  %v14231_v4 = vadd.f32 %v10936_v49, %v9992_v19  ;;  %v9995_v53 = vadd.f32 %v9994_v3, %v9993_v62 }
 0x3e8   : > { %10755 = vmatmul.mubr.bf16.gmra.mrb[132].mxu1 %v14110_v39  ;;  %7614 = vmatprep.mubr.bf16.mxu0 %v15200_v1  ;;  %v14238_v41 = vadd.f32 %v15201_v23, %v9919_v20  ;;  %v15203_v1 = vld [vmem:[#allocation18_spill] sm:$0xff] }
 0x3e9   : > { %15199 = vst [vmem:[#allocation60_spill] sm:$0xff] %v14231_v4  ;;  %10758 = vmatprep.mubr.bf16.mxu1 %v14118_v26  ;;  %v14241_v52 = vadd.f32 %v10952_v8, %v9995_v53 }
 0x3ea   : > { %v9920_v43 = vpop.f32.mrb[188].mxu1 }
 0x3eb   : > { %15202 = vst [vmem:[#allocation61_spill] sm:$0xff] %v14241_v52  ;;  %v9996_v59 = vpop.f32.mrb[244].mxu0  ;;  %v9921_v57 = vpop.f32.mrb[189].mxu1  ;;  %v15208_v52 = vld [vmem:[#allocation25_spill] sm:$0xff] }
 0x3ec   : > { %v9997_v19 = vpop.f32.mrb[245].mxu0  ;;  %v9922_v49 = vadd.f32 %v9921_v57, %v9920_v43  ;;  %v9923_v62 = vpop.f32.mrb[190].mxu1  ;;  %v10944_v43 = vadd.f32 %v14107_v7, %v14223_v58  ;;  %v10968_v7 = vadd.f32 %v14115_v36, %v14223_v58  ;;  %v15212_v36 = vld [vmem:[#allocation72_spill] sm:$0xff] }
 0x3ed   : > { %v9998_v3 = vadd.f32 %v9997_v19, %v9996_v59  ;;  %v9999_v25 = vpop.f32.mrb[246].mxu0  ;;  %v9924_v24 = vpop.f32.mrb[191].mxu1  ;;  %v15206_v59 = vld [vmem:[#allocation24_spill] sm:$0xff] }
 0x3ee   : > { %v10000_v4 = vpop.f32.mrb[247].mxu0  ;;  %v14246_v20 = vadd.f32 %v15203_v1, %v9922_v49  ;;  %v9925_v23 = vadd.f32 %v9924_v24, %v9923_v62 }
 0x3ef   : > { %7615 = vmatmul.mubr.bf16.gmra.mrb[92].mxu0 %v15204_v18  ;;  %v14249_v53 = vadd.f32 %v10928_v22, %v9998_v3  ;;  %v10001_v8 = vadd.f32 %v10000_v4, %v9999_v25 }
 0x3f0   : > { %10759 = vmatmul.mubr.bf16.gmra.mrb[136].mxu1 %v14125_v15  ;;  %7622 = vmatprep.mubr.bf16.mxu0 %v15206_v59  ;;  %v14256_v57 = vadd.f32 %v15207_v35, %v9925_v23  ;;  %v15209_v59 = vld [vmem:[#allocation23_spill] sm:$0xff] }
 0x3f1   : > { %15205 = vst [vmem:[#allocation34_spill] sm:$0xff] %v14249_v53  ;;  %10762 = vmatprep.mubr.bf16.mxu1 %v14136_v11  ;;  %v14259_v1 = vadd.f32 %v10944_v43, %v10001_v8 }
 0x3f2   : > { %v9926_v19 = vpop.f32.mrb[192].mxu1 }
 0x3f3   : > { %v10002_v49 = vpop.f32.mrb[248].mxu0  ;;  %v9927_v18 = vpop.f32.mrb[193].mxu1 }
 0x3f4   : > { %v10003_v62 = vpop.f32.mrb[249].mxu0  ;;  %v9928_v3 = vadd.f32 %v9927_v18, %v9926_v19  ;;  %v9929_v4 = vpop.f32.mrb[194].mxu1  ;;  %v10984_v19 = vadd.f32 %v14129_v2, %v14223_v58 }
 0x3f5   : > { %v10004_v22 = vadd.f32 %v10003_v62, %v10002_v49  ;;  %v10005_v25 = vpop.f32.mrb[250].mxu0  ;;  %v9930_v24 = vpop.f32.mrb[195].mxu1  ;;  %v15211_v49 = vld [vmem:[#allocation63_spill] sm:$0xff] }
 0x3f6   : > { %v10006_v53 = vpop.f32.mrb[251].mxu0  ;;  %v14264_v23 = vadd.f32 %v15208_v52, %v9928_v3  ;;  %v9931_v35 = vadd.f32 %v9930_v24, %v9929_v4 }
 0x3f7   : > { %7623 = vmatmul.mubr.bf16.gmra.mrb[96].mxu0 %v15209_v59  ;;  %v14267_v8 = vadd.f32 %v10968_v7, %v10004_v22  ;;  %v10007_v43 = vadd.f32 %v10006_v53, %v10005_v25  ;;  %v15214_v25 = vld [vmem:[#allocation42_spill] sm:$0xff] }
 0x3f8   : > { %10763 = vmatmul.mubr.bf16.gmra.mrb[140].mxu1 %v14143_v21  ;;  %7630 = vmatprep.mubr.bf16.mxu0 %v15211_v49  ;;  %v14274_v18 = vadd.f32 %v15212_v36, %v9931_v35  ;;  %v15215_v35 = vld [vmem:[#allocation56_spill] sm:$0xff]  ;;  %v15216_v36 = vld [vmem:[#allocation27_spill] sm:$0xff] }
 0x3f9   : > { %15210 = vst [vmem:[#allocation51_spill] sm:$0xff] %v14267_v8  ;;  %10782 = vmatprep.mubr.bf16.mxu1 %v14031_v56  ;;  %v14277_v52 = vadd.f32 %v10984_v19, %v10007_v43  ;;  %v10960_v43 = vadd.f32 %v14133_v46, %v14223_v58 }
 0x3fb   : > { %15213 = vst [vmem:[#allocation32_spill] sm:$0xff] %v14277_v52  ;;  %v9932_v62 = vpop.f32.mrb[196].mxu1  ;;  %v15218_v52 = vld [vmem:[#allocation58_spill] sm:$0xff] }
 0x3fc   : > { %v9933_v3 = vpop.f32.mrb[197].mxu1 }
 0x3fd   : > { %v9934_v59 = vadd.f32 %v9933_v3, %v9932_v62  ;;  %v9935_v4 = vpop.f32.mrb[198].mxu1 }
 0x3fe   : > { %v9936_v22 = vpop.f32.mrb[199].mxu1  ;;  %v10008_v53 = vpop.f32.mrb[252].mxu0 }
 0x3ff   : > { %v14280_v7 = vadd.f32 %v14023_v17, %v9934_v59  ;;  %v9937_v2 = vadd.f32 %v9936_v22, %v9935_v4  ;;  %7631 = vmatmul.mubr.bf16.gmra.mrb[100].mxu0 %v15214_v25  ;;  %v10009_v24 = vpop.f32.mrb[253].mxu0  ;;  %v10976_v4 = vadd.f32 %v14147_v30, %v14223_v58 }
 0x400   : > { %10783 = vmatmul.mubr.bf16.vlgmr.msra.gmra.mrb[112].mxu1 %v14039_v40  ;;  %7638 = vmatprep.mubr.bf16.mxu0 %v15215_v35  ;;  %v10010_v56 = vadd.f32 %v10009_v24, %v10008_v53  ;;  %v10011_v19 = vpop.f32.mrb[254].mxu0 }
 0x401   : > { %v14288_v62 = vadd.f32 %v15216_v36, %v9937_v2  ;;  %10786 = vmatprep.mubr.bf16.mxu1 %v14053_v5  ;;  %v10012_v17 = vpop.f32.mrb[255].mxu0  ;;  %v15219_v36 = vld [vmem:[#allocation33_spill] sm:$0xff] }
 0x402   : > { %v14291_v3 = vadd.f32 %v10960_v43, %v10010_v56  ;;  %v10013_v59 = vadd.f32 %v10012_v17, %v10011_v19  ;;  %v15220_v5 = vld [vmem:[#allocation45_spill] sm:$0xff]  ;;  %v15221_v56 = vld [vmem:[#allocation59_spill] sm:$0xff] }
 0x403   : > { %v9938_v40 = vpop.f32.mrb[200].mxu1 }
 0x404   : > { %v9939_v22 = vpop.f32.mrb[201].mxu1  ;;  %v14295_v25 = vadd.f32 %v10976_v4, %v10013_v59 }
 0x405   : > { %v9940_v53 = vadd.f32 %v9939_v22, %v9938_v40  ;;  %v9941_v24 = vpop.f32.mrb[202].mxu1 }
 0x406   : > { %15217 = vst [vmem:[#allocation21_spill] sm:$0xff] %v14295_v25  ;;  %v9942_v46 = vpop.f32.mrb[203].mxu1 }
 0x407   : > { %v14298_v8 = vadd.f32 %v15218_v52, %v9940_v53  ;;  %v9943_v2 = vadd.f32 %v9942_v46, %v9941_v24  ;;  %7639 = vmatmul.mubr.bf16.gmra.mrb[104].mxu0 %v15219_v36  ;;  %v11000_v52 = vadd.f32 %v14151_v47, %v14223_v58  ;;  %v15224_v47 = vld [vmem:[#allocation64_spill] sm:$0xff] }
 0x408   : > { %10787 = vmatmul.mubr.bf16.gmra.mrb[116].mxu1 %v14061_v51  ;;  %7646 = vmatprep.mubr.bf16.mxu0 %v15220_v5 }
 0x409   : > { %v14304_v43 = vadd.f32 %v15221_v56, %v9943_v2  ;;  %10790 = vmatprep.mubr.bf16.mxu1 %v14072_v27  ;;  %v10014_v30 = vpop.f32.mrb[0].mxu0  ;;  %v11016_v2 = vadd.f32 %v14162_v48, %v14223_v58  ;;  %v15222_v27 = vld [vmem:[#allocation30_spill] sm:$0xff] }
 0x40a   : > { %v10015_v19 = vpop.f32.mrb[1].mxu0 }
 0x40b   : > { %v9944_v17 = vpop.f32.mrb[204].mxu1  ;;  %v10016_v59 = vadd.f32 %v10015_v19, %v10014_v30  ;;  %v10017_v4 = vpop.f32.mrb[2].mxu0  ;;  %v15223_v19 = vld [vmem:[#allocation28_spill] sm:$0xff] }
 0x40c   : > { %v9945_v40 = vpop.f32.mrb[205].mxu1  ;;  %v10018_v22 = vpop.f32.mrb[3].mxu0 }
 0x40d   : > { %v9946_v53 = vadd.f32 %v9945_v40, %v9944_v17  ;;  %v9947_v24 = vpop.f32.mrb[206].mxu1  ;;  %v14309_v51 = vadd.f32 %v11000_v52, %v10016_v59  ;;  %v10019_v46 = vadd.f32 %v10018_v22, %v10017_v4  ;;  %v15225_v17 = vld [vmem:[#allocation47_spill] sm:$0xff]  ;;  %v10992_v40 = vadd.f32 %v14166_v54, %v14223_v58 }
 0x40e   : > { %v9948_v36 = vpop.f32.mrb[207].mxu1 }
 0x40f   : > { %v14314_v56 = vadd.f32 %v15222_v27, %v9946_v53  ;;  %v9949_v25 = vadd.f32 %v9948_v36, %v9947_v24  ;;  %v14316_v30 = vadd.f32 %v11016_v2, %v10019_v46  ;;  %7647 = vmatmul.mubr.bf16.gmra.mrb[108].mxu0 %v15223_v19  ;;  %v15226_v2 = vld [vmem:[#allocation22_spill] sm:$0xff]  ;;  %v11032_v19 = vadd.f32 %v14179_v14, %v14223_v58 }
 0x410   : > { %10791 = vmatmul.mubr.bf16.gmra.mrb[120].mxu1 %v14076_v31  ;;  %8088 = vmatprep.mubr.bf16.mxu0 %v15224_v47  ;;  %v11008_v31 = vadd.f32 %v14174_v6, %v14223_v58 }
 0x411   : > { %v14322_v59 = vadd.f32 %v15225_v17, %v9949_v25  ;;  %10794 = vmatprep.mubr.bf16.mxu1 %v14084_v38  ;;  %v15227_v38 = vld [vmem:[#allocation39_spill] sm:$0xff] }
 0x412   : > { %v10020_v52 = vpop.f32.mrb[4].mxu0 }
 0x413   : > { %v10021_v48 = vpop.f32.mrb[5].mxu0 }
 0x414   : > { %v10022_v4 = vadd.f32 %v10021_v48, %v10020_v52  ;;  %v10023_v22 = vpop.f32.mrb[6].mxu0 }
 0x415   : > { %v10024_v53 = vpop.f32.mrb[7].mxu0 }
 0x416   : > { %v14327_v24 = vadd.f32 %v10992_v40, %v10022_v4  ;;  %v10025_v46 = vadd.f32 %v10024_v53, %v10023_v22  ;;  %v11024_v40 = vadd.f32 %v14191_v61, %v14223_v58 }
 0x417   : > { %8089 = vmatmul.mubr.bf16.vlgmr.msra.gmra.mrb[112].mxu0 %v15226_v2 }
 0x418   : > { %10795 = vmatmul.mubr.bf16.gmra.mrb[124].mxu1 %v14093_v42  ;;  %v14333_v25 = vadd.f32 %v11008_v31, %v10025_v46  ;;  %8096 = vmatprep.mubr.bf16.mxu0 %v15227_v38  ;;  %v11048_v42 = vadd.f32 %v14187_v60, %v14223_v58  ;;  %v11064_v31 = vadd.f32 %v14201_v37, %v14223_v58 }
 0x419   : > { %10798 = vmatprep.mubr.bf16.mxu1 %v14100_v33 }
 0x41a   : > { %v10026_v36 = vpop.f32.mrb[8].mxu0 }
 0x41b   : > { %v10027_v54 = vpop.f32.mrb[9].mxu0 }
 0x41c   : > { %v10028_v27 = vadd.f32 %v10027_v54, %v10026_v36  ;;  %v10029_v47 = vpop.f32.mrb[10].mxu0  ;;  %v11056_v54 = vadd.f32 %v14211_v55, %v14223_v58  ;;  %v11096_v55 = vadd.f32 %v14228_v50, %v14223_v58  ;;  %v11088_v50 = vadd.f32 %v14246_v20, %v14223_v58 }
 0x41d   : > { %v10030_v17 = vpop.f32.mrb[11].mxu0  ;;  %v11128_v20 = vadd.f32 %v14264_v23, %v14223_v58  ;;  %v11120_v23 = vadd.f32 %v14280_v7, %v14223_v58  ;;  %v11160_v7 = vadd.f32 %v14298_v8, %v14223_v58  ;;  %v11152_v8 = vadd.f32 %v14314_v56, %v14223_v58  ;;  %v15233_v56 = vld [vmem:[#allocation60_spill] sm:$0xff] }
 0x41e   : > { %v14339_v52 = vadd.f32 %v11032_v19, %v10028_v27  ;;  %v10031_v6 = vadd.f32 %v10030_v17, %v10029_v47 }
 0x41f   : > { %8097 = vmatmul.mubr.bf16.gmra.mrb[116].mxu0 %v14138_v9 }
 0x420   : > { %10799 = vmatmul.mubr.bf16.gmra.mrb[128].mxu1 %v14110_v39  ;;  %v14345_v48 = vadd.f32 %v11048_v42, %v10031_v6  ;;  %8104 = vmatprep.mubr.bf16.mxu0 %v15194_v13  ;;  %v11040_v39 = vadd.f32 %v14197_v45, %v14223_v58 }
 0x421   : > { %10802 = vmatprep.mubr.bf16.mxu1 %v14118_v26 }
 0x422   : > { %v10032_v33 = vpop.f32.mrb[12].mxu0 }
 0x423   : > { %v10033_v14 = vpop.f32.mrb[13].mxu0 }
 0x424   : > { %v10034_v4 = vadd.f32 %v10033_v14, %v10032_v33  ;;  %v10035_v22 = vpop.f32.mrb[14].mxu0 }
 0x425   : > { %v10036_v53 = vpop.f32.mrb[15].mxu0 }
 0x426   : > { %v14351_v46 = vadd.f32 %v11024_v40, %v10034_v4  ;;  %v10037_v60 = vadd.f32 %v10036_v53, %v10035_v22  ;;  %v15228_v40 = vld [vmem:[#allocation31_spill] sm:$0xff] }
 0x427   : > { %8105 = vmatmul.mubr.bf16.gmra.mrb[120].mxu0 %v14156_v16 }
 0x428   : > { %10803 = vmatmul.mubr.bf16.gmra.mrb[132].mxu1 %v14125_v15  ;;  %v14357_v9 = vadd.f32 %v11040_v39, %v10037_v60  ;;  %8112 = vmatprep.mubr.bf16.mxu0 %v13825_v28  ;;  %v11080_v15 = vadd.f32 %v14207_v10, %v14223_v58 }
 0x429   : > { %10806 = vmatprep.mubr.bf16.mxu1 %v14136_v11 }
 0x42a   : > { %v10038_v26 = vpop.f32.mrb[16].mxu0 }
 0x42b   : > { %v10039_v13 = vpop.f32.mrb[17].mxu0 }
 0x42c   : > { %v10040_v61 = vadd.f32 %v10039_v13, %v10038_v26  ;;  %v10041_v2 = vpop.f32.mrb[18].mxu0 }
 0x42d   : > { %v10042_v38 = vpop.f32.mrb[19].mxu0 }
 0x42e   : > { %v14363_v36 = vadd.f32 %v11064_v31, %v10040_v61  ;;  %v10043_v45 = vadd.f32 %v10042_v38, %v10041_v2  ;;  %v11905_v61 = vld [vmem:[#allocation2 + $0x54] sm:$0xff]   ;;  %v15229_v2 = vld [vmem:[#allocation54_spill] sm:$0xff] }
 0x42f   : > { %8113 = vmatmul.mubr.bf16.gmra.mrb[124].mxu0 %v14168_v34 }
 0x430   : > { %10807 = vmatmul.mubr.bf16.gmra.mrb[136].mxu1 %v14143_v21  ;;  %v14369_v28 = vadd.f32 %v11080_v15, %v10043_v45  ;;  %8120 = vmatprep.mubr.bf16.mxu0 %v13867_v12  ;;  %v11072_v21 = vadd.f32 %v14217_v44, %v14223_v58  ;;  %v11904_v44 = vld [vmem:[#allocation2 + $0x48] sm:$0xff]  }
 0x431   : > { %10810 = vmatprep.mubr.bf16.mxu1 %v14154_v63 }
 0x432   : > { %v10044_v11 = vpop.f32.mrb[20].mxu0 }
 0x433   : > { %v10045_v16 = vpop.f32.mrb[21].mxu0 }
 0x434   : > { %v10046_v37 = vadd.f32 %v10045_v16, %v10044_v11  ;;  %v10047_v27 = vpop.f32.mrb[22].mxu0 }
 0x435   : > { %v10048_v19 = vpop.f32.mrb[23].mxu0 }
 0x436   : > { %v14375_v47 = vadd.f32 %v11056_v54, %v10046_v37  ;;  %v10049_v10 = vadd.f32 %v10048_v19, %v10047_v27  ;;  %v11906_v27 = vld [vmem:[#allocation2 + $0x60] sm:$0xff]  }
 0x437   : > { %8121 = vmatmul.mubr.bf16.gmra.mrb[128].mxu0 %v14181_v32  ;;  %v11112_v32 = vadd.f32 %v14238_v41, %v14223_v58  ;;  %v11104_v41 = vadd.f32 %v14256_v57, %v14223_v58  ;;  %v11144_v57 = vadd.f32 %v14274_v18, %v14223_v58  ;;  %v11136_v18 = vadd.f32 %v14288_v62, %v14223_v58 }
 0x438   : > { %10811 = vmatmul.mubr.bf16.gmra.mrb[140].mxu1 %v15128_v29  ;;  %v14381_v12 = vadd.f32 %v11072_v21, %v10049_v10  ;;  %8128 = vmatprep.mubr.bf16.mxu0 %v13882_v0  ;;  %v15230_v10 = vld [vmem:[#allocation41_spill] sm:$0xff]  ;;  %v11176_v62 = vadd.f32 %v14304_v43, %v14223_v58  ;;  %v11168_v43 = vadd.f32 %v14322_v59, %v14223_v58 }
 0x43a   : > { %v10050_v63 = vpop.f32.mrb[24].mxu0 }
 0x43b   : > { %v10051_v34 = vpop.f32.mrb[25].mxu0 }
 0x43c   : > { %v10052_v17 = vadd.f32 %v10051_v34, %v10050_v63  ;;  %v10053_v6 = vpop.f32.mrb[26].mxu0 }
 0x43d   : > { %v10054_v42 = vpop.f32.mrb[27].mxu0 }
 0x43e   : > { %v14386_v33 = vadd.f32 %v11096_v55, %v10052_v17  ;;  %v10055_v14 = vadd.f32 %v10054_v42, %v10053_v6 }
 0x43f   : > { %8129 = vmatmul.mubr.bf16.gmra.mrb[132].mxu0 %v11904_v44  ;;  %v15231_v44 = vld [vmem:[#allocation20_spill] sm:$0xff] }
 0x440   : > { %v14390_v4 = vadd.f32 %v11112_v32, %v10055_v14  ;;  %8136 = vmatprep.mubr.bf16.mxu0 %v15228_v40  ;;  %v11907_v14 = vld [vmem:[#allocation2 + $0x6c] sm:$0xff]  }
 0x442   : > { %v10056_v0 = vpop.f32.mrb[28].mxu0 }
 0x443   : > { %v10057_v22 = vpop.f32.mrb[29].mxu0 }
 0x444   : > { %v10058_v53 = vadd.f32 %v10057_v22, %v10056_v0  ;;  %v10059_v60 = vpop.f32.mrb[30].mxu0 }
 0x445   : > { %v10060_v39 = vpop.f32.mrb[31].mxu0 }
 0x446   : > { %v14395_v26 = vadd.f32 %v11088_v50, %v10058_v53  ;;  %v10061_v13 = vadd.f32 %v10060_v39, %v10059_v60 }
 0x447   : > { %8137 = vmatmul.mubr.bf16.gmra.mrb[136].mxu0 %v11905_v61  ;;  %v15232_v61 = vld [vmem:[#allocation24_spill] sm:$0xff] }
 0x448   : > { %v14399_v31 = vadd.f32 %v11104_v41, %v10061_v13  ;;  %8144 = vmatprep.mubr.bf16.mxu0 %v15229_v2  ;;  %v11908_v13 = vld [vmem:[#allocation2 + $0x78] sm:$0xff]  }
 0x44a   : > { %v10062_v38 = vpop.f32.mrb[32].mxu0 }
 0x44b   : > { %v10063_v45 = vpop.f32.mrb[33].mxu0 }
 0x44c   : > { %v10064_v15 = vadd.f32 %v10063_v45, %v10062_v38  ;;  %v10065_v11 = vpop.f32.mrb[34].mxu0 }
 0x44d   : > { %v10066_v16 = vpop.f32.mrb[35].mxu0 }
 0x44e   : > { %v14404_v37 = vadd.f32 %v11128_v20, %v10064_v15  ;;  %v10067_v54 = vadd.f32 %v10066_v16, %v10065_v11 }
 0x44f   : > { %8145 = vmatmul.mubr.bf16.gmra.mrb[140].mxu0 %v11906_v27 }
 0x450   : > { %v14408_v19 = vadd.f32 %v11144_v57, %v10067_v54  ;;  %8152 = vmatprep.mubr.bf16.mxu0 %v15230_v10  ;;  %v11909_v54 = vld [vmem:[#allocation2 + $0x84] sm:$0xff]  }
 0x452   : > { %v10068_v21 = vpop.f32.mrb[36].mxu0 }
 0x453   : > { %v10069_v63 = vpop.f32.mrb[37].mxu0 }
 0x454   : > { %v10070_v34 = vadd.f32 %v10069_v63, %v10068_v21  ;;  %v10071_v17 = vpop.f32.mrb[38].mxu0 }
 0x455   : > { %v10072_v55 = vpop.f32.mrb[39].mxu0 }
 0x456   : > { %v14413_v6 = vadd.f32 %v11120_v23, %v10070_v34  ;;  %v10073_v42 = vadd.f32 %v10072_v55, %v10071_v17  ;;  %v11910_v55 = vld [vmem:[#allocation2 + $0x90] sm:$0xff]  }
 0x457   : > { %8153 = vmatmul.mubr.bf16.gmra.mrb[144].mxu0 %v11907_v14 }
 0x458   : > { %v14417_v32 = vadd.f32 %v11136_v18, %v10073_v42  ;;  %8160 = vmatprep.mubr.bf16.mxu0 %v15231_v44  ;;  %v15234_v42 = vld [vmem:[#allocation61_spill] sm:$0xff] }
 0x45a   : > { %v10074_v40 = vpop.f32.mrb[40].mxu0 }
 0x45b   : > { %v10075_v0 = vpop.f32.mrb[41].mxu0 }
 0x45c   : > { %v10076_v22 = vadd.f32 %v10075_v0, %v10074_v40  ;;  %v10077_v53 = vpop.f32.mrb[42].mxu0  ;;  %v15235_v40 = vld [vmem:[#allocation34_spill] sm:$0xff] }
 0x45d   : > { %v10078_v50 = vpop.f32.mrb[43].mxu0 }
 0x45e   : > { %v14422_v60 = vadd.f32 %v11160_v7, %v10076_v22  ;;  %v10079_v39 = vadd.f32 %v10078_v50, %v10077_v53  ;;  %v11911_v7 = vld [vmem:[#allocation2 + $0x9c] sm:$0xff]  }
 0x45f   : > { %8161 = vmatmul.mubr.bf16.gmra.mrb[148].mxu0 %v11908_v13 }
 0x460   : > { %v14426_v41 = vadd.f32 %v11176_v62, %v10079_v39  ;;  %8168 = vmatprep.mubr.bf16.mxu0 %v15232_v61  ;;  %v15236_v61 = vld [vmem:[#allocation51_spill] sm:$0xff] }
 0x462   : > { %v10080_v2 = vpop.f32.mrb[44].mxu0 }
 0x463   : > { %v10081_v38 = vpop.f32.mrb[45].mxu0 }
 0x464   : > { %v10082_v45 = vadd.f32 %v10081_v38, %v10080_v2  ;;  %v10083_v15 = vpop.f32.mrb[46].mxu0 }
 0x465   : > { %v10084_v20 = vpop.f32.mrb[47].mxu0 }
 0x466   : > { %v14431_v11 = vadd.f32 %v11152_v8, %v10082_v45  ;;  %v10085_v16 = vadd.f32 %v10084_v20, %v10083_v15  ;;  %v11912_v45 = vld [vmem:[#allocation2 + $0xa8] sm:$0xff]   ;;  %v15237_v8 = vld [vmem:[#allocation32_spill] sm:$0xff] }
 0x467   : > { %8169 = vmatmul.mubr.bf16.gmra.mrb[152].mxu0 %v11909_v54  ;;  %v15238_v20 = vld [vmem:[#allocation36_spill] sm:$0xff] }
 0x468   : > { %v14435_v57 = vadd.f32 %v11168_v43, %v10085_v16  ;;  %8176 = vmatprep.mubr.bf16.mxu0 %v15211_v49 }
 0x46a   : > { %v10126_v27 = vpop.f32.mrb[48].mxu0 }
 0x46b   : > { %v10127_v10 = vpop.f32.mrb[49].mxu0 }
 0x46c   : > { %v10128_v21 = vadd.f32 %v10127_v10, %v10126_v27  ;;  %v10129_v63 = vpop.f32.mrb[50].mxu0 }
 0x46d   : > { %v10130_v34 = vpop.f32.mrb[51].mxu0 }
 0x46e   : > { %v14439_v23 = vadd.f32 %v15233_v56, %v10128_v21  ;;  %v10131_v17 = vadd.f32 %v10130_v34, %v10129_v63  ;;  %v11913_v21 = vld [vmem:[#allocation2 + $0xb4] sm:$0xff]  }
 0x46f   : > { %8177 = vmatmul.mubr.bf16.gmra.mrb[156].mxu0 %v11910_v55  ;;  %v15239_v63 = vld [vmem:[#allocation21_spill] sm:$0xff] }
 0x470   : > { %v14442_v18 = vadd.f32 %v15234_v42, %v10131_v17  ;;  %8184 = vmatprep.mubr.bf16.mxu0 %v15215_v35 }
 0x472   : > { %v10132_v58 = vpop.f32.mrb[52].mxu0 }
 0x473   : > { %v10133_v59 = vpop.f32.mrb[53].mxu0 }
 0x474   : > { %v10134_v14 = vadd.f32 %v10133_v59, %v10132_v58  ;;  %v10135_v49 = vpop.f32.mrb[54].mxu0 }
 0x475   : > { %v10136_v44 = vpop.f32.mrb[55].mxu0 }
 0x476   : > { %v14446_v0 = vadd.f32 %v15235_v40, %v10134_v14  ;;  %v10137_v22 = vadd.f32 %v10136_v44, %v10135_v49 }
 0x477   : > { %8185 = vmatmul.mubr.bf16.gmra.mrb[160].mxu0 %v11911_v7 }
 0x478   : > { %v14449_v53 = vadd.f32 %v14259_v1, %v10137_v22  ;;  %8192 = vmatprep.mubr.bf16.mxu0 %v15220_v5 }
 0x47a   : > { %v10138_v50 = vpop.f32.mrb[56].mxu0 }
 0x47b   : > { %v10139_v39 = vpop.f32.mrb[57].mxu0 }
 0x47c   : > { %v10140_v62 = vadd.f32 %v10139_v39, %v10138_v50  ;;  %v10141_v35 = vpop.f32.mrb[58].mxu0 }
 0x47d   : > { %v10142_v13 = vpop.f32.mrb[59].mxu0 }
 0x47e   : > { %v14453_v2 = vadd.f32 %v15236_v61, %v10140_v62  ;;  %v10143_v38 = vadd.f32 %v10142_v13, %v10141_v35 }
 0x47f   : > { %8193 = vmatmul.mubr.bf16.gmra.mrb[164].mxu0 %v11912_v45 }
 0x480   : > { %v14456_v15 = vadd.f32 %v15237_v8, %v10143_v38  ;;  %8200 = vmatprep.mubr.bf16.mxu0 %v15238_v20 }
 0x482   : > { %v10144_v1 = vpop.f32.mrb[60].mxu0 }
 0x483   : > { %v10145_v16 = vpop.f32.mrb[61].mxu0 }
 0x484   : > { %v10146_v43 = vadd.f32 %v10145_v16, %v10144_v1  ;;  %v10147_v5 = vpop.f32.mrb[62].mxu0 }
 0x485   : > { %v10148_v54 = vpop.f32.mrb[63].mxu0 }
 0x486   : > { %v14460_v27 = vadd.f32 %v14291_v3, %v10146_v43  ;;  %v10149_v10 = vadd.f32 %v10148_v54, %v10147_v5 }
 0x487   : > { %8201 = vmatmul.mubr.bf16.gmra.mrb[168].mxu0 %v11913_v21 }
 0x488   : > { %v14463_v34 = vadd.f32 %v15239_v63, %v10149_v10  ;;  %8208 = vmatprep.mubr.bf16.mxu0 %v15128_v29 }
 0x48a   : > { %v10150_v56 = vpop.f32.mrb[64].mxu0 }
 0x48b   : > { %v10151_v17 = vpop.f32.mrb[65].mxu0 }
 0x48c   : > { %v10152_v55 = vadd.f32 %v10151_v17, %v10150_v56  ;;  %v10153_v42 = vpop.f32.mrb[66].mxu0 }
 0x48d   : > { %v10154_v58 = vpop.f32.mrb[67].mxu0 }
 0x48e   : > { %v14467_v59 = vadd.f32 %v14309_v51, %v10152_v55  ;;  %v10155_v14 = vadd.f32 %v10154_v58, %v10153_v42 }
 0x48f   : > { %8209 = vmatmul.mubr.bf16.gmra.mrb[172].mxu0 %v15128_v29 }
 0x490   : > { %v14471_v3 = vadd.f32 %v14316_v30, %v10155_v14 }
 0x492   : > { %v10156_v49 = vpop.f32.mrb[68].mxu0 }
 0x493   : > { %v10157_v44 = vpop.f32.mrb[69].mxu0 }
 0x494   : > { %v10158_v40 = vadd.f32 %v10157_v44, %v10156_v49  ;;  %v10159_v22 = vpop.f32.mrb[70].mxu0 }
 0x495   : > { %v10160_v7 = vpop.f32.mrb[71].mxu0 }
 0x496   : > { %v14474_v50 = vadd.f32 %v14327_v24, %v10158_v40  ;;  %v10161_v39 = vadd.f32 %v10160_v7, %v10159_v22 }
 0x498   : > { %v14477_v62 = vadd.f32 %v14333_v25, %v10161_v39 }
 0x49a   : > { %v10162_v51 = vpop.f32.mrb[72].mxu0 }
 0x49b   : > { %v10163_v35 = vpop.f32.mrb[73].mxu0 }
 0x49c   : > { %v10164_v13 = vadd.f32 %v10163_v35, %v10162_v51  ;;  %v10165_v61 = vpop.f32.mrb[74].mxu0 }
 0x49d   : > { %v10166_v29 = vpop.f32.mrb[75].mxu0 }
 0x49e   : > { %v14480_v30 = vadd.f32 %v14339_v52, %v10164_v13  ;;  %v10167_v38 = vadd.f32 %v10166_v29, %v10165_v61 }
 0x4a0   : > { %v14483_v45 = vadd.f32 %v14345_v48, %v10167_v38 }
 0x4a2   : > { %v10168_v8 = vpop.f32.mrb[76].mxu0 }
 0x4a3   : > { %v10169_v20 = vpop.f32.mrb[77].mxu0 }
 0x4a4   : > { %v10170_v24 = vadd.f32 %v10169_v20, %v10168_v8  ;;  %v10171_v1 = vpop.f32.mrb[78].mxu0 }
 0x4a5   : > { %v10172_v16 = vpop.f32.mrb[79].mxu0 }
 0x4a6   : > { %v14486_v25 = vadd.f32 %v14351_v46, %v10170_v24  ;;  %v10173_v43 = vadd.f32 %v10172_v16, %v10171_v1 }
 0x4a8   : > { %v14489_v5 = vadd.f32 %v14357_v9, %v10173_v43 }
 0x4aa   : > { %v10174_v54 = vpop.f32.mrb[80].mxu0 }
 0x4ab   : > { %v10175_v10 = vpop.f32.mrb[81].mxu0 }
 0x4ac   : > { %v10176_v52 = vadd.f32 %v10175_v10, %v10174_v54  ;;  %v10177_v21 = vpop.f32.mrb[82].mxu0 }
 0x4ad   : > { %v10178_v63 = vpop.f32.mrb[83].mxu0 }
 0x4ae   : > { %v14492_v48 = vadd.f32 %v14363_v36, %v10176_v52  ;;  %v10179_v56 = vadd.f32 %v10178_v63, %v10177_v21 }
 0x4b0   : > { %v14495_v17 = vadd.f32 %v14369_v28, %v10179_v56 }
 0x4b2   : > { %v10180_v55 = vpop.f32.mrb[84].mxu0 }
 0x4b3   : > { %v10181_v42 = vpop.f32.mrb[85].mxu0 }
 0x4b4   : > { %v10182_v46 = vadd.f32 %v10181_v42, %v10180_v55  ;;  %v10183_v58 = vpop.f32.mrb[86].mxu0 }
 0x4b5   : > { %v10184_v14 = vpop.f32.mrb[87].mxu0 }
 0x4b6   : > { %v14498_v9 = vadd.f32 %v14375_v47, %v10182_v46  ;;  %v10185_v49 = vadd.f32 %v10184_v14, %v10183_v58 }
 0x4b8   : > { %v14501_v44 = vadd.f32 %v14381_v12, %v10185_v49 }
 0x4ba   : > { %v10186_v40 = vpop.f32.mrb[88].mxu0 }
 0x4bb   : > { %v10187_v22 = vpop.f32.mrb[89].mxu0 }
 0x4bc   : > { %v10188_v36 = vadd.f32 %v10187_v22, %v10186_v40  ;;  %v10189_v7 = vpop.f32.mrb[90].mxu0 }
 0x4bd   : > { %v10190_v39 = vpop.f32.mrb[91].mxu0 }
 0x4be   : > { %v14504_v28 = vadd.f32 %v14386_v33, %v10188_v36  ;;  %v10191_v51 = vadd.f32 %v10190_v39, %v10189_v7 }
 0x4c0   : > { %v14507_v35 = vadd.f32 %v14390_v4, %v10191_v51 }
 0x4c2   : > { %v10192_v13 = vpop.f32.mrb[92].mxu0 }
 0x4c3   : > { %v10193_v61 = vpop.f32.mrb[93].mxu0 }
 0x4c4   : > { %v10194_v47 = vadd.f32 %v10193_v61, %v10192_v13  ;;  %v10195_v29 = vpop.f32.mrb[94].mxu0 }
 0x4c5   : > { %v10196_v38 = vpop.f32.mrb[95].mxu0 }
 0x4c6   : > { %v14510_v12 = vadd.f32 %v14395_v26, %v10194_v47  ;;  %v10197_v8 = vadd.f32 %v10196_v38, %v10195_v29 }
 0x4c8   : > { %v14513_v20 = vadd.f32 %v14399_v31, %v10197_v8 }
 0x4ca   : > { %v10198_v24 = vpop.f32.mrb[96].mxu0 }
 0x4cb   : > { %v10199_v1 = vpop.f32.mrb[97].mxu0 }
 0x4cc   : > { %v10200_v33 = vadd.f32 %v10199_v1, %v10198_v24  ;;  %v10201_v16 = vpop.f32.mrb[98].mxu0 }
 0x4cd   : > { %v10202_v43 = vpop.f32.mrb[99].mxu0 }
 0x4ce   : > { %v14516_v4 = vadd.f32 %v14404_v37, %v10200_v33  ;;  %v10203_v54 = vadd.f32 %v10202_v43, %v10201_v16 }
 0x4d0   : > { %v14519_v10 = vadd.f32 %v14408_v19, %v10203_v54 }
 0x4d2   : > { %v10204_v52 = vpop.f32.mrb[100].mxu0 }
 0x4d3   : > { %v14521_v21 = vpop.f32.mrb[112].mxu1  ;;  %v10205_v26 = vpop.f32.mrb[101].mxu0 }
 0x4d4   : > { %v8251_v63 = vpop.f32.mrb[113].mxu1  ;;  %v10206_v56 = vadd.f32 %v10205_v26, %v10204_v52  ;;  %v10207_v31 = vpop.f32.mrb[102].mxu0 }
 0x4d5   : > { %v14523_v55 = vpop.f32.mrb[114].mxu1  ;;  %v10208_v42 = vpop.f32.mrb[103].mxu0 }
 0x4d6   : > { %v8254_v46 = vpop.f32.mrb[115].mxu1  ;;  %v14526_v58 = vadd.f32 %v14413_v6, %v10206_v56  ;;  %v10209_v37 = vadd.f32 %v10208_v42, %v10207_v31 }
 0x4d8   : > { %v14529_v14 = vadd.f32 %v14417_v32, %v10209_v37 }
 0x4da   : > { %v10210_v19 = vpop.f32.mrb[104].mxu0 }
 0x4db   : > { %v14531_v49 = vpop.f32.mrb[116].mxu1  ;;  %v10211_v40 = vpop.f32.mrb[105].mxu0 }
 0x4dc   : > { %v14533_v22 = vpop.f32.mrb[117].mxu1  ;;  %v10212_v36 = vadd.f32 %v10211_v40, %v10210_v19  ;;  %v10213_v7 = vpop.f32.mrb[106].mxu0 }
 0x4dd   : > { %v14535_v39 = vpop.f32.mrb[118].mxu1  ;;  %v10214_v51 = vpop.f32.mrb[107].mxu0 }
 0x4de   : > { %v14537_v13 = vpop.f32.mrb[119].mxu1  ;;  %v14540_v6 = vadd.f32 %v14422_v60, %v10212_v36  ;;  %v10215_v61 = vadd.f32 %v10214_v51, %v10213_v7 }
 0x4e0   : > { %v14543_v32 = vadd.f32 %v14426_v41, %v10215_v61 }
 0x4e2   : > { %v10216_v47 = vpop.f32.mrb[108].mxu0 }
 0x4e3   : > { %v14545_v29 = vpop.f32.mrb[120].mxu1  ;;  %v10217_v38 = vpop.f32.mrb[109].mxu0 }
 0x4e4   : > { %v14547_v8 = vpop.f32.mrb[121].mxu1  ;;  %v10218_v24 = vadd.f32 %v10217_v38, %v10216_v47  ;;  %v10219_v1 = vpop.f32.mrb[110].mxu0 }
 0x4e5   : > { %v14549_v33 = vpop.f32.mrb[122].mxu1  ;;  %v10220_v16 = vpop.f32.mrb[111].mxu0 }
 0x4e6   : > { %v14551_v43 = vpop.f32.mrb[123].mxu1  ;;  %v14554_v60 = vadd.f32 %v14431_v11, %v10218_v24  ;;  %v10221_v54 = vadd.f32 %v10220_v16, %v10219_v1 }
 0x4e8   : > { %v14557_v41 = vadd.f32 %v14435_v57, %v10221_v54  ;;  %v14571_v57 = vld [vmem:[%s14789_s4] ss:$0 sm:$0xff] }
 0x4ea   : > { %v10262_v52 = vpop.f32.mrb[112].mxu0 }
 0x4eb   : > { %v14559_v26 = vpop.f32.mrb[124].mxu1  ;;  %v10263_v56 = vpop.f32.mrb[113].mxu0 }
 0x4ec   : > { %v14561_v31 = vpop.f32.mrb[125].mxu1  ;;  %v10264_v42 = vadd.f32 %v10263_v56, %v10262_v52  ;;  %v10265_v37 = vpop.f32.mrb[114].mxu0 }
 0x4ed   : > { %v14563_v19 = vpop.f32.mrb[126].mxu1  ;;  %v10266_v40 = vpop.f32.mrb[115].mxu0 }
 0x4ee   : > { %v14565_v36 = vpop.f32.mrb[127].mxu1  ;;  %v10267_v11 = vadd.f32 %v10266_v40, %v10265_v37  ;;  %v10939_v7 = vadd.f32 %v14439_v23, %v10264_v42 }
 0x4f0   : > { %v10940_v51 = vadd.f32 %v10939_v7, %v8251_v63  ;;  %v10955_v61 = vadd.f32 %v14442_v18, %v10267_v11 }
 0x4f2   : > { %v10268_v47 = vpop.f32.mrb[116].mxu0  ;;  %v10941_v38 = vadd.f32 %v10940_v51, %v14571_v57  ;;  %v10956_v24 = vadd.f32 %v10955_v61, %v8254_v46 }
 0x4f3   : > { %v14575_v1 = vpop.f32.mrb[128].mxu1  ;;  %v10269_v16 = vpop.f32.mrb[117].mxu0 }
 0x4f4   : > { %v14577_v54 = vpop.f32.mrb[129].mxu1  ;;  %v10270_v52 = vadd.f32 %v10269_v16, %v10268_v47  ;;  %8481 = vst [vmem:[%s14581_s12] sm:$0xff] %v10941_v38  ;;  %v10271_v23 = vpop.f32.mrb[118].mxu0  ;;  %v10957_v18 = vadd.f32 %v10956_v24, %v14571_v57 }
 0x4f5   : > { %v14585_v63 = vpop.f32.mrb[130].mxu1  ;;  %v10272_v56 = vpop.f32.mrb[119].mxu0 }
 0x4f6   : > { %v14587_v46 = vpop.f32.mrb[131].mxu1  ;;  %v10931_v42 = vadd.f32 %v14446_v0, %v10270_v52  ;;  %v10273_v37 = vadd.f32 %v10272_v56, %v10271_v23  ;;  %8482 = vst [vmem:[%s14581_s12 + $0x8] sm:$0xff] %v10957_v18 }
 0x4f8   : > { %v10932_v40 = vadd.f32 %v10931_v42, %v14521_v21  ;;  %v10947_v11 = vadd.f32 %v14449_v53, %v10273_v37 }
 0x4fa   : > { %v10933_v7 = vadd.f32 %v10932_v40, %v14571_v57  ;;  %v10948_v51 = vadd.f32 %v10947_v11, %v14523_v55  ;;  %v10274_v61 = vpop.f32.mrb[120].mxu0 }
 0x4fb   : > { %v14595_v47 = vpop.f32.mrb[132].mxu1  ;;  %v10275_v38 = vpop.f32.mrb[121].mxu0 }
 0x4fc   : > { %v14597_v24 = vpop.f32.mrb[133].mxu1  ;;  %8483 = vst [vmem:[%s14581_s12 + $0x10] sm:$0xff] %v10933_v7  ;;  %v10949_v0 = vadd.f32 %v10948_v51, %v14571_v57  ;;  %v10276_v16 = vadd.f32 %v10275_v38, %v10274_v61  ;;  %v10277_v52 = vpop.f32.mrb[122].mxu0 }
 0x4fd   : > { %v14601_v23 = vpop.f32.mrb[134].mxu1  ;;  %v10278_v21 = vpop.f32.mrb[123].mxu0 }
 0x4fe   : > { %v14603_v53 = vpop.f32.mrb[135].mxu1  ;;  %8484 = vst [vmem:[%s14581_s12 + $0x18] sm:$0xff] %v10949_v0  ;;  %v10971_v55 = vadd.f32 %v14453_v2, %v10276_v16  ;;  %v10279_v18 = vadd.f32 %v10278_v21, %v10277_v52 }
 0x500   : > { %v10972_v56 = vadd.f32 %v10971_v55, %v14533_v22  ;;  %v10987_v42 = vadd.f32 %v14456_v15, %v10279_v18 }
 0x502   : > { %v10973_v37 = vadd.f32 %v10972_v56, %v14571_v57  ;;  %v10988_v40 = vadd.f32 %v10987_v42, %v14537_v13  ;;  %v10280_v11 = vpop.f32.mrb[124].mxu0 }
 0x503   : > { %v14611_v7 = vpop.f32.mrb[136].mxu1  ;;  %v10281_v51 = vpop.f32.mrb[125].mxu0 }
 0x504   : > { %v14613_v61 = vpop.f32.mrb[137].mxu1  ;;  %8485 = vst [vmem:[%s14581_s12 + $0x20] sm:$0xff] %v10973_v37  ;;  %v10989_v38 = vadd.f32 %v10988_v40, %v14571_v57  ;;  %v10282_v2 = vadd.f32 %v10281_v51, %v10280_v11  ;;  %v10283_v0 = vpop.f32.mrb[126].mxu0 }
 0x505   : > { %v14617_v16 = vpop.f32.mrb[138].mxu1  ;;  %v10284_v22 = vpop.f32.mrb[127].mxu0 }
 0x506   : > { %v14619_v15 = vpop.f32.mrb[139].mxu1  ;;  %8486 = vst [vmem:[%s14581_s12 + $0x28] sm:$0xff] %v10989_v38  ;;  %v10963_v13 = vadd.f32 %v14460_v27, %v10282_v2  ;;  %v10285_v52 = vadd.f32 %v10284_v22, %v10283_v0 }
 0x508   : > { %v10964_v21 = vadd.f32 %v10963_v13, %v14531_v49  ;;  %v10979_v55 = vadd.f32 %v14463_v34, %v10285_v52 }
 0x50a   : > { %v10965_v18 = vadd.f32 %v10964_v21, %v14571_v57  ;;  %v10980_v56 = vadd.f32 %v10979_v55, %v14535_v39  ;;  %v10286_v42 = vpop.f32.mrb[128].mxu0 }
 0x50b   : > { %v14627_v37 = vpop.f32.mrb[140].mxu1  ;;  %v10287_v40 = vpop.f32.mrb[129].mxu0 }
 0x50c   : > { %v14629_v11 = vpop.f32.mrb[141].mxu1  ;;  %8487 = vst [vmem:[%s14581_s12 + $0x30] sm:$0xff] %v10965_v18  ;;  %v10981_v27 = vadd.f32 %v10980_v56, %v14571_v57  ;;  %v10288_v51 = vadd.f32 %v10287_v40, %v10286_v42  ;;  %v10289_v38 = vpop.f32.mrb[130].mxu0 }
 0x50d   : > { %v14633_v2 = vpop.f32.mrb[142].mxu1  ;;  %v10290_v49 = vpop.f32.mrb[131].mxu0 }
 0x50e   : > { %v14635_v34 = vpop.f32.mrb[143].mxu1  ;;  %8488 = vst [vmem:[%s14581_s12 + $0x38] sm:$0xff] %v10981_v27  ;;  %v11003_v39 = vadd.f32 %v14467_v59, %v10288_v51  ;;  %v10291_v0 = vadd.f32 %v10290_v49, %v10289_v38 }
 0x510   : > { %v11004_v22 = vadd.f32 %v11003_v39, %v14547_v8  ;;  %v11019_v13 = vadd.f32 %v14471_v3, %v10291_v0 }
 0x512   : > { %v11005_v52 = vadd.f32 %v11004_v22, %v14571_v57  ;;  %v11020_v21 = vadd.f32 %v11019_v13, %v14551_v43  ;;  %v10292_v55 = vpop.f32.mrb[132].mxu0 }
 0x513   : > { %v10293_v18 = vpop.f32.mrb[133].mxu0 }
 0x514   : > { %8489 = vst [vmem:[%s14581_s12 + $0x40] sm:$0xff] %v11005_v52  ;;  %v11021_v56 = vadd.f32 %v11020_v21, %v14571_v57  ;;  %v10294_v42 = vadd.f32 %v10293_v18, %v10292_v55  ;;  %v10295_v40 = vpop.f32.mrb[134].mxu0 }
 0x515   : > { %v10296_v27 = vpop.f32.mrb[135].mxu0 }
 0x516   : > { %8490 = vst [vmem:[%s14581_s12 + $0x48] sm:$0xff] %v11021_v56  ;;  %v10995_v59 = vadd.f32 %v14474_v50, %v10294_v42  ;;  %v10297_v8 = vadd.f32 %v10296_v27, %v10295_v40 }
 0x518   : > { %v10996_v3 = vadd.f32 %v10995_v59, %v14545_v29  ;;  %v11011_v51 = vadd.f32 %v14477_v62, %v10297_v8 }
 0x51a   : > { %v10997_v43 = vadd.f32 %v10996_v3, %v14571_v57  ;;  %v11012_v38 = vadd.f32 %v11011_v51, %v14549_v33  ;;  %v10298_v49 = vpop.f32.mrb[136].mxu0 }
 0x51b   : > { %v10299_v39 = vpop.f32.mrb[137].mxu0 }
 0x51c   : > { %8491 = vst [vmem:[%s14581_s12 + $0x50] sm:$0xff] %v10997_v43  ;;  %v11013_v0 = vadd.f32 %v11012_v38, %v14571_v57  ;;  %v10300_v22 = vadd.f32 %v10299_v39, %v10298_v49  ;;  %v10301_v13 = vpop.f32.mrb[138].mxu0 }
 0x51d   : > { %v10302_v52 = vpop.f32.mrb[139].mxu0 }
 0x51e   : > { %8492 = vst [vmem:[%s14581_s12 + $0x58] sm:$0xff] %v11013_v0  ;;  %v11035_v50 = vadd.f32 %v14480_v30, %v10300_v22  ;;  %v10303_v29 = vadd.f32 %v10302_v52, %v10301_v13 }
 0x520   : > { %v11036_v62 = vadd.f32 %v11035_v50, %v14561_v31  ;;  %v11051_v21 = vadd.f32 %v14483_v45, %v10303_v29 }
 0x522   : > { %v11037_v33 = vadd.f32 %v11036_v62, %v14571_v57  ;;  %v11052_v55 = vadd.f32 %v11051_v21, %v14565_v36  ;;  %v10304_v18 = vpop.f32.mrb[140].mxu0 }
 0x523   : > { %v10305_v56 = vpop.f32.mrb[141].mxu0 }
 0x524   : > { %8493 = vst [vmem:[%s14581_s12 + $0x60] sm:$0xff] %v11037_v33  ;;  %v11053_v42 = vadd.f32 %v11052_v55, %v14571_v57  ;;  %v10306_v40 = vadd.f32 %v10305_v56, %v10304_v18  ;;  %v10307_v27 = vpop.f32.mrb[142].mxu0 }
 0x525   : > { %v10308_v59 = vpop.f32.mrb[143].mxu0 }
 0x526   : > { %8494 = vst [vmem:[%s14581_s12 + $0x68] sm:$0xff] %v11053_v42  ;;  %v11027_v30 = vadd.f32 %v14486_v25, %v10306_v40  ;;  %v10309_v31 = vadd.f32 %v10308_v59, %v10307_v27 }
 0x528   : > { %v11028_v45 = vadd.f32 %v11027_v30, %v14559_v26  ;;  %v11043_v8 = vadd.f32 %v14489_v5, %v10309_v31 }
 0x52a   : > { %v11029_v36 = vadd.f32 %v11028_v45, %v14571_v57  ;;  %v11044_v3 = vadd.f32 %v11043_v8, %v14563_v19  ;;  %v10310_v51 = vpop.f32.mrb[144].mxu0 }
 0x52b   : > { %v10311_v43 = vpop.f32.mrb[145].mxu0 }
 0x52c   : > { %8495 = vst [vmem:[%s14581_s12 + $0x70] sm:$0xff] %v11029_v36  ;;  %v11045_v38 = vadd.f32 %v11044_v3, %v14571_v57  ;;  %v10312_v49 = vadd.f32 %v10311_v43, %v10310_v51  ;;  %v10313_v39 = vpop.f32.mrb[146].mxu0 }
 0x52d   : > { %v10314_v0 = vpop.f32.mrb[147].mxu0 }
 0x52e   : > { %8496 = vst [vmem:[%s14581_s12 + $0x78] sm:$0xff] %v11045_v38  ;;  %v11067_v25 = vadd.f32 %v14492_v48, %v10312_v49  ;;  %v10315_v26 = vadd.f32 %v10314_v0, %v10313_v39 }
 0x530   : > { %v11068_v5 = vadd.f32 %v11067_v25, %v14577_v54  ;;  %v11083_v22 = vadd.f32 %v14495_v17, %v10315_v26 }
 0x532   : > { %v11069_v19 = vadd.f32 %v11068_v5, %v14571_v57  ;;  %v11084_v13 = vadd.f32 %v11083_v22, %v14587_v46  ;;  %v10316_v52 = vpop.f32.mrb[148].mxu0 }
 0x533   : > { %v10317_v50 = vpop.f32.mrb[149].mxu0 }
 0x534   : > { %8497 = vst [vmem:[%s14581_s12 + $0x80] sm:$0xff] %v11069_v19  ;;  %v11085_v29 = vadd.f32 %v11084_v13, %v14571_v57  ;;  %v10318_v62 = vadd.f32 %v10317_v50, %v10316_v52  ;;  %v10319_v21 = vpop.f32.mrb[150].mxu0 }
 0x535   : > { %v10320_v33 = vpop.f32.mrb[151].mxu0 }
 0x536   : > { %8498 = vst [vmem:[%s14581_s12 + $0x88] sm:$0xff] %v11085_v29  ;;  %v11059_v48 = vadd.f32 %v14498_v9, %v10318_v62  ;;  %v10321_v54 = vadd.f32 %v10320_v33, %v10319_v21 }
 0x538   : > { %v11060_v17 = vadd.f32 %v11059_v48, %v14575_v1  ;;  %v11075_v55 = vadd.f32 %v14501_v44, %v10321_v54 }
 0x53a   : > { %v11061_v46 = vadd.f32 %v11060_v17, %v14571_v57  ;;  %v11076_v18 = vadd.f32 %v11075_v55, %v14585_v63  ;;  %v10322_v56 = vpop.f32.mrb[152].mxu0 }
 0x53b   : > { %v10323_v42 = vpop.f32.mrb[153].mxu0 }
 0x53c   : > { %8499 = vst [vmem:[%s14581_s12 + $0x90] sm:$0xff] %v11061_v46  ;;  %v11077_v40 = vadd.f32 %v11076_v18, %v14571_v57  ;;  %v10324_v27 = vadd.f32 %v10323_v42, %v10322_v56  ;;  %v10325_v59 = vpop.f32.mrb[154].mxu0 }
 0x53d   : > { %v10326_v30 = vpop.f32.mrb[155].mxu0 }
 0x53e   : > { %8500 = vst [vmem:[%s14581_s12 + $0x98] sm:$0xff] %v11077_v40  ;;  %v11099_v9 = vadd.f32 %v14504_v28, %v10324_v27  ;;  %v10327_v1 = vadd.f32 %v10326_v30, %v10325_v59 }
 0x540   : > { %v11100_v44 = vadd.f32 %v11099_v9, %v14597_v24  ;;  %v11115_v31 = vadd.f32 %v14507_v35, %v10327_v1 }
 0x542   : > { %v11101_v63 = vadd.f32 %v11100_v44, %v14571_v57  ;;  %v11116_v45 = vadd.f32 %v11115_v31, %v14603_v53  ;;  %v10328_v8 = vpop.f32.mrb[156].mxu0 }
 0x543   : > { %v10329_v36 = vpop.f32.mrb[157].mxu0 }
 0x544   : > { %8501 = vst [vmem:[%s14581_s12 + $0xa0] sm:$0xff] %v11101_v63  ;;  %v11117_v3 = vadd.f32 %v11116_v45, %v14571_v57  ;;  %v10330_v51 = vadd.f32 %v10329_v36, %v10328_v8  ;;  %v10331_v43 = vpop.f32.mrb[158].mxu0 }
 0x545   : > { %v10332_v38 = vpop.f32.mrb[159].mxu0 }
 0x546   : > { %8502 = vst [vmem:[%s14581_s12 + $0xa8] sm:$0xff] %v11117_v3  ;;  %v11091_v28 = vadd.f32 %v14510_v12, %v10330_v51  ;;  %v10333_v24 = vadd.f32 %v10332_v38, %v10331_v43 }
 0x548   : > { %v11092_v35 = vadd.f32 %v11091_v28, %v14595_v47  ;;  %v11107_v49 = vadd.f32 %v14513_v20, %v10333_v24 }
 0x54a   : > { %v11093_v53 = vadd.f32 %v11092_v35, %v14571_v57  ;;  %v11108_v39 = vadd.f32 %v11107_v49, %v14601_v23  ;;  %v10334_v0 = vpop.f32.mrb[160].mxu0 }
 0x54b   : > { %v10335_v25 = vpop.f32.mrb[161].mxu0 }
 0x54c   : > { %8503 = vst [vmem:[%s14581_s12 + $0xb0] sm:$0xff] %v11093_v53  ;;  %v11109_v26 = vadd.f32 %v11108_v39, %v14571_v57  ;;  %v10336_v5 = vadd.f32 %v10335_v25, %v10334_v0  ;;  %v10337_v22 = vpop.f32.mrb[162].mxu0 }
 0x54d   : > { %v10338_v19 = vpop.f32.mrb[163].mxu0 }
 0x54e   : > { %8504 = vst [vmem:[%s14581_s12 + $0xb8] sm:$0xff] %v11109_v26  ;;  %v11131_v12 = vadd.f32 %v14516_v4, %v10336_v5  ;;  %v10339_v47 = vadd.f32 %v10338_v19, %v10337_v22 }
 0x550   : > { %v11132_v20 = vadd.f32 %v11131_v12, %v14613_v61  ;;  %v11147_v13 = vadd.f32 %v14519_v10, %v10339_v47 }
 0x552   : > { %v11133_v23 = vadd.f32 %v11132_v20, %v14571_v57  ;;  %v11148_v52 = vadd.f32 %v11147_v13, %v14619_v15  ;;  %v10340_v50 = vpop.f32.mrb[164].mxu0 }
 0x553   : > { %v10341_v29 = vpop.f32.mrb[165].mxu0 }
 0x554   : > { %8505 = vst [vmem:[%s14581_s12 + $0xc0] sm:$0xff] %v11133_v23  ;;  %v11149_v62 = vadd.f32 %v11148_v52, %v14571_v57  ;;  %v10342_v21 = vadd.f32 %v10341_v29, %v10340_v50  ;;  %v10343_v33 = vpop.f32.mrb[166].mxu0 }
 0x555   : > { %v10344_v48 = vpop.f32.mrb[167].mxu0 }
 0x556   : > { %8506 = vst [vmem:[%s14581_s12 + $0xc8] sm:$0xff] %v11149_v62  ;;  %v11123_v4 = vadd.f32 %v14526_v58, %v10342_v21  ;;  %v10345_v61 = vadd.f32 %v10344_v48, %v10343_v33 }
 0x558   : > { %v11124_v10 = vadd.f32 %v11123_v4, %v14611_v7  ;;  %v11139_v54 = vadd.f32 %v14529_v14, %v10345_v61 }
 0x55a   : > { %v11125_v15 = vadd.f32 %v11124_v10, %v14571_v57  ;;  %v11140_v17 = vadd.f32 %v11139_v54, %v14617_v16  ;;  %v10346_v55 = vpop.f32.mrb[168].mxu0 }
 0x55b   : > { %v10347_v46 = vpop.f32.mrb[169].mxu0 }
 0x55c   : > { %8507 = vst [vmem:[%s14581_s12 + $0xd0] sm:$0xff] %v11125_v15  ;;  %v11141_v18 = vadd.f32 %v11140_v17, %v14571_v57  ;;  %v10348_v56 = vadd.f32 %v10347_v46, %v10346_v55  ;;  %v10349_v42 = vpop.f32.mrb[170].mxu0 }
 0x55d   : > { %v10350_v40 = vpop.f32.mrb[171].mxu0 }
 0x55e   : > { %8508 = vst [vmem:[%s14581_s12 + $0xd8] sm:$0xff] %v11141_v18  ;;  %v11163_v58 = vadd.f32 %v14540_v6, %v10348_v56  ;;  %v10351_v7 = vadd.f32 %v10350_v40, %v10349_v42 }
 0x560   : > { %v11164_v14 = vadd.f32 %v11163_v58, %v14629_v11  ;;  %v11179_v27 = vadd.f32 %v14543_v32, %v10351_v7 }
 0x562   : > { %v11165_v16 = vadd.f32 %v11164_v14, %v14571_v57  ;;  %v11180_v59 = vadd.f32 %v11179_v27, %v14635_v34  ;;  %v10352_v30 = vpop.f32.mrb[172].mxu0 }
 0x563   : > { %v10353_v9 = vpop.f32.mrb[173].mxu0 }
 0x564   : > { %8509 = vst [vmem:[%s14581_s12 + $0xe0] sm:$0xff] %v11165_v16  ;;  %v11181_v1 = vadd.f32 %v11180_v59, %v14571_v57  ;;  %v10354_v44 = vadd.f32 %v10353_v9, %v10352_v30  ;;  %v10355_v6 = vpop.f32.mrb[174].mxu0 }
 0x565   : > { %v10356_v31 = vpop.f32.mrb[175].mxu0 }
 0x566   : > { %8510 = vst [vmem:[%s14581_s12 + $0xe8] sm:$0xff] %v11181_v1  ;;  %v11155_v11 = vadd.f32 %v14554_v60, %v10354_v44  ;;  %v10357_v32 = vadd.f32 %v10356_v31, %v10355_v6 }
 0x568   : > { %v11156_v63 = vadd.f32 %v11155_v11, %v14627_v37  ;;  %v11171_v34 = vadd.f32 %v14557_v41, %v10357_v32 }
 0x56a   : > { %v11157_v45 = vadd.f32 %v11156_v63, %v14571_v57  ;;  %v11172_v8 = vadd.f32 %v11171_v34, %v14633_v2 }
 0x56c   : > { %8511 = vst [vmem:[%s14581_s12 + $0xf0] sm:$0xff] %v11157_v45  ;;  %v11173_v60 = vadd.f32 %v11172_v8, %v14571_v57 }
 0x56e   : > { %8512 = vst [vmem:[%s14581_s12 + $0xf8] sm:$0xff] %v11173_v60 }
 0x56f   : > { %12041 = shalt.err (!%p12038_p4)
}
 0x570   : > { %s12042_s11 = scalar_lea.hbm %s14736_s20, 4096  ;;  %s12046_s29 = scalar_lea.hbm %s14792_s7, 8192 }
 0x571   : > { %p12043_p9 = scmp.ne.s32.totalorder %s14736_s20, %s12042_s11  ;;  %p12047_p8 = scmp.lt.u32.totalorder %s14736_s20, %s14792_s7 }
 0x572   : > { %p12048_p13 = scmp.lt.u32.totalorder %s12046_s29, %s12042_s11  ;;  %p12050_p10 = scmp.lt.u32.totalorder %s12042_s11, %s14736_s20 }
 0x573   : > { %p12044_p0 = pnand %p12043_p9, %p12310_p5 }
 0x574   : > { %p12049_p6 = por %p12048_p13, %p12047_p8 }
 0x575   : > { %p12045_p11 = pneg %p12044_p0 }
 0x576   : > { %p12051_p3 = por %p12050_p10, %p12049_p6 }
 0x578   : > { %p12052_p7 = pnand %p12051_p3, %p12045_p11 }
 0x57a   : > { %12055 = shalt.err (!%p12052_p7)
}
 0x57b   : > { %s12114_s16 = smov 128   ;;  %s12115_s13 = smov 8  }
 0x57c   : > { %11420 = dma.vmem_to_hbm [thread:$0]  (%p12310_p5), %s14738_s17, 4096, %s14736_s20, %s8514_s28, %s12114_s16, %s12114_s16, %s12115_s13  }
 0x57d PF: > { %s15240_s30 = sld [smem:[#allocation17_spill]]  ;;  %s8542_s9 = sand.u32 1, %s12090_s24  }
 0x57e   : > { %p15242_p1 = scmp.ge.s32.totalorder %s12102_s27, 2  ;;  %s8543_s23 = scalar_lea.sflag [#allocation6], %s8542_s9 }
 0x583   : > { %p15241_p12 = scmp.ne.s32.totalorder %s15240_s30, 0 }
 0x585   : > { %p11437_p2 = pnand %p15242_p1, %p15241_p12 }
 0x587   : > { %12085 = dma.done.wait (!%p11437_p2), %s8543_s23, 4096  }
 0x588   : > { %12087 = vsyncadd (!%p11437_p2), %s8543_s23, 4294963200  ;;  %p22_p4 = scmp.ge.s32.totalorder %s12296_s22, 4   ;;  %s15243_s24 = smov %s12094_s25 }
 0x589   : > { %s15244_s25 = smov %s12098_s26  ;;  %s15245_s26 = smov %s12306_s18 }
 0x58a   : > { %s15246_s27 = smov %s12296_s22  ;;  %24 = sbr.rel (!%p22_p4) target bundleno = 7 (0x7), region = 108 }
 0x591   :  { %8548 = vsyncpa [#allocation5], 1 }
 0x592   :  { %8550 = vsyncpa [#allocation5 + $0x1], 1 }
 0x593   :  { %8551 = vsyncpa [#allocation8], 1 }
 0x594   :  { %8552 = vsyncpa [#allocation11], 1 }
 0x595   :  { %8553 = vsyncpa [#allocation6], 1 }
 0x596   :  { %8555 = vsyncpa [#allocation6 + $0x1], 1 }

</bundles_post_ra>
